<compile_context>
chip_gen: v7x
topology: tpu7x:2x2x1
jax: 0.10.0
libtpu: 0.0.40
codegen_flags: <defaults>
</compile_context>

<pallas_src>
import math
import functools

import jax
import jax.numpy as jnp
from jax.experimental import pallas as pl
from jax.experimental.pallas import tpu as pltpu

_VMEM_LIMIT = 32 * 1024 * 1024      # safe scoped-VMEM budget on v5e/v6e/v7x
_NEG = -1e30


def _pick_tile(dim, prefs):
    """Largest preferred tile that divides `dim`; the full dim otherwise so
    that weights / activations never need a per-call pad copy."""
    if dim <= prefs[0]:
        return dim
    for t in prefs:
        if t <= dim and dim % t == 0:
            return t
    return dim   # TODO(synk): pad very large non-divisible dims if ever hit


# ----------------------------------------------------------------------------
# Fused tiled linear kernel:  out = relu?( LN?(x) @ w + b? + residual? )
# ----------------------------------------------------------------------------

def _make_linear_kernel(has_ln, has_b, has_r, relu, kt, eps):
    def kernel(*refs):
        it = iter(refs)
        x_ref = next(it)
        if has_ln:
            g_ref = next(it)
            beta_ref = next(it)
        w_ref = next(it)
        b_ref = next(it) if has_b else None
        r_ref = next(it) if has_r else None
        o_ref = next(it)
        acc_ref = next(it) if kt > 1 else None

        xv = x_ref[...]
        if has_ln:
            # LayerNorm fused in front of the matmul (block spans the full K).
            xf = xv.astype(jnp.float32)
            mean = jnp.mean(xf, axis=-1, keepdims=True)
            cen = xf - mean
            var = jnp.mean(cen * cen, axis=-1, keepdims=True)
            xv = cen * jax.lax.rsqrt(var + eps) * g_ref[...] + beta_ref[...]

        # bf16 operands -> MXU-native; accumulate in f32.
        part = jnp.dot(xv.astype(jnp.bfloat16),
                       w_ref[...].astype(jnp.bfloat16),
                       preferred_element_type=jnp.float32)

        def finalize(val):
            if has_b:
                val = val + b_ref[...]
            if has_r:
                val = val + r_ref[...].astype(jnp.float32)
            if relu:
                val = jnp.maximum(val, 0.0)
            return val.astype(o_ref.dtype)

        if kt == 1:
            o_ref[...] = finalize(part)
        else:
            kk = pl.program_id(2)

            @pl.when(kk == 0)
            def _():
                acc_ref[...] = jnp.zeros_like(acc_ref)

            acc_ref[...] += part

            @pl.when(kk == kt - 1)
            def _():
                o_ref[...] = finalize(acc_ref[...])

    return kernel


def fused_linear(x, w, b=None, *, ln=None, residual=None, relu=False,
                 out_dtype=jnp.float32, tm=512, tn=512, tk=512, eps=1e-5):
    """Tiled Pallas matmul with optional fused LayerNorm / bias / residual /
    ReLU.  x: (M, K); w: (K, N) bf16; b: (N,); ln: (gamma, beta) each (K,);
    residual: (M, N).  Default 512 tiles target v6e; on v5e 128-256 wide N
    tiles already fill the 4x128x128 MXU (HBM-bound there anyway)."""
    M, K = x.shape
    N = w.shape[1]
    has_ln = ln is not None
    has_b = b is not None
    has_r = residual is not None

    tm = _pick_tile(M, (tm, 256, 128))
    tn = _pick_tile(N, (tn, 256, 128))
    tk = K if has_ln else _pick_tile(K, (tk, 256, 128))  # LN needs the whole row
    kt = K // tk

    operands = [x]
    in_specs = [pl.BlockSpec((tm, tk), lambda i, j, k: (i, k))]
    if has_ln:
        gamma, beta = ln
        operands += [gamma.reshape(1, K), beta.reshape(1, K)]
        in_specs += [pl.BlockSpec((1, K), lambda i, j, k: (0, 0)),
                     pl.BlockSpec((1, K), lambda i, j, k: (0, 0))]
    operands.append(w)
    in_specs.append(pl.BlockSpec((tk, tn), lambda i, j, k: (k, j)))
    if has_b:
        operands.append(b.reshape(1, N))
        in_specs.append(pl.BlockSpec((1, tn), lambda i, j, k: (0, j)))
    if has_r:
        operands.append(residual)
        in_specs.append(pl.BlockSpec((tm, tn), lambda i, j, k: (i, j)))

    kernel = _make_linear_kernel(has_ln, has_b, has_r, relu, kt, eps)
    out = pl.pallas_call(
        kernel,
        out_shape=jax.ShapeDtypeStruct((M, N), out_dtype),
        grid=(M // tm, N // tn, kt),
        in_specs=in_specs,
        out_specs=pl.BlockSpec((tm, tn), lambda i, j, k: (i, j)),
        scratch_shapes=([pltpu.VMEM((tm, tn), jnp.float32)] if kt > 1 else []),
        compiler_params=pltpu.CompilerParams(
            dimension_semantics=("parallel", "parallel", "arbitrary"),
            vmem_limit_bytes=_VMEM_LIMIT),
    )(*operands)
    return out


# ----------------------------------------------------------------------------
# Fused FFN kernel: y = LN2?( x + (relu(LN(x) @ w1 + b1) @ w2 + b2) )
# The (tm, d_inner) hidden activation never leaves VMEM.
# ----------------------------------------------------------------------------

def _make_ffn_kernel(has_final_ln, eps):
    def kernel(*refs):
        it = iter(refs)
        x_ref = next(it)
        g_ref = next(it)
        b_ref = next(it)
        w1_ref = next(it)
        b1_ref = next(it)
        w2_ref = next(it)
        b2_ref = next(it)
        if has_final_ln:
            fg_ref = next(it)
            fb_ref = next(it)
        o_ref = next(it)

        x = x_ref[...].astype(jnp.float32)
        mean = jnp.mean(x, axis=-1, keepdims=True)
        cen = x - mean
        var = jnp.mean(cen * cen, axis=-1, keepdims=True)
        xn = cen * jax.lax.rsqrt(var + eps) * g_ref[...] + b_ref[...]

        h = jnp.dot(xn.astype(jnp.bfloat16), w1_ref[...].astype(jnp.bfloat16),
                    preferred_element_type=jnp.float32) + b1_ref[...]
        h = jnp.maximum(h, 0.0)
        y = jnp.dot(h.astype(jnp.bfloat16), w2_ref[...].astype(jnp.bfloat16),
                    preferred_element_type=jnp.float32) + b2_ref[...] + x

        if has_final_ln:            # decoder's final LayerNorm fused here
            m2 = jnp.mean(y, axis=-1, keepdims=True)
            c2 = y - m2
            v2 = jnp.mean(c2 * c2, axis=-1, keepdims=True)
            y = c2 * jax.lax.rsqrt(v2 + eps) * fg_ref[...] + fb_ref[...]

        o_ref[...] = y.astype(o_ref.dtype)

    return kernel


def fused_ffn(x, p, *, final_ln=None, out_dtype=jnp.float32, tm=256, eps=1e-5):
    M, D = x.shape
    Dh = p["w1"].shape[1]
    tm = _pick_tile(M, (tm, 256, 128))
    # TODO(synk): K-tile w2 over d_inner for very large d_inner (>8k) weights.

    operands = [x, p["ln_g"].reshape(1, D), p["ln_b"].reshape(1, D),
                p["w1"], p["b1"].reshape(1, Dh), p["w2"], p["b2"].reshape(1, D)]
    in_specs = [pl.BlockSpec((tm, D), lambda i: (i, 0)),
                pl.BlockSpec((1, D), lambda i: (0, 0)),
                pl.BlockSpec((1, D), lambda i: (0, 0)),
                pl.BlockSpec((D, Dh), lambda i: (0, 0)),
                pl.BlockSpec((1, Dh), lambda i: (0, 0)),
                pl.BlockSpec((Dh, D), lambda i: (0, 0)),
                pl.BlockSpec((1, D), lambda i: (0, 0))]
    if final_ln is not None:
        fg, fb = final_ln
        operands += [fg.reshape(1, D), fb.reshape(1, D)]
        in_specs += [pl.BlockSpec((1, D), lambda i: (0, 0)),
                     pl.BlockSpec((1, D), lambda i: (0, 0))]

    return pl.pallas_call(
        _make_ffn_kernel(final_ln is not None, eps),
        out_shape=jax.ShapeDtypeStruct((M, D), out_dtype),
        grid=(M // tm,),
        in_specs=in_specs,
        out_specs=pl.BlockSpec((tm, D), lambda i: (i, 0)),
        compiler_params=pltpu.CompilerParams(
            dimension_semantics=("parallel",),
            vmem_limit_bytes=_VMEM_LIMIT),
    )(*operands)


# ----------------------------------------------------------------------------
# Attention kernel.  Heads are selected by BlockSpec index maps on a
# (B, L, parts, H, dk) view of the fused projection output (no HBM head
# transposes).  Masks are built in-kernel from a (B, 1, Lk) key-pad vector and
# an iota causal triangle.  For long keys the KV axis is tiled with an
# online-softmax accumulator; the context is written lane-dense as (B, Lq, D).
# ----------------------------------------------------------------------------

def _make_attn_kernel(H, dk, scale, causal, tq, tkv, kvt, return_probs):
    def kernel(*refs):
        it = iter(refs)
        q_ref = next(it)
        k_ref = next(it)
        v_ref = next(it)
        kb_ref = next(it)
        o_ref = next(it)
        p_ref = next(it) if return_probs else None
        if kvt > 1:
            m_ref = next(it)
            l_ref = next(it)
            acc_ref = next(it)

        qi = pl.program_id(1)
        kvi = pl.program_id(2)

        def make_bias():
            kpad = kb_ref[...] < -1.0                      # (1, tkv) key padding
            if causal:
                row = jax.lax.broadcasted_iota(jnp.int32, (tq, tkv), 0) + qi * tq
                col = jax.lax.broadcasted_iota(jnp.int32, (tq, tkv), 1) + kvi * tkv
                mask = kpad | (col > row)
            else:
                mask = kpad
            return jnp.where(mask, _NEG, 0.0).astype(jnp.float32)

        if kvt == 1:
            # Single-KV-block path (also the only path that can emit probs).
            bias = make_bias()
            for h in range(H):                              # static head unroll
                qh = (q_ref[:, h, :] * scale).astype(jnp.bfloat16)
                kh = k_ref[:, h, :].astype(jnp.bfloat16)
                s = jax.lax.dot_general(qh, kh, (((1,), (1,)), ((), ())),
                                        preferred_element_type=jnp.float32)
                s = s + bias
                s = s - jnp.max(s, axis=-1, keepdims=True)
                e = jnp.exp(s)
                p = e * pl.reciprocal(jnp.sum(e, axis=-1, keepdims=True),
                                      approx=True)
                ctx = jnp.dot(p.astype(jnp.bfloat16),
                              v_ref[:, h, :].astype(jnp.bfloat16),
                              preferred_element_type=jnp.float32)
                o_ref[:, h * dk:(h + 1) * dk] = ctx.astype(o_ref.dtype)
                if return_probs:
                    p_ref[h] = p
        else:
            # Online-softmax (flash) accumulation over KV tiles.
            @pl.when(kvi == 0)
            def _():
                m_ref[...] = jnp.full_like(m_ref, _NEG)
                l_ref[...] = jnp.zeros_like(l_ref)
                acc_ref[...] = jnp.zeros_like(acc_ref)

            def step():
                bias = make_bias()
                for h in range(H):
                    qh = (q_ref[:, h, :] * scale).astype(jnp.bfloat16)
                    kh = k_ref[:, h, :].astype(jnp.bfloat16)
                    s = jax.lax.dot_general(qh, kh, (((1,), (1,)), ((), ())),
                                            preferred_element_type=jnp.float32)
                    s = s + bias
                    m_prev = m_ref[:, h:h + 1]
                    m_new = jnp.maximum(m_prev, jnp.max(s, axis=-1, keepdims=True))
                    alpha = jnp.exp(m_prev - m_new)
                    p = jnp.exp(s - m_new)
                    l_ref[:, h:h + 1] = (alpha * l_ref[:, h:h + 1]
                                         + jnp.sum(p, axis=-1, keepdims=True))
                    pv = jnp.dot(p.astype(jnp.bfloat16),
                                 v_ref[:, h, :].astype(jnp.bfloat16),
                                 preferred_element_type=jnp.float32)
                    acc_ref[:, h * dk:(h + 1) * dk] = (
                        alpha * acc_ref[:, h * dk:(h + 1) * dk] + pv)
                    m_ref[:, h:h + 1] = m_new

            if causal:
                # Skip KV tiles that lie entirely above the causal diagonal.
                live = (kvi * tkv) <= (qi * tq + (tq - 1))
                pl.when(live)(step)
            else:
                step()

            @pl.when(kvi == kvt - 1)
            def _():
                for h in range(H):
                    inv = pl.reciprocal(l_ref[:, h:h + 1], approx=True)
                    o_ref[:, h * dk:(h + 1) * dk] = (
                        acc_ref[:, h * dk:(h + 1) * dk] * inv).astype(o_ref.dtype)

    return kernel


def attention_pallas(q5, kv5, key_bias, parts, *, causal, return_probs=False,
                     q_tile=256, kv_tile=512, out_dtype=jnp.float32):
    """q5: (B, Lq, Pq, H, dk); kv5: (B, Lk, Pk, H, dk);
    key_bias: (B, 1, Lk) f32 with 0 for visible keys and -1e30 for padded keys.
    parts = (q_part, k_part, v_part) select which slice of the fused
    projection holds q / k / v."""
    B, Lq, _, H, dk = q5.shape
    Lk = kv5.shape[1]
    D = H * dk
    scale = 1.0 / math.sqrt(dk)
    q_part, k_part, v_part = parts

    tq = _pick_tile(Lq, (q_tile, 256, 128))
    tkv = Lk if return_probs else _pick_tile(Lk, (kv_tile, 512, 256, 128))
    kvt = Lk // tkv
    grid = (B, Lq // tq, kvt)

    in_specs = [
        pl.BlockSpec((None, tq, None, H, dk), lambda b, i, kv: (b, i, q_part, 0, 0)),
        pl.BlockSpec((None, tkv, None, H, dk), lambda b, i, kv: (b, kv, k_part, 0, 0)),
        pl.BlockSpec((None, tkv, None, H, dk), lambda b, i, kv: (b, kv, v_part, 0, 0)),
        pl.BlockSpec((None, 1, tkv), lambda b, i, kv: (b, 0, kv)),
    ]
    out_shapes = [jax.ShapeDtypeStruct((B, Lq, D), out_dtype)]
    out_specs = [pl.BlockSpec((None, tq, D), lambda b, i, kv: (b, i, 0))]
    if return_probs:
        out_shapes.append(jax.ShapeDtypeStruct((B, H, Lq, Lk), jnp.float32))
        out_specs.append(pl.BlockSpec((None, H, tq, Lk), lambda b, i, kv: (b, 0, i, 0)))

    scratch = []
    if kvt > 1:
        scratch = [pltpu.VMEM((tq, H), jnp.float32),    # running max per head
                   pltpu.VMEM((tq, H), jnp.float32),    # running denom per head
                   pltpu.VMEM((tq, D), jnp.float32)]    # context accumulator

    outs = pl.pallas_call(
        _make_attn_kernel(H, dk, scale, causal, tq, tkv, kvt, return_probs),
        out_shape=tuple(out_shapes) if return_probs else out_shapes[0],
        grid=grid,
        in_specs=in_specs,
        out_specs=tuple(out_specs) if return_probs else out_specs[0],
        scratch_shapes=scratch,
        compiler_params=pltpu.CompilerParams(
            dimension_semantics=("parallel", "parallel", "arbitrary"),
            vmem_limit_bytes=_VMEM_LIMIT),
    )(q5, kv5, kv5, key_bias)

    if return_probs:
        return outs
    return outs, None


def attention_reference(q5, kv5, key_bias, parts, causal):
    """Pure-JAX f32 reference (used only by the self-test in __main__)."""
    q = q5[:, :, parts[0]].astype(jnp.float32)
    k = kv5[:, :, parts[1]].astype(jnp.float32)
    v = kv5[:, :, parts[2]].astype(jnp.float32)
    B, Lq, H, dk = q.shape
    Lk = k.shape[1]
    s = jnp.einsum("bqhd,bkhd->bhqk", q, k) / math.sqrt(dk)
    s = s + key_bias[:, :, None, :]
    if causal:
        row = jnp.arange(Lq)[:, None]
        col = jnp.arange(Lk)[None, :]
        s = s + jnp.where(col > row, _NEG, 0.0)
    p = jax.nn.softmax(s, axis=-1)
    ctx = jnp.einsum("bhqk,bkhd->bqhd", p, v)
    return ctx.reshape(B, Lq, H * dk)


# ----------------------------------------------------------------------------
# Decoder forward (all heavy lifting inside the Pallas kernels)
# ----------------------------------------------------------------------------

@functools.partial(jax.jit, static_argnums=(4,))
def decoder_forward(params, tgt_seq, enc_out, enc_mask, n_head):
    B, Lt = tgt_seq.shape
    _, Ls, D = enc_out.shape
    n_vocab = params["emb_t"].shape[1]
    dk = D // n_head

    # Embedding (shared with output weight) + scale + sinusoidal positions.
    dec = jnp.take(params["emb"], tgt_seq, axis=0) * jnp.float32(math.sqrt(D))
    pos_seq = jnp.arange(Lt, dtype=jnp.float32)
    inv_freq = 1.0 / (10000.0 ** (jnp.arange(0, D, 2, dtype=jnp.float32) / D))
    sin_inp = pos_seq[:, None] * inv_freq[None, :]
    pos_emb = jnp.concatenate([jnp.sin(sin_inp), jnp.cos(sin_inp)], axis=-1)
    dec = dec + pos_emb[None, :, :]
    # TODO(synk): emb_drop / per-layer dropout / layer_drop are identity in eval.

    # Tiny per-batch key-side pad biases; the causal triangle and the full
    # (tq, tkv) additive mask are generated inside the attention kernel.
    slf_kbias = jnp.where(tgt_seq == 0, _NEG, 0.0).astype(jnp.float32).reshape(B, 1, Lt)
    enc_kbias = jnp.where(enc_mask == 0, _NEG, 0.0).astype(jnp.float32).reshape(B, 1, Ls)

    dec2d = dec.reshape(B * Lt, D)
    enc2d = enc_out.reshape(B * Ls, D)

    attn = None
    n_layers = len(params["layers"])
    for li, lp in enumerate(params["layers"]):
        last = li == n_layers - 1

        # --- self-attention: LN + fused QKV (D x 3D), heads via view ---
        slf = lp["slf"]
        qkv = fused_linear(dec2d, slf["wqkv"], ln=(slf["ln_g"], slf["ln_b"]))
        qkv5 = qkv.reshape(B, Lt, 3, n_head, dk)
        ctx, _ = attention_pallas(qkv5, qkv5, slf_kbias, parts=(0, 1, 2),
                                  causal=True, out_dtype=jnp.bfloat16)
        dec2d = fused_linear(ctx.reshape(B * Lt, D), slf["wo"], residual=dec2d)

        # --- cross-attention: LN + Q, fused KV (D x 2D) from raw enc_out ---
        enc = lp["enc"]
        q = fused_linear(dec2d, enc["wq"], ln=(enc["ln_g"], enc["ln_b"]))
        q5 = q.reshape(B, Lt, 1, n_head, dk)
        kv = fused_linear(enc2d, enc["wkv"])
        kv5 = kv.reshape(B, Ls, 2, n_head, dk)
        ctx, probs = attention_pallas(q5, kv5, enc_kbias, parts=(0, 0, 1),
                                      causal=False, return_probs=last,
                                      out_dtype=jnp.bfloat16)
        dec2d = fused_linear(ctx.reshape(B * Lt, D), enc["wo"], residual=dec2d)
        if probs is not None:
            attn = probs

        # --- fused FFN (final LayerNorm folded into the last layer) ---
        dec2d = fused_ffn(dec2d, lp["ffn"],
                          final_ln=(params["ln_g"], params["ln_b"]) if last else None,
                          out_dtype=jnp.bfloat16 if last else jnp.float32)

    # Output projection with the pre-transposed bf16 shared embedding.
    logits = fused_linear(dec2d, params["emb_t"], params["out_b"])
    return logits.reshape(B, Lt, n_vocab), attn


# ----------------------------------------------------------------------------
# Deterministic parameter init (matches torch module parameter shapes;
# matmul weights stored bf16 once, biases / LN params f32)
# ----------------------------------------------------------------------------

def init_params(key, n_vocab, d_model, n_layer, n_head, d_inner):
    keys = jax.random.split(key, 1 + n_layer)

    def normal(k, shape, std=0.02):
        return jax.random.normal(k, shape, dtype=jnp.float32) * std

    def wnormal(k, shape, std=0.02):
        return normal(k, shape, std).astype(jnp.bfloat16)

    emb = normal(keys[0], (n_vocab, d_model)).at[0].set(0.0)   # padding_idx=0
    params = {
        "emb": emb,                                # f32 lookup table
        "emb_t": emb.T.astype(jnp.bfloat16),       # pre-transposed logits weight
        "out_b": jnp.zeros((n_vocab,), jnp.float32),
        "ln_g": jnp.ones((d_model,), jnp.float32),
        "ln_b": jnp.zeros((d_model,), jnp.float32),
        "layers": [],
    }
    for l in range(n_layer):
        lk = jax.random.split(keys[1 + l], 10)
        layer = {
            "slf": {"ln_g": jnp.ones((d_model,), jnp.float32),
                    "ln_b": jnp.zeros((d_model,), jnp.float32),
                    "wqkv": jnp.concatenate(
                        [wnormal(lk[0], (d_model, d_model)),
                         wnormal(lk[1], (d_model, d_model)),
                         wnormal(lk[2], (d_model, d_model))], axis=1),
                    "wo": wnormal(lk[3], (d_model, d_model))},
            "enc": {"ln_g": jnp.ones((d_model,), jnp.float32),
                    "ln_b": jnp.zeros((d_model,), jnp.float32),
                    "wq": wnormal(lk[4], (d_model, d_model)),
                    "wkv": jnp.concatenate(
                        [wnormal(lk[5], (d_model, d_model)),
                         wnormal(lk[6], (d_model, d_model))], axis=1),
                    "wo": wnormal(lk[7], (d_model, d_model))},
            "ffn": {"ln_g": jnp.ones((d_model,), jnp.float32),
                    "ln_b": jnp.zeros((d_model,), jnp.float32),
                    "w1": wnormal(lk[8], (d_model, d_inner)),
                    "b1": jnp.zeros((d_inner,), jnp.float32),
                    "w2": wnormal(lk[9], (d_inner, d_model)),
                    "b2": jnp.zeros((d_model,), jnp.float32)},
        }
        params["layers"].append(layer)
    return params


if __name__ == "__main__":
    n_vocab, d_model, n_layer, n_head, d_inner = 32, 32, 2, 4, 64
    B, Lt, Ls = 2, 8, 16

    key = jax.random.PRNGKey(0)
    kp, kt_, ke, ka = jax.random.split(key, 4)

    params = init_params(kp, n_vocab, d_model, n_layer, n_head, d_inner)

    tgt_seq = jax.random.randint(kt_, (B, Lt), 1, n_vocab, dtype=jnp.int32)
    tgt_seq = tgt_seq.at[:, -2:].set(0)                        # trailing padding
    enc_out = jax.random.normal(ke, (B, Ls, d_model), dtype=jnp.float32)
    enc_mask = jnp.ones((B, Ls), jnp.int32).at[1, -4:].set(0)  # pad tail of batch 1

    logits, attn = decoder_forward(params, tgt_seq, enc_out, enc_mask, n_head)
    jax.block_until_ready((logits, attn))

    assert logits.shape == (B, Lt, n_vocab)
    assert attn.shape == (B, n_head, Lt, Ls)
    assert bool(jnp.all(jnp.isfinite(logits)))

    # --- self-test of the KV-tiled online-softmax path (not reached by the
    #     tiny decoder shapes above) against the untiled kernel and a pure-JAX
    #     reference.  Tolerances account for bf16 MXU operands + approx recip.
    Bt, Ht, dkt, L2 = 2, 2, 128, 256
    x5 = jax.random.normal(ka, (Bt, L2, 3, Ht, dkt), dtype=jnp.float32)
    valid = jnp.array([L2, 200])
    kbias = jnp.where(jnp.arange(L2)[None, :] < valid[:, None],
                      0.0, _NEG).astype(jnp.float32).reshape(Bt, 1, L2)

    ctx_tiled, _ = attention_pallas(x5, x5, kbias, parts=(0, 1, 2), causal=True,
                                    q_tile=128, kv_tile=128)     # flash path
    ctx_one, _ = attention_pallas(x5, x5, kbias, parts=(0, 1, 2), causal=True,
                                  q_tile=128, kv_tile=512)       # single KV block
    ctx_ref = attention_reference(x5, x5, kbias, (0, 1, 2), True)
    jax.block_until_ready((ctx_tiled, ctx_one))

    err_paths = float(jnp.max(jnp.abs(ctx_tiled - ctx_one)))
    err_ref = float(jnp.max(jnp.abs(ctx_one - ctx_ref)))
    assert err_paths < 0.05, f"flash vs single-block mismatch: {err_paths}"
    assert err_ref < 0.15, f"attention vs reference mismatch: {err_ref}"

    print("KERNEL_OK")
</pallas_src>

<mosaic_0001>
module attributes {stable_mosaic.version = 11 : i64} {
  func.func @kernel(%arg0: i32, %arg1: i32, %arg2: i32, %arg3: memref<16x32xf32, #tpu.memory_space<vmem>>, %arg4: memref<1x32xf32, #tpu.memory_space<vmem>>, %arg5: memref<1x32xf32, #tpu.memory_space<vmem>>, %arg6: memref<32x96xbf16, #tpu.memory_space<vmem>>, %arg7: memref<16x96xf32, #tpu.memory_space<vmem>>) attributes {dimension_semantics = [#tpu.dimension_semantics<parallel>, #tpu.dimension_semantics<parallel>, #tpu.dimension_semantics<arbitrary>], iteration_bounds = array<i64: 1, 1, 1>, scalar_prefetch = 0 : i64, scratch_operands = 0 : i64, tpu.core_type = #tpu.core_type<tc>, window_params = [{transform_indices = @transform_0, window_bounds = array<i64: 16, 32>}, {pipeline_mode = #tpu.pipeline_mode<synchronous>, transform_indices = @transform_1, window_bounds = array<i64: 1, 32>}, {pipeline_mode = #tpu.pipeline_mode<synchronous>, transform_indices = @transform_2, window_bounds = array<i64: 1, 32>}, {transform_indices = @transform_3, window_bounds = array<i64: 32, 96>}, {transform_indices = @transform_4, window_bounds = array<i64: 16, 96>}]} {
    %c0 = arith.constant 0 : index
    %c0_0 = arith.constant 0 : index
    %0 = vector.load %arg3[%c0, %c0_0] : memref<16x32xf32, #tpu.memory_space<vmem>>, vector<16x32xf32>
    %cst = arith.constant dense<0.000000e+00> : vector<16xf32>
    %1 = vector.multi_reduction <add>, %0, %cst [1] : vector<16x32xf32> to vector<16xf32>
    %2 = vector.shape_cast %1 : vector<16xf32> to vector<16x1xf32>
    %cst_1 = arith.constant 3.200000e+01 : f32
    %3 = vector.broadcast %cst_1 : f32 to vector<16x1xf32>
    %4 = arith.divf %2, %3 : vector<16x1xf32>
    %5 = vector.broadcast %4 : vector<16x1xf32> to vector<16x32xf32>
    %6 = arith.subf %0, %5 : vector<16x32xf32>
    %7 = arith.mulf %6, %6 : vector<16x32xf32>
    %cst_2 = arith.constant dense<0.000000e+00> : vector<16xf32>
    %8 = vector.multi_reduction <add>, %7, %cst_2 [1] : vector<16x32xf32> to vector<16xf32>
    %9 = vector.shape_cast %8 : vector<16xf32> to vector<16x1xf32>
    %cst_3 = arith.constant 3.200000e+01 : f32
    %10 = vector.broadcast %cst_3 : f32 to vector<16x1xf32>
    %11 = arith.divf %9, %10 : vector<16x1xf32>
    %cst_4 = arith.constant 9.99999974E-6 : f32
    %12 = vector.broadcast %cst_4 : f32 to vector<16x1xf32>
    %13 = arith.addf %11, %12 : vector<16x1xf32>
    %14 = math.rsqrt %13 : vector<16x1xf32>
    %15 = vector.broadcast %14 : vector<16x1xf32> to vector<16x32xf32>
    %16 = arith.mulf %6, %15 : vector<16x32xf32>
    %c0_5 = arith.constant 0 : index
    %c0_6 = arith.constant 0 : index
    %17 = vector.load %arg4[%c0_5, %c0_6] : memref<1x32xf32, #tpu.memory_space<vmem>>, vector<1x32xf32>
    %18 = vector.broadcast %17 : vector<1x32xf32> to vector<16x32xf32>
    %19 = arith.mulf %16, %18 : vector<16x32xf32>
    %c0_7 = arith.constant 0 : index
    %c0_8 = arith.constant 0 : index
    %20 = vector.load %arg5[%c0_7, %c0_8] : memref<1x32xf32, #tpu.memory_space<vmem>>, vector<1x32xf32>
    %21 = vector.broadcast %20 : vector<1x32xf32> to vector<16x32xf32>
    %22 = arith.addf %19, %21 : vector<16x32xf32>
    %23 = arith.truncf %22 : vector<16x32xf32> to vector<16x32xbf16>
    %c0_9 = arith.constant 0 : index
    %c0_10 = arith.constant 0 : index
    %24 = vector.load %arg6[%c0_9, %c0_10] : memref<32x96xbf16, #tpu.memory_space<vmem>>, vector<32x96xbf16>
    %cst_11 = arith.constant dense<0.000000e+00> : vector<16x96xf32>
    %25 = tpu.matmul %23, %24, %cst_11 {dimension_numbers = #tpu.dot_dimension_numbers<[1], [0], [0], [1], [0, 0, 1, 1], [], []>} : vector<16x32xbf16>, vector<32x96xbf16>, vector<16x96xf32> -> vector<16x96xf32>
    %c0_12 = arith.constant 0 : index
    %c0_13 = arith.constant 0 : index
    %26 = vector.load %arg7[%c0_12, %c0_13] : memref<16x96xf32, #tpu.memory_space<vmem>>, vector<16x96xf32>
    tpu.vector_store %arg7[%c0_12, %c0_13], %25 {strides = array<i32>} : memref<16x96xf32, #tpu.memory_space<vmem>>, vector<16x96xf32>,
    return
  }
  func.func @transform_0(%arg0: i32, %arg1: i32, %arg2: i32) -> (i32, i32) {
    %c0_i32 = arith.constant 0 : i32
    return %arg0, %arg2 : i32, i32
  }
  func.func @transform_1(%arg0: i32, %arg1: i32, %arg2: i32) -> (i32, i32) {
    %c0_i32 = arith.constant 0 : i32
    %c0_i32_0 = arith.constant 0 : i32
    %c0_i32_1 = arith.constant 0 : i32
    return %c0_i32, %c0_i32_0 : i32, i32
  }
  func.func @transform_2(%arg0: i32, %arg1: i32, %arg2: i32) -> (i32, i32) {
    %c0_i32 = arith.constant 0 : i32
    %c0_i32_0 = arith.constant 0 : i32
    %c0_i32_1 = arith.constant 0 : i32
    return %c0_i32, %c0_i32_0 : i32, i32
  }
  func.func @transform_3(%arg0: i32, %arg1: i32, %arg2: i32) -> (i32, i32) {
    %c0_i32 = arith.constant 0 : i32
    return %arg2, %arg1 : i32, i32
  }
  func.func @transform_4(%arg0: i32, %arg1: i32, %arg2: i32) -> (i32, i32) {
    %c0_i32 = arith.constant 0 : i32
    return %arg0, %arg1 : i32, i32
  }
}

module attributes {stable_mosaic.version = 11 : i64} {
  func.func @kernel(%arg0: i32, %arg1: i32, %arg2: i32, %arg3: memref<16x32xbf16, #tpu.memory_space<vmem>>, %arg4: memref<32x32xbf16, #tpu.memory_space<vmem>>, %arg5: memref<16x32xf32, #tpu.memory_space<vmem>>, %arg6: memref<16x32xf32, #tpu.memory_space<vmem>>) attributes {dimension_semantics = [#tpu.dimension_semantics<parallel>, #tpu.dimension_semantics<parallel>, #tpu.dimension_semantics<arbitrary>], iteration_bounds = array<i64: 1, 1, 1>, scalar_prefetch = 0 : i64, scratch_operands = 0 : i64, tpu.core_type = #tpu.core_type<tc>, window_params = [{transform_indices = @transform_0, window_bounds = array<i64: 16, 32>}, {transform_indices = @transform_1, window_bounds = array<i64: 32, 32>}, {transform_indices = @transform_2, window_bounds = array<i64: 16, 32>}, {transform_indices = @transform_3, window_bounds = array<i64: 16, 32>}]} {
    %c0 = arith.constant 0 : index
    %c0_0 = arith.constant 0 : index
    %0 = vector.load %arg3[%c0, %c0_0] : memref<16x32xbf16, #tpu.memory_space<vmem>>, vector<16x32xbf16>
    %c0_1 = arith.constant 0 : index
    %c0_2 = arith.constant 0 : index
    %1 = vector.load %arg4[%c0_1, %c0_2] : memref<32x32xbf16, #tpu.memory_space<vmem>>, vector<32x32xbf16>
    %cst = arith.constant dense<0.000000e+00> : vector<16x32xf32>
    %2 = tpu.matmul %0, %1, %cst {dimension_numbers = #tpu.dot_dimension_numbers<[1], [0], [0], [1], [0, 0, 1, 1], [], []>} : vector<16x32xbf16>, vector<32x32xbf16>, vector<16x32xf32> -> vector<16x32xf32>
    %c0_3 = arith.constant 0 : index
    %c0_4 = arith.constant 0 : index
    %3 = vector.load %arg5[%c0_3, %c0_4] : memref<16x32xf32, #tpu.memory_space<vmem>>, vector<16x32xf32>
    %4 = arith.addf %2, %3 : vector<16x32xf32>
    %c0_5 = arith.constant 0 : index
    %c0_6 = arith.constant 0 : index
    %5 = vector.load %arg6[%c0_5, %c0_6] : memref<16x32xf32, #tpu.memory_space<vmem>>, vector<16x32xf32>
    tpu.vector_store %arg6[%c0_5, %c0_6], %4 {strides = array<i32>} : memref<16x32xf32, #tpu.memory_space<vmem>>, vector<16x32xf32>,
    return
  }
  func.func @transform_0(%arg0: i32, %arg1: i32, %arg2: i32) -> (i32, i32) {
    %c0_i32 = arith.constant 0 : i32
    return %arg0, %arg2 : i32, i32
  }
  func.func @transform_1(%arg0: i32, %arg1: i32, %arg2: i32) -> (i32, i32) {
    %c0_i32 = arith.constant 0 : i32
    return %arg2, %arg1 : i32, i32
  }
  func.func @transform_2(%arg0: i32, %arg1: i32, %arg2: i32) -> (i32, i32) {
    %c0_i32 = arith.constant 0 : i32
    return %arg0, %arg1 : i32, i32
  }
  func.func @transform_3(%arg0: i32, %arg1: i32, %arg2: i32) -> (i32, i32) {
    %c0_i32 = arith.constant 0 : i32
    return %arg0, %arg1 : i32, i32
  }
}

module attributes {stable_mosaic.version = 11 : i64} {
  func.func @kernel(%arg0: i32, %arg1: i32, %arg2: i32, %arg3: memref<1x8x1x4x8xf32, #tpu.memory_space<vmem>>, %arg4: memref<1x8x1x4x8xf32, #tpu.memory_space<vmem>>, %arg5: memref<1x8x1x4x8xf32, #tpu.memory_space<vmem>>, %arg6: memref<1x1x8xf32, #tpu.memory_space<vmem>>, %arg7: memref<1x8x32xbf16, #tpu.memory_space<vmem>>) attributes {dimension_semantics = [#tpu.dimension_semantics<parallel>, #tpu.dimension_semantics<parallel>, #tpu.dimension_semantics<arbitrary>], iteration_bounds = array<i64: 2, 1, 1>, scalar_prefetch = 0 : i64, scratch_operands = 0 : i64, tpu.core_type = #tpu.core_type<tc>, window_params = [{transform_indices = @transform_0, window_bounds = array<i64: 1, 8, 1, 4, 8>}, {transform_indices = @transform_1, window_bounds = array<i64: 1, 8, 1, 4, 8>}, {transform_indices = @transform_2, window_bounds = array<i64: 1, 8, 1, 4, 8>}, {transform_indices = @transform_3, window_bounds = array<i64: 1, 1, 8>}, {transform_indices = @transform_4, window_bounds = array<i64: 1, 8, 32>}]} {
    %c0 = arith.constant 0 : index
    %c0_0 = arith.constant 0 : index
    %c0_1 = arith.constant 0 : index
    %0 = vector.load %arg6[%c0, %c0_0, %c0_1] : memref<1x1x8xf32, #tpu.memory_space<vmem>>, vector<1x1x8xf32>
    %1 = vector.shape_cast %0 : vector<1x1x8xf32> to vector<1x8xf32>
    %cst = arith.constant -1.000000e+00 : f32
    %2 = vector.broadcast %cst : f32 to vector<1x8xf32>
    %3 = arith.cmpf olt, %1, %2 : vector<1x8xf32>
    %4 = tpu.iota {dimensions = array<i32: 0>} : vector<8x8xi32>
    %c8_i32 = arith.constant 8 : i32
    %5 = arith.muli %arg1, %c8_i32 : i32
    %6 = vector.broadcast %5 : i32 to vector<8x8xi32>
    %7 = arith.addi %4, %6 : vector<8x8xi32>
    %8 = tpu.iota {dimensions = array<i32: 1>} : vector<8x8xi32>
    %c8_i32_2 = arith.constant 8 : i32
    %9 = arith.muli %arg2, %c8_i32_2 : i32
    %10 = vector.broadcast %9 : i32 to vector<8x8xi32>
    %11 = arith.addi %8, %10 : vector<8x8xi32>
    %12 = arith.cmpi sgt, %11, %7 : vector<8x8xi32>
    %13 = vector.broadcast %3 : vector<1x8xi1> to vector<8x8xi1>
    %14 = arith.ori %13, %12 : vector<8x8xi1>
    %cst_3 = arith.constant -1.000000e+30 : f32
    %cst_4 = arith.constant 0.000000e+00 : f32
    %15 = vector.broadcast %cst_3 : f32 to vector<8x8xf32>
    %16 = vector.broadcast %cst_4 : f32 to vector<8x8xf32>
    %17 = arith.select %14, %15, %16 : vector<8x8xi1>, vector<8x8xf32>
    %c0_5 = arith.constant 0 : index
    %c0_6 = arith.constant 0 : index
    %c0_7 = arith.constant 0 : index
    %c0_8 = arith.constant 0 : index
    %c0_9 = arith.constant 0 : index
    %18 = vector.load %arg3[%c0_5, %c0_6, %c0_7, %c0_8, %c0_9] : memref<1x8x1x4x8xf32, #tpu.memory_space<vmem>>, vector<1x8x1x1x8xf32>
    %19 = vector.shape_cast %18 : vector<1x8x1x1x8xf32> to vector<8x8xf32>
    %cst_10 = arith.constant 0.353553385 : f32
    %20 = vector.broadcast %cst_10 : f32 to vector<8x8xf32>
    %21 = arith.mulf %19, %20 : vector<8x8xf32>
    %22 = arith.truncf %21 : vector<8x8xf32> to vector<8x8xbf16>
    %c0_11 = arith.constant 0 : index
    %c0_12 = arith.constant 0 : index
    %c0_13 = arith.constant 0 : index
    %c0_14 = arith.constant 0 : index
    %c0_15 = arith.constant 0 : index
    %23 = vector.load %arg4[%c0_11, %c0_12, %c0_13, %c0_14, %c0_15] : memref<1x8x1x4x8xf32, #tpu.memory_space<vmem>>, vector<1x8x1x1x8xf32>
    %24 = vector.shape_cast %23 : vector<1x8x1x1x8xf32> to vector<8x8xf32>
    %25 = arith.truncf %24 : vector<8x8xf32> to vector<8x8xbf16>
    %cst_16 = arith.constant dense<0.000000e+00> : vector<8x8xf32>
    %26 = tpu.matmul %22, %25, %cst_16 {dimension_numbers = #tpu.dot_dimension_numbers<[1], [1], [0], [0], [0, 0, 1, 0], [], []>} : vector<8x8xbf16>, vector<8x8xbf16>, vector<8x8xf32> -> vector<8x8xf32>
    %27 = arith.addf %26, %17 : vector<8x8xf32>
    %cst_17 = arith.constant dense<0xFF800000> : vector<8xf32>
    %28 = vector.multi_reduction <maximumf>, %27, %cst_17 [1] : vector<8x8xf32> to vector<8xf32>
    %29 = vector.shape_cast %28 : vector<8xf32> to vector<8x1xf32>
    %30 = vector.broadcast %29 : vector<8x1xf32> to vector<8x8xf32>
    %31 = arith.subf %27, %30 : vector<8x8xf32>
    %32 = math.exp %31 : vector<8x8xf32>
    %cst_18 = arith.constant dense<0.000000e+00> : vector<8xf32>
    %33 = vector.multi_reduction <add>, %32, %cst_18 [1] : vector<8x8xf32> to vector<8xf32>
    %34 = vector.shape_cast %33 : vector<8xf32> to vector<8x1xf32>
    %35 = tpu.reciprocal %34 {approx = true} : vector<8x1xf32> -> vector<8x1xf32>
    %36 = vector.broadcast %35 : vector<8x1xf32> to vector<8x8xf32>
    %37 = arith.mulf %32, %36 : vector<8x8xf32>
    %38 = arith.truncf %37 : vector<8x8xf32> to vector<8x8xbf16>
    %c0_19 = arith.constant 0 : index
    %c0_20 = arith.constant 0 : index
    %c0_21 = arith.constant 0 : index
    %c0_22 = arith.constant 0 : index
    %c0_23 = arith.constant 0 : index
    %39 = vector.load %arg5[%c0_19, %c0_20, %c0_21, %c0_22, %c0_23] : memref<1x8x1x4x8xf32, #tpu.memory_space<vmem>>, vector<1x8x1x1x8xf32>
    %40 = vector.shape_cast %39 : vector<1x8x1x1x8xf32> to vector<8x8xf32>
    %41 = arith.truncf %40 : vector<8x8xf32> to vector<8x8xbf16>
    %cst_24 = arith.constant dense<0.000000e+00> : vector<8x8xf32>
    %42 = tpu.matmul %38, %41, %cst_24 {dimension_numbers = #tpu.dot_dimension_numbers<[1], [0], [0], [1], [0, 0, 1, 1], [], []>} : vector<8x8xbf16>, vector<8x8xbf16>, vector<8x8xf32> -> vector<8x8xf32>
    %43 = arith.truncf %42 : vector<8x8xf32> to vector<8x8xbf16>
    %c0_25 = arith.constant 0 : index
    %c0_26 = arith.constant 0 : index
    %c0_27 = arith.constant 0 : index
    %44 = vector.load %arg7[%c0_25, %c0_26, %c0_27] : memref<1x8x32xbf16, #tpu.memory_space<vmem>>, vector<1x8x8xbf16>
    %45 = vector.shape_cast %44 : vector<1x8x8xbf16> to vector<8x8xbf16>
    %46 = vector.shape_cast %43 : vector<8x8xbf16> to vector<1x8x8xbf16>
    tpu.vector_store %arg7[%c0_25, %c0_26, %c0_27], %46 {strides = array<i32>} : memref<1x8x32xbf16, #tpu.memory_space<vmem>>, vector<1x8x8xbf16>,
    %c0_28 = arith.constant 0 : index
    %c0_29 = arith.constant 0 : index
    %c0_30 = arith.constant 0 : index
    %c1 = arith.constant 1 : index
    %c0_31 = arith.constant 0 : index
    %47 = vector.load %arg3[%c0_28, %c0_29, %c0_30, %c1, %c0_31] : memref<1x8x1x4x8xf32, #tpu.memory_space<vmem>>, vector<1x8x1x1x8xf32>
    %48 = vector.shape_cast %47 : vector<1x8x1x1x8xf32> to vector<8x8xf32>
    %cst_32 = arith.constant 0.353553385 : f32
    %49 = vector.broadcast %cst_32 : f32 to vector<8x8xf32>
    %50 = arith.mulf %48, %49 : vector<8x8xf32>
    %51 = arith.truncf %50 : vector<8x8xf32> to vector<8x8xbf16>
    %c0_33 = arith.constant 0 : index
    %c0_34 = arith.constant 0 : index
    %c0_35 = arith.constant 0 : index
    %c1_36 = arith.constant 1 : index
    %c0_37 = arith.constant 0 : index
    %52 = vector.load %arg4[%c0_33, %c0_34, %c0_35, %c1_36, %c0_37] : memref<1x8x1x4x8xf32, #tpu.memory_space<vmem>>, vector<1x8x1x1x8xf32>
    %53 = vector.shape_cast %52 : vector<1x8x1x1x8xf32> to vector<8x8xf32>
    %54 = arith.truncf %53 : vector<8x8xf32> to vector<8x8xbf16>
    %cst_38 = arith.constant dense<0.000000e+00> : vector<8x8xf32>
    %55 = tpu.matmul %51, %54, %cst_38 {dimension_numbers = #tpu.dot_dimension_numbers<[1], [1], [0], [0], [0, 0, 1, 0], [], []>} : vector<8x8xbf16>, vector<8x8xbf16>, vector<8x8xf32> -> vector<8x8xf32>
    %56 = arith.addf %55, %17 : vector<8x8xf32>
    %cst_39 = arith.constant dense<0xFF800000> : vector<8xf32>
    %57 = vector.multi_reduction <maximumf>, %56, %cst_39 [1] : vector<8x8xf32> to vector<8xf32>
    %58 = vector.shape_cast %57 : vector<8xf32> to vector<8x1xf32>
    %59 = vector.broadcast %58 : vector<8x1xf32> to vector<8x8xf32>
    %60 = arith.subf %56, %59 : vector<8x8xf32>
    %61 = math.exp %60 : vector<8x8xf32>
    %cst_40 = arith.constant dense<0.000000e+00> : vector<8xf32>
    %62 = vector.multi_reduction <add>, %61, %cst_40 [1] : vector<8x8xf32> to vector<8xf32>
    %63 = vector.shape_cast %62 : vector<8xf32> to vector<8x1xf32>
    %64 = tpu.reciprocal %63 {approx = true} : vector<8x1xf32> -> vector<8x1xf32>
    %65 = vector.broadcast %64 : vector<8x1xf32> to vector<8x8xf32>
    %66 = arith.mulf %61, %65 : vector<8x8xf32>
    %67 = arith.truncf %66 : vector<8x8xf32> to vector<8x8xbf16>
    %c0_41 = arith.constant 0 : index
    %c0_42 = arith.constant 0 : index
    %c0_43 = arith.constant 0 : index
    %c1_44 = arith.constant 1 : index
    %c0_45 = arith.constant 0 : index
    %68 = vector.load %arg5[%c0_41, %c0_42, %c0_43, %c1_44, %c0_45] : memref<1x8x1x4x8xf32, #tpu.memory_space<vmem>>, vector<1x8x1x1x8xf32>
    %69 = vector.shape_cast %68 : vector<1x8x1x1x8xf32> to vector<8x8xf32>
    %70 = arith.truncf %69 : vector<8x8xf32> to vector<8x8xbf16>
    %cst_46 = arith.constant dense<0.000000e+00> : vector<8x8xf32>
    %71 = tpu.matmul %67, %70, %cst_46 {dimension_numbers = #tpu.dot_dimension_numbers<[1], [0], [0], [1], [0, 0, 1, 1], [], []>} : vector<8x8xbf16>, vector<8x8xbf16>, vector<8x8xf32> -> vector<8x8xf32>
    %72 = arith.truncf %71 : vector<8x8xf32> to vector<8x8xbf16>
    %c0_47 = arith.constant 0 : index
    %c0_48 = arith.constant 0 : index
    %c8 = arith.constant 8 : index
    %73 = vector.load %arg7[%c0_47, %c0_48, %c8] : memref<1x8x32xbf16, #tpu.memory_space<vmem>>, vector<1x8x8xbf16>
    %74 = vector.shape_cast %73 : vector<1x8x8xbf16> to vector<8x8xbf16>
    %75 = vector.shape_cast %72 : vector<8x8xbf16> to vector<1x8x8xbf16>
    tpu.vector_store %arg7[%c0_47, %c0_48, %c8], %75 {strides = array<i32>} : memref<1x8x32xbf16, #tpu.memory_space<vmem>>, vector<1x8x8xbf16>,
    %c0_49 = arith.constant 0 : index
    %c0_50 = arith.constant 0 : index
    %c0_51 = arith.constant 0 : index
    %c2 = arith.constant 2 : index
    %c0_52 = arith.constant 0 : index
    %76 = vector.load %arg3[%c0_49, %c0_50, %c0_51, %c2, %c0_52] : memref<1x8x1x4x8xf32, #tpu.memory_space<vmem>>, vector<1x8x1x1x8xf32>
    %77 = vector.shape_cast %76 : vector<1x8x1x1x8xf32> to vector<8x8xf32>
    %cst_53 = arith.constant 0.353553385 : f32
    %78 = vector.broadcast %cst_53 : f32 to vector<8x8xf32>
    %79 = arith.mulf %77, %78 : vector<8x8xf32>
    %80 = arith.truncf %79 : vector<8x8xf32> to vector<8x8xbf16>
    %c0_54 = arith.constant 0 : index
    %c0_55 = arith.constant 0 : index
    %c0_56 = arith.constant 0 : index
    %c2_57 = arith.constant 2 : index
    %c0_58 = arith.constant 0 : index
    %81 = vector.load %arg4[%c0_54, %c0_55, %c0_56, %c2_57, %c0_58] : memref<1x8x1x4x8xf32, #tpu.memory_space<vmem>>, vector<1x8x1x1x8xf32>
    %82 = vector.shape_cast %81 : vector<1x8x1x1x8xf32> to vector<8x8xf32>
    %83 = arith.truncf %82 : vector<8x8xf32> to vector<8x8xbf16>
    %cst_59 = arith.constant dense<0.000000e+00> : vector<8x8xf32>
    %84 = tpu.matmul %80, %83, %cst_59 {dimension_numbers = #tpu.dot_dimension_numbers<[1], [1], [0], [0], [0, 0, 1, 0], [], []>} : vector<8x8xbf16>, vector<8x8xbf16>, vector<8x8xf32> -> vector<8x8xf32>
    %85 = arith.addf %84, %17 : vector<8x8xf32>
    %cst_60 = arith.constant dense<0xFF800000> : vector<8xf32>
    %86 = vector.multi_reduction <maximumf>, %85, %cst_60 [1] : vector<8x8xf32> to vector<8xf32>
    %87 = vector.shape_cast %86 : vector<8xf32> to vector<8x1xf32>
    %88 = vector.broadcast %87 : vector<8x1xf32> to vector<8x8xf32>
    %89 = arith.subf %85, %88 : vector<8x8xf32>
    %90 = math.exp %89 : vector<8x8xf32>
    %cst_61 = arith.constant dense<0.000000e+00> : vector<8xf32>
    %91 = vector.multi_reduction <add>, %90, %cst_61 [1] : vector<8x8xf32> to vector<8xf32>
    %92 = vector.shape_cast %91 : vector<8xf32> to vector<8x1xf32>
    %93 = tpu.reciprocal %92 {approx = true} : vector<8x1xf32> -> vector<8x1xf32>
    %94 = vector.broadcast %93 : vector<8x1xf32> to vector<8x8xf32>
    %95 = arith.mulf %90, %94 : vector<8x8xf32>
    %96 = arith.truncf %95 : vector<8x8xf32> to vector<8x8xbf16>
    %c0_62 = arith.constant 0 : index
    %c0_63 = arith.constant 0 : index
    %c0_64 = arith.constant 0 : index
    %c2_65 = arith.constant 2 : index
    %c0_66 = arith.constant 0 : index
    %97 = vector.load %arg5[%c0_62, %c0_63, %c0_64, %c2_65, %c0_66] : memref<1x8x1x4x8xf32, #tpu.memory_space<vmem>>, vector<1x8x1x1x8xf32>
    %98 = vector.shape_cast %97 : vector<1x8x1x1x8xf32> to vector<8x8xf32>
    %99 = arith.truncf %98 : vector<8x8xf32> to vector<8x8xbf16>
    %cst_67 = arith.constant dense<0.000000e+00> : vector<8x8xf32>
    %100 = tpu.matmul %96, %99, %cst_67 {dimension_numbers = #tpu.dot_dimension_numbers<[1], [0], [0], [1], [0, 0, 1, 1], [], []>} : vector<8x8xbf16>, vector<8x8xbf16>, vector<8x8xf32> -> vector<8x8xf32>
    %101 = arith.truncf %100 : vector<8x8xf32> to vector<8x8xbf16>
    %c0_68 = arith.constant 0 : index
    %c0_69 = arith.constant 0 : index
    %c16 = arith.constant 16 : index
    %102 = vector.load %arg7[%c0_68, %c0_69, %c16] : memref<1x8x32xbf16, #tpu.memory_space<vmem>>, vector<1x8x8xbf16>
    %103 = vector.shape_cast %102 : vector<1x8x8xbf16> to vector<8x8xbf16>
    %104 = vector.shape_cast %101 : vector<8x8xbf16> to vector<1x8x8xbf16>
    tpu.vector_store %arg7[%c0_68, %c0_69, %c16], %104 {strides = array<i32>} : memref<1x8x32xbf16, #tpu.memory_space<vmem>>, vector<1x8x8xbf16>,
    %c0_70 = arith.constant 0 : index
    %c0_71 = arith.constant 0 : index
    %c0_72 = arith.constant 0 : index
    %c3 = arith.constant 3 : index
    %c0_73 = arith.constant 0 : index
    %105 = vector.load %arg3[%c0_70, %c0_71, %c0_72, %c3, %c0_73] : memref<1x8x1x4x8xf32, #tpu.memory_space<vmem>>, vector<1x8x1x1x8xf32>
    %106 = vector.shape_cast %105 : vector<1x8x1x1x8xf32> to vector<8x8xf32>
    %cst_74 = arith.constant 0.353553385 : f32
    %107 = vector.broadcast %cst_74 : f32 to vector<8x8xf32>
    %108 = arith.mulf %106, %107 : vector<8x8xf32>
    %109 = arith.truncf %108 : vector<8x8xf32> to vector<8x8xbf16>
    %c0_75 = arith.constant 0 : index
    %c0_76 = arith.constant 0 : index
    %c0_77 = arith.constant 0 : index
    %c3_78 = arith.constant 3 : index
    %c0_79 = arith.constant 0 : index
    %110 = vector.load %arg4[%c0_75, %c0_76, %c0_77, %c3_78, %c0_79] : memref<1x8x1x4x8xf32, #tpu.memory_space<vmem>>, vector<1x8x1x1x8xf32>
    %111 = vector.shape_cast %110 : vector<1x8x1x1x8xf32> to vector<8x8xf32>
    %112 = arith.truncf %111 : vector<8x8xf32> to vector<8x8xbf16>
    %cst_80 = arith.constant dense<0.000000e+00> : vector<8x8xf32>
    %113 = tpu.matmul %109, %112, %cst_80 {dimension_numbers = #tpu.dot_dimension_numbers<[1], [1], [0], [0], [0, 0, 1, 0], [], []>} : vector<8x8xbf16>, vector<8x8xbf16>, vector<8x8xf32> -> vector<8x8xf32>
    %114 = arith.addf %113, %17 : vector<8x8xf32>
    %cst_81 = arith.constant dense<0xFF800000> : vector<8xf32>
    %115 = vector.multi_reduction <maximumf>, %114, %cst_81 [1] : vector<8x8xf32> to vector<8xf32>
    %116 = vector.shape_cast %115 : vector<8xf32> to vector<8x1xf32>
    %117 = vector.broadcast %116 : vector<8x1xf32> to vector<8x8xf32>
    %118 = arith.subf %114, %117 : vector<8x8xf32>
    %119 = math.exp %118 : vector<8x8xf32>
    %cst_82 = arith.constant dense<0.000000e+00> : vector<8xf32>
    %120 = vector.multi_reduction <add>, %119, %cst_82 [1] : vector<8x8xf32> to vector<8xf32>
    %121 = vector.shape_cast %120 : vector<8xf32> to vector<8x1xf32>
    %122 = tpu.reciprocal %121 {approx = true} : vector<8x1xf32> -> vector<8x1xf32>
    %123 = vector.broadcast %122 : vector<8x1xf32> to vector<8x8xf32>
    %124 = arith.mulf %119, %123 : vector<8x8xf32>
    %125 = arith.truncf %124 : vector<8x8xf32> to vector<8x8xbf16>
    %c0_83 = arith.constant 0 : index
    %c0_84 = arith.constant 0 : index
    %c0_85 = arith.constant 0 : index
    %c3_86 = arith.constant 3 : index
    %c0_87 = arith.constant 0 : index
    %126 = vector.load %arg5[%c0_83, %c0_84, %c0_85, %c3_86, %c0_87] : memref<1x8x1x4x8xf32, #tpu.memory_space<vmem>>, vector<1x8x1x1x8xf32>
    %127 = vector.shape_cast %126 : vector<1x8x1x1x8xf32> to vector<8x8xf32>
    %128 = arith.truncf %127 : vector<8x8xf32> to vector<8x8xbf16>
    %cst_88 = arith.constant dense<0.000000e+00> : vector<8x8xf32>
    %129 = tpu.matmul %125, %128, %cst_88 {dimension_numbers = #tpu.dot_dimension_numbers<[1], [0], [0], [1], [0, 0, 1, 1], [], []>} : vector<8x8xbf16>, vector<8x8xbf16>, vector<8x8xf32> -> vector<8x8xf32>
    %130 = arith.truncf %129 : vector<8x8xf32> to vector<8x8xbf16>
    %c0_89 = arith.constant 0 : index
    %c0_90 = arith.constant 0 : index
    %c24 = arith.constant 24 : index
    %131 = vector.load %arg7[%c0_89, %c0_90, %c24] : memref<1x8x32xbf16, #tpu.memory_space<vmem>>, vector<1x8x8xbf16>
    %132 = vector.shape_cast %131 : vector<1x8x8xbf16> to vector<8x8xbf16>
    %133 = vector.shape_cast %130 : vector<8x8xbf16> to vector<1x8x8xbf16>
    tpu.vector_store %arg7[%c0_89, %c0_90, %c24], %133 {strides = array<i32>} : memref<1x8x32xbf16, #tpu.memory_space<vmem>>, vector<1x8x8xbf16>,
    return
  }
  func.func @transform_0(%arg0: i32, %arg1: i32, %arg2: i32) -> (i32, i32, i32, i32, i32) {
    %c0_i32 = arith.constant 0 : i32
    %c0_i32_0 = arith.constant 0 : i32
    %c0_i32_1 = arith.constant 0 : i32
    %c0_i32_2 = arith.constant 0 : i32
    return %arg0, %arg1, %c0_i32, %c0_i32_0, %c0_i32_1 : i32, i32, i32, i32, i32
  }
  func.func @transform_1(%arg0: i32, %arg1: i32, %arg2: i32) -> (i32, i32, i32, i32, i32) {
    %c1_i32 = arith.constant 1 : i32
    %c0_i32 = arith.constant 0 : i32
    %c0_i32_0 = arith.constant 0 : i32
    %c0_i32_1 = arith.constant 0 : i32
    return %arg0, %arg2, %c1_i32, %c0_i32, %c0_i32_0 : i32, i32, i32, i32, i32
  }
  func.func @transform_2(%arg0: i32, %arg1: i32, %arg2: i32) -> (i32, i32, i32, i32, i32) {
    %c2_i32 = arith.constant 2 : i32
    %c0_i32 = arith.constant 0 : i32
    %c0_i32_0 = arith.constant 0 : i32
    %c0_i32_1 = arith.constant 0 : i32
    return %arg0, %arg2, %c2_i32, %c0_i32, %c0_i32_0 : i32, i32, i32, i32, i32
  }
  func.func @transform_3(%arg0: i32, %arg1: i32, %arg2: i32) -> (i32, i32, i32) {
    %c0_i32 = arith.constant 0 : i32
    %c0_i32_0 = arith.constant 0 : i32
    return %arg0, %c0_i32, %arg2 : i32, i32, i32
  }
  func.func @transform_4(%arg0: i32, %arg1: i32, %arg2: i32) -> (i32, i32, i32) {
    %c0_i32 = arith.constant 0 : i32
    %c0_i32_0 = arith.constant 0 : i32
    return %arg0, %arg1, %c0_i32 : i32, i32, i32
  }
}

module attributes {stable_mosaic.version = 11 : i64} {
  func.func @kernel(%arg0: i32, %arg1: i32, %arg2: i32, %arg3: memref<16x32xf32, #tpu.memory_space<vmem>>, %arg4: memref<1x32xf32, #tpu.memory_space<vmem>>, %arg5: memref<1x32xf32, #tpu.memory_space<vmem>>, %arg6: memref<32x32xbf16, #tpu.memory_space<vmem>>, %arg7: memref<16x32xf32, #tpu.memory_space<vmem>>) attributes {dimension_semantics = [#tpu.dimension_semantics<parallel>, #tpu.dimension_semantics<parallel>, #tpu.dimension_semantics<arbitrary>], iteration_bounds = array<i64: 1, 1, 1>, scalar_prefetch = 0 : i64, scratch_operands = 0 : i64, tpu.core_type = #tpu.core_type<tc>, window_params = [{transform_indices = @transform_0, window_bounds = array<i64: 16, 32>}, {pipeline_mode = #tpu.pipeline_mode<synchronous>, transform_indices = @transform_1, window_bounds = array<i64: 1, 32>}, {pipeline_mode = #tpu.pipeline_mode<synchronous>, transform_indices = @transform_2, window_bounds = array<i64: 1, 32>}, {transform_indices = @transform_3, window_bounds = array<i64: 32, 32>}, {transform_indices = @transform_4, window_bounds = array<i64: 16, 32>}]} {
    %c0 = arith.constant 0 : index
    %c0_0 = arith.constant 0 : index
    %0 = vector.load %arg3[%c0, %c0_0] : memref<16x32xf32, #tpu.memory_space<vmem>>, vector<16x32xf32>
    %cst = arith.constant dense<0.000000e+00> : vector<16xf32>
    %1 = vector.multi_reduction <add>, %0, %cst [1] : vector<16x32xf32> to vector<16xf32>
    %2 = vector.shape_cast %1 : vector<16xf32> to vector<16x1xf32>
    %cst_1 = arith.constant 3.200000e+01 : f32
    %3 = vector.broadcast %cst_1 : f32 to vector<16x1xf32>
    %4 = arith.divf %2, %3 : vector<16x1xf32>
    %5 = vector.broadcast %4 : vector<16x1xf32> to vector<16x32xf32>
    %6 = arith.subf %0, %5 : vector<16x32xf32>
    %7 = arith.mulf %6, %6 : vector<16x32xf32>
    %cst_2 = arith.constant dense<0.000000e+00> : vector<16xf32>
    %8 = vector.multi_reduction <add>, %7, %cst_2 [1] : vector<16x32xf32> to vector<16xf32>
    %9 = vector.shape_cast %8 : vector<16xf32> to vector<16x1xf32>
    %cst_3 = arith.constant 3.200000e+01 : f32
    %10 = vector.broadcast %cst_3 : f32 to vector<16x1xf32>
    %11 = arith.divf %9, %10 : vector<16x1xf32>
    %cst_4 = arith.constant 9.99999974E-6 : f32
    %12 = vector.broadcast %cst_4 : f32 to vector<16x1xf32>
    %13 = arith.addf %11, %12 : vector<16x1xf32>
    %14 = math.rsqrt %13 : vector<16x1xf32>
    %15 = vector.broadcast %14 : vector<16x1xf32> to vector<16x32xf32>
    %16 = arith.mulf %6, %15 : vector<16x32xf32>
    %c0_5 = arith.constant 0 : index
    %c0_6 = arith.constant 0 : index
    %17 = vector.load %arg4[%c0_5, %c0_6] : memref<1x32xf32, #tpu.memory_space<vmem>>, vector<1x32xf32>
    %18 = vector.broadcast %17 : vector<1x32xf32> to vector<16x32xf32>
    %19 = arith.mulf %16, %18 : vector<16x32xf32>
    %c0_7 = arith.constant 0 : index
    %c0_8 = arith.constant 0 : index
    %20 = vector.load %arg5[%c0_7, %c0_8] : memref<1x32xf32, #tpu.memory_space<vmem>>, vector<1x32xf32>
    %21 = vector.broadcast %20 : vector<1x32xf32> to vector<16x32xf32>
    %22 = arith.addf %19, %21 : vector<16x32xf32>
    %23 = arith.truncf %22 : vector<16x32xf32> to vector<16x32xbf16>
    %c0_9 = arith.constant 0 : index
    %c0_10 = arith.constant 0 : index
    %24 = vector.load %arg6[%c0_9, %c0_10] : memref<32x32xbf16, #tpu.memory_space<vmem>>, vector<32x32xbf16>
    %cst_11 = arith.constant dense<0.000000e+00> : vector<16x32xf32>
    %25 = tpu.matmul %23, %24, %cst_11 {dimension_numbers = #tpu.dot_dimension_numbers<[1], [0], [0], [1], [0, 0, 1, 1], [], []>} : vector<16x32xbf16>, vector<32x32xbf16>, vector<16x32xf32> -> vector<16x32xf32>
    %c0_12 = arith.constant 0 : index
    %c0_13 = arith.constant 0 : index
    %26 = vector.load %arg7[%c0_12, %c0_13] : memref<16x32xf32, #tpu.memory_space<vmem>>, vector<16x32xf32>
    tpu.vector_store %arg7[%c0_12, %c0_13], %25 {strides = array<i32>} : memref<16x32xf32, #tpu.memory_space<vmem>>, vector<16x32xf32>,
    return
  }
  func.func @transform_0(%arg0: i32, %arg1: i32, %arg2: i32) -> (i32, i32) {
    %c0_i32 = arith.constant 0 : i32
    return %arg0, %arg2 : i32, i32
  }
  func.func @transform_1(%arg0: i32, %arg1: i32, %arg2: i32) -> (i32, i32) {
    %c0_i32 = arith.constant 0 : i32
    %c0_i32_0 = arith.constant 0 : i32
    %c0_i32_1 = arith.constant 0 : i32
    return %c0_i32, %c0_i32_0 : i32, i32
  }
  func.func @transform_2(%arg0: i32, %arg1: i32, %arg2: i32) -> (i32, i32) {
    %c0_i32 = arith.constant 0 : i32
    %c0_i32_0 = arith.constant 0 : i32
    %c0_i32_1 = arith.constant 0 : i32
    return %c0_i32, %c0_i32_0 : i32, i32
  }
  func.func @transform_3(%arg0: i32, %arg1: i32, %arg2: i32) -> (i32, i32) {
    %c0_i32 = arith.constant 0 : i32
    return %arg2, %arg1 : i32, i32
  }
  func.func @transform_4(%arg0: i32, %arg1: i32, %arg2: i32) -> (i32, i32) {
    %c0_i32 = arith.constant 0 : i32
    return %arg0, %arg1 : i32, i32
  }
}

module attributes {stable_mosaic.version = 11 : i64} {
  func.func @kernel(%arg0: i32, %arg1: i32, %arg2: i32, %arg3: memref<32x32xf32, #tpu.memory_space<vmem>>, %arg4: memref<32x64xbf16, #tpu.memory_space<vmem>>, %arg5: memref<32x64xf32, #tpu.memory_space<vmem>>) attributes {dimension_semantics = [#tpu.dimension_semantics<parallel>, #tpu.dimension_semantics<parallel>, #tpu.dimension_semantics<arbitrary>], iteration_bounds = array<i64: 1, 1, 1>, scalar_prefetch = 0 : i64, scratch_operands = 0 : i64, tpu.core_type = #tpu.core_type<tc>, window_params = [{transform_indices = @transform_0, window_bounds = array<i64: 32, 32>}, {transform_indices = @transform_1, window_bounds = array<i64: 32, 64>}, {transform_indices = @transform_2, window_bounds = array<i64: 32, 64>}]} {
    %c0 = arith.constant 0 : index
    %c0_0 = arith.constant 0 : index
    %0 = vector.load %arg3[%c0, %c0_0] : memref<32x32xf32, #tpu.memory_space<vmem>>, vector<32x32xf32>
    %1 = arith.truncf %0 : vector<32x32xf32> to vector<32x32xbf16>
    %c0_1 = arith.constant 0 : index
    %c0_2 = arith.constant 0 : index
    %2 = vector.load %arg4[%c0_1, %c0_2] : memref<32x64xbf16, #tpu.memory_space<vmem>>, vector<32x64xbf16>
    %cst = arith.constant dense<0.000000e+00> : vector<32x64xf32>
    %3 = tpu.matmul %1, %2, %cst {dimension_numbers = #tpu.dot_dimension_numbers<[1], [0], [0], [1], [0, 0, 1, 1], [], []>} : vector<32x32xbf16>, vector<32x64xbf16>, vector<32x64xf32> -> vector<32x64xf32>
    %c0_3 = arith.constant 0 : index
    %c0_4 = arith.constant 0 : index
    %4 = vector.load %arg5[%c0_3, %c0_4] : memref<32x64xf32, #tpu.memory_space<vmem>>, vector<32x64xf32>
    tpu.vector_store %arg5[%c0_3, %c0_4], %3 {strides = array<i32>} : memref<32x64xf32, #tpu.memory_space<vmem>>, vector<32x64xf32>,
    return
  }
  func.func @transform_0(%arg0: i32, %arg1: i32, %arg2: i32) -> (i32, i32) {
    %c0_i32 = arith.constant 0 : i32
    return %arg0, %arg2 : i32, i32
  }
  func.func @transform_1(%arg0: i32, %arg1: i32, %arg2: i32) -> (i32, i32) {
    %c0_i32 = arith.constant 0 : i32
    return %arg2, %arg1 : i32, i32
  }
  func.func @transform_2(%arg0: i32, %arg1: i32, %arg2: i32) -> (i32, i32) {
    %c0_i32 = arith.constant 0 : i32
    return %arg0, %arg1 : i32, i32
  }
}

module attributes {stable_mosaic.version = 11 : i64} {
  func.func @kernel(%arg0: i32, %arg1: i32, %arg2: i32, %arg3: memref<1x8x1x4x8xf32, #tpu.memory_space<vmem>>, %arg4: memref<1x16x1x4x8xf32, #tpu.memory_space<vmem>>, %arg5: memref<1x16x1x4x8xf32, #tpu.memory_space<vmem>>, %arg6: memref<1x1x16xf32, #tpu.memory_space<vmem>>, %arg7: memref<1x8x32xbf16, #tpu.memory_space<vmem>>) attributes {dimension_semantics = [#tpu.dimension_semantics<parallel>, #tpu.dimension_semantics<parallel>, #tpu.dimension_semantics<arbitrary>], iteration_bounds = array<i64: 2, 1, 1>, scalar_prefetch = 0 : i64, scratch_operands = 0 : i64, tpu.core_type = #tpu.core_type<tc>, window_params = [{transform_indices = @transform_0, window_bounds = array<i64: 1, 8, 1, 4, 8>}, {transform_indices = @transform_1, window_bounds = array<i64: 1, 16, 1, 4, 8>}, {transform_indices = @transform_2, window_bounds = array<i64: 1, 16, 1, 4, 8>}, {transform_indices = @transform_3, window_bounds = array<i64: 1, 1, 16>}, {transform_indices = @transform_4, window_bounds = array<i64: 1, 8, 32>}]} {
    %c0 = arith.constant 0 : index
    %c0_0 = arith.constant 0 : index
    %c0_1 = arith.constant 0 : index
    %0 = vector.load %arg6[%c0, %c0_0, %c0_1] : memref<1x1x16xf32, #tpu.memory_space<vmem>>, vector<1x1x16xf32>
    %1 = vector.shape_cast %0 : vector<1x1x16xf32> to vector<1x16xf32>
    %cst = arith.constant -1.000000e+00 : f32
    %2 = vector.broadcast %cst : f32 to vector<1x16xf32>
    %3 = arith.cmpf olt, %1, %2 : vector<1x16xf32>
    %cst_2 = arith.constant -1.000000e+30 : f32
    %cst_3 = arith.constant 0.000000e+00 : f32
    %4 = vector.broadcast %cst_2 : f32 to vector<1x16xf32>
    %5 = vector.broadcast %cst_3 : f32 to vector<1x16xf32>
    %6 = arith.select %3, %4, %5 : vector<1x16xi1>, vector<1x16xf32>
    %c0_4 = arith.constant 0 : index
    %c0_5 = arith.constant 0 : index
    %c0_6 = arith.constant 0 : index
    %c0_7 = arith.constant 0 : index
    %c0_8 = arith.constant 0 : index
    %7 = vector.load %arg3[%c0_4, %c0_5, %c0_6, %c0_7, %c0_8] : memref<1x8x1x4x8xf32, #tpu.memory_space<vmem>>, vector<1x8x1x1x8xf32>
    %8 = vector.shape_cast %7 : vector<1x8x1x1x8xf32> to vector<8x8xf32>
    %cst_9 = arith.constant 0.353553385 : f32
    %9 = vector.broadcast %cst_9 : f32 to vector<8x8xf32>
    %10 = arith.mulf %8, %9 : vector<8x8xf32>
    %11 = arith.truncf %10 : vector<8x8xf32> to vector<8x8xbf16>
    %c0_10 = arith.constant 0 : index
    %c0_11 = arith.constant 0 : index
    %c0_12 = arith.constant 0 : index
    %c0_13 = arith.constant 0 : index
    %c0_14 = arith.constant 0 : index
    %12 = vector.load %arg4[%c0_10, %c0_11, %c0_12, %c0_13, %c0_14] : memref<1x16x1x4x8xf32, #tpu.memory_space<vmem>>, vector<1x16x1x1x8xf32>
    %13 = vector.shape_cast %12 : vector<1x16x1x1x8xf32> to vector<16x8xf32>
    %14 = arith.truncf %13 : vector<16x8xf32> to vector<16x8xbf16>
    %cst_15 = arith.constant dense<0.000000e+00> : vector<8x16xf32>
    %15 = tpu.matmul %11, %14, %cst_15 {dimension_numbers = #tpu.dot_dimension_numbers<[1], [1], [0], [0], [0, 0, 1, 0], [], []>} : vector<8x8xbf16>, vector<16x8xbf16>, vector<8x16xf32> -> vector<8x16xf32>
    %16 = vector.broadcast %6 : vector<1x16xf32> to vector<8x16xf32>
    %17 = arith.addf %15, %16 : vector<8x16xf32>
    %cst_16 = arith.constant dense<0xFF800000> : vector<8xf32>
    %18 = vector.multi_reduction <maximumf>, %17, %cst_16 [1] : vector<8x16xf32> to vector<8xf32>
    %19 = vector.shape_cast %18 : vector<8xf32> to vector<8x1xf32>
    %20 = vector.broadcast %19 : vector<8x1xf32> to vector<8x16xf32>
    %21 = arith.subf %17, %20 : vector<8x16xf32>
    %22 = math.exp %21 : vector<8x16xf32>
    %cst_17 = arith.constant dense<0.000000e+00> : vector<8xf32>
    %23 = vector.multi_reduction <add>, %22, %cst_17 [1] : vector<8x16xf32> to vector<8xf32>
    %24 = vector.shape_cast %23 : vector<8xf32> to vector<8x1xf32>
    %25 = tpu.reciprocal %24 {approx = true} : vector<8x1xf32> -> vector<8x1xf32>
    %26 = vector.broadcast %25 : vector<8x1xf32> to vector<8x16xf32>
    %27 = arith.mulf %22, %26 : vector<8x16xf32>
    %28 = arith.truncf %27 : vector<8x16xf32> to vector<8x16xbf16>
    %c0_18 = arith.constant 0 : index
    %c0_19 = arith.constant 0 : index
    %c0_20 = arith.constant 0 : index
    %c0_21 = arith.constant 0 : index
    %c0_22 = arith.constant 0 : index
    %29 = vector.load %arg5[%c0_18, %c0_19, %c0_20, %c0_21, %c0_22] : memref<1x16x1x4x8xf32, #tpu.memory_space<vmem>>, vector<1x16x1x1x8xf32>
    %30 = vector.shape_cast %29 : vector<1x16x1x1x8xf32> to vector<16x8xf32>
    %31 = arith.truncf %30 : vector<16x8xf32> to vector<16x8xbf16>
    %cst_23 = arith.constant dense<0.000000e+00> : vector<8x8xf32>
    %32 = tpu.matmul %28, %31, %cst_23 {dimension_numbers = #tpu.dot_dimension_numbers<[1], [0], [0], [1], [0, 0, 1, 1], [], []>} : vector<8x16xbf16>, vector<16x8xbf16>, vector<8x8xf32> -> vector<8x8xf32>
    %33 = arith.truncf %32 : vector<8x8xf32> to vector<8x8xbf16>
    %c0_24 = arith.constant 0 : index
    %c0_25 = arith.constant 0 : index
    %c0_26 = arith.constant 0 : index
    %34 = vector.load %arg7[%c0_24, %c0_25, %c0_26] : memref<1x8x32xbf16, #tpu.memory_space<vmem>>, vector<1x8x8xbf16>
    %35 = vector.shape_cast %34 : vector<1x8x8xbf16> to vector<8x8xbf16>
    %36 = vector.shape_cast %33 : vector<8x8xbf16> to vector<1x8x8xbf16>
    tpu.vector_store %arg7[%c0_24, %c0_25, %c0_26], %36 {strides = array<i32>} : memref<1x8x32xbf16, #tpu.memory_space<vmem>>, vector<1x8x8xbf16>,
    %c0_27 = arith.constant 0 : index
    %c0_28 = arith.constant 0 : index
    %c0_29 = arith.constant 0 : index
    %c1 = arith.constant 1 : index
    %c0_30 = arith.constant 0 : index
    %37 = vector.load %arg3[%c0_27, %c0_28, %c0_29, %c1, %c0_30] : memref<1x8x1x4x8xf32, #tpu.memory_space<vmem>>, vector<1x8x1x1x8xf32>
    %38 = vector.shape_cast %37 : vector<1x8x1x1x8xf32> to vector<8x8xf32>
    %cst_31 = arith.constant 0.353553385 : f32
    %39 = vector.broadcast %cst_31 : f32 to vector<8x8xf32>
    %40 = arith.mulf %38, %39 : vector<8x8xf32>
    %41 = arith.truncf %40 : vector<8x8xf32> to vector<8x8xbf16>
    %c0_32 = arith.constant 0 : index
    %c0_33 = arith.constant 0 : index
    %c0_34 = arith.constant 0 : index
    %c1_35 = arith.constant 1 : index
    %c0_36 = arith.constant 0 : index
    %42 = vector.load %arg4[%c0_32, %c0_33, %c0_34, %c1_35, %c0_36] : memref<1x16x1x4x8xf32, #tpu.memory_space<vmem>>, vector<1x16x1x1x8xf32>
    %43 = vector.shape_cast %42 : vector<1x16x1x1x8xf32> to vector<16x8xf32>
    %44 = arith.truncf %43 : vector<16x8xf32> to vector<16x8xbf16>
    %cst_37 = arith.constant dense<0.000000e+00> : vector<8x16xf32>
    %45 = tpu.matmul %41, %44, %cst_37 {dimension_numbers = #tpu.dot_dimension_numbers<[1], [1], [0], [0], [0, 0, 1, 0], [], []>} : vector<8x8xbf16>, vector<16x8xbf16>, vector<8x16xf32> -> vector<8x16xf32>
    %46 = vector.broadcast %6 : vector<1x16xf32> to vector<8x16xf32>
    %47 = arith.addf %45, %46 : vector<8x16xf32>
    %cst_38 = arith.constant dense<0xFF800000> : vector<8xf32>
    %48 = vector.multi_reduction <maximumf>, %47, %cst_38 [1] : vector<8x16xf32> to vector<8xf32>
    %49 = vector.shape_cast %48 : vector<8xf32> to vector<8x1xf32>
    %50 = vector.broadcast %49 : vector<8x1xf32> to vector<8x16xf32>
    %51 = arith.subf %47, %50 : vector<8x16xf32>
    %52 = math.exp %51 : vector<8x16xf32>
    %cst_39 = arith.constant dense<0.000000e+00> : vector<8xf32>
    %53 = vector.multi_reduction <add>, %52, %cst_39 [1] : vector<8x16xf32> to vector<8xf32>
    %54 = vector.shape_cast %53 : vector<8xf32> to vector<8x1xf32>
    %55 = tpu.reciprocal %54 {approx = true} : vector<8x1xf32> -> vector<8x1xf32>
    %56 = vector.broadcast %55 : vector<8x1xf32> to vector<8x16xf32>
    %57 = arith.mulf %52, %56 : vector<8x16xf32>
    %58 = arith.truncf %57 : vector<8x16xf32> to vector<8x16xbf16>
    %c0_40 = arith.constant 0 : index
    %c0_41 = arith.constant 0 : index
    %c0_42 = arith.constant 0 : index
    %c1_43 = arith.constant 1 : index
    %c0_44 = arith.constant 0 : index
    %59 = vector.load %arg5[%c0_40, %c0_41, %c0_42, %c1_43, %c0_44] : memref<1x16x1x4x8xf32, #tpu.memory_space<vmem>>, vector<1x16x1x1x8xf32>
    %60 = vector.shape_cast %59 : vector<1x16x1x1x8xf32> to vector<16x8xf32>
    %61 = arith.truncf %60 : vector<16x8xf32> to vector<16x8xbf16>
    %cst_45 = arith.constant dense<0.000000e+00> : vector<8x8xf32>
    %62 = tpu.matmul %58, %61, %cst_45 {dimension_numbers = #tpu.dot_dimension_numbers<[1], [0], [0], [1], [0, 0, 1, 1], [], []>} : vector<8x16xbf16>, vector<16x8xbf16>, vector<8x8xf32> -> vector<8x8xf32>
    %63 = arith.truncf %62 : vector<8x8xf32> to vector<8x8xbf16>
    %c0_46 = arith.constant 0 : index
    %c0_47 = arith.constant 0 : index
    %c8 = arith.constant 8 : index
    %64 = vector.load %arg7[%c0_46, %c0_47, %c8] : memref<1x8x32xbf16, #tpu.memory_space<vmem>>, vector<1x8x8xbf16>
    %65 = vector.shape_cast %64 : vector<1x8x8xbf16> to vector<8x8xbf16>
    %66 = vector.shape_cast %63 : vector<8x8xbf16> to vector<1x8x8xbf16>
    tpu.vector_store %arg7[%c0_46, %c0_47, %c8], %66 {strides = array<i32>} : memref<1x8x32xbf16, #tpu.memory_space<vmem>>, vector<1x8x8xbf16>,
    %c0_48 = arith.constant 0 : index
    %c0_49 = arith.constant 0 : index
    %c0_50 = arith.constant 0 : index
    %c2 = arith.constant 2 : index
    %c0_51 = arith.constant 0 : index
    %67 = vector.load %arg3[%c0_48, %c0_49, %c0_50, %c2, %c0_51] : memref<1x8x1x4x8xf32, #tpu.memory_space<vmem>>, vector<1x8x1x1x8xf32>
    %68 = vector.shape_cast %67 : vector<1x8x1x1x8xf32> to vector<8x8xf32>
    %cst_52 = arith.constant 0.353553385 : f32
    %69 = vector.broadcast %cst_52 : f32 to vector<8x8xf32>
    %70 = arith.mulf %68, %69 : vector<8x8xf32>
    %71 = arith.truncf %70 : vector<8x8xf32> to vector<8x8xbf16>
    %c0_53 = arith.constant 0 : index
    %c0_54 = arith.constant 0 : index
    %c0_55 = arith.constant 0 : index
    %c2_56 = arith.constant 2 : index
    %c0_57 = arith.constant 0 : index
    %72 = vector.load %arg4[%c0_53, %c0_54, %c0_55, %c2_56, %c0_57] : memref<1x16x1x4x8xf32, #tpu.memory_space<vmem>>, vector<1x16x1x1x8xf32>
    %73 = vector.shape_cast %72 : vector<1x16x1x1x8xf32> to vector<16x8xf32>
    %74 = arith.truncf %73 : vector<16x8xf32> to vector<16x8xbf16>
    %cst_58 = arith.constant dense<0.000000e+00> : vector<8x16xf32>
    %75 = tpu.matmul %71, %74, %cst_58 {dimension_numbers = #tpu.dot_dimension_numbers<[1], [1], [0], [0], [0, 0, 1, 0], [], []>} : vector<8x8xbf16>, vector<16x8xbf16>, vector<8x16xf32> -> vector<8x16xf32>
    %76 = vector.broadcast %6 : vector<1x16xf32> to vector<8x16xf32>
    %77 = arith.addf %75, %76 : vector<8x16xf32>
    %cst_59 = arith.constant dense<0xFF800000> : vector<8xf32>
    %78 = vector.multi_reduction <maximumf>, %77, %cst_59 [1] : vector<8x16xf32> to vector<8xf32>
    %79 = vector.shape_cast %78 : vector<8xf32> to vector<8x1xf32>
    %80 = vector.broadcast %79 : vector<8x1xf32> to vector<8x16xf32>
    %81 = arith.subf %77, %80 : vector<8x16xf32>
    %82 = math.exp %81 : vector<8x16xf32>
    %cst_60 = arith.constant dense<0.000000e+00> : vector<8xf32>
    %83 = vector.multi_reduction <add>, %82, %cst_60 [1] : vector<8x16xf32> to vector<8xf32>
    %84 = vector.shape_cast %83 : vector<8xf32> to vector<8x1xf32>
    %85 = tpu.reciprocal %84 {approx = true} : vector<8x1xf32> -> vector<8x1xf32>
    %86 = vector.broadcast %85 : vector<8x1xf32> to vector<8x16xf32>
    %87 = arith.mulf %82, %86 : vector<8x16xf32>
    %88 = arith.truncf %87 : vector<8x16xf32> to vector<8x16xbf16>
    %c0_61 = arith.constant 0 : index
    %c0_62 = arith.constant 0 : index
    %c0_63 = arith.constant 0 : index
    %c2_64 = arith.constant 2 : index
    %c0_65 = arith.constant 0 : index
    %89 = vector.load %arg5[%c0_61, %c0_62, %c0_63, %c2_64, %c0_65] : memref<1x16x1x4x8xf32, #tpu.memory_space<vmem>>, vector<1x16x1x1x8xf32>
    %90 = vector.shape_cast %89 : vector<1x16x1x1x8xf32> to vector<16x8xf32>
    %91 = arith.truncf %90 : vector<16x8xf32> to vector<16x8xbf16>
    %cst_66 = arith.constant dense<0.000000e+00> : vector<8x8xf32>
    %92 = tpu.matmul %88, %91, %cst_66 {dimension_numbers = #tpu.dot_dimension_numbers<[1], [0], [0], [1], [0, 0, 1, 1], [], []>} : vector<8x16xbf16>, vector<16x8xbf16>, vector<8x8xf32> -> vector<8x8xf32>
    %93 = arith.truncf %92 : vector<8x8xf32> to vector<8x8xbf16>
    %c0_67 = arith.constant 0 : index
    %c0_68 = arith.constant 0 : index
    %c16 = arith.constant 16 : index
    %94 = vector.load %arg7[%c0_67, %c0_68, %c16] : memref<1x8x32xbf16, #tpu.memory_space<vmem>>, vector<1x8x8xbf16>
    %95 = vector.shape_cast %94 : vector<1x8x8xbf16> to vector<8x8xbf16>
    %96 = vector.shape_cast %93 : vector<8x8xbf16> to vector<1x8x8xbf16>
    tpu.vector_store %arg7[%c0_67, %c0_68, %c16], %96 {strides = array<i32>} : memref<1x8x32xbf16, #tpu.memory_space<vmem>>, vector<1x8x8xbf16>,
    %c0_69 = arith.constant 0 : index
    %c0_70 = arith.constant 0 : index
    %c0_71 = arith.constant 0 : index
    %c3 = arith.constant 3 : index
    %c0_72 = arith.constant 0 : index
    %97 = vector.load %arg3[%c0_69, %c0_70, %c0_71, %c3, %c0_72] : memref<1x8x1x4x8xf32, #tpu.memory_space<vmem>>, vector<1x8x1x1x8xf32>
    %98 = vector.shape_cast %97 : vector<1x8x1x1x8xf32> to vector<8x8xf32>
    %cst_73 = arith.constant 0.353553385 : f32
    %99 = vector.broadcast %cst_73 : f32 to vector<8x8xf32>
    %100 = arith.mulf %98, %99 : vector<8x8xf32>
    %101 = arith.truncf %100 : vector<8x8xf32> to vector<8x8xbf16>
    %c0_74 = arith.constant 0 : index
    %c0_75 = arith.constant 0 : index
    %c0_76 = arith.constant 0 : index
    %c3_77 = arith.constant 3 : index
    %c0_78 = arith.constant 0 : index
    %102 = vector.load %arg4[%c0_74, %c0_75, %c0_76, %c3_77, %c0_78] : memref<1x16x1x4x8xf32, #tpu.memory_space<vmem>>, vector<1x16x1x1x8xf32>
    %103 = vector.shape_cast %102 : vector<1x16x1x1x8xf32> to vector<16x8xf32>
    %104 = arith.truncf %103 : vector<16x8xf32> to vector<16x8xbf16>
    %cst_79 = arith.constant dense<0.000000e+00> : vector<8x16xf32>
    %105 = tpu.matmul %101, %104, %cst_79 {dimension_numbers = #tpu.dot_dimension_numbers<[1], [1], [0], [0], [0, 0, 1, 0], [], []>} : vector<8x8xbf16>, vector<16x8xbf16>, vector<8x16xf32> -> vector<8x16xf32>
    %106 = vector.broadcast %6 : vector<1x16xf32> to vector<8x16xf32>
    %107 = arith.addf %105, %106 : vector<8x16xf32>
    %cst_80 = arith.constant dense<0xFF800000> : vector<8xf32>
    %108 = vector.multi_reduction <maximumf>, %107, %cst_80 [1] : vector<8x16xf32> to vector<8xf32>
    %109 = vector.shape_cast %108 : vector<8xf32> to vector<8x1xf32>
    %110 = vector.broadcast %109 : vector<8x1xf32> to vector<8x16xf32>
    %111 = arith.subf %107, %110 : vector<8x16xf32>
    %112 = math.exp %111 : vector<8x16xf32>
    %cst_81 = arith.constant dense<0.000000e+00> : vector<8xf32>
    %113 = vector.multi_reduction <add>, %112, %cst_81 [1] : vector<8x16xf32> to vector<8xf32>
    %114 = vector.shape_cast %113 : vector<8xf32> to vector<8x1xf32>
    %115 = tpu.reciprocal %114 {approx = true} : vector<8x1xf32> -> vector<8x1xf32>
    %116 = vector.broadcast %115 : vector<8x1xf32> to vector<8x16xf32>
    %117 = arith.mulf %112, %116 : vector<8x16xf32>
    %118 = arith.truncf %117 : vector<8x16xf32> to vector<8x16xbf16>
    %c0_82 = arith.constant 0 : index
    %c0_83 = arith.constant 0 : index
    %c0_84 = arith.constant 0 : index
    %c3_85 = arith.constant 3 : index
    %c0_86 = arith.constant 0 : index
    %119 = vector.load %arg5[%c0_82, %c0_83, %c0_84, %c3_85, %c0_86] : memref<1x16x1x4x8xf32, #tpu.memory_space<vmem>>, vector<1x16x1x1x8xf32>
    %120 = vector.shape_cast %119 : vector<1x16x1x1x8xf32> to vector<16x8xf32>
    %121 = arith.truncf %120 : vector<16x8xf32> to vector<16x8xbf16>
    %cst_87 = arith.constant dense<0.000000e+00> : vector<8x8xf32>
    %122 = tpu.matmul %118, %121, %cst_87 {dimension_numbers = #tpu.dot_dimension_numbers<[1], [0], [0], [1], [0, 0, 1, 1], [], []>} : vector<8x16xbf16>, vector<16x8xbf16>, vector<8x8xf32> -> vector<8x8xf32>
    %123 = arith.truncf %122 : vector<8x8xf32> to vector<8x8xbf16>
    %c0_88 = arith.constant 0 : index
    %c0_89 = arith.constant 0 : index
    %c24 = arith.constant 24 : index
    %124 = vector.load %arg7[%c0_88, %c0_89, %c24] : memref<1x8x32xbf16, #tpu.memory_space<vmem>>, vector<1x8x8xbf16>
    %125 = vector.shape_cast %124 : vector<1x8x8xbf16> to vector<8x8xbf16>
    %126 = vector.shape_cast %123 : vector<8x8xbf16> to vector<1x8x8xbf16>
    tpu.vector_store %arg7[%c0_88, %c0_89, %c24], %126 {strides = array<i32>} : memref<1x8x32xbf16, #tpu.memory_space<vmem>>, vector<1x8x8xbf16>,
    return
  }
  func.func @transform_0(%arg0: i32, %arg1: i32, %arg2: i32) -> (i32, i32, i32, i32, i32) {
    %c0_i32 = arith.constant 0 : i32
    %c0_i32_0 = arith.constant 0 : i32
    %c0_i32_1 = arith.constant 0 : i32
    %c0_i32_2 = arith.constant 0 : i32
    return %arg0, %arg1, %c0_i32, %c0_i32_0, %c0_i32_1 : i32, i32, i32, i32, i32
  }
  func.func @transform_1(%arg0: i32, %arg1: i32, %arg2: i32) -> (i32, i32, i32, i32, i32) {
    %c0_i32 = arith.constant 0 : i32
    %c0_i32_0 = arith.constant 0 : i32
    %c0_i32_1 = arith.constant 0 : i32
    %c0_i32_2 = arith.constant 0 : i32
    return %arg0, %arg2, %c0_i32, %c0_i32_0, %c0_i32_1 : i32, i32, i32, i32, i32
  }
  func.func @transform_2(%arg0: i32, %arg1: i32, %arg2: i32) -> (i32, i32, i32, i32, i32) {
    %c1_i32 = arith.constant 1 : i32
    %c0_i32 = arith.constant 0 : i32
    %c0_i32_0 = arith.constant 0 : i32
    %c0_i32_1 = arith.constant 0 : i32
    return %arg0, %arg2, %c1_i32, %c0_i32, %c0_i32_0 : i32, i32, i32, i32, i32
  }
  func.func @transform_3(%arg0: i32, %arg1: i32, %arg2: i32) -> (i32, i32, i32) {
    %c0_i32 = arith.constant 0 : i32
    %c0_i32_0 = arith.constant 0 : i32
    return %arg0, %c0_i32, %arg2 : i32, i32, i32
  }
  func.func @transform_4(%arg0: i32, %arg1: i32, %arg2: i32) -> (i32, i32, i32) {
    %c0_i32 = arith.constant 0 : i32
    %c0_i32_0 = arith.constant 0 : i32
    return %arg0, %arg1, %c0_i32 : i32, i32, i32
  }
}

module attributes {stable_mosaic.version = 11 : i64} {
  func.func @kernel(%arg0: i32, %arg1: memref<16x32xf32, #tpu.memory_space<vmem>>, %arg2: memref<1x32xf32, #tpu.memory_space<vmem>>, %arg3: memref<1x32xf32, #tpu.memory_space<vmem>>, %arg4: memref<32x64xbf16, #tpu.memory_space<vmem>>, %arg5: memref<1x64xf32, #tpu.memory_space<vmem>>, %arg6: memref<64x32xbf16, #tpu.memory_space<vmem>>, %arg7: memref<1x32xf32, #tpu.memory_space<vmem>>, %arg8: memref<16x32xf32, #tpu.memory_space<vmem>>) attributes {dimension_semantics = [#tpu.dimension_semantics<parallel>], iteration_bounds = array<i64: 1>, scalar_prefetch = 0 : i64, scratch_operands = 0 : i64, tpu.core_type = #tpu.core_type<tc>, window_params = [{transform_indices = @transform_0, window_bounds = array<i64: 16, 32>}, {pipeline_mode = #tpu.pipeline_mode<synchronous>, transform_indices = @transform_1, window_bounds = array<i64: 1, 32>}, {pipeline_mode = #tpu.pipeline_mode<synchronous>, transform_indices = @transform_2, window_bounds = array<i64: 1, 32>}, {pipeline_mode = #tpu.pipeline_mode<synchronous>, transform_indices = @transform_3, window_bounds = array<i64: 32, 64>}, {pipeline_mode = #tpu.pipeline_mode<synchronous>, transform_indices = @transform_4, window_bounds = array<i64: 1, 64>}, {pipeline_mode = #tpu.pipeline_mode<synchronous>, transform_indices = @transform_5, window_bounds = array<i64: 64, 32>}, {pipeline_mode = #tpu.pipeline_mode<synchronous>, transform_indices = @transform_6, window_bounds = array<i64: 1, 32>}, {transform_indices = @transform_7, window_bounds = array<i64: 16, 32>}]} {
    %c0 = arith.constant 0 : index
    %c0_0 = arith.constant 0 : index
    %0 = vector.load %arg1[%c0, %c0_0] : memref<16x32xf32, #tpu.memory_space<vmem>>, vector<16x32xf32>
    %cst = arith.constant dense<0.000000e+00> : vector<16xf32>
    %1 = vector.multi_reduction <add>, %0, %cst [1] : vector<16x32xf32> to vector<16xf32>
    %2 = vector.shape_cast %1 : vector<16xf32> to vector<16x1xf32>
    %cst_1 = arith.constant 3.200000e+01 : f32
    %3 = vector.broadcast %cst_1 : f32 to vector<16x1xf32>
    %4 = arith.divf %2, %3 : vector<16x1xf32>
    %5 = vector.broadcast %4 : vector<16x1xf32> to vector<16x32xf32>
    %6 = arith.subf %0, %5 : vector<16x32xf32>
    %7 = arith.mulf %6, %6 : vector<16x32xf32>
    %cst_2 = arith.constant dense<0.000000e+00> : vector<16xf32>
    %8 = vector.multi_reduction <add>, %7, %cst_2 [1] : vector<16x32xf32> to vector<16xf32>
    %9 = vector.shape_cast %8 : vector<16xf32> to vector<16x1xf32>
    %cst_3 = arith.constant 3.200000e+01 : f32
    %10 = vector.broadcast %cst_3 : f32 to vector<16x1xf32>
    %11 = arith.divf %9, %10 : vector<16x1xf32>
    %cst_4 = arith.constant 9.99999974E-6 : f32
    %12 = vector.broadcast %cst_4 : f32 to vector<16x1xf32>
    %13 = arith.addf %11, %12 : vector<16x1xf32>
    %14 = math.rsqrt %13 : vector<16x1xf32>
    %15 = vector.broadcast %14 : vector<16x1xf32> to vector<16x32xf32>
    %16 = arith.mulf %6, %15 : vector<16x32xf32>
    %c0_5 = arith.constant 0 : index
    %c0_6 = arith.constant 0 : index
    %17 = vector.load %arg2[%c0_5, %c0_6] : memref<1x32xf32, #tpu.memory_space<vmem>>, vector<1x32xf32>
    %18 = vector.broadcast %17 : vector<1x32xf32> to vector<16x32xf32>
    %19 = arith.mulf %16, %18 : vector<16x32xf32>
    %c0_7 = arith.constant 0 : index
    %c0_8 = arith.constant 0 : index
    %20 = vector.load %arg3[%c0_7, %c0_8] : memref<1x32xf32, #tpu.memory_space<vmem>>, vector<1x32xf32>
    %21 = vector.broadcast %20 : vector<1x32xf32> to vector<16x32xf32>
    %22 = arith.addf %19, %21 : vector<16x32xf32>
    %23 = arith.truncf %22 : vector<16x32xf32> to vector<16x32xbf16>
    %c0_9 = arith.constant 0 : index
    %c0_10 = arith.constant 0 : index
    %24 = vector.load %arg4[%c0_9, %c0_10] : memref<32x64xbf16, #tpu.memory_space<vmem>>, vector<32x64xbf16>
    %cst_11 = arith.constant dense<0.000000e+00> : vector<16x64xf32>
    %25 = tpu.matmul %23, %24, %cst_11 {dimension_numbers = #tpu.dot_dimension_numbers<[1], [0], [0], [1], [0, 0, 1, 1], [], []>} : vector<16x32xbf16>, vector<32x64xbf16>, vector<16x64xf32> -> vector<16x64xf32>
    %c0_12 = arith.constant 0 : index
    %c0_13 = arith.constant 0 : index
    %26 = vector.load %arg5[%c0_12, %c0_13] : memref<1x64xf32, #tpu.memory_space<vmem>>, vector<1x64xf32>
    %27 = vector.broadcast %26 : vector<1x64xf32> to vector<16x64xf32>
    %28 = arith.addf %25, %27 : vector<16x64xf32>
    %cst_14 = arith.constant 0.000000e+00 : f32
    %29 = vector.broadcast %cst_14 : f32 to vector<16x64xf32>
    %30 = arith.maximumf %28, %29 : vector<16x64xf32>
    %31 = arith.truncf %30 : vector<16x64xf32> to vector<16x64xbf16>
    %c0_15 = arith.constant 0 : index
    %c0_16 = arith.constant 0 : index
    %32 = vector.load %arg6[%c0_15, %c0_16] : memref<64x32xbf16, #tpu.memory_space<vmem>>, vector<64x32xbf16>
    %cst_17 = arith.constant dense<0.000000e+00> : vector<16x32xf32>
    %33 = tpu.matmul %31, %32, %cst_17 {dimension_numbers = #tpu.dot_dimension_numbers<[1], [0], [0], [1], [0, 0, 1, 1], [], []>} : vector<16x64xbf16>, vector<64x32xbf16>, vector<16x32xf32> -> vector<16x32xf32>
    %c0_18 = arith.constant 0 : index
    %c0_19 = arith.constant 0 : index
    %34 = vector.load %arg7[%c0_18, %c0_19] : memref<1x32xf32, #tpu.memory_space<vmem>>, vector<1x32xf32>
    %35 = vector.broadcast %34 : vector<1x32xf32> to vector<16x32xf32>
    %36 = arith.addf %33, %35 : vector<16x32xf32>
    %37 = arith.addf %36, %0 : vector<16x32xf32>
    %c0_20 = arith.constant 0 : index
    %c0_21 = arith.constant 0 : index
    %38 = vector.load %arg8[%c0_20, %c0_21] : memref<16x32xf32, #tpu.memory_space<vmem>>, vector<16x32xf32>
    tpu.vector_store %arg8[%c0_20, %c0_21], %37 {strides = array<i32>} : memref<16x32xf32, #tpu.memory_space<vmem>>, vector<16x32xf32>,
    return
  }
  func.func @transform_0(%arg0: i32) -> (i32, i32) {
    %c0_i32 = arith.constant 0 : i32
    %c0_i32_0 = arith.constant 0 : i32
    return %arg0, %c0_i32 : i32, i32
  }
  func.func @transform_1(%arg0: i32) -> (i32, i32) {
    %c0_i32 = arith.constant 0 : i32
    %c0_i32_0 = arith.constant 0 : i32
    %c0_i32_1 = arith.constant 0 : i32
    return %c0_i32, %c0_i32_0 : i32, i32
  }
  func.func @transform_2(%arg0: i32) -> (i32, i32) {
    %c0_i32 = arith.constant 0 : i32
    %c0_i32_0 = arith.constant 0 : i32
    %c0_i32_1 = arith.constant 0 : i32
    return %c0_i32, %c0_i32_0 : i32, i32
  }
  func.func @transform_3(%arg0: i32) -> (i32, i32) {
    %c0_i32 = arith.constant 0 : i32
    %c0_i32_0 = arith.constant 0 : i32
    %c0_i32_1 = arith.constant 0 : i32
    return %c0_i32, %c0_i32_0 : i32, i32
  }
  func.func @transform_4(%arg0: i32) -> (i32, i32) {
    %c0_i32 = arith.constant 0 : i32
    %c0_i32_0 = arith.constant 0 : i32
    %c0_i32_1 = arith.constant 0 : i32
    return %c0_i32, %c0_i32_0 : i32, i32
  }
  func.func @transform_5(%arg0: i32) -> (i32, i32) {
    %c0_i32 = arith.constant 0 : i32
    %c0_i32_0 = arith.constant 0 : i32
    %c0_i32_1 = arith.constant 0 : i32
    return %c0_i32, %c0_i32_0 : i32, i32
  }
  func.func @transform_6(%arg0: i32) -> (i32, i32) {
    %c0_i32 = arith.constant 0 : i32
    %c0_i32_0 = arith.constant 0 : i32
    %c0_i32_1 = arith.constant 0 : i32
    return %c0_i32, %c0_i32_0 : i32, i32
  }
  func.func @transform_7(%arg0: i32) -> (i32, i32) {
    %c0_i32 = arith.constant 0 : i32
    %c0_i32_0 = arith.constant 0 : i32
    return %arg0, %c0_i32 : i32, i32
  }
}

module attributes {stable_mosaic.version = 11 : i64} {
  func.func @kernel(%arg0: i32, %arg1: i32, %arg2: i32, %arg3: memref<1x8x1x4x8xf32, #tpu.memory_space<vmem>>, %arg4: memref<1x16x1x4x8xf32, #tpu.memory_space<vmem>>, %arg5: memref<1x16x1x4x8xf32, #tpu.memory_space<vmem>>, %arg6: memref<1x1x16xf32, #tpu.memory_space<vmem>>, %arg7: memref<1x8x32xbf16, #tpu.memory_space<vmem>>, %arg8: memref<1x4x8x16xf32, #tpu.memory_space<vmem>>) attributes {dimension_semantics = [#tpu.dimension_semantics<parallel>, #tpu.dimension_semantics<parallel>, #tpu.dimension_semantics<arbitrary>], iteration_bounds = array<i64: 2, 1, 1>, scalar_prefetch = 0 : i64, scratch_operands = 0 : i64, tpu.core_type = #tpu.core_type<tc>, window_params = [{transform_indices = @transform_0, window_bounds = array<i64: 1, 8, 1, 4, 8>}, {transform_indices = @transform_1, window_bounds = array<i64: 1, 16, 1, 4, 8>}, {transform_indices = @transform_2, window_bounds = array<i64: 1, 16, 1, 4, 8>}, {transform_indices = @transform_3, window_bounds = array<i64: 1, 1, 16>}, {transform_indices = @transform_4, window_bounds = array<i64: 1, 8, 32>}, {transform_indices = @transform_5, window_bounds = array<i64: 1, 4, 8, 16>}]} {
    %c0 = arith.constant 0 : index
    %c0_0 = arith.constant 0 : index
    %c0_1 = arith.constant 0 : index
    %0 = vector.load %arg6[%c0, %c0_0, %c0_1] : memref<1x1x16xf32, #tpu.memory_space<vmem>>, vector<1x1x16xf32>
    %1 = vector.shape_cast %0 : vector<1x1x16xf32> to vector<1x16xf32>
    %cst = arith.constant -1.000000e+00 : f32
    %2 = vector.broadcast %cst : f32 to vector<1x16xf32>
    %3 = arith.cmpf olt, %1, %2 : vector<1x16xf32>
    %cst_2 = arith.constant -1.000000e+30 : f32
    %cst_3 = arith.constant 0.000000e+00 : f32
    %4 = vector.broadcast %cst_2 : f32 to vector<1x16xf32>
    %5 = vector.broadcast %cst_3 : f32 to vector<1x16xf32>
    %6 = arith.select %3, %4, %5 : vector<1x16xi1>, vector<1x16xf32>
    %c0_4 = arith.constant 0 : index
    %c0_5 = arith.constant 0 : index
    %c0_6 = arith.constant 0 : index
    %c0_7 = arith.constant 0 : index
    %c0_8 = arith.constant 0 : index
    %7 = vector.load %arg3[%c0_4, %c0_5, %c0_6, %c0_7, %c0_8] : memref<1x8x1x4x8xf32, #tpu.memory_space<vmem>>, vector<1x8x1x1x8xf32>
    %8 = vector.shape_cast %7 : vector<1x8x1x1x8xf32> to vector<8x8xf32>
    %cst_9 = arith.constant 0.353553385 : f32
    %9 = vector.broadcast %cst_9 : f32 to vector<8x8xf32>
    %10 = arith.mulf %8, %9 : vector<8x8xf32>
    %11 = arith.truncf %10 : vector<8x8xf32> to vector<8x8xbf16>
    %c0_10 = arith.constant 0 : index
    %c0_11 = arith.constant 0 : index
    %c0_12 = arith.constant 0 : index
    %c0_13 = arith.constant 0 : index
    %c0_14 = arith.constant 0 : index
    %12 = vector.load %arg4[%c0_10, %c0_11, %c0_12, %c0_13, %c0_14] : memref<1x16x1x4x8xf32, #tpu.memory_space<vmem>>, vector<1x16x1x1x8xf32>
    %13 = vector.shape_cast %12 : vector<1x16x1x1x8xf32> to vector<16x8xf32>
    %14 = arith.truncf %13 : vector<16x8xf32> to vector<16x8xbf16>
    %cst_15 = arith.constant dense<0.000000e+00> : vector<8x16xf32>
    %15 = tpu.matmul %11, %14, %cst_15 {dimension_numbers = #tpu.dot_dimension_numbers<[1], [1], [0], [0], [0, 0, 1, 0], [], []>} : vector<8x8xbf16>, vector<16x8xbf16>, vector<8x16xf32> -> vector<8x16xf32>
    %16 = vector.broadcast %6 : vector<1x16xf32> to vector<8x16xf32>
    %17 = arith.addf %15, %16 : vector<8x16xf32>
    %cst_16 = arith.constant dense<0xFF800000> : vector<8xf32>
    %18 = vector.multi_reduction <maximumf>, %17, %cst_16 [1] : vector<8x16xf32> to vector<8xf32>
    %19 = vector.shape_cast %18 : vector<8xf32> to vector<8x1xf32>
    %20 = vector.broadcast %19 : vector<8x1xf32> to vector<8x16xf32>
    %21 = arith.subf %17, %20 : vector<8x16xf32>
    %22 = math.exp %21 : vector<8x16xf32>
    %cst_17 = arith.constant dense<0.000000e+00> : vector<8xf32>
    %23 = vector.multi_reduction <add>, %22, %cst_17 [1] : vector<8x16xf32> to vector<8xf32>
    %24 = vector.shape_cast %23 : vector<8xf32> to vector<8x1xf32>
    %25 = tpu.reciprocal %24 {approx = true} : vector<8x1xf32> -> vector<8x1xf32>
    %26 = vector.broadcast %25 : vector<8x1xf32> to vector<8x16xf32>
    %27 = arith.mulf %22, %26 : vector<8x16xf32>
    %28 = arith.truncf %27 : vector<8x16xf32> to vector<8x16xbf16>
    %c0_18 = arith.constant 0 : index
    %c0_19 = arith.constant 0 : index
    %c0_20 = arith.constant 0 : index
    %c0_21 = arith.constant 0 : index
    %c0_22 = arith.constant 0 : index
    %29 = vector.load %arg5[%c0_18, %c0_19, %c0_20, %c0_21, %c0_22] : memref<1x16x1x4x8xf32, #tpu.memory_space<vmem>>, vector<1x16x1x1x8xf32>
    %30 = vector.shape_cast %29 : vector<1x16x1x1x8xf32> to vector<16x8xf32>
    %31 = arith.truncf %30 : vector<16x8xf32> to vector<16x8xbf16>
    %cst_23 = arith.constant dense<0.000000e+00> : vector<8x8xf32>
    %32 = tpu.matmul %28, %31, %cst_23 {dimension_numbers = #tpu.dot_dimension_numbers<[1], [0], [0], [1], [0, 0, 1, 1], [], []>} : vector<8x16xbf16>, vector<16x8xbf16>, vector<8x8xf32> -> vector<8x8xf32>
    %33 = arith.truncf %32 : vector<8x8xf32> to vector<8x8xbf16>
    %c0_24 = arith.constant 0 : index
    %c0_25 = arith.constant 0 : index
    %c0_26 = arith.constant 0 : index
    %34 = vector.load %arg7[%c0_24, %c0_25, %c0_26] : memref<1x8x32xbf16, #tpu.memory_space<vmem>>, vector<1x8x8xbf16>
    %35 = vector.shape_cast %34 : vector<1x8x8xbf16> to vector<8x8xbf16>
    %36 = vector.shape_cast %33 : vector<8x8xbf16> to vector<1x8x8xbf16>
    tpu.vector_store %arg7[%c0_24, %c0_25, %c0_26], %36 {strides = array<i32>} : memref<1x8x32xbf16, #tpu.memory_space<vmem>>, vector<1x8x8xbf16>,
    %c0_27 = arith.constant 0 : index
    %c0_28 = arith.constant 0 : index
    %c0_29 = arith.constant 0 : index
    %c0_30 = arith.constant 0 : index
    %37 = vector.load %arg8[%c0_27, %c0_28, %c0_29, %c0_30] : memref<1x4x8x16xf32, #tpu.memory_space<vmem>>, vector<1x1x8x16xf32>
    %38 = vector.shape_cast %37 : vector<1x1x8x16xf32> to vector<8x16xf32>
    %39 = vector.shape_cast %27 : vector<8x16xf32> to vector<1x1x8x16xf32>
    tpu.vector_store %arg8[%c0_27, %c0_28, %c0_29, %c0_30], %39 {strides = array<i32>} : memref<1x4x8x16xf32, #tpu.memory_space<vmem>>, vector<1x1x8x16xf32>,
    %c0_31 = arith.constant 0 : index
    %c0_32 = arith.constant 0 : index
    %c0_33 = arith.constant 0 : index
    %c1 = arith.constant 1 : index
    %c0_34 = arith.constant 0 : index
    %40 = vector.load %arg3[%c0_31, %c0_32, %c0_33, %c1, %c0_34] : memref<1x8x1x4x8xf32, #tpu.memory_space<vmem>>, vector<1x8x1x1x8xf32>
    %41 = vector.shape_cast %40 : vector<1x8x1x1x8xf32> to vector<8x8xf32>
    %cst_35 = arith.constant 0.353553385 : f32
    %42 = vector.broadcast %cst_35 : f32 to vector<8x8xf32>
    %43 = arith.mulf %41, %42 : vector<8x8xf32>
    %44 = arith.truncf %43 : vector<8x8xf32> to vector<8x8xbf16>
    %c0_36 = arith.constant 0 : index
    %c0_37 = arith.constant 0 : index
    %c0_38 = arith.constant 0 : index
    %c1_39 = arith.constant 1 : index
    %c0_40 = arith.constant 0 : index
    %45 = vector.load %arg4[%c0_36, %c0_37, %c0_38, %c1_39, %c0_40] : memref<1x16x1x4x8xf32, #tpu.memory_space<vmem>>, vector<1x16x1x1x8xf32>
    %46 = vector.shape_cast %45 : vector<1x16x1x1x8xf32> to vector<16x8xf32>
    %47 = arith.truncf %46 : vector<16x8xf32> to vector<16x8xbf16>
    %cst_41 = arith.constant dense<0.000000e+00> : vector<8x16xf32>
    %48 = tpu.matmul %44, %47, %cst_41 {dimension_numbers = #tpu.dot_dimension_numbers<[1], [1], [0], [0], [0, 0, 1, 0], [], []>} : vector<8x8xbf16>, vector<16x8xbf16>, vector<8x16xf32> -> vector<8x16xf32>
    %49 = vector.broadcast %6 : vector<1x16xf32> to vector<8x16xf32>
    %50 = arith.addf %48, %49 : vector<8x16xf32>
    %cst_42 = arith.constant dense<0xFF800000> : vector<8xf32>
    %51 = vector.multi_reduction <maximumf>, %50, %cst_42 [1] : vector<8x16xf32> to vector<8xf32>
    %52 = vector.shape_cast %51 : vector<8xf32> to vector<8x1xf32>
    %53 = vector.broadcast %52 : vector<8x1xf32> to vector<8x16xf32>
    %54 = arith.subf %50, %53 : vector<8x16xf32>
    %55 = math.exp %54 : vector<8x16xf32>
    %cst_43 = arith.constant dense<0.000000e+00> : vector<8xf32>
    %56 = vector.multi_reduction <add>, %55, %cst_43 [1] : vector<8x16xf32> to vector<8xf32>
    %57 = vector.shape_cast %56 : vector<8xf32> to vector<8x1xf32>
    %58 = tpu.reciprocal %57 {approx = true} : vector<8x1xf32> -> vector<8x1xf32>
    %59 = vector.broadcast %58 : vector<8x1xf32> to vector<8x16xf32>
    %60 = arith.mulf %55, %59 : vector<8x16xf32>
    %61 = arith.truncf %60 : vector<8x16xf32> to vector<8x16xbf16>
    %c0_44 = arith.constant 0 : index
    %c0_45 = arith.constant 0 : index
    %c0_46 = arith.constant 0 : index
    %c1_47 = arith.constant 1 : index
    %c0_48 = arith.constant 0 : index
    %62 = vector.load %arg5[%c0_44, %c0_45, %c0_46, %c1_47, %c0_48] : memref<1x16x1x4x8xf32, #tpu.memory_space<vmem>>, vector<1x16x1x1x8xf32>
    %63 = vector.shape_cast %62 : vector<1x16x1x1x8xf32> to vector<16x8xf32>
    %64 = arith.truncf %63 : vector<16x8xf32> to vector<16x8xbf16>
    %cst_49 = arith.constant dense<0.000000e+00> : vector<8x8xf32>
    %65 = tpu.matmul %61, %64, %cst_49 {dimension_numbers = #tpu.dot_dimension_numbers<[1], [0], [0], [1], [0, 0, 1, 1], [], []>} : vector<8x16xbf16>, vector<16x8xbf16>, vector<8x8xf32> -> vector<8x8xf32>
    %66 = arith.truncf %65 : vector<8x8xf32> to vector<8x8xbf16>
    %c0_50 = arith.constant 0 : index
    %c0_51 = arith.constant 0 : index
    %c8 = arith.constant 8 : index
    %67 = vector.load %arg7[%c0_50, %c0_51, %c8] : memref<1x8x32xbf16, #tpu.memory_space<vmem>>, vector<1x8x8xbf16>
    %68 = vector.shape_cast %67 : vector<1x8x8xbf16> to vector<8x8xbf16>
    %69 = vector.shape_cast %66 : vector<8x8xbf16> to vector<1x8x8xbf16>
    tpu.vector_store %arg7[%c0_50, %c0_51, %c8], %69 {strides = array<i32>} : memref<1x8x32xbf16, #tpu.memory_space<vmem>>, vector<1x8x8xbf16>,
    %c0_52 = arith.constant 0 : index
    %c1_53 = arith.constant 1 : index
    %c0_54 = arith.constant 0 : index
    %c0_55 = arith.constant 0 : index
    %70 = vector.load %arg8[%c0_52, %c1_53, %c0_54, %c0_55] : memref<1x4x8x16xf32, #tpu.memory_space<vmem>>, vector<1x1x8x16xf32>
    %71 = vector.shape_cast %70 : vector<1x1x8x16xf32> to vector<8x16xf32>
    %72 = vector.shape_cast %60 : vector<8x16xf32> to vector<1x1x8x16xf32>
    tpu.vector_store %arg8[%c0_52, %c1_53, %c0_54, %c0_55], %72 {strides = array<i32>} : memref<1x4x8x16xf32, #tpu.memory_space<vmem>>, vector<1x1x8x16xf32>,
    %c0_56 = arith.constant 0 : index
    %c0_57 = arith.constant 0 : index
    %c0_58 = arith.constant 0 : index
    %c2 = arith.constant 2 : index
    %c0_59 = arith.constant 0 : index
    %73 = vector.load %arg3[%c0_56, %c0_57, %c0_58, %c2, %c0_59] : memref<1x8x1x4x8xf32, #tpu.memory_space<vmem>>, vector<1x8x1x1x8xf32>
    %74 = vector.shape_cast %73 : vector<1x8x1x1x8xf32> to vector<8x8xf32>
    %cst_60 = arith.constant 0.353553385 : f32
    %75 = vector.broadcast %cst_60 : f32 to vector<8x8xf32>
    %76 = arith.mulf %74, %75 : vector<8x8xf32>
    %77 = arith.truncf %76 : vector<8x8xf32> to vector<8x8xbf16>
    %c0_61 = arith.constant 0 : index
    %c0_62 = arith.constant 0 : index
    %c0_63 = arith.constant 0 : index
    %c2_64 = arith.constant 2 : index
    %c0_65 = arith.constant 0 : index
    %78 = vector.load %arg4[%c0_61, %c0_62, %c0_63, %c2_64, %c0_65] : memref<1x16x1x4x8xf32, #tpu.memory_space<vmem>>, vector<1x16x1x1x8xf32>
    %79 = vector.shape_cast %78 : vector<1x16x1x1x8xf32> to vector<16x8xf32>
    %80 = arith.truncf %79 : vector<16x8xf32> to vector<16x8xbf16>
    %cst_66 = arith.constant dense<0.000000e+00> : vector<8x16xf32>
    %81 = tpu.matmul %77, %80, %cst_66 {dimension_numbers = #tpu.dot_dimension_numbers<[1], [1], [0], [0], [0, 0, 1, 0], [], []>} : vector<8x8xbf16>, vector<16x8xbf16>, vector<8x16xf32> -> vector<8x16xf32>
    %82 = vector.broadcast %6 : vector<1x16xf32> to vector<8x16xf32>
    %83 = arith.addf %81, %82 : vector<8x16xf32>
    %cst_67 = arith.constant dense<0xFF800000> : vector<8xf32>
    %84 = vector.multi_reduction <maximumf>, %83, %cst_67 [1] : vector<8x16xf32> to vector<8xf32>
    %85 = vector.shape_cast %84 : vector<8xf32> to vector<8x1xf32>
    %86 = vector.broadcast %85 : vector<8x1xf32> to vector<8x16xf32>
    %87 = arith.subf %83, %86 : vector<8x16xf32>
    %88 = math.exp %87 : vector<8x16xf32>
    %cst_68 = arith.constant dense<0.000000e+00> : vector<8xf32>
    %89 = vector.multi_reduction <add>, %88, %cst_68 [1] : vector<8x16xf32> to vector<8xf32>
    %90 = vector.shape_cast %89 : vector<8xf32> to vector<8x1xf32>
    %91 = tpu.reciprocal %90 {approx = true} : vector<8x1xf32> -> vector<8x1xf32>
    %92 = vector.broadcast %91 : vector<8x1xf32> to vector<8x16xf32>
    %93 = arith.mulf %88, %92 : vector<8x16xf32>
    %94 = arith.truncf %93 : vector<8x16xf32> to vector<8x16xbf16>
    %c0_69 = arith.constant 0 : index
    %c0_70 = arith.constant 0 : index
    %c0_71 = arith.constant 0 : index
    %c2_72 = arith.constant 2 : index
    %c0_73 = arith.constant 0 : index
    %95 = vector.load %arg5[%c0_69, %c0_70, %c0_71, %c2_72, %c0_73] : memref<1x16x1x4x8xf32, #tpu.memory_space<vmem>>, vector<1x16x1x1x8xf32>
    %96 = vector.shape_cast %95 : vector<1x16x1x1x8xf32> to vector<16x8xf32>
    %97 = arith.truncf %96 : vector<16x8xf32> to vector<16x8xbf16>
    %cst_74 = arith.constant dense<0.000000e+00> : vector<8x8xf32>
    %98 = tpu.matmul %94, %97, %cst_74 {dimension_numbers = #tpu.dot_dimension_numbers<[1], [0], [0], [1], [0, 0, 1, 1], [], []>} : vector<8x16xbf16>, vector<16x8xbf16>, vector<8x8xf32> -> vector<8x8xf32>
    %99 = arith.truncf %98 : vector<8x8xf32> to vector<8x8xbf16>
    %c0_75 = arith.constant 0 : index
    %c0_76 = arith.constant 0 : index
    %c16 = arith.constant 16 : index
    %100 = vector.load %arg7[%c0_75, %c0_76, %c16] : memref<1x8x32xbf16, #tpu.memory_space<vmem>>, vector<1x8x8xbf16>
    %101 = vector.shape_cast %100 : vector<1x8x8xbf16> to vector<8x8xbf16>
    %102 = vector.shape_cast %99 : vector<8x8xbf16> to vector<1x8x8xbf16>
    tpu.vector_store %arg7[%c0_75, %c0_76, %c16], %102 {strides = array<i32>} : memref<1x8x32xbf16, #tpu.memory_space<vmem>>, vector<1x8x8xbf16>,
    %c0_77 = arith.constant 0 : index
    %c2_78 = arith.constant 2 : index
    %c0_79 = arith.constant 0 : index
    %c0_80 = arith.constant 0 : index
    %103 = vector.load %arg8[%c0_77, %c2_78, %c0_79, %c0_80] : memref<1x4x8x16xf32, #tpu.memory_space<vmem>>, vector<1x1x8x16xf32>
    %104 = vector.shape_cast %103 : vector<1x1x8x16xf32> to vector<8x16xf32>
    %105 = vector.shape_cast %93 : vector<8x16xf32> to vector<1x1x8x16xf32>
    tpu.vector_store %arg8[%c0_77, %c2_78, %c0_79, %c0_80], %105 {strides = array<i32>} : memref<1x4x8x16xf32, #tpu.memory_space<vmem>>, vector<1x1x8x16xf32>,
    %c0_81 = arith.constant 0 : index
    %c0_82 = arith.constant 0 : index
    %c0_83 = arith.constant 0 : index
    %c3 = arith.constant 3 : index
    %c0_84 = arith.constant 0 : index
    %106 = vector.load %arg3[%c0_81, %c0_82, %c0_83, %c3, %c0_84] : memref<1x8x1x4x8xf32, #tpu.memory_space<vmem>>, vector<1x8x1x1x8xf32>
    %107 = vector.shape_cast %106 : vector<1x8x1x1x8xf32> to vector<8x8xf32>
    %cst_85 = arith.constant 0.353553385 : f32
    %108 = vector.broadcast %cst_85 : f32 to vector<8x8xf32>
    %109 = arith.mulf %107, %108 : vector<8x8xf32>
    %110 = arith.truncf %109 : vector<8x8xf32> to vector<8x8xbf16>
    %c0_86 = arith.constant 0 : index
    %c0_87 = arith.constant 0 : index
    %c0_88 = arith.constant 0 : index
    %c3_89 = arith.constant 3 : index
    %c0_90 = arith.constant 0 : index
    %111 = vector.load %arg4[%c0_86, %c0_87, %c0_88, %c3_89, %c0_90] : memref<1x16x1x4x8xf32, #tpu.memory_space<vmem>>, vector<1x16x1x1x8xf32>
    %112 = vector.shape_cast %111 : vector<1x16x1x1x8xf32> to vector<16x8xf32>
    %113 = arith.truncf %112 : vector<16x8xf32> to vector<16x8xbf16>
    %cst_91 = arith.constant dense<0.000000e+00> : vector<8x16xf32>
    %114 = tpu.matmul %110, %113, %cst_91 {dimension_numbers = #tpu.dot_dimension_numbers<[1], [1], [0], [0], [0, 0, 1, 0], [], []>} : vector<8x8xbf16>, vector<16x8xbf16>, vector<8x16xf32> -> vector<8x16xf32>
    %115 = vector.broadcast %6 : vector<1x16xf32> to vector<8x16xf32>
    %116 = arith.addf %114, %115 : vector<8x16xf32>
    %cst_92 = arith.constant dense<0xFF800000> : vector<8xf32>
    %117 = vector.multi_reduction <maximumf>, %116, %cst_92 [1] : vector<8x16xf32> to vector<8xf32>
    %118 = vector.shape_cast %117 : vector<8xf32> to vector<8x1xf32>
    %119 = vector.broadcast %118 : vector<8x1xf32> to vector<8x16xf32>
    %120 = arith.subf %116, %119 : vector<8x16xf32>
    %121 = math.exp %120 : vector<8x16xf32>
    %cst_93 = arith.constant dense<0.000000e+00> : vector<8xf32>
    %122 = vector.multi_reduction <add>, %121, %cst_93 [1] : vector<8x16xf32> to vector<8xf32>
    %123 = vector.shape_cast %122 : vector<8xf32> to vector<8x1xf32>
    %124 = tpu.reciprocal %123 {approx = true} : vector<8x1xf32> -> vector<8x1xf32>
    %125 = vector.broadcast %124 : vector<8x1xf32> to vector<8x16xf32>
    %126 = arith.mulf %121, %125 : vector<8x16xf32>
    %127 = arith.truncf %126 : vector<8x16xf32> to vector<8x16xbf16>
    %c0_94 = arith.constant 0 : index
    %c0_95 = arith.constant 0 : index
    %c0_96 = arith.constant 0 : index
    %c3_97 = arith.constant 3 : index
    %c0_98 = arith.constant 0 : index
    %128 = vector.load %arg5[%c0_94, %c0_95, %c0_96, %c3_97, %c0_98] : memref<1x16x1x4x8xf32, #tpu.memory_space<vmem>>, vector<1x16x1x1x8xf32>
    %129 = vector.shape_cast %128 : vector<1x16x1x1x8xf32> to vector<16x8xf32>
    %130 = arith.truncf %129 : vector<16x8xf32> to vector<16x8xbf16>
    %cst_99 = arith.constant dense<0.000000e+00> : vector<8x8xf32>
    %131 = tpu.matmul %127, %130, %cst_99 {dimension_numbers = #tpu.dot_dimension_numbers<[1], [0], [0], [1], [0, 0, 1, 1], [], []>} : vector<8x16xbf16>, vector<16x8xbf16>, vector<8x8xf32> -> vector<8x8xf32>
    %132 = arith.truncf %131 : vector<8x8xf32> to vector<8x8xbf16>
    %c0_100 = arith.constant 0 : index
    %c0_101 = arith.constant 0 : index
    %c24 = arith.constant 24 : index
    %133 = vector.load %arg7[%c0_100, %c0_101, %c24] : memref<1x8x32xbf16, #tpu.memory_space<vmem>>, vector<1x8x8xbf16>
    %134 = vector.shape_cast %133 : vector<1x8x8xbf16> to vector<8x8xbf16>
    %135 = vector.shape_cast %132 : vector<8x8xbf16> to vector<1x8x8xbf16>
    tpu.vector_store %arg7[%c0_100, %c0_101, %c24], %135 {strides = array<i32>} : memref<1x8x32xbf16, #tpu.memory_space<vmem>>, vector<1x8x8xbf16>,
    %c0_102 = arith.constant 0 : index
    %c3_103 = arith.constant 3 : index
    %c0_104 = arith.constant 0 : index
    %c0_105 = arith.constant 0 : index
    %136 = vector.load %arg8[%c0_102, %c3_103, %c0_104, %c0_105] : memref<1x4x8x16xf32, #tpu.memory_space<vmem>>, vector<1x1x8x16xf32>
    %137 = vector.shape_cast %136 : vector<1x1x8x16xf32> to vector<8x16xf32>
    %138 = vector.shape_cast %126 : vector<8x16xf32> to vector<1x1x8x16xf32>
    tpu.vector_store %arg8[%c0_102, %c3_103, %c0_104, %c0_105], %138 {strides = array<i32>} : memref<1x4x8x16xf32, #tpu.memory_space<vmem>>, vector<1x1x8x16xf32>,
    return
  }
  func.func @transform_0(%arg0: i32, %arg1: i32, %arg2: i32) -> (i32, i32, i32, i32, i32) {
    %c0_i32 = arith.constant 0 : i32
    %c0_i32_0 = arith.constant 0 : i32
    %c0_i32_1 = arith.constant 0 : i32
    %c0_i32_2 = arith.constant 0 : i32
    return %arg0, %arg1, %c0_i32, %c0_i32_0, %c0_i32_1 : i32, i32, i32, i32, i32
  }
  func.func @transform_1(%arg0: i32, %arg1: i32, %arg2: i32) -> (i32, i32, i32, i32, i32) {
    %c0_i32 = arith.constant 0 : i32
    %c0_i32_0 = arith.constant 0 : i32
    %c0_i32_1 = arith.constant 0 : i32
    %c0_i32_2 = arith.constant 0 : i32
    return %arg0, %arg2, %c0_i32, %c0_i32_0, %c0_i32_1 : i32, i32, i32, i32, i32
  }
  func.func @transform_2(%arg0: i32, %arg1: i32, %arg2: i32) -> (i32, i32, i32, i32, i32) {
    %c1_i32 = arith.constant 1 : i32
    %c0_i32 = arith.constant 0 : i32
    %c0_i32_0 = arith.constant 0 : i32
    %c0_i32_1 = arith.constant 0 : i32
    return %arg0, %arg2, %c1_i32, %c0_i32, %c0_i32_0 : i32, i32, i32, i32, i32
  }
  func.func @transform_3(%arg0: i32, %arg1: i32, %arg2: i32) -> (i32, i32, i32) {
    %c0_i32 = arith.constant 0 : i32
    %c0_i32_0 = arith.constant 0 : i32
    return %arg0, %c0_i32, %arg2 : i32, i32, i32
  }
  func.func @transform_4(%arg0: i32, %arg1: i32, %arg2: i32) -> (i32, i32, i32) {
    %c0_i32 = arith.constant 0 : i32
    %c0_i32_0 = arith.constant 0 : i32
    return %arg0, %arg1, %c0_i32 : i32, i32, i32
  }
  func.func @transform_5(%arg0: i32, %arg1: i32, %arg2: i32) -> (i32, i32, i32, i32) {
    %c0_i32 = arith.constant 0 : i32
    %c0_i32_0 = arith.constant 0 : i32
    %c0_i32_1 = arith.constant 0 : i32
    return %arg0, %c0_i32, %arg1, %c0_i32_0 : i32, i32, i32, i32
  }
}

module attributes {stable_mosaic.version = 11 : i64} {
  func.func @kernel(%arg0: i32, %arg1: memref<16x32xf32, #tpu.memory_space<vmem>>, %arg2: memref<1x32xf32, #tpu.memory_space<vmem>>, %arg3: memref<1x32xf32, #tpu.memory_space<vmem>>, %arg4: memref<32x64xbf16, #tpu.memory_space<vmem>>, %arg5: memref<1x64xf32, #tpu.memory_space<vmem>>, %arg6: memref<64x32xbf16, #tpu.memory_space<vmem>>, %arg7: memref<1x32xf32, #tpu.memory_space<vmem>>, %arg8: memref<1x32xf32, #tpu.memory_space<vmem>>, %arg9: memref<1x32xf32, #tpu.memory_space<vmem>>, %arg10: memref<16x32xbf16, #tpu.memory_space<vmem>>) attributes {dimension_semantics = [#tpu.dimension_semantics<parallel>], iteration_bounds = array<i64: 1>, scalar_prefetch = 0 : i64, scratch_operands = 0 : i64, tpu.core_type = #tpu.core_type<tc>, window_params = [{transform_indices = @transform_0, window_bounds = array<i64: 16, 32>}, {pipeline_mode = #tpu.pipeline_mode<synchronous>, transform_indices = @transform_1, window_bounds = array<i64: 1, 32>}, {pipeline_mode = #tpu.pipeline_mode<synchronous>, transform_indices = @transform_2, window_bounds = array<i64: 1, 32>}, {pipeline_mode = #tpu.pipeline_mode<synchronous>, transform_indices = @transform_3, window_bounds = array<i64: 32, 64>}, {pipeline_mode = #tpu.pipeline_mode<synchronous>, transform_indices = @transform_4, window_bounds = array<i64: 1, 64>}, {pipeline_mode = #tpu.pipeline_mode<synchronous>, transform_indices = @transform_5, window_bounds = array<i64: 64, 32>}, {pipeline_mode = #tpu.pipeline_mode<synchronous>, transform_indices = @transform_6, window_bounds = array<i64: 1, 32>}, {pipeline_mode = #tpu.pipeline_mode<synchronous>, transform_indices = @transform_7, window_bounds = array<i64: 1, 32>}, {pipeline_mode = #tpu.pipeline_mode<synchronous>, transform_indices = @transform_8, window_bounds = array<i64: 1, 32>}, {transform_indices = @transform_9, window_bounds = array<i64: 16, 32>}]} {
    %c0 = arith.constant 0 : index
    %c0_0 = arith.constant 0 : index
    %0 = vector.load %arg1[%c0, %c0_0] : memref<16x32xf32, #tpu.memory_space<vmem>>, vector<16x32xf32>
    %cst = arith.constant dense<0.000000e+00> : vector<16xf32>
    %1 = vector.multi_reduction <add>, %0, %cst [1] : vector<16x32xf32> to vector<16xf32>
    %2 = vector.shape_cast %1 : vector<16xf32> to vector<16x1xf32>
    %cst_1 = arith.constant 3.200000e+01 : f32
    %3 = vector.broadcast %cst_1 : f32 to vector<16x1xf32>
    %4 = arith.divf %2, %3 : vector<16x1xf32>
    %5 = vector.broadcast %4 : vector<16x1xf32> to vector<16x32xf32>
    %6 = arith.subf %0, %5 : vector<16x32xf32>
    %7 = arith.mulf %6, %6 : vector<16x32xf32>
    %cst_2 = arith.constant dense<0.000000e+00> : vector<16xf32>
    %8 = vector.multi_reduction <add>, %7, %cst_2 [1] : vector<16x32xf32> to vector<16xf32>
    %9 = vector.shape_cast %8 : vector<16xf32> to vector<16x1xf32>
    %cst_3 = arith.constant 3.200000e+01 : f32
    %10 = vector.broadcast %cst_3 : f32 to vector<16x1xf32>
    %11 = arith.divf %9, %10 : vector<16x1xf32>
    %cst_4 = arith.constant 9.99999974E-6 : f32
    %12 = vector.broadcast %cst_4 : f32 to vector<16x1xf32>
    %13 = arith.addf %11, %12 : vector<16x1xf32>
    %14 = math.rsqrt %13 : vector<16x1xf32>
    %15 = vector.broadcast %14 : vector<16x1xf32> to vector<16x32xf32>
    %16 = arith.mulf %6, %15 : vector<16x32xf32>
    %c0_5 = arith.constant 0 : index
    %c0_6 = arith.constant 0 : index
    %17 = vector.load %arg2[%c0_5, %c0_6] : memref<1x32xf32, #tpu.memory_space<vmem>>, vector<1x32xf32>
    %18 = vector.broadcast %17 : vector<1x32xf32> to vector<16x32xf32>
    %19 = arith.mulf %16, %18 : vector<16x32xf32>
    %c0_7 = arith.constant 0 : index
    %c0_8 = arith.constant 0 : index
    %20 = vector.load %arg3[%c0_7, %c0_8] : memref<1x32xf32, #tpu.memory_space<vmem>>, vector<1x32xf32>
    %21 = vector.broadcast %20 : vector<1x32xf32> to vector<16x32xf32>
    %22 = arith.addf %19, %21 : vector<16x32xf32>
    %23 = arith.truncf %22 : vector<16x32xf32> to vector<16x32xbf16>
    %c0_9 = arith.constant 0 : index
    %c0_10 = arith.constant 0 : index
    %24 = vector.load %arg4[%c0_9, %c0_10] : memref<32x64xbf16, #tpu.memory_space<vmem>>, vector<32x64xbf16>
    %cst_11 = arith.constant dense<0.000000e+00> : vector<16x64xf32>
    %25 = tpu.matmul %23, %24, %cst_11 {dimension_numbers = #tpu.dot_dimension_numbers<[1], [0], [0], [1], [0, 0, 1, 1], [], []>} : vector<16x32xbf16>, vector<32x64xbf16>, vector<16x64xf32> -> vector<16x64xf32>
    %c0_12 = arith.constant 0 : index
    %c0_13 = arith.constant 0 : index
    %26 = vector.load %arg5[%c0_12, %c0_13] : memref<1x64xf32, #tpu.memory_space<vmem>>, vector<1x64xf32>
    %27 = vector.broadcast %26 : vector<1x64xf32> to vector<16x64xf32>
    %28 = arith.addf %25, %27 : vector<16x64xf32>
    %cst_14 = arith.constant 0.000000e+00 : f32
    %29 = vector.broadcast %cst_14 : f32 to vector<16x64xf32>
    %30 = arith.maximumf %28, %29 : vector<16x64xf32>
    %31 = arith.truncf %30 : vector<16x64xf32> to vector<16x64xbf16>
    %c0_15 = arith.constant 0 : index
    %c0_16 = arith.constant 0 : index
    %32 = vector.load %arg6[%c0_15, %c0_16] : memref<64x32xbf16, #tpu.memory_space<vmem>>, vector<64x32xbf16>
    %cst_17 = arith.constant dense<0.000000e+00> : vector<16x32xf32>
    %33 = tpu.matmul %31, %32, %cst_17 {dimension_numbers = #tpu.dot_dimension_numbers<[1], [0], [0], [1], [0, 0, 1, 1], [], []>} : vector<16x64xbf16>, vector<64x32xbf16>, vector<16x32xf32> -> vector<16x32xf32>
    %c0_18 = arith.constant 0 : index
    %c0_19 = arith.constant 0 : index
    %34 = vector.load %arg7[%c0_18, %c0_19] : memref<1x32xf32, #tpu.memory_space<vmem>>, vector<1x32xf32>
    %35 = vector.broadcast %34 : vector<1x32xf32> to vector<16x32xf32>
    %36 = arith.addf %33, %35 : vector<16x32xf32>
    %37 = arith.addf %36, %0 : vector<16x32xf32>
    %cst_20 = arith.constant dense<0.000000e+00> : vector<16xf32>
    %38 = vector.multi_reduction <add>, %37, %cst_20 [1] : vector<16x32xf32> to vector<16xf32>
    %39 = vector.shape_cast %38 : vector<16xf32> to vector<16x1xf32>
    %cst_21 = arith.constant 3.200000e+01 : f32
    %40 = vector.broadcast %cst_21 : f32 to vector<16x1xf32>
    %41 = arith.divf %39, %40 : vector<16x1xf32>
    %42 = vector.broadcast %41 : vector<16x1xf32> to vector<16x32xf32>
    %43 = arith.subf %37, %42 : vector<16x32xf32>
    %44 = arith.mulf %43, %43 : vector<16x32xf32>
    %cst_22 = arith.constant dense<0.000000e+00> : vector<16xf32>
    %45 = vector.multi_reduction <add>, %44, %cst_22 [1] : vector<16x32xf32> to vector<16xf32>
    %46 = vector.shape_cast %45 : vector<16xf32> to vector<16x1xf32>
    %cst_23 = arith.constant 3.200000e+01 : f32
    %47 = vector.broadcast %cst_23 : f32 to vector<16x1xf32>
    %48 = arith.divf %46, %47 : vector<16x1xf32>
    %cst_24 = arith.constant 9.99999974E-6 : f32
    %49 = vector.broadcast %cst_24 : f32 to vector<16x1xf32>
    %50 = arith.addf %48, %49 : vector<16x1xf32>
    %51 = math.rsqrt %50 : vector<16x1xf32>
    %52 = vector.broadcast %51 : vector<16x1xf32> to vector<16x32xf32>
    %53 = arith.mulf %43, %52 : vector<16x32xf32>
    %c0_25 = arith.constant 0 : index
    %c0_26 = arith.constant 0 : index
    %54 = vector.load %arg8[%c0_25, %c0_26] : memref<1x32xf32, #tpu.memory_space<vmem>>, vector<1x32xf32>
    %55 = vector.broadcast %54 : vector<1x32xf32> to vector<16x32xf32>
    %56 = arith.mulf %53, %55 : vector<16x32xf32>
    %c0_27 = arith.constant 0 : index
    %c0_28 = arith.constant 0 : index
    %57 = vector.load %arg9[%c0_27, %c0_28] : memref<1x32xf32, #tpu.memory_space<vmem>>, vector<1x32xf32>
    %58 = vector.broadcast %57 : vector<1x32xf32> to vector<16x32xf32>
    %59 = arith.addf %56, %58 : vector<16x32xf32>
    %60 = arith.truncf %59 : vector<16x32xf32> to vector<16x32xbf16>
    %c0_29 = arith.constant 0 : index
    %c0_30 = arith.constant 0 : index
    %61 = vector.load %arg10[%c0_29, %c0_30] : memref<16x32xbf16, #tpu.memory_space<vmem>>, vector<16x32xbf16>
    tpu.vector_store %arg10[%c0_29, %c0_30], %60 {strides = array<i32>} : memref<16x32xbf16, #tpu.memory_space<vmem>>, vector<16x32xbf16>,
    return
  }
  func.func @transform_0(%arg0: i32) -> (i32, i32) {
    %c0_i32 = arith.constant 0 : i32
    %c0_i32_0 = arith.constant 0 : i32
    return %arg0, %c0_i32 : i32, i32
  }
  func.func @transform_1(%arg0: i32) -> (i32, i32) {
    %c0_i32 = arith.constant 0 : i32
    %c0_i32_0 = arith.constant 0 : i32
    %c0_i32_1 = arith.constant 0 : i32
    return %c0_i32, %c0_i32_0 : i32, i32
  }
  func.func @transform_2(%arg0: i32) -> (i32, i32) {
    %c0_i32 = arith.constant 0 : i32
    %c0_i32_0 = arith.constant 0 : i32
    %c0_i32_1 = arith.constant 0 : i32
    return %c0_i32, %c0_i32_0 : i32, i32
  }
  func.func @transform_3(%arg0: i32) -> (i32, i32) {
    %c0_i32 = arith.constant 0 : i32
    %c0_i32_0 = arith.constant 0 : i32
    %c0_i32_1 = arith.constant 0 : i32
    return %c0_i32, %c0_i32_0 : i32, i32
  }
  func.func @transform_4(%arg0: i32) -> (i32, i32) {
    %c0_i32 = arith.constant 0 : i32
    %c0_i32_0 = arith.constant 0 : i32
    %c0_i32_1 = arith.constant 0 : i32
    return %c0_i32, %c0_i32_0 : i32, i32
  }
  func.func @transform_5(%arg0: i32) -> (i32, i32) {
    %c0_i32 = arith.constant 0 : i32
    %c0_i32_0 = arith.constant 0 : i32
    %c0_i32_1 = arith.constant 0 : i32
    return %c0_i32, %c0_i32_0 : i32, i32
  }
  func.func @transform_6(%arg0: i32) -> (i32, i32) {
    %c0_i32 = arith.constant 0 : i32
    %c0_i32_0 = arith.constant 0 : i32
    %c0_i32_1 = arith.constant 0 : i32
    return %c0_i32, %c0_i32_0 : i32, i32
  }
  func.func @transform_7(%arg0: i32) -> (i32, i32) {
    %c0_i32 = arith.constant 0 : i32
    %c0_i32_0 = arith.constant 0 : i32
    %c0_i32_1 = arith.constant 0 : i32
    return %c0_i32, %c0_i32_0 : i32, i32
  }
  func.func @transform_8(%arg0: i32) -> (i32, i32) {
    %c0_i32 = arith.constant 0 : i32
    %c0_i32_0 = arith.constant 0 : i32
    %c0_i32_1 = arith.constant 0 : i32
    return %c0_i32, %c0_i32_0 : i32, i32
  }
  func.func @transform_9(%arg0: i32) -> (i32, i32) {
    %c0_i32 = arith.constant 0 : i32
    %c0_i32_0 = arith.constant 0 : i32
    return %arg0, %c0_i32 : i32, i32
  }
}

module attributes {stable_mosaic.version = 11 : i64} {
  func.func @kernel(%arg0: i32, %arg1: i32, %arg2: i32, %arg3: memref<16x32xbf16, #tpu.memory_space<vmem>>, %arg4: memref<32x32xbf16, #tpu.memory_space<vmem>>, %arg5: memref<1x32xf32, #tpu.memory_space<vmem>>, %arg6: memref<16x32xf32, #tpu.memory_space<vmem>>) attributes {dimension_semantics = [#tpu.dimension_semantics<parallel>, #tpu.dimension_semantics<parallel>, #tpu.dimension_semantics<arbitrary>], iteration_bounds = array<i64: 1, 1, 1>, scalar_prefetch = 0 : i64, scratch_operands = 0 : i64, tpu.core_type = #tpu.core_type<tc>, window_params = [{transform_indices = @transform_0, window_bounds = array<i64: 16, 32>}, {transform_indices = @transform_1, window_bounds = array<i64: 32, 32>}, {transform_indices = @transform_2, window_bounds = array<i64: 1, 32>}, {transform_indices = @transform_3, window_bounds = array<i64: 16, 32>}]} {
    %c0 = arith.constant 0 : index
    %c0_0 = arith.constant 0 : index
    %0 = vector.load %arg3[%c0, %c0_0] : memref<16x32xbf16, #tpu.memory_space<vmem>>, vector<16x32xbf16>
    %c0_1 = arith.constant 0 : index
    %c0_2 = arith.constant 0 : index
    %1 = vector.load %arg4[%c0_1, %c0_2] : memref<32x32xbf16, #tpu.memory_space<vmem>>, vector<32x32xbf16>
    %cst = arith.constant dense<0.000000e+00> : vector<16x32xf32>
    %2 = tpu.matmul %0, %1, %cst {dimension_numbers = #tpu.dot_dimension_numbers<[1], [0], [0], [1], [0, 0, 1, 1], [], []>} : vector<16x32xbf16>, vector<32x32xbf16>, vector<16x32xf32> -> vector<16x32xf32>
    %c0_3 = arith.constant 0 : index
    %c0_4 = arith.constant 0 : index
    %3 = vector.load %arg5[%c0_3, %c0_4] : memref<1x32xf32, #tpu.memory_space<vmem>>, vector<1x32xf32>
    %4 = vector.broadcast %3 : vector<1x32xf32> to vector<16x32xf32>
    %5 = arith.addf %2, %4 : vector<16x32xf32>
    %c0_5 = arith.constant 0 : index
    %c0_6 = arith.constant 0 : index
    %6 = vector.load %arg6[%c0_5, %c0_6] : memref<16x32xf32, #tpu.memory_space<vmem>>, vector<16x32xf32>
    tpu.vector_store %arg6[%c0_5, %c0_6], %5 {strides = array<i32>} : memref<16x32xf32, #tpu.memory_space<vmem>>, vector<16x32xf32>,
    return
  }
  func.func @transform_0(%arg0: i32, %arg1: i32, %arg2: i32) -> (i32, i32) {
    %c0_i32 = arith.constant 0 : i32
    return %arg0, %arg2 : i32, i32
  }
  func.func @transform_1(%arg0: i32, %arg1: i32, %arg2: i32) -> (i32, i32) {
    %c0_i32 = arith.constant 0 : i32
    return %arg2, %arg1 : i32, i32
  }
  func.func @transform_2(%arg0: i32, %arg1: i32, %arg2: i32) -> (i32, i32) {
    %c0_i32 = arith.constant 0 : i32
    %c0_i32_0 = arith.constant 0 : i32
    return %c0_i32, %arg1 : i32, i32
  }
  func.func @transform_3(%arg0: i32, %arg1: i32, %arg2: i32) -> (i32, i32) {
    %c0_i32 = arith.constant 0 : i32
    return %arg0, %arg1 : i32, i32
  }
}

</mosaic_0001>

<bundles_post_ra>
// kernel: decoder_forward.19
= control target key start
LH: loop header
LB: loop body
LE: loop exit
PB: predicated region body
PF: predicated region fallthrough
CT: control target
= control target key end

     0   :  { %v111_v0 = vmov 0.0   ;;  %vm112_vm0 = vmmov 0   ;;  %vm40_vm1 = vcmask 261120   ;;  %s154_s1 = inlined_call_operand.vmem [shape: bf16[32,32], index: 1, kind: input, shape index: {}]   ;;  %s155_s0 = inlined_call_operand.vmem [shape: bf16[16,32], index: 0, kind: input, shape index: {}]   ;;  %s156_s2 = inlined_call_operand.vmem [shape: f32[16,32], index: 2, kind: input, shape index: {}]   ;;  %s157_s3 = inlined_call_operand.vmem [shape: f32[16,32], index: 3, kind: output, shape index: {}]  }
   0x1   :  { %98 = vmatprep.subr.bf16.mxu0 %v111_v0  ;;  %v108_v1 = vld [vmem:[%s154_s1] sm:$0xff]   ;;  %102 = vmatprep.mubr.msk.bf16.mxu0 %vm112_vm0, %v111_v0  ;;  %v109_v2 = vld [vmem:[%s154_s1 + $0x8] sm:$0xff]  }
   0x2   :  { %99 = vmatpush3.bf16.msra.mxu0 %v108_v1  ;;  %v110_v3 = vld [vmem:[%s155_s0] sm:$0xff]   ;;  %v22_v6 = vld [vmem:[%s156_s2 + $0x8] sm:$0xff] }
   0x3   :  { %100 = vmatprep.subr.bf16.mxu0 %v111_v0  ;;  %v21_v4 = vld [vmem:[%s156_s2] sm:$0xff] }
   0x6   :  { %101 = vmatpush3.bf16.msra.mxu0 %v109_v2 }
   0x9   :  { %103 = vmatmul.mubr.msk.bf16.vlgmr.msra.gmra.mrb[0].mxu0 %vm40_vm1, %v110_v3 }
  0xdc   :  { %v78_v5 = vpop.f32.mrb[0].mxu0 }
  0xdd   :  { %v79_v7 = vadd.f32 %v78_v5, %v21_v4  ;;  %v104_v8 = vpop.f32.mrb[1].mxu0 }
  0xde   :  { %v81_v9 = vpop.f32.mrb[2].mxu0 }
  0xdf   :  { %85 = vst.msk [vmem:[%s157_s3] sm:$0xff] %vm40_vm1, %v79_v7  ;;  %v82_v10 = vadd.f32 %v81_v9, %v22_v6  ;;  %v105_v11 = vpop.f32.mrb[3].mxu0 }
  0xe1   :  { %86 = vst.msk [vmem:[%s157_s3 + $0x8] sm:$0xff] %vm40_vm1, %v82_v10 }

// kernel: decoder_forward.17
= control target key start
LH: loop header
LB: loop body
LE: loop exit
PB: predicated region body
PF: predicated region fallthrough
CT: control target
= control target key end

     0   :  { %vm20_vm0 = vcmask 261120   ;;  %v158_v15 = vmov 0.0   ;;  %vm159_vm1 = vmmov 0   ;;  %vm127_vm2 = vcmask 785408   ;;  %s214_s0 = inlined_call_operand.vmem [shape: f32[16,32], index: 0, kind: input, shape index: {}]   ;;  %s215_s3 = inlined_call_operand.vmem [shape: bf16[32,96], index: 3, kind: input, shape index: {}]   ;;  %s216_s1 = inlined_call_operand.vmem [shape: f32[1,32], index: 1, kind: input, shape index: {}]   ;;  %s217_s2 = inlined_call_operand.vmem [shape: f32[1,32], index: 2, kind: input, shape index: {}]   ;;  %s218_s4 = inlined_call_operand.vmem [shape: f32[16,96], index: 4, kind: output, shape index: {}]  }
   0x1   :  { %v18_v0 = vld [vmem:[%s214_s0] sm:$0xff]  ;;  %v19_v1 = vld [vmem:[%s214_s0 + $0x8] sm:$0xff]  ;;  %142 = vmatprep.subr.bf16.mxu0 %v158_v15  ;;  %146 = vmatprep.mubr.msk.bf16.mxu0 %vm159_vm1, %v158_v15 }
   0x2   :  { %v21_v2 = vsel %vm20_vm0, %v18_v0, 0.0  ;;  %v24_v3 = vsel %vm20_vm0, %v19_v1, 0.0  ;;  %v152_v14 = vld [vmem:[%s215_s3] sm:$0xff]   ;;  %v153_v16 = vld [vmem:[%s215_s3 + $0x8] sm:$0xff]  }
   0x3   :  { %22 = vadd.xlane.f32.xlu0 %v21_v2  ;;  %143 = vmatpush3.bf16.msra.mxu0 %v152_v14  ;;  %v134_v25 = vld [vmem:[%s216_s1] ss:$0 sm:$0xff] }
   0x4   :  { %144 = vmatprep.subr.bf16.mxu0 %v158_v15  ;;  %v135_v29 = vld [vmem:[%s217_s2] ss:$0 sm:$0xff] }
   0x7   :  { %25 = vadd.xlane.f32.xlu0 %v24_v3  ;;  %145 = vmatpush3.bf16.msra.mxu0 %v153_v16 }
  0x90   :  { %v23_v4 = vpop.xlane.xlu0 %22 }
  0x91   :  { %v28_v5 = vmul.f32 0.03125, %v23_v4 }
  0x93   :  { %v30_v6 = vsub.f32 %v18_v0, %v28_v5 }
  0x94   :  { %v26_v7 = vpop.xlane.xlu0 %25 }
  0x95   :  { %v29_v8 = vmul.f32 0.03125, %v26_v7  ;;  %v32_v9 = vmul.f32 %v30_v6, %v30_v6 }
  0x97   :  { %v31_v10 = vsub.f32 %v19_v1, %v29_v8  ;;  %v34_v11 = vsel %vm20_vm0, %v32_v9, 0.0 }
  0x98   :  { %35 = vadd.xlane.f32.xlu1 %v34_v11 }
  0x99   :  { %v33_v12 = vmul.f32 %v31_v10, %v31_v10 }
  0x9b   :  { %v37_v13 = vsel %vm20_vm0, %v33_v12, 0.0 }
  0x9c   :  { %38 = vadd.xlane.f32.xlu1 %v37_v13 }
 0x125   :  { %v36_v17 = vpop.xlane.xlu1 %35 }
 0x126   :  { %v40_v18 = vmul.f32 0.03125, %v36_v17 }
 0x128   :  { %v42_v19 = vadd.f32 1e-05, %v40_v18 }
 0x129   :  { %v39_v20 = vpop.xlane.xlu1 %38 }
 0x12a   :  { %154 = vrsqrt.f32 %v42_v19  ;;  %v41_v21 = vmul.f32 0.03125, %v39_v20 }
 0x12c   :  { %v43_v22 = vadd.f32 1e-05, %v41_v21 }
 0x12e   :  { %156 = vrsqrt.f32 %v43_v22 }
 0x134   :  { %v155_v23 = vpop.eup %154 }
 0x135   :  { %v46_v24 = vmul.f32 %v155_v23, %v30_v6 }
 0x137   :  { %v55_v28 = vmul.f32 %v134_v25, %v46_v24 }
 0x138   :  { %v157_v26 = vpop.eup %156 }
 0x139   :  { %v47_v27 = vmul.f32 %v157_v26, %v31_v10  ;;  %v64_v31 = vadd.f32 %v135_v29, %v55_v28 }
 0x13b   :  { %v56_v30 = vmul.f32 %v134_v25, %v47_v27 }
 0x13d   :  { %v65_v32 = vadd.f32 %v135_v29, %v56_v30 }
 0x13f   :  { %v66_v33 = vpack.c.bf16 %v65_v32, %v64_v31 }
 0x141   :  { %147 = vmatmul.mubr.msk.bf16.vlgmr.msra.gmra.mrb[0].mxu0 %vm20_vm0, %v66_v33 }
 0x214   :  { %v120_v34 = vpop.f32.mrb[0].mxu0 }
 0x215   :  { %128 = vst.msk [vmem:[%s218_s4] sm:$0xff] %vm127_vm2, %v120_v34  ;;  %v148_v35 = vpop.f32.mrb[1].mxu0 }
 0x216   :  { %v123_v36 = vpop.f32.mrb[2].mxu0 }
 0x217   :  { %129 = vst.msk [vmem:[%s218_s4 + $0x8] sm:$0xff] %vm127_vm2, %v123_v36  ;;  %v149_v37 = vpop.f32.mrb[3].mxu0 }

// kernel: decoder_forward.20
= control target key start
LH: loop header
LB: loop body
LE: loop exit
PB: predicated region body
PF: predicated region fallthrough
CT: control target
= control target key end

     0   :  { %vm20_vm0 = vcmask 261120   ;;  %v157_v15 = vmov 0.0   ;;  %vm158_vm1 = vmmov 0   ;;  %s215_s0 = inlined_call_operand.vmem [shape: f32[16,32], index: 0, kind: input, shape index: {}]   ;;  %s216_s3 = inlined_call_operand.vmem [shape: bf16[32,32], index: 3, kind: input, shape index: {}]   ;;  %s217_s1 = inlined_call_operand.vmem [shape: f32[1,32], index: 1, kind: input, shape index: {}]   ;;  %s218_s2 = inlined_call_operand.vmem [shape: f32[1,32], index: 2, kind: input, shape index: {}]   ;;  %s219_s4 = inlined_call_operand.vmem [shape: f32[16,32], index: 4, kind: output, shape index: {}]  }
   0x1   :  { %v18_v0 = vld [vmem:[%s215_s0] sm:$0xff]  ;;  %v19_v1 = vld [vmem:[%s215_s0 + $0x8] sm:$0xff]  ;;  %141 = vmatprep.subr.bf16.mxu0 %v157_v15  ;;  %145 = vmatprep.mubr.msk.bf16.mxu0 %vm158_vm1, %v157_v15 }
   0x2   :  { %v21_v2 = vsel %vm20_vm0, %v18_v0, 0.0  ;;  %v24_v3 = vsel %vm20_vm0, %v19_v1, 0.0  ;;  %v151_v14 = vld [vmem:[%s216_s3] sm:$0xff]   ;;  %v152_v16 = vld [vmem:[%s216_s3 + $0x8] sm:$0xff]  }
   0x3   :  { %22 = vadd.xlane.f32.xlu0 %v21_v2  ;;  %142 = vmatpush3.bf16.msra.mxu0 %v151_v14  ;;  %v133_v25 = vld [vmem:[%s217_s1] ss:$0 sm:$0xff] }
   0x4   :  { %143 = vmatprep.subr.bf16.mxu0 %v157_v15  ;;  %v134_v29 = vld [vmem:[%s218_s2] ss:$0 sm:$0xff] }
   0x7   :  { %25 = vadd.xlane.f32.xlu0 %v24_v3  ;;  %144 = vmatpush3.bf16.msra.mxu0 %v152_v16 }
  0x90   :  { %v23_v4 = vpop.xlane.xlu0 %22 }
  0x91   :  { %v28_v5 = vmul.f32 0.03125, %v23_v4 }
  0x93   :  { %v30_v6 = vsub.f32 %v18_v0, %v28_v5 }
  0x94   :  { %v26_v7 = vpop.xlane.xlu0 %25 }
  0x95   :  { %v29_v8 = vmul.f32 0.03125, %v26_v7  ;;  %v32_v9 = vmul.f32 %v30_v6, %v30_v6 }
  0x97   :  { %v31_v10 = vsub.f32 %v19_v1, %v29_v8  ;;  %v34_v11 = vsel %vm20_vm0, %v32_v9, 0.0 }
  0x98   :  { %35 = vadd.xlane.f32.xlu1 %v34_v11 }
  0x99   :  { %v33_v12 = vmul.f32 %v31_v10, %v31_v10 }
  0x9b   :  { %v37_v13 = vsel %vm20_vm0, %v33_v12, 0.0 }
  0x9c   :  { %38 = vadd.xlane.f32.xlu1 %v37_v13 }
 0x125   :  { %v36_v17 = vpop.xlane.xlu1 %35 }
 0x126   :  { %v40_v18 = vmul.f32 0.03125, %v36_v17 }
 0x128   :  { %v42_v19 = vadd.f32 1e-05, %v40_v18 }
 0x129   :  { %v39_v20 = vpop.xlane.xlu1 %38 }
 0x12a   :  { %153 = vrsqrt.f32 %v42_v19  ;;  %v41_v21 = vmul.f32 0.03125, %v39_v20 }
 0x12c   :  { %v43_v22 = vadd.f32 1e-05, %v41_v21 }
 0x12e   :  { %155 = vrsqrt.f32 %v43_v22 }
 0x134   :  { %v154_v23 = vpop.eup %153 }
 0x135   :  { %v46_v24 = vmul.f32 %v154_v23, %v30_v6 }
 0x137   :  { %v55_v28 = vmul.f32 %v133_v25, %v46_v24 }
 0x138   :  { %v156_v26 = vpop.eup %155 }
 0x139   :  { %v47_v27 = vmul.f32 %v156_v26, %v31_v10  ;;  %v64_v31 = vadd.f32 %v134_v29, %v55_v28 }
 0x13b   :  { %v56_v30 = vmul.f32 %v133_v25, %v47_v27 }
 0x13d   :  { %v65_v32 = vadd.f32 %v134_v29, %v56_v30 }
 0x13f   :  { %v66_v33 = vpack.c.bf16 %v65_v32, %v64_v31 }
 0x141   :  { %146 = vmatmul.mubr.msk.bf16.vlgmr.msra.gmra.mrb[0].mxu0 %vm20_vm0, %v66_v33 }
 0x214   :  { %v120_v34 = vpop.f32.mrb[0].mxu0 }
 0x215   :  { %127 = vst.msk [vmem:[%s219_s4] sm:$0xff] %vm20_vm0, %v120_v34  ;;  %v147_v35 = vpop.f32.mrb[1].mxu0 }
 0x216   :  { %v123_v36 = vpop.f32.mrb[2].mxu0 }
 0x217   :  { %128 = vst.msk [vmem:[%s219_s4 + $0x8] sm:$0xff] %vm20_vm0, %v123_v36  ;;  %v148_v37 = vpop.f32.mrb[3].mxu0 }

// kernel: decoder_forward.21
= control target key start
LH: loop header
LB: loop body
LE: loop exit
PB: predicated region body
PF: predicated region fallthrough
CT: control target
= control target key end

     0   :  { %vm34_vm0 = vcmask 261120   ;;  %vm90_vm1 = vcmask 523264   ;;  %s162_s1 = inlined_call_operand.vmem [shape: bf16[32,64], index: 1, kind: input, shape index: {}]   ;;  %s163_s0 = inlined_call_operand.vmem [shape: f32[32,32], index: 0, kind: input, shape index: {}]   ;;  %s164_s2 = inlined_call_operand.vmem [shape: f32[32,64], index: 2, kind: output, shape index: {}]  }
   0x1   :  { %v115_v0 = vld [vmem:[%s162_s1] sm:$0xff]   ;;  %v116_v1 = vld [vmem:[%s162_s1 + $0x8] sm:$0xff]   ;;  %v14_v5 = vld [vmem:[%s163_s0 + $0x10] sm:$0xff] }
   0x2   :  { %107 = vmatprep.subr.bf16.mxu0 %v115_v0  ;;  %v12_v2 = vld [vmem:[%s163_s0] sm:$0xff]  ;;  %v13_v3 = vld [vmem:[%s163_s0 + $0x8] sm:$0xff]  ;;  %v15_v6 = vld [vmem:[%s163_s0 + $0x18] sm:$0xff] }
   0x3   :  { %108 = vmatpush3.bf16.msra.mxu0 %v115_v0  ;;  %v16_v4 = vpack.c.bf16 %v13_v3, %v12_v2  ;;  %v17_v7 = vpack.c.bf16 %v15_v6, %v14_v5 }
   0x4   :  { %109 = vmatprep.subr.bf16.mxu0 %v116_v1 }
   0x5   :  { %111 = vmatprep.mubr.msk.bf16.mxu0 %vm34_vm0, %v16_v4 }
   0x7   :  { %110 = vmatpush3.bf16.msra.mxu0 %v116_v1 }
   0xa   :  { %112 = vmatmul.mubr.msk.bf16.vlgmr.msra.gmra.mrb[0].mxu0 %vm34_vm0, %v17_v7 }
  0xdd   :  { %v113_v8 = vpop.f32.mrb[0].mxu0 }
  0xde   :  { %93 = vst.msk [vmem:[%s164_s2 + $0x10] sm:$0xff] %vm90_vm1, %v113_v8  ;;  %v75_v9 = vpop.f32.mrb[1].mxu0 }
  0xdf   :  { %91 = vst.msk [vmem:[%s164_s2] sm:$0xff] %vm90_vm1, %v75_v9  ;;  %v114_v10 = vpop.f32.mrb[2].mxu0 }
  0xe0   :  { %94 = vst.msk [vmem:[%s164_s2 + $0x18] sm:$0xff] %vm90_vm1, %v114_v10  ;;  %v78_v11 = vpop.f32.mrb[3].mxu0 }
  0xe1   :  { %92 = vst.msk [vmem:[%s164_s2 + $0x8] sm:$0xff] %vm90_vm1, %v78_v11 }

// kernel: decoder_forward.18
= control target key start
LH: loop header
LB: loop body
LE: loop exit
PB: predicated region body
PF: predicated region fallthrough
CT: control target
= control target key end

     0   :  { %s1975_s15 = smov 0   ;;  %s1977_s16 = smov 0   ;;  %s2359_s0 = inlined_call_operand.vmem [shape: f32[2,8,3,4,8], index: 0, kind: input, shape index: {}, may-alias: {0,1,2}]   ;;  %s2360_s1 = inlined_call_operand.vmem [shape: f32[2,8,3,4,8], index: 1, kind: input, shape index: {}, may-alias: {0,1,2}]   ;;  %s2361_s2 = inlined_call_operand.vmem [shape: f32[2,8,3,4,8], index: 2, kind: input, shape index: {}, may-alias: {0,1,2}]   ;;  %s2362_s3 = inlined_call_operand.vmem [shape: f32[2,1,8], index: 3, kind: input, shape index: {}]   ;;  %s2363_s4 = inlined_call_operand.vmem [shape: bf16[2,8,32], index: 4, kind: output, shape index: {}]  }
   0x1   :  { %s1979_s17 = smov 0   ;;  %s1981_s18 = smov 0  }
   0x2   :  { %s1983_s19 = smov 0  }
   0x3 LB: > { %s33_s20 = sadd.s32 1, %s1938_s18  ;;  %p49_p1 = scmp.ne.s32.totalorder %s1930_s16, %s1926_s15  ;;  %s1942_s19 = sphi %s1983_s19, %s14_s19   ;;  %s1938_s18 = sphi %s1981_s18, %s2368_s18   ;;  %s1934_s17 = sphi %s1979_s17, %s2367_s17   ;;  %s1930_s16 = sphi %s1977_s16, %s2366_s16   ;;  %s1926_s15 = sphi %s1975_s15, %s2365_s15  }
   0x4   : > { %p35_p0 = scmp.ge.s32.totalorder %s33_s20, 2  ;;  %p50_p2 = scmp.eq.s32.totalorder %s1942_s19, 0 }
   0x5   : > { %s42_s23 = sadd.s32 1, %s1930_s16  ;;  %p1733_p5 = scmp.ge.s32.totalorder %s1942_s19, 2 }
   0x6   : > { %s2370_s20 = smov (%p35_p0, %s33_s20), 0  ;;  %p2006_p3 = por %p50_p2, %p49_p1 }
   0x7   : > { %s37_s22 = ssub.s32 %s1938_s18, %s2370_s20  ;;  %187 = sbr.rel (%p1733_p5) target bundleno = 44 (0x2c), region = 16 }
   0x8   : > { %p40_p4 = scmp.eq.s32.totalorder %s37_s22, 0 }
   0xa   : > { %s2014_s24 = scalar_select %p40_p4, %s1930_s16, %s42_s23  }
   0xe   : > { %190 = sbr.rel (!%p2006_p3) target bundleno = 24 (0x18), region = 20  ;;  %s192_s25 = sand.u32 (%p2006_p3), 1, %s1930_s16  }
   0xf   : > { %s1841_s26 = smul.u32 (%p2006_p3), 96, %s1938_s18  ;;  %s1734_s27 = sshll.u32 (%p2006_p3), %s192_s25, 5 }
  0x10   : > { %s194_s5 = scalar_lea.vmem (%p2006_p3), [#allocation2], %s1734_s27 }
  0x11   : > { %s200_s30 = scalar_lea.vmem (%p2006_p3), %s2359_s0, %s1841_s26 }
  0x12   : > { %v216_v0 = vld [vmem:[%s200_s30] sm:$0xf] (%p2006_p3)  ;;  %v218_v1 = vld [vmem:[%s200_s30 + $0xc] sm:$0xf] (%p2006_p3)  ;;  %v220_v2 = vld [vmem:[%s200_s30 + $0x18] sm:$0xf] (%p2006_p3) }
  0x13   : > { %217 = vst [vmem:[%s194_s5] sm:$0xf] (%p2006_p3), %v216_v0  ;;  %219 = vst [vmem:[%s194_s5 + $0x4] sm:$0xf] (%p2006_p3), %v218_v1  ;;  %v222_v3 = vld [vmem:[%s200_s30 + $0x24] sm:$0xf] (%p2006_p3) }
  0x14   : > { %221 = vst [vmem:[%s194_s5 + $0x8] sm:$0xf] (%p2006_p3), %v220_v2  ;;  %v224_v4 = vld [vmem:[%s200_s30 + $0x30] sm:$0xf] (%p2006_p3)  ;;  %v226_v5 = vld [vmem:[%s200_s30 + $0x3c] sm:$0xf] (%p2006_p3) }
  0x15   : > { %223 = vst [vmem:[%s194_s5 + $0xc] sm:$0xf] %v222_v3  ;;  %225 = vst [vmem:[%s194_s5 + $0x10] sm:$0xf] %v224_v4  ;;  %v228_v6 = vld [vmem:[%s200_s30 + $0x48] sm:$0xf] }
  0x16   : > { %227 = vst [vmem:[%s194_s5 + $0x14] sm:$0xf] %v226_v5  ;;  %v230_v7 = vld [vmem:[%s200_s30 + $0x54] sm:$0xf]  ;;  %229 = vst [vmem:[%s194_s5 + $0x18] sm:$0xf] %v228_v6 }
  0x17   : > { %231 = vst [vmem:[%s194_s5 + $0x1c] sm:$0xf] %v230_v7 }
  0x18 PF: > { %270 = sbr.rel (!%p2006_p3) target bundleno = 34 (0x22), region = 61  ;;  %s272_s6 = sand.u32 (%p2006_p3), 1, %s1930_s16  }
  0x19   : > { %s1737_s7 = smul.u32 (%p2006_p3), 96, %s1938_s18  ;;  %s1736_s8 = sshll.u32 (%p2006_p3), %s272_s6, 5 }
  0x1a   : > { %s274_s12 = scalar_lea.vmem (%p2006_p3), [#allocation3], %s1736_s8 }
  0x1b   : > { %s1629_s11 = scalar_lea.vmem (%p2006_p3), %s2360_s1, %s1737_s7 }
  0x1c   : > { %v1738_v8 = vld [vmem:[%s1629_s11 + $0x4] sm:$0xf] (%p2006_p3)  ;;  %v1739_v9 = vld [vmem:[%s1629_s11 + $0x10] sm:$0xf] (%p2006_p3)  ;;  %v1740_v10 = vld [vmem:[%s1629_s11 + $0x1c] sm:$0xf] (%p2006_p3) }
  0x1d   : > { %298 = vst [vmem:[%s274_s12] sm:$0xf] (%p2006_p3), %v1738_v8  ;;  %300 = vst [vmem:[%s274_s12 + $0x4] sm:$0xf] (%p2006_p3), %v1739_v9  ;;  %v1741_v11 = vld [vmem:[%s1629_s11 + $0x28] sm:$0xf] (%p2006_p3) }
  0x1e   : > { %302 = vst [vmem:[%s274_s12 + $0x8] sm:$0xf] (%p2006_p3), %v1740_v10  ;;  %v1742_v12 = vld [vmem:[%s1629_s11 + $0x34] sm:$0xf] (%p2006_p3)  ;;  %v1743_v13 = vld [vmem:[%s1629_s11 + $0x40] sm:$0xf] (%p2006_p3) }
  0x1f   : > { %304 = vst [vmem:[%s274_s12 + $0xc] sm:$0xf] %v1741_v11  ;;  %306 = vst [vmem:[%s274_s12 + $0x10] sm:$0xf] %v1742_v12  ;;  %v1744_v14 = vld [vmem:[%s1629_s11 + $0x4c] sm:$0xf] }
  0x20   : > { %308 = vst [vmem:[%s274_s12 + $0x14] sm:$0xf] %v1743_v13  ;;  %v1745_v15 = vld [vmem:[%s1629_s11 + $0x58] sm:$0xf]  ;;  %310 = vst [vmem:[%s274_s12 + $0x18] sm:$0xf] %v1744_v14 }
  0x21   : > { %312 = vst [vmem:[%s274_s12 + $0x1c] sm:$0xf] %v1745_v15 }
  0x22 PF: > { %351 = sbr.rel (!%p2006_p3) target bundleno = 44 (0x2c), region = 102  ;;  %s353_s13 = sand.u32 (%p2006_p3), 1, %s1930_s16  }
  0x23   : > { %s1747_s14 = smul.u32 (%p2006_p3), 96, %s1938_s18  ;;  %s1746_s22 = sshll.u32 (%p2006_p3), %s353_s13, 5 }
  0x24   : > { %s355_s27 = scalar_lea.vmem (%p2006_p3), [#allocation4], %s1746_s22 }
  0x25   : > { %s1637_s26 = scalar_lea.vmem (%p2006_p3), %s2361_s2, %s1747_s14 }
  0x26   : > { %v1748_v16 = vld [vmem:[%s1637_s26 + $0x8] sm:$0xf] (%p2006_p3)  ;;  %v1749_v17 = vld [vmem:[%s1637_s26 + $0x14] sm:$0xf] (%p2006_p3)  ;;  %v1750_v18 = vld [vmem:[%s1637_s26 + $0x20] sm:$0xf] (%p2006_p3) }
  0x27   : > { %379 = vst [vmem:[%s355_s27] sm:$0xf] (%p2006_p3), %v1748_v16  ;;  %381 = vst [vmem:[%s355_s27 + $0x4] sm:$0xf] (%p2006_p3), %v1749_v17  ;;  %v1751_v19 = vld [vmem:[%s1637_s26 + $0x2c] sm:$0xf] (%p2006_p3) }
  0x28   : > { %383 = vst [vmem:[%s355_s27 + $0x8] sm:$0xf] (%p2006_p3), %v1750_v18  ;;  %v1752_v20 = vld [vmem:[%s1637_s26 + $0x38] sm:$0xf] (%p2006_p3)  ;;  %v1753_v21 = vld [vmem:[%s1637_s26 + $0x44] sm:$0xf] (%p2006_p3) }
  0x29   : > { %385 = vst [vmem:[%s355_s27 + $0xc] sm:$0xf] %v1751_v19  ;;  %387 = vst [vmem:[%s355_s27 + $0x10] sm:$0xf] %v1752_v20  ;;  %v1754_v22 = vld [vmem:[%s1637_s26 + $0x50] sm:$0xf] }
  0x2a   : > { %389 = vst [vmem:[%s355_s27 + $0x14] sm:$0xf] %v1753_v21  ;;  %v1755_v23 = vld [vmem:[%s1637_s26 + $0x5c] sm:$0xf]  ;;  %391 = vst [vmem:[%s355_s27 + $0x18] sm:$0xf] %v1754_v22 }
  0x2b   : > { %393 = vst [vmem:[%s355_s27 + $0x1c] sm:$0xf] %v1755_v23 }
  0x2c PF: > { %p1756_p6 = scmp.ge.s32.totalorder %s1942_s19, 1  ;;  %p440_p7 = scmp.lt.s32.totalorder %s1942_s19, 3 }
  0x2e   : > { %p441_p8 = pnand %p1756_p6, %p440_p7 }
  0x2f   : > { %s447_s21 = sand.u32 (!%p441_p8), 1, %s1926_s15   ;;  %v1944_v24 = vmov (!%p441_p8), 0.0   ;;  %vm597_vm0 = vcmask (!%p441_p8), 1041409   ;;  %vm600_vm1 = vcmask (!%p441_p8), 1042434   ;;  %vm603_vm2 = vcmask (!%p441_p8), 1043459   ;;  %p505_p9 = scmp.lt.s32.totalorder (!%p441_p8), %s1934_s17, 1 }
  0x30   : > { %444 = sbr.rel (%p441_p8) target bundleno = 1490 (0x5d2), region = 147  ;;  %1793 = vmatprep.subr.bf16.mxu0 (!%p441_p8), %v1944_v24  ;;  %s2042_s28 = sshll.u32 (!%p441_p8), %s447_s21, 5  ;;  %1799 = vmatprep.subr.bf16.mxu1 (!%p441_p8), %v1944_v24  ;;  %vm606_vm3 = vcmask (!%p441_p8), 1044484   ;;  %vm609_vm4 = vcmask (!%p441_p8), 1045509   ;;  %vm1945_vm5 = vmmov (!%p441_p8), 0   ;;  %vm612_vm6 = vcmask (!%p441_p8), 1046534  }
  0x31   : > { %s2046_s29 = scalar_lea.vmem (!%p441_p8), [#allocation3], %s2042_s28  ;;  %1795 = vmatprep.mubr.msk.bf16.mxu0 (!%p441_p8), %vm1945_vm5, %v1944_v24  ;;  %1801 = vmatprep.mubr.msk.bf16.mxu1 (!%p441_p8), %vm1945_vm5, %v1944_v24  ;;  %vm615_vm7 = vcmask (!%p441_p8), 1047559   ;;  %s2061_s15 = scalar_lea.vmem (!%p441_p8), [#allocation2], %s2042_s28  ;;  %vm649_vm8 = vcmask (!%p441_p8), 64512   ;;  %vm758_vm13 = vcmask (!%p441_p8), 1043456   ;;  %vm803_vm14 = vcmask (!%p441_p8), 60416  }
  0x32   : > { %v564_v25 = vld [vmem:[%s2046_s29] sm:$0x1] (!%p441_p8)  ;;  %v565_v26 = vld [vmem:[%s2046_s29 + $0x4] sm:$0x1] (!%p441_p8)  ;;  %v566_v27 = vld [vmem:[%s2046_s29 + $0x8] sm:$0x1] (!%p441_p8) }
  0x33   : > { %v567_v28 = vld [vmem:[%s2046_s29 + $0xc] sm:$0x1] (!%p441_p8)  ;;  %v568_v29 = vld [vmem:[%s2046_s29 + $0x10] sm:$0x1] (!%p441_p8)  ;;  %v569_v30 = vld [vmem:[%s2046_s29 + $0x14] sm:$0x1] (!%p441_p8)  ;;  %v572_v31 = vpack.c.bf16 (!%p441_p8), %v564_v25, %v564_v25  ;;  %v573_v32 = vpack.c.bf16 (!%p441_p8), %v565_v26, %v565_v26  ;;  %v574_v33 = vpack.c.bf16 (!%p441_p8), %v566_v27, %v566_v27 }
  0x34   : > { %v570_v34 = vld [vmem:[%s2046_s29 + $0x18] sm:$0x1] (!%p441_p8)  ;;  %v571_v35 = vld [vmem:[%s2046_s29 + $0x1c] sm:$0x1] (!%p441_p8)  ;;  %v575_v36 = vpack.c.bf16 (!%p441_p8), %v567_v28, %v567_v28  ;;  %v576_v37 = vpack.c.bf16 (!%p441_p8), %v568_v29, %v568_v29  ;;  %v577_v38 = vpack.c.bf16 (!%p441_p8), %v569_v30, %v569_v30  ;;  %v540_v39 = vld [vmem:[%s2061_s15] sm:$0x1] (!%p441_p8) }
  0x35   : > { %v578_v40 = vpack.c.bf16 (!%p441_p8), %v570_v34, %v570_v34  ;;  %v579_v41 = vpack.c.bf16 (!%p441_p8), %v571_v35, %v571_v35  ;;  %v626_v42 = vunpack.c.l.b16 (!%p441_p8), %v572_v31  ;;  %v627_v43 = vunpack.c.l.b16 (!%p441_p8), %v573_v32  ;;  %v541_v44 = vld [vmem:[%s2061_s15 + $0x4] sm:$0x1] (!%p441_p8)  ;;  %v542_v45 = vld [vmem:[%s2061_s15 + $0x8] sm:$0x1] (!%p441_p8)  ;;  %v543_v50 = vld [vmem:[%s2061_s15 + $0xc] sm:$0x1] (!%p441_p8) }
  0x36   : > { %v628_v46 = vunpack.c.l.b16 (!%p441_p8), %v574_v33  ;;  %v629_v47 = vunpack.c.l.b16 (!%p441_p8), %v575_v36  ;;  %v630_v48 = vunpack.c.l.b16 (!%p441_p8), %v576_v37  ;;  %v631_v49 = vunpack.c.l.b16 (!%p441_p8), %v577_v38  ;;  %v544_v51 = vld [vmem:[%s2061_s15 + $0x10] sm:$0x1] (!%p441_p8)  ;;  %v545_v52 = vld [vmem:[%s2061_s15 + $0x14] sm:$0x1] (!%p441_p8)  ;;  %v546_v56 = vld [vmem:[%s2061_s15 + $0x18] sm:$0x1] (!%p441_p8) }
  0x37   : > { %v632_v53 = vunpack.c.l.b16 %v578_v40  ;;  %v633_v54 = vunpack.c.l.b16 %v579_v41  ;;  %v634_v55 = vrot.slane %v627_v43, 7  ;;  %v548_v57 = vmul.f32 0.35355338, %v540_v39  ;;  %v547_v62 = vld [vmem:[%s2061_s15 + $0x1c] sm:$0x1]  ;;  %s2372_s17 = smov (!%p505_p9, %s1934_s17), 1 }
  0x38   : > { %v636_v58 = vrot.slane %v628_v46, 6  ;;  %v638_v59 = vrot.slane %v629_v47, 5  ;;  %v640_v60 = vrot.slane %v630_v48, 4  ;;  %v642_v61 = vrot.slane %v631_v49, 3  ;;  %s510_s6 = scalar_lea.vmem %s2362_s3, %s2372_s17  ;;  %s2108_s7 = scalar_lea.vmem [#allocation4], %s2042_s28 }
  0x39   : > { %v635_v63 = vsel %vm597_vm0, %v634_v55, %v626_v42  ;;  %v644_v0 = vrot.slane %v632_v53, 2  ;;  %v646_v1 = vrot.slane %v633_v54, 1  ;;  %v549_v2 = vmul.f32 0.35355338, %v541_v44  ;;  %s1760_s8 = sshll.u32 %s2372_s17, 2  ;;  %s1947_s17 = smov 8  }
  0x3a   : > { %v637_v3 = vsel %vm600_vm1, %v636_v58, %v635_v63  ;;  %v550_v4 = vmul.f32 0.35355338, %v542_v45  ;;  %v551_v5 = vmul.f32 0.35355338, %v543_v50  ;;  %v552_v6 = vmul.f32 0.35355338, %v544_v51  ;;  %s2260_s11 = scalar_lea.vmem %s2363_s4, %s1760_s8 }
  0x3b   : > { %v639_v7 = vsel %vm603_vm2, %v638_v59, %v637_v3  ;;  %v553_v8 = vmul.f32 0.35355338, %v545_v52  ;;  %v554_v9 = vmul.f32 0.35355338, %v546_v56  ;;  %v555_v10 = vmul.f32 0.35355338, %v547_v62 }
  0x3c   : > { %v641_v11 = vsel %vm606_vm3, %v640_v60, %v639_v7  ;;  %v556_v12 = vpack.c.bf16 %v548_v57, %v548_v57  ;;  %v557_v13 = vpack.c.bf16 %v549_v2, %v549_v2  ;;  %v558_v14 = vpack.c.bf16 %v550_v4, %v550_v4  ;;  %v519_v50 = vld [vmem:[%s510_s6] sm:$0x1]  ;;  %s1948_s12 = smov 16   ;;  %s1949_s13 = smov 24  }
  0x3d   : > { %v643_v15 = vsel %vm609_vm4, %v642_v61, %v641_v11  ;;  %v559_v16 = vpack.c.bf16 %v551_v5, %v551_v5  ;;  %v560_v17 = vpack.c.bf16 %v552_v6, %v552_v6  ;;  %v561_v18 = vpack.c.bf16 %v553_v8, %v553_v8  ;;  %v709_v5 = vld [vmem:[%s2108_s7 + $0x4] sm:$0x1]  ;;  %v710_v6 = vld [vmem:[%s2108_s7 + $0x8] sm:$0x1]  ;;  %v708_v8 = vld [vmem:[%s2108_s7] sm:$0x1] }
  0x3e   : > { %v645_v19 = vsel %vm612_vm6, %v644_v0, %v643_v15  ;;  %v562_v20 = vpack.c.bf16 %v554_v9, %v554_v9  ;;  %v563_v21 = vpack.c.bf16 %v555_v10, %v555_v10  ;;  %v588_v22 = vunpack.c.l.b16 %v556_v12  ;;  %v711_v9 = vld [vmem:[%s2108_s7 + $0xc] sm:$0x1]  ;;  %v712_v11 = vld [vmem:[%s2108_s7 + $0x10] sm:$0x1]  ;;  %v713_v15 = vld [vmem:[%s2108_s7 + $0x14] sm:$0x1] }
  0x3f   : > { %v647_v23 = vsel %vm615_vm7, %v646_v1, %v645_v19  ;;  %v589_v25 = vunpack.c.l.b16 %v557_v13  ;;  %v590_v26 = vunpack.c.l.b16 %v558_v14  ;;  %v591_v27 = vunpack.c.l.b16 %v559_v16 }
  0x40   : > { %v648_v28 = vpack.c.b16 %v647_v23, %v647_v23  ;;  %v592_v29 = vunpack.c.l.b16 %v560_v17  ;;  %v593_v30 = vunpack.c.l.b16 %v561_v18  ;;  %v594_v31 = vunpack.c.l.b16 %v562_v20  ;;  %v714_v18 = vld [vmem:[%s2108_s7 + $0x18] sm:$0x1]  ;;  %v715_v23 = vld [vmem:[%s2108_s7 + $0x1c] sm:$0x1] }
  0x41   : > { %v595_v32 = vunpack.c.l.b16 %v563_v21  ;;  %v596_v33 = vrot.slane %v589_v25, 7  ;;  %v599_v34 = vrot.slane %v590_v26, 6  ;;  %v602_v35 = vrot.slane %v591_v27, 5 }
  0x42   : > { %v654_v36 = vsel %vm649_vm8, %v648_v28, 0  ;;  %v605_v37 = vrot.slane %v592_v29, 4  ;;  %v608_v39 = vrot.slane %v593_v30, 3  ;;  %v611_v41 = vrot.slane %v594_v31, 2 }
  0x43   : > { %1794 = vmatpush3.bf16.xpose.msra.mxu0 %v654_v36  ;;  %v598_v38 = vsel %vm597_vm0, %v596_v33, %v588_v22  ;;  %v614_v43 = vrot.slane %v595_v32, 1  ;;  %v521_v49 = vlaneseq  ;;  %vm520_vm9 = vcmp.lt.f32.partialorder %v519_v50, -1.0  ;;  %v832_v50 = vld [vmem:[%s2046_s29 + $0xd] sm:$0x1] }
  0x44   : > { %v601_v40 = vsel %vm600_vm1, %v599_v34, %v598_v38  ;;  %1811 = vmatprep.subr.bf16.mxu0 %v1944_v24  ;;  %v1946_v53 = vmov 0   ;;  %v717_v7 = vpack.c.bf16 %v709_v5, %v709_v5  ;;  %v718_v10 = vpack.c.bf16 %v710_v6, %v710_v6  ;;  %v807_v6 = vld [vmem:[%s2061_s15 + $0x9] sm:$0x1] }
  0x45   : > { %v604_v42 = vsel %vm603_vm2, %v602_v35, %v601_v40  ;;  %v522_v51 = vshrl.u32 %v521_v49, 7  ;;  %v532_v54 = vsel %vm520_vm9, 1, %v1946_v53  ;;  %v527_v55 = vand.u32 127, %v521_v49  ;;  %v829_v49 = vld [vmem:[%s2046_s29 + $0x1] sm:$0x1] }
  0x46   : > { %v607_v44 = vsel %vm606_vm3, %v605_v37, %v604_v42  ;;  %v716_v12 = vpack.c.bf16 %v708_v8, %v708_v8  ;;  %v719_v13 = vpack.c.bf16 %v711_v9, %v711_v9  ;;  %v733_v14 = vunpack.c.l.b16 %v717_v7  ;;  %v805_v9 = vld [vmem:[%s2061_s15 + $0x1] sm:$0x1] }
  0x47   : > { %v610_v45 = vsel %vm609_vm4, %v608_v39, %v607_v44  ;;  %v535_v52 = vsub.s32 0, %v522_v51  ;;  %vm531_vm10 = vcmp.gt.s32.totalorder %v527_v55, %v522_v51  ;;  %v720_v16 = vpack.c.bf16 %v712_v11, %v712_v11 }
  0x48   : > { %v613_v46 = vsel %vm612_vm6, %v611_v41, %v610_v45  ;;  %v734_v17 = vunpack.c.l.b16 %v718_v10  ;;  %v721_v19 = vpack.c.bf16 %v713_v15, %v713_v15  ;;  %v732_v20 = vunpack.c.l.b16 %v716_v12  ;;  %v836_v12 = vld [vmem:[%s2046_s29 + $0x1d] sm:$0x1] }
  0x49   : > { %v616_v47 = vsel %vm615_vm7, %v614_v43, %v613_v46  ;;  %v536_v56 = vrot.slane %v532_v54, %v535_v52  ;;  %v735_v21 = vunpack.c.l.b16 %v719_v13  ;;  %v740_v22 = vrot.slane %v733_v14, 7  ;;  %v830_v46 = vld [vmem:[%s2046_s29 + $0x5] sm:$0x1]  ;;  %v833_v54 = vld [vmem:[%s2046_s29 + $0x11] sm:$0x1] }
  0x4a   : > { %v617_v48 = vpack.c.b16 %v616_v47, %v616_v47  ;;  %v722_v25 = vpack.c.bf16 %v714_v18, %v714_v18  ;;  %v736_v26 = vunpack.c.l.b16 %v720_v16  ;;  %v742_v27 = vrot.slane %v734_v17, 6  ;;  %v831_v47 = vld [vmem:[%s2046_s29 + $0x9] sm:$0x1]  ;;  %v808_v14 = vld [vmem:[%s2061_s15 + $0xd] sm:$0x1] }
  0x4b   : > { %vm537_vm11 = vcmp.eq.s32.totalorder %v536_v56, 1  ;;  %v723_v28 = vpack.c.bf16 %v715_v23, %v715_v23  ;;  %v737_v29 = vunpack.c.l.b16 %v721_v19  ;;  %v741_v30 = vsel %vm597_vm0, %v740_v22, %v732_v20  ;;  %v1092_v20 = vld [vmem:[%s2046_s29 + $0x6] sm:$0x1]  ;;  %v809_v23 = vld [vmem:[%s2061_s15 + $0x11] sm:$0x1] }
  0x4c   : > { %1796 = vmatmul.mubr.msk.bf16.vlgmr.msra.gmra.mrb[0].mxu0 %vm649_vm8, %v617_v48  ;;  %vm538_vm12 = vmor %vm537_vm11, %vm531_vm10  ;;  %v744_v31 = vrot.slane %v735_v21, 5  ;;  %v738_v32 = vunpack.c.l.b16 %v722_v25  ;;  %v743_v33 = vsel %vm600_vm1, %v742_v27, %v741_v30  ;;  %v746_v34 = vrot.slane %v736_v26, 4 }
  0x4d   : > { %1813 = vmatprep.mubr.msk.bf16.mxu0 %vm1945_vm5, %v1944_v24  ;;  %v2099_v57 = vsel %vm538_vm12, -1e+30, %v1944_v24  ;;  %v739_v35 = vunpack.c.l.b16 %v723_v28  ;;  %v748_v37 = vrot.slane %v737_v29, 3  ;;  %v838_v48 = vpack.c.bf16 %v830_v46, %v830_v46  ;;  %v810_v29 = vld [vmem:[%s2061_s15 + $0x15] sm:$0x1] }
  0x4e   : > { %v745_v36 = vsel %vm603_vm2, %v744_v31, %v743_v33  ;;  %v750_v39 = vrot.slane %v738_v32, 2  ;;  %v839_v51 = vpack.c.bf16 %v831_v47, %v831_v47  ;;  %v837_v52 = vpack.c.bf16 %v829_v49, %v829_v49  ;;  %v1093_v32 = vld [vmem:[%s2046_s29 + $0xa] sm:$0x1] }
  0x4f   : > { %v747_v38 = vsel %vm606_vm3, %v746_v34, %v745_v36  ;;  %v752_v41 = vrot.slane %v739_v35, 1  ;;  %v885_v53 = vunpack.c.l.b16 %v838_v48  ;;  %v840_v55 = vpack.c.bf16 %v832_v50, %v832_v50  ;;  %v1091_v35 = vld [vmem:[%s2046_s29 + $0x2] sm:$0x1] }
  0x50   : > { %v749_v40 = vsel %vm609_vm4, %v748_v37, %v747_v38  ;;  %v886_v56 = vunpack.c.l.b16 %v839_v51  ;;  %v815_v15 = vmul.f32 0.35355338, %v807_v6  ;;  %v813_v17 = vmul.f32 0.35355338, %v805_v9 }
  0x51   : > { %v751_v42 = vsel %vm612_vm6, %v750_v39, %v749_v40  ;;  %v844_v21 = vpack.c.bf16 %v836_v12, %v836_v12  ;;  %v816_v25 = vmul.f32 0.35355338, %v808_v14  ;;  %v1100_v33 = vpack.c.bf16 %v1092_v20, %v1092_v20 }
  0x52   : > { %v753_v43 = vsel %vm615_vm7, %v752_v41, %v751_v42  ;;  %v823_v27 = vpack.c.bf16 %v815_v15, %v815_v15  ;;  %v821_v30 = vpack.c.bf16 %v813_v17, %v813_v17  ;;  %v817_v34 = vmul.f32 0.35355338, %v809_v23  ;;  %v1094_v42 = vld [vmem:[%s2046_s29 + $0xe] sm:$0x1] }
  0x53   : > { %v754_v44 = vpack.c.b16 %v753_v43, %v753_v43  ;;  %v891_v36 = vunpack.c.l.b16 %v844_v21  ;;  %v824_v38 = vpack.c.bf16 %v816_v25, %v816_v25  ;;  %v818_v40 = vmul.f32 0.35355338, %v810_v29 }
  0x54   : > { %v855_v41 = vunpack.c.l.b16 %v823_v27  ;;  %v1101_v43 = vpack.c.bf16 %v1093_v32, %v1093_v32  ;;  %v853_v46 = vunpack.c.l.b16 %v821_v30  ;;  %v1099_v48 = vpack.c.bf16 %v1091_v35, %v1091_v35  ;;  %v1067_v35 = vld [vmem:[%s2061_s15 + $0x2] sm:$0x1] }
  0x55   : > { %v760_v45 = vsel %vm758_vm13, %v754_v44, 0  ;;  %v811_v44 = vld [vmem:[%s2061_s15 + $0x19] sm:$0x1]  ;;  %v1147_v49 = vunpack.c.l.b16 %v1100_v33  ;;  %v825_v50 = vpack.c.bf16 %v817_v34, %v817_v34  ;;  %v1354_v33 = vld [vmem:[%s2046_s29 + $0x7] sm:$0x1]  ;;  %vm1065_vm15 = vcmask 126016  }
  0x56   : > { %1800 = vmatpush3.bf16.msra.mxu1 %v760_v45  ;;  %v812_v45 = vld [vmem:[%s2061_s15 + $0x1d] sm:$0x1] }
  0x57   : > { %1805 = vmatprep.subr.bf16.mxu1 %v1944_v24 }
 0x11f   : > { %v690_v58 = vpop.f32.mrb[0].mxu0 }
 0x120   : > { %v691_v59 = vadd.f32 %v690_v58, %v2099_v57  ;;  %v1797_v60 = vpop.f32.mrb[1].mxu0  ;;  %v884_v58 = vunpack.c.l.b16 %v837_v52  ;;  %v904_v52 = vrot.slane %v891_v36, 1  ;;  %v1069_v36 = vld [vmem:[%s2061_s15 + $0xa] sm:$0x1] }
 0x121   : > { %v693_v61 = vpop.f32.mrb[2].mxu0  ;;  %v834_v60 = vld [vmem:[%s2046_s29 + $0x15] sm:$0x1] }
 0x122   : > { %v1798_v62 = vpop.f32.mrb[3].mxu0  ;;  %v696_v63 = vsel %vm649_vm8, %v691_v59, -inf  ;;  %v841_v61 = vpack.c.bf16 %v833_v54, %v833_v54  ;;  %v1095_v54 = vld [vmem:[%s2046_s29 + $0x12] sm:$0x1] }
 0x123   : > { %697 = vmax.xlane.f32.xlu0 %v696_v63  ;;  %v887_v62 = vunpack.c.l.b16 %v840_v55  ;;  %v806_v63 = vld [vmem:[%s2061_s15 + $0x5] sm:$0x1]  ;;  %v1102_v55 = vpack.c.bf16 %v1094_v42, %v1094_v42 }
 0x124   : > { %v888_v5 = vunpack.c.l.b16 %v841_v61  ;;  %v814_v7 = vmul.f32 0.35355338, %v806_v63  ;;  %v826_v61 = vpack.c.bf16 %v818_v40, %v818_v40  ;;  %v1146_v63 = vunpack.c.l.b16 %v1099_v48 }
 0x125   : > { %v896_v8 = vrot.slane %v887_v62, 5  ;;  %v1149_v6 = vunpack.c.l.b16 %v1102_v55 }
 0x126   : > { %v898_v16 = vrot.slane %v888_v5, 4  ;;  %v822_v18 = vpack.c.bf16 %v814_v7, %v814_v7  ;;  %v858_v12 = vunpack.c.l.b16 %v826_v61 }
 0x127   : > { %v1158_v20 = vrot.slane %v1149_v6, 5 }
 0x128   : > { %v854_v31 = vunpack.c.l.b16 %v822_v18 }
 0x12a   : > { %v861_v47 = vrot.slane %v854_v31, 7 }
 0x12c   : > { %v862_v62 = vsel %vm597_vm0, %v861_v47, %v853_v46  ;;  %v1355_v46 = vld [vmem:[%s2046_s29 + $0xb] sm:$0x1]  ;;  %v1362_v47 = vpack.c.bf16 %v1354_v33, %v1354_v33 }
 0x12d   : > { %v1363_v61 = vpack.c.bf16 %v1355_v46, %v1355_v46  ;;  %v1333_v46 = vld [vmem:[%s2061_s15 + $0x13] sm:$0x1] }
 0x1b0   : > { %v698_v0 = vpop.xlane.xlu0 %697 }
 0x1b1   : > { %v699_v1 = vsub.f32 %v691_v59, %v698_v0  ;;  %v892_v59 = vrot.slane %v885_v53, 7  ;;  %v894_v0 = vrot.slane %v886_v56, 6  ;;  %v856_v53 = vunpack.c.l.b16 %v824_v38 }
 0x1b2   : > { %v819_v56 = vmul.f32 0.35355338, %v811_v44 }
 0x1b3   : > { %v700_v2 = vmul.f32 1.442695, %v699_v1  ;;  %v835_v1 = vld [vmem:[%s2046_s29 + $0x19] sm:$0x1]  ;;  %v865_v5 = vrot.slane %v856_v53, 5 }
 0x1b4   : > { %v843_v10 = vpack.c.bf16 %v835_v1, %v835_v1  ;;  %v857_v1 = vunpack.c.l.b16 %v825_v50  ;;  %v1075_v50 = vmul.f32 0.35355338, %v1067_v35  ;;  %v1072_v53 = vld [vmem:[%s2061_s15 + $0x16] sm:$0x1] }
 0x1b5   : > { %1888 = vpow2.f32 %v700_v2  ;;  %v842_v2 = vpack.c.bf16 %v834_v60, %v834_v60  ;;  %v1148_v60 = vunpack.c.l.b16 %v1101_v43  ;;  %v1080_v6 = vmul.f32 0.35355338, %v1072_v53  ;;  %v1360_v53 = vld [vmem:[%s2046_s29 + $0x1f] sm:$0x1] }
 0x1b6   : > { %v890_v22 = vunpack.c.l.b16 %v843_v10 }
 0x1b7   : > { %v889_v13 = vunpack.c.l.b16 %v842_v2  ;;  %v1096_v2 = vld [vmem:[%s2046_s29 + $0x16] sm:$0x1]  ;;  %v1156_v10 = vrot.slane %v1148_v60, 6 }
 0x1b8   : > { %v902_v37 = vrot.slane %v890_v22, 2  ;;  %v1104_v14 = vpack.c.bf16 %v1096_v2, %v1096_v2 }
 0x1b9   : > { %v900_v26 = vrot.slane %v889_v13, 3  ;;  %v1097_v13 = vld [vmem:[%s2046_s29 + $0x1a] sm:$0x1] }
 0x1ba   : > { %v1105_v23 = vpack.c.bf16 %v1097_v13, %v1097_v13  ;;  %v1151_v29 = vunpack.c.l.b16 %v1104_v14  ;;  %v1331_v13 = vld [vmem:[%s2061_s15 + $0xb] sm:$0x1] }
 0x1bc   : > { %v1152_v40 = vunpack.c.l.b16 %v1105_v23  ;;  %v1162_v44 = vrot.slane %v1151_v29, 3 }
 0x1bf   : > { %v2103_v3 = vpop.eup %1888 }
 0x1c0   : > { %v702_v4 = vsel %vm649_vm8, %v2103_v3, 0.0 }
 0x1c1   : > { %703 = vadd.xlane.f32.xlu0 %v702_v4  ;;  %v893_v4 = vsel %vm597_vm0, %v892_v59, %v884_v58  ;;  %v820_v58 = vmul.f32 0.35355338, %v812_v45  ;;  %v863_v59 = vrot.slane %v855_v41, 6  ;;  %v1070_v41 = vld [vmem:[%s2061_s15 + $0xe] sm:$0x1] }
 0x1c2   : > { %v895_v11 = vsel %vm600_vm1, %v894_v0, %v893_v4  ;;  %v1154_v0 = vrot.slane %v1147_v49, 7  ;;  %v1103_v4 = vpack.c.bf16 %v1095_v54, %v1095_v54  ;;  %v1071_v45 = vld [vmem:[%s2061_s15 + $0x12] sm:$0x1]  ;;  %v1073_v54 = vld [vmem:[%s2061_s15 + $0x1a] sm:$0x1] }
 0x1c3   : > { %v897_v19 = vsel %vm603_vm2, %v896_v8, %v895_v11  ;;  %v827_v8 = vpack.c.bf16 %v819_v56, %v819_v56  ;;  %v864_v9 = vsel %vm600_vm1, %v863_v59, %v862_v62  ;;  %v828_v11 = vpack.c.bf16 %v820_v58, %v820_v58  ;;  %v1356_v56 = vld [vmem:[%s2046_s29 + $0xf] sm:$0x1]  ;;  %v1330_v62 = vld [vmem:[%s2061_s15 + $0x7] sm:$0x1] }
 0x1c4   : > { %v899_v28 = vsel %vm606_vm3, %v898_v16, %v897_v19  ;;  %v1155_v15 = vsel %vm597_vm0, %v1154_v0, %v1146_v63  ;;  %v867_v16 = vrot.slane %v857_v1, 4  ;;  %v1150_v17 = vunpack.c.l.b16 %v1103_v4  ;;  %v1098_v19 = vld [vmem:[%s2046_s29 + $0x1e] sm:$0x1] }
 0x1c5   : > { %v901_v39 = vsel %vm609_vm4, %v900_v26, %v899_v28  ;;  %v866_v18 = vsel %vm603_vm2, %v865_v5, %v864_v9  ;;  %v859_v22 = vunpack.c.l.b16 %v827_v8  ;;  %v1157_v25 = vsel %vm600_vm1, %v1156_v10, %v1155_v15  ;;  %v1068_v26 = vld [vmem:[%s2061_s15 + $0x6] sm:$0x1]  ;;  %v1074_v0 = vld [vmem:[%s2061_s15 + $0x1e] sm:$0x1]  ;;  %v1357_v9 = vld [vmem:[%s2046_s29 + $0x13] sm:$0x1] }
 0x1c6   : > { %v903_v51 = vsel %vm612_vm6, %v902_v37, %v901_v39  ;;  %v2164_v27 = vunpack.c.l.b16 %v828_v11  ;;  %v869_v28 = vrot.slane %v858_v12, 3  ;;  %v868_v30 = vsel %vm606_vm3, %v867_v16, %v866_v18 }
 0x1c7   : > { %v905_v7 = vsel %vm615_vm7, %v904_v52, %v903_v51  ;;  %v1106_v31 = vpack.c.bf16 %v1098_v19, %v1098_v19  ;;  %v1160_v32 = vrot.slane %v1150_v17, 4  ;;  %v1159_v34 = vsel %vm603_vm2, %v1158_v20, %v1157_v25  ;;  %v1353_v52 = vld [vmem:[%s2046_s29 + $0x3] sm:$0x1] }
 0x1c8   : > { %v906_v21 = vpack.c.b16 %v905_v7, %v905_v7  ;;  %v1076_v37 = vmul.f32 0.35355338, %v1068_v26  ;;  %v871_v39 = vrot.slane %v859_v22, 2  ;;  %v870_v42 = vsel %vm609_vm4, %v869_v28, %v868_v30  ;;  %v1329_v20 = vld [vmem:[%s2061_s15 + $0x3] sm:$0x1] }
 0x1c9   : > { %v873_v43 = vrot.slane %v2164_v27, 1  ;;  %v1153_v48 = vunpack.c.l.b16 %v1106_v31  ;;  %v1161_v49 = vsel %vm606_vm3, %v1160_v32, %v1159_v34  ;;  %v1077_v51 = vmul.f32 0.35355338, %v1069_v36  ;;  %v1358_v28 = vld [vmem:[%s2046_s29 + $0x17] sm:$0x1] }
 0x1ca   : > { %v2172_v38 = vsel %vm649_vm8, %v906_v21, 0  ;;  %v1084_v55 = vpack.c.bf16 %v1076_v37, %v1076_v37  ;;  %v2185_v58 = vsel %vm612_vm6, %v871_v39, %v870_v42  ;;  %v1164_v59 = vrot.slane %v1152_v40, 2  ;;  %v1332_v30 = vld [vmem:[%s2061_s15 + $0xf] sm:$0x1]  ;;  %v1359_v42 = vld [vmem:[%s2046_s29 + $0x1b] sm:$0x1] }
 0x1cb   : > { %v1078_v60 = vmul.f32 0.35355338, %v1070_v41  ;;  %v1163_v63 = vsel %vm609_vm4, %v1162_v44, %v1161_v49  ;;  %v1079_v1 = vmul.f32 0.35355338, %v1071_v45  ;;  %v1361_v2 = vpack.c.bf16 %v1353_v52, %v1353_v52 }
 0x1cc   : > { %v1409_v4 = vunpack.c.l.b16 %v1362_v47  ;;  %v1166_v5 = vrot.slane %v1153_v48, 1  ;;  %v1083_v7 = vpack.c.bf16 %v1075_v50, %v1075_v50  ;;  %v1085_v8 = vpack.c.bf16 %v1077_v51, %v1077_v51 }
 0x1cd   : > { %v2191_v10 = vmul.f32 0.35355338, %v1073_v54  ;;  %v1116_v11 = vunpack.c.l.b16 %v1084_v55  ;;  %v1364_v12 = vpack.c.bf16 %v1356_v56, %v1356_v56  ;;  %v1338_v14 = vmul.f32 0.35355338, %v1330_v62  ;;  %v1334_v62 = vld [vmem:[%s2061_s15 + $0x17] sm:$0x1] }
 0x1ce   : > { %v1165_v16 = vsel %vm612_vm6, %v1164_v59, %v1163_v63  ;;  %v2195_v17 = vmul.f32 0.35355338, %v1074_v0  ;;  %v1086_v18 = vpack.c.bf16 %v1078_v60, %v1078_v60  ;;  %v1410_v19 = vunpack.c.l.b16 %v1363_v61 }
 0x1cf   : > { %v1087_v21 = vpack.c.bf16 %v1079_v1, %v1079_v1  ;;  %v1408_v22 = vunpack.c.l.b16 %v1361_v2  ;;  %v1416_v23 = vrot.slane %v1409_v4, 7  ;;  %v1115_v25 = vunpack.c.l.b16 %v1083_v7 }
 0x1d0   : > { %v1117_v26 = vunpack.c.l.b16 %v1085_v8  ;;  %v1365_v29 = vpack.c.bf16 %v1357_v9, %v1357_v9  ;;  %v1339_v31 = vmul.f32 0.35355338, %v1331_v13  ;;  %v1123_v32 = vrot.slane %v1116_v11, 7  ;;  %v1335_v11 = vld [vmem:[%s2061_s15 + $0x1b] sm:$0x1] }
 0x1d1   : > { %v1411_v33 = vunpack.c.l.b16 %v1364_v12  ;;  %v1337_v34 = vmul.f32 0.35355338, %v1329_v20  ;;  %v1346_v35 = vpack.c.bf16 %v1338_v14, %v1338_v14  ;;  %v2201_v36 = vsel %vm615_vm7, %v1166_v5, %v1165_v16 }
 0x1d2   : > { %v1088_v37 = vpack.c.bf16 %v1080_v6, %v1080_v6  ;;  %v1089_v39 = vpack.c.bf16 %v2191_v10, %v2191_v10  ;;  %v1418_v40 = vrot.slane %v1410_v19, 6  ;;  %v1118_v41 = vunpack.c.l.b16 %v1086_v18 }
 0x1d3   : > { %v1366_v44 = vpack.c.bf16 %v1358_v28, %v1358_v28  ;;  %v1417_v45 = vsel %vm597_vm0, %v1416_v23, %v1408_v22  ;;  %v1340_v47 = vmul.f32 0.35355338, %v1332_v30  ;;  %v1090_v48 = vpack.c.bf16 %v2195_v17, %v2195_v17 }
 0x1d4   : > { %v1125_v49 = vrot.slane %v1117_v26, 6  ;;  %v1412_v50 = vunpack.c.l.b16 %v1365_v29  ;;  %v1347_v51 = vpack.c.bf16 %v1339_v31, %v1339_v31  ;;  %v1124_v52 = vsel %vm597_vm0, %v1123_v32, %v1115_v25  ;;  %v1336_v26 = vld [vmem:[%s2061_s15 + $0x1f] sm:$0x1] }
 0x1d5   : > { %v1420_v54 = vrot.slane %v1411_v33, 5  ;;  %v1345_v55 = vpack.c.bf16 %v1337_v34, %v1337_v34  ;;  %v1378_v56 = vunpack.c.l.b16 %v1346_v35  ;;  %v1119_v59 = vunpack.c.l.b16 %v1087_v21 }
 0x1d6   : > { %v1367_v60 = vpack.c.bf16 %v1359_v42, %v1359_v42  ;;  %v1419_v61 = vsel %vm600_vm1, %v1418_v40, %v1417_v45  ;;  %v1341_v63 = vmul.f32 0.35355338, %v1333_v46  ;;  %v1120_v0 = vunpack.c.l.b16 %v1088_v37 }
 0x1d7   : > { %v1127_v1 = vrot.slane %v1118_v41, 5  ;;  %v1413_v2 = vunpack.c.l.b16 %v1366_v44  ;;  %v1348_v4 = vpack.c.bf16 %v1340_v47, %v1340_v47  ;;  %v1126_v5 = vsel %vm600_vm1, %v1125_v49, %v1124_v52 }
 0x1d8   : > { %v1368_v6 = vpack.c.bf16 %v1360_v53, %v1360_v53  ;;  %v1422_v7 = vrot.slane %v1412_v50, 4  ;;  %v1379_v8 = vunpack.c.l.b16 %v1347_v51  ;;  %v1421_v10 = vsel %vm603_vm2, %v1420_v54, %v1419_v61 }
 0x1d9   : > { %v1342_v12 = vmul.f32 0.35355338, %v1334_v62  ;;  %v1377_v13 = vunpack.c.l.b16 %v1345_v55  ;;  %v1385_v14 = vrot.slane %v1378_v56, 7  ;;  %v1129_v16 = vrot.slane %v1119_v59, 4 }
 0x1da   : > { %v1414_v17 = vunpack.c.l.b16 %v1367_v60  ;;  %v1349_v18 = vpack.c.bf16 %v1341_v63, %v1341_v63  ;;  %v1121_v19 = vunpack.c.l.b16 %v1089_v39  ;;  %v1128_v20 = vsel %vm603_vm2, %v1127_v1, %v1126_v5 }
 0x1db   : > { %v1424_v21 = vrot.slane %v1413_v2, 3  ;;  %v1380_v22 = vunpack.c.l.b16 %v1348_v4  ;;  %v1423_v25 = vsel %vm606_vm3, %v1422_v7, %v1421_v10  ;;  %v1343_v28 = vmul.f32 0.35355338, %v1335_v11 }
 0x1dc   : > { %v1387_v29 = vrot.slane %v1379_v8, 6  ;;  %v1131_v30 = vrot.slane %v1120_v0, 3  ;;  %v1415_v31 = vunpack.c.l.b16 %v1368_v6  ;;  %v1350_v32 = vpack.c.bf16 %v1342_v12, %v1342_v12 }
 0x1dd   : > { %v1386_v33 = vsel %vm597_vm0, %v1385_v14, %v1377_v13  ;;  %v1130_v34 = vsel %vm606_vm3, %v1129_v16, %v1128_v20  ;;  %v1426_v35 = vrot.slane %v1414_v17, 2  ;;  %v1381_v37 = vunpack.c.l.b16 %v1349_v18 }
 0x1de   : > { %v1122_v39 = vunpack.c.l.b16 %v1090_v48  ;;  %v1425_v40 = vsel %vm609_vm4, %v1424_v21, %v1423_v25  ;;  %v1344_v41 = vmul.f32 0.35355338, %v1336_v26  ;;  %v1389_v42 = vrot.slane %v1380_v22, 5 }
 0x1df   : > { %v1168_v27 = vpack.c.b16 %v2201_v36, %v2201_v36  ;;  %v1388_v44 = vsel %vm600_vm1, %v1387_v29, %v1386_v33  ;;  %v1132_v45 = vsel %vm609_vm4, %v1131_v30, %v1130_v34  ;;  %v1382_v46 = vunpack.c.l.b16 %v1350_v32 }
 0x1e0   : > { %v1427_v48 = vsel %vm612_vm6, %v1426_v35, %v1425_v40  ;;  %v1391_v49 = vrot.slane %v1381_v37, 4  ;;  %v1135_v50 = vrot.slane %v1122_v39, 1  ;;  %v1352_v51 = vpack.c.bf16 %v1344_v41, %v1344_v41 }
 0x1e1   : > { %v1390_v52 = vsel %vm603_vm2, %v1389_v42, %v1388_v44  ;;  %v1173_v53 = vsel %vm649_vm8, %v1168_v27, 0  ;;  %v1393_v56 = vrot.slane %v1382_v46, 3  ;;  %v966_v44 = vld [vmem:[%s2108_s7 + $0x5] sm:$0x1]  ;;  %v965_v46 = vld [vmem:[%s2108_s7 + $0x1] sm:$0x1] }
 0x1e2   : > { %v1392_v59 = vsel %vm606_vm3, %v1391_v49, %v1390_v52  ;;  %v1384_v61 = vunpack.c.l.b16 %v1352_v51  ;;  %v969_v49 = vld [vmem:[%s2108_s7 + $0x11] sm:$0x1] }
 0x1e3   : > { %v1394_v0 = vsel %vm609_vm4, %v1393_v56, %v1392_v59  ;;  %v971_v56 = vld [vmem:[%s2108_s7 + $0x19] sm:$0x1] }
 0x1e4   : > { %v1397_v2 = vrot.slane %v1384_v61, 1 }
 0x24e   : > { %v704_v15 = vpop.xlane.xlu0 %703 }
 0x24f   : > { %1890 = vrcp.f32 %v704_v15 }
 0x259   : > { %v1891_v9 = vpop.eup %1890 }
 0x25a   : > { %v706_v15 = vmul.f32 %v1891_v9, %v2103_v3  ;;  %v874_v3 = vsel %vm615_vm7, %v873_v43, %v2185_v58  ;;  %v1133_v43 = vrot.slane %v1121_v19, 2  ;;  %v1351_v58 = vpack.c.bf16 %v1343_v28, %v1343_v28 }
 0x25b   : > { %v875_v47 = vpack.c.b16 %v874_v3, %v874_v3 }
 0x25c   : > { %v707_v23 = vpack.c.bf16 %v706_v15, %v706_v15  ;;  %v1134_v36 = vsel %vm612_vm6, %v1133_v43, %v1132_v45  ;;  %v1383_v54 = vunpack.c.l.b16 %v1351_v58  ;;  %v967_v45 = vld [vmem:[%s2108_s7 + $0x9] sm:$0x1] }
 0x25d   : > { %v1136_v60 = vsel %vm615_vm7, %v1135_v50, %v1134_v36  ;;  %v973_v50 = vpack.c.bf16 %v965_v46, %v965_v46  ;;  %v977_v36 = vpack.c.bf16 %v969_v49, %v969_v49 }
 0x25e   : > { %1802 = vmatmul.mubr.msk.bf16.vlgmr.msra.gmra.mrb[0].mxu1 %vm649_vm8, %v707_v23  ;;  %v1395_v63 = vrot.slane %v1383_v54, 2  ;;  %v1137_v1 = vpack.c.b16 %v1136_v60, %v1136_v60 }
 0x25f   : > { %1806 = vmatpush3.bf16.xpose.msra.mxu1 %v2172_v38  ;;  %1807 = vmatprep.mubr.msk.bf16.mxu1 %vm1945_vm5, %v1944_v24  ;;  %v1428_v38 = vrot.slane %v1415_v31, 1  ;;  %v989_v60 = vunpack.c.l.b16 %v973_v50 }
 0x260   : > { %1817 = vmatprep.subr.bf16.mxu1 %v1944_v24  ;;  %v1396_v5 = vsel %vm612_vm6, %v1395_v63, %v1394_v0  ;;  %v972_v0 = vld [vmem:[%s2108_s7 + $0x1d] sm:$0x1] }
 0x261   : > { %v1429_v55 = vsel %vm615_vm7, %v1428_v38, %v1427_v48  ;;  %v1398_v6 = vsel %vm615_vm7, %v1397_v2, %v1396_v5  ;;  %v974_v38 = vpack.c.bf16 %v966_v44, %v966_v44  ;;  %v975_v48 = vpack.c.bf16 %v967_v45, %v967_v45 }
 0x262   : > { %v1430_v62 = vpack.c.b16 %v1429_v55, %v1429_v55  ;;  %v1399_v7 = vpack.c.b16 %v1398_v6, %v1398_v6  ;;  %v993_v2 = vunpack.c.l.b16 %v977_v36  ;;  %v980_v5 = vpack.c.bf16 %v972_v0, %v972_v0  ;;  %v1493_v36 = vld [vmem:[%s2108_s7 + $0x13] sm:$0x1] }
 0x263   : > { %v990_v52 = vunpack.c.l.b16 %v974_v38  ;;  %v991_v54 = vunpack.c.l.b16 %v975_v48  ;;  %v1492_v38 = vld [vmem:[%s2108_s7 + $0xf] sm:$0x1] }
 0x264   : > { %v1435_v4 = vsel %vm649_vm8, %v1430_v62, 0 }
 0x265   : > { %v997_v62 = vrot.slane %v990_v52, 7 }
 0x266   : > { %1808 = vmatmul.mubr.msk.bf16.vlgmr.msra.gmra.mrb[4].mxu1 %vm649_vm8, %v875_v47  ;;  %v968_v47 = vld [vmem:[%s2108_s7 + $0xd] sm:$0x1] }
 0x267   : > { %1818 = vmatpush3.bf16.xpose.msra.mxu1 %v1173_v53  ;;  %1819 = vmatprep.mubr.msk.bf16.mxu1 %vm1945_vm5, %v1944_v24  ;;  %v976_v51 = vpack.c.bf16 %v968_v47, %v968_v47  ;;  %v970_v53 = vld [vmem:[%s2108_s7 + $0x15] sm:$0x1]  ;;  %v1233_v47 = vld [vmem:[%s2108_s7 + $0x1a] sm:$0x1] }
 0x268   : > { %1829 = vmatprep.subr.bf16.mxu1 %v1944_v24  ;;  %v978_v59 = vpack.c.bf16 %v970_v53, %v970_v53 }
 0x269   : > { %v992_v61 = vunpack.c.l.b16 %v976_v51 }
 0x26a   : > { %v994_v6 = vunpack.c.l.b16 %v978_v59  ;;  %v1241_v59 = vpack.c.bf16 %v1233_v47, %v1233_v47 }
 0x26e   : > { %1820 = vmatmul.mubr.msk.bf16.vlgmr.msra.gmra.mrb[8].mxu1 %vm649_vm8, %v1137_v1  ;;  %v979_v1 = vpack.c.bf16 %v971_v56, %v971_v56  ;;  %v1234_v56 = vld [vmem:[%s2108_s7 + $0x1e] sm:$0x1] }
 0x26f   : > { %1830 = vmatpush3.bf16.xpose.msra.mxu1 %v1435_v4  ;;  %1831 = vmatprep.mubr.msk.bf16.mxu1 %vm1945_vm5, %v1944_v24  ;;  %v999_v4 = vrot.slane %v991_v54, 6  ;;  %v1500_v54 = vpack.c.bf16 %v1492_v38, %v1492_v38 }
 0x276   : > { %1832 = vmatmul.mubr.msk.bf16.vlgmr.msra.gmra.mrb[12].mxu1 %vm649_vm8, %v1399_v7  ;;  %v998_v7 = vsel %vm597_vm0, %v997_v62, %v989_v60 }
 0x331   : > { %v796_v8 = vpop.f32.mrb[0].mxu1 }
 0x332   : > { %v802_v9 = vpack.c.bf16 %v796_v8, %v796_v8  ;;  %v1803_v10 = vpop.f32.mrb[1].mxu1  ;;  %v1001_v8 = vrot.slane %v992_v61, 5 }
 0x333   : > { %v799_v11 = vpop.f32.mrb[2].mxu1  ;;  %v1000_v10 = vsel %vm600_vm1, %v999_v4, %v998_v7  ;;  %v1501_v4 = vpack.c.bf16 %v1493_v36, %v1493_v36  ;;  %v1516_v7 = vunpack.c.l.b16 %v1500_v54 }
 0x334   : > { %804 = vst.msk [vmem:[%s2260_s11] sm:$0xf] %vm803_vm14, %v802_v9  ;;  %v1804_v12 = vpop.f32.mrb[3].mxu1  ;;  %v995_v9 = vunpack.c.l.b16 %v979_v1  ;;  %v1003_v11 = vrot.slane %v993_v2, 4  ;;  %v1494_v2 = vld [vmem:[%s2108_s7 + $0x17] sm:$0x1] }
 0x335   : > { %v996_v12 = vunpack.c.l.b16 %v980_v5  ;;  %v1242_v5 = vpack.c.bf16 %v1234_v56, %v1234_v56 }
 0x339   : > { %v947_v13 = vpop.f32.mrb[4].mxu1 }
 0x33a   : > { %v948_v14 = vadd.f32 %v947_v13, %v2099_v57  ;;  %v1809_v15 = vpop.f32.mrb[5].mxu1  ;;  %v1002_v13 = vsel %vm603_vm2, %v1001_v8, %v1000_v10  ;;  %v1257_v8 = vunpack.c.l.b16 %v1241_v59 }
 0x33b   : > { %v950_v16 = vpop.f32.mrb[6].mxu1  ;;  %v1004_v15 = vsel %vm606_vm3, %v1003_v11, %v1002_v13  ;;  %v1495_v11 = vld [vmem:[%s2108_s7 + $0x1b] sm:$0x1] }
 0x33c   : > { %v1810_v17 = vpop.f32.mrb[7].mxu1  ;;  %v953_v18 = vsel %vm649_vm8, %v948_v14, -inf  ;;  %v1007_v16 = vrot.slane %v995_v9, 2 }
 0x33d   : > { %954 = vmax.xlane.f32.xlu1 %v953_v18  ;;  %v1009_v18 = vrot.slane %v996_v12, 1  ;;  %v1502_v12 = vpack.c.bf16 %v1494_v2, %v1494_v2 }
 0x341   : > { %v1209_v19 = vpop.f32.mrb[8].mxu1 }
 0x342   : > { %v1210_v20 = vadd.f32 %v1209_v19, %v2099_v57  ;;  %v1821_v21 = vpop.f32.mrb[9].mxu1 }
 0x343   : > { %v1212_v22 = vpop.f32.mrb[10].mxu1 }
 0x344   : > { %v1822_v23 = vpop.f32.mrb[11].mxu1  ;;  %v1215_v25 = vsel %vm649_vm8, %v1210_v20, -inf }
 0x345   : > { %1216 = vmax.xlane.f32.xlu1 %v1215_v25  ;;  %v1228_v23 = vld [vmem:[%s2108_s7 + $0x6] sm:$0x1]  ;;  %v1229_v25 = vld [vmem:[%s2108_s7 + $0xa] sm:$0x1] }
 0x349   : > { %v1471_v26 = vpop.f32.mrb[12].mxu1 }
 0x34a   : > { %v1472_v28 = vadd.f32 %v1471_v26, %v2099_v57  ;;  %v1833_v29 = vpop.f32.mrb[13].mxu1  ;;  %v1236_v26 = vpack.c.bf16 %v1228_v23, %v1228_v23 }
 0x34b   : > { %v1474_v30 = vpop.f32.mrb[14].mxu1  ;;  %v1230_v29 = vld [vmem:[%s2108_s7 + $0xe] sm:$0x1] }
 0x34c   : > { %v1834_v31 = vpop.f32.mrb[15].mxu1  ;;  %v1477_v32 = vsel %vm649_vm8, %v1472_v28, -inf  ;;  %v1237_v30 = vpack.c.bf16 %v1229_v25, %v1229_v25  ;;  %v1518_v25 = vunpack.c.l.b16 %v1502_v12 }
 0x34d   : > { %1478 = vmax.xlane.f32.xlu0 %v1477_v32  ;;  %v1252_v32 = vunpack.c.l.b16 %v1236_v26 }
 0x3ca   : > { %v955_v33 = vpop.xlane.xlu1 %954 }
 0x3cb   : > { %v956_v3 = vsub.f32 %v948_v14, %v955_v33  ;;  %v1005_v14 = vrot.slane %v994_v6, 3  ;;  %v1490_v33 = vld [vmem:[%s2108_s7 + $0x7] sm:$0x1] }
 0x3cd   : > { %v957_v34 = vmul.f32 1.442695, %v956_v3  ;;  %v1006_v17 = vsel %vm609_vm4, %v1005_v14, %v1004_v15  ;;  %v1231_v3 = vld [vmem:[%s2108_s7 + $0x12] sm:$0x1]  ;;  %v1517_v15 = vunpack.c.l.b16 %v1501_v4 }
 0x3ce   : > { %v1008_v19 = vsel %vm612_vm6, %v1007_v16, %v1006_v17  ;;  %v1258_v16 = vunpack.c.l.b16 %v1242_v5  ;;  %v1525_v17 = vrot.slane %v1516_v7, 5 }
 0x3cf   : > { %1892 = vpow2.f32 %v957_v34  ;;  %v1238_v34 = vpack.c.bf16 %v1230_v29, %v1230_v29  ;;  %v1527_v26 = vrot.slane %v1517_v15, 4 }
 0x3d1   : > { %v1254_v44 = vunpack.c.l.b16 %v1238_v34 }
 0x3d2   : > { %v1217_v35 = vpop.xlane.xlu1 %1216 }
 0x3d3   : > { %v1218_v37 = vsub.f32 %v1210_v20, %v1217_v35  ;;  %v1010_v20 = vsel %vm615_vm7, %v1009_v18, %v1008_v19  ;;  %v1253_v35 = vunpack.c.l.b16 %v1237_v30  ;;  %v1263_v53 = vrot.slane %v1254_v44, 5 }
 0x3d4   : > { %v1011_v21 = vpack.c.b16 %v1010_v20, %v1010_v20  ;;  %v1269_v19 = vrot.slane %v1257_v8, 2  ;;  %v1496_v20 = vld [vmem:[%s2108_s7 + $0x1f] sm:$0x1] }
 0x3d5   : > { %v1219_v39 = vmul.f32 1.442695, %v1218_v37  ;;  %v1261_v45 = vrot.slane %v1253_v35, 6  ;;  %v1504_v29 = vpack.c.bf16 %v1496_v20, %v1496_v20 }
 0x3d6   : > { %v1016_v22 = vsel %vm758_vm13, %v1011_v21, 0  ;;  %v1503_v21 = vpack.c.bf16 %v1495_v11, %v1495_v11 }
 0x3d7   : > { %1894 = vpow2.f32 %v1219_v39  ;;  %1812 = vmatpush3.bf16.msra.mxu0 %v1016_v22  ;;  %v1259_v39 = vrot.slane %v1252_v32, 7  ;;  %v1520_v35 = vunpack.c.l.b16 %v1504_v29 }
 0x3d8   : > { %1823 = vmatprep.subr.bf16.mxu0 %v1944_v24  ;;  %v1519_v32 = vunpack.c.l.b16 %v1503_v21 }
 0x3d9   : > { %v2269_v40 = vpop.eup %1892 }
 0x3da   : > { %v1479_v57 = vpop.xlane.xlu0 %1478  ;;  %v959_v41 = vsel %vm649_vm8, %v2269_v40, 0.0 }
 0x3db   : > { %v1480_v42 = vsub.f32 %v1472_v28, %v1479_v57  ;;  %960 = vadd.xlane.f32.xlu1 %v959_v41  ;;  %v1227_v28 = vld [vmem:[%s2108_s7 + $0x2] sm:$0x1]  ;;  %v1491_v57 = vld [vmem:[%s2108_s7 + $0xb] sm:$0x1]  ;;  %v1498_v41 = vpack.c.bf16 %v1490_v33, %v1490_v33  ;;  %v1529_v33 = vrot.slane %v1518_v25, 3 }
 0x3dc   : > { %v1235_v31 = vpack.c.bf16 %v1227_v28, %v1227_v28  ;;  %v1499_v46 = vpack.c.bf16 %v1491_v57, %v1491_v57  ;;  %v1271_v28 = vrot.slane %v1258_v16, 1 }
 0x3dd   : > { %v1481_v27 = vmul.f32 1.442695, %v1480_v42  ;;  %v1232_v42 = vld [vmem:[%s2108_s7 + $0x16] sm:$0x1]  ;;  %v1514_v51 = vunpack.c.l.b16 %v1498_v41 }
 0x3de   : > { %v1251_v37 = vunpack.c.l.b16 %v1235_v31  ;;  %v1240_v48 = vpack.c.bf16 %v1232_v42, %v1232_v42  ;;  %v1515_v61 = vunpack.c.l.b16 %v1499_v46 }
 0x3df   : > { %1896 = vpow2.f32 %v1481_v27  ;;  %v1239_v27 = vpack.c.bf16 %v1231_v3, %v1231_v3  ;;  %v1521_v0 = vrot.slane %v1514_v51, 7 }
 0x3e0   : > { %v1260_v49 = vsel %vm597_vm0, %v1259_v39, %v1251_v37  ;;  %v1256_v62 = vunpack.c.l.b16 %v1240_v48  ;;  %v1523_v9 = vrot.slane %v1515_v61, 6  ;;  %v1531_v39 = vrot.slane %v1519_v32, 2 }
 0x3e1   : > { %v2273_v43 = vpop.eup %1894  ;;  %v1255_v52 = vunpack.c.l.b16 %v1239_v27  ;;  %v1262_v60 = vsel %vm600_vm1, %v1261_v45, %v1260_v49  ;;  %v1533_v27 = vrot.slane %v1520_v35, 1 }
 0x3e2   : > { %v1221_v58 = vsel %vm649_vm8, %v2273_v43, 0.0  ;;  %v1264_v6 = vsel %vm603_vm2, %v1263_v53, %v1262_v60  ;;  %v1267_v10 = vrot.slane %v1256_v62, 3 }
 0x3e3   : > { %1222 = vadd.xlane.f32.xlu0 %v1221_v58  ;;  %v1489_v58 = vld [vmem:[%s2108_s7 + $0x3] sm:$0x1]  ;;  %v1265_v1 = vrot.slane %v1255_v52, 4 }
 0x3e4   : > { %v1497_v50 = vpack.c.bf16 %v1489_v58, %v1489_v58 }
 0x3e5   : > { %v1266_v14 = vsel %vm606_vm3, %v1265_v1, %v1264_v6 }
 0x3e6   : > { %v1268_v23 = vsel %vm609_vm4, %v1267_v10, %v1266_v14 }
 0x3e7   : > { %v1270_v31 = vsel %vm612_vm6, %v1269_v19, %v1268_v23 }
 0x3e8   : > { %v1272_v34 = vsel %vm615_vm7, %v1271_v28, %v1270_v31 }
 0x3e9   : > { %v2283_v55 = vpop.eup %1896  ;;  %v1273_v41 = vpack.c.b16 %v1272_v34, %v1272_v34 }
 0x3ea   : > { %v1483_v63 = vsel %vm649_vm8, %v2283_v55, 0.0 }
 0x3eb   : > { %1484 = vadd.xlane.f32.xlu1 %v1483_v63  ;;  %v1513_v63 = vunpack.c.l.b16 %v1497_v50  ;;  %v1278_v38 = vsel %vm758_vm13, %v1273_v41, 0 }
 0x3ed   : > { %v1522_v13 = vsel %vm597_vm0, %v1521_v0, %v1513_v63  ;;  %vm1327_vm0 = vcmask 191616  }
 0x3ee   : > { %v1524_v22 = vsel %vm600_vm1, %v1523_v9, %v1522_v13  ;;  %vm1589_vm1 = vcmask 257216  }
 0x3ef   : > { %v1526_v30 = vsel %vm603_vm2, %v1525_v17, %v1524_v22 }
 0x3f0   : > { %v1528_v3 = vsel %vm606_vm3, %v1527_v26, %v1526_v30 }
 0x3f1   : > { %v1530_v57 = vsel %vm609_vm4, %v1529_v33, %v1528_v3 }
 0x3f2   : > { %v1532_v44 = vsel %vm612_vm6, %v1531_v39, %v1530_v57 }
 0x3f3   : > { %v1534_v46 = vsel %vm615_vm7, %v1533_v27, %v1532_v44 }
 0x3f4   : > { %v1535_v48 = vpack.c.b16 %v1534_v46, %v1534_v46 }
 0x3f6   : > { %v1540_v51 = vsel %vm758_vm13, %v1535_v48, 0 }
 0x468   : > { %v961_v18 = vpop.xlane.xlu1 %960 }
 0x469   : > { %1898 = vrcp.f32 %v961_v18 }
 0x470   : > { %v1223_v37 = vpop.xlane.xlu0 %1222 }
 0x471   : > { %1900 = vrcp.f32 %v1223_v37 }
 0x473   : > { %v1899_v42 = vpop.eup %1898 }
 0x474   : > { %v963_v58 = vmul.f32 %v1899_v42, %v2269_v40 }
 0x476   : > { %v964_v45 = vpack.c.bf16 %v963_v58, %v963_v58 }
 0x478   : > { %1814 = vmatmul.mubr.msk.bf16.vlgmr.msra.gmra.mrb[4].mxu0 %vm649_vm8, %v964_v45  ;;  %v1485_v47 = vpop.xlane.xlu1 %1484 }
 0x479   : > { %1824 = vmatpush3.bf16.msra.mxu0 %v1278_v38  ;;  %1902 = vrcp.f32 %v1485_v47  ;;  %1825 = vmatprep.mubr.msk.bf16.mxu0 %vm1945_vm5, %v1944_v24 }
 0x47a   : > { %1835 = vmatprep.subr.bf16.mxu0 %v1944_v24 }
 0x47b   : > { %v1901_v49 = vpop.eup %1900 }
 0x47c   : > { %v1225_v40 = vmul.f32 %v1901_v49, %v2273_v43 }
 0x47e   : > { %v1226_v50 = vpack.c.bf16 %v1225_v40, %v1225_v40 }
 0x480   : > { %1826 = vmatmul.mubr.msk.bf16.vlgmr.msra.gmra.mrb[8].mxu0 %vm649_vm8, %v1226_v50 }
 0x481   : > { %1836 = vmatpush3.bf16.msra.mxu0 %v1540_v51  ;;  %1837 = vmatprep.mubr.msk.bf16.mxu0 %vm1945_vm5, %v1944_v24 }
 0x483   : > { %v1903_v52 = vpop.eup %1902 }
 0x484   : > { %v1487_v53 = vmul.f32 %v1903_v52, %v2283_v55 }
 0x486   : > { %v1488_v36 = vpack.c.bf16 %v1487_v53, %v1487_v53 }
 0x488   : > { %1838 = vmatmul.mubr.msk.bf16.vlgmr.msra.gmra.mrb[12].mxu0 %vm649_vm8, %v1488_v36 }
 0x54b   : > { %v1052_v54 = vpop.f32.mrb[4].mxu0 }
 0x54c   : > { %v1774_v56 = vpack.c.bf16 %v1052_v54, %v1052_v54  ;;  %v1815_v59 = vpop.f32.mrb[5].mxu0 }
 0x54d   : > { %v1055_v60 = vpop.f32.mrb[6].mxu0 }
 0x54e   : > { %1062 = vrot.lane.b32.xlu0 %v1774_v56, %s1947_s17  ;;  %v1816_v43 = vpop.f32.mrb[7].mxu0 }
 0x553   : > { %v1314_v61 = vpop.f32.mrb[8].mxu0 }
 0x554   : > { %v1775_v62 = vpack.c.bf16 %v1314_v61, %v1314_v61  ;;  %v1827_v63 = vpop.f32.mrb[9].mxu0 }
 0x555   : > { %v1317_v0 = vpop.f32.mrb[10].mxu0 }
 0x556   : > { %1324 = vrot.lane.b32.xlu1 %v1775_v62, %s1948_s12  ;;  %v1828_v24 = vpop.f32.mrb[11].mxu0 }
 0x55b   : > { %v1576_v55 = vpop.f32.mrb[12].mxu0 }
 0x55c   : > { %v1776_v1 = vpack.c.bf16 %v1576_v55, %v1576_v55  ;;  %v1839_v2 = vpop.f32.mrb[13].mxu0 }
 0x55d   : > { %v1579_v4 = vpop.f32.mrb[14].mxu0 }
 0x55e   : > { %1586 = vrot.lane.b32.xlu1 %v1776_v1, %s1949_s13  ;;  %v1840_v5 = vpop.f32.mrb[15].mxu0 }
 0x5c0   : > { %v1063_v6 = vpop.permute.xlu0 %1062 }
 0x5c1   : > { %1066 = vst.msk [vmem:[%s2260_s11] sm:$0xf] %vm1065_vm15, %v1063_v6 }
 0x5c8   : > { %v1325_v7 = vpop.permute.xlu1 %1324 }
 0x5c9   : > { %1328 = vst.msk [vmem:[%s2260_s11] sm:$0xf] %vm1327_vm0, %v1325_v7 }
 0x5d0   : > { %v1587_v8 = vpop.permute.xlu1 %1586 }
 0x5d1   : > { %1590 = vst.msk [vmem:[%s2260_s11] sm:$0xf] %vm1589_vm1, %v1587_v8 }
 0x5d2 PF: > { %s14_s19 = sadd.s32 1, %s1942_s19   ;;  %s2365_s15 = smov %s1930_s16 }
 0x5d3   : > { %p11_p10 = scmp.ge.s32.totalorder %s14_s19, 4   ;;  %s2366_s16 = smov %s2014_s24 }
 0x5d4   : > { %s2367_s17 = smov %s1938_s18  ;;  %s2368_s18 = smov %s2370_s20 }
 0x5d5   :  { %13 = sbr.rel (!%p11_p10) target bundleno = 3 (0x3), region = 213 }

// kernel: decoder_forward.24
= control target key start
LH: loop header
LB: loop body
LE: loop exit
PB: predicated region body
PF: predicated region fallthrough
CT: control target
= control target key end

     0   :  { %vm29_vm0 = vcmask 261120   ;;  %v290_v15 = vmov 0.0   ;;  %vm291_vm1 = vmmov 0   ;;  %vm185_vm2 = vcmask 523264   ;;  %s391_s0 = inlined_call_operand.vmem [shape: f32[16,32], index: 0, kind: input, shape index: {}]   ;;  %s392_s3 = inlined_call_operand.vmem [shape: bf16[32,64], index: 3, kind: input, shape index: {}]   ;;  %s393_s5 = inlined_call_operand.vmem [shape: bf16[64,32], index: 5, kind: input, shape index: {}]   ;;  %s394_s1 = inlined_call_operand.vmem [shape: f32[1,32], index: 1, kind: input, shape index: {}]   ;;  %s395_s2 = inlined_call_operand.vmem [shape: f32[1,32], index: 2, kind: input, shape index: {}]   ;;  %s396_s4 = inlined_call_operand.vmem [shape: f32[1,64], index: 4, kind: input, shape index: {}]   ;;  %s397_s6 = inlined_call_operand.vmem [shape: f32[1,32], index: 6, kind: input, shape index: {}]   ;;  %s398_s7 = inlined_call_operand.vmem [shape: f32[16,32], index: 7, kind: output, shape index: {}]  }
   0x1   :  { %v335_v0 = vld [vmem:[%s391_s0] sm:$0xff]  ;;  %v340_v1 = vld [vmem:[%s391_s0 + $0x8] sm:$0xff]  ;;  %258 = vmatprep.subr.bf16.mxu0 %v290_v15  ;;  %266 = vmatprep.subr.bf16.mxu1 %v290_v15  ;;  %v284_v36 = vld [vmem:[%s393_s5 + $0x10] sm:$0xff]  }
   0x2   :  { %v30_v2 = vsel %vm29_vm0, %v335_v0, 0.0  ;;  %v33_v3 = vsel %vm29_vm0, %v340_v1, 0.0  ;;  %v280_v14 = vld [vmem:[%s392_s3] sm:$0xff]   ;;  %v281_v16 = vld [vmem:[%s392_s3 + $0x8] sm:$0xff]   ;;  %262 = vmatprep.mubr.msk.bf16.mxu0 %vm291_vm1, %v290_v15  ;;  %274 = vmatprep.mubr.msk.bf16.mxu1 %vm291_vm1, %v290_v15  ;;  %v285_v37 = vld [vmem:[%s393_s5 + $0x18] sm:$0xff]  }
   0x3   :  { %31 = vadd.xlane.f32.xlu0 %v30_v2  ;;  %259 = vmatpush3.bf16.msra.mxu0 %v280_v14  ;;  %v282_v17 = vld [vmem:[%s393_s5] sm:$0xff]   ;;  %v283_v18 = vld [vmem:[%s393_s5 + $0x8] sm:$0xff]  }
   0x4   :  { %260 = vmatprep.subr.bf16.mxu0 %v290_v15  ;;  %267 = vmatpush3.bf16.msra.mxu1 %v282_v17  ;;  %v238_v27 = vld [vmem:[%s394_s1] ss:$0 sm:$0xff] }
   0x5   :  { %268 = vmatprep.subr.bf16.mxu1 %v290_v15  ;;  %v239_v31 = vld [vmem:[%s395_s2] ss:$0 sm:$0xff] }
   0x6   :  { %v240_v38 = vld [vmem:[%s396_s4] ss:$0 sm:$0xff] }
   0x7   :  { %34 = vadd.xlane.f32.xlu0 %v33_v3  ;;  %261 = vmatpush3.bf16.msra.mxu0 %v281_v16  ;;  %v244_v48 = vld [vmem:[%s397_s6] ss:$0 sm:$0xff] }
   0x8   :  { %269 = vmatpush3.bf16.msra.mxu1 %v283_v18 }
   0x9   :  { %270 = vmatprep.subr.bf16.mxu1 %v290_v15 }
   0xc   :  { %271 = vmatpush3.bf16.msra.mxu1 %v284_v36 }
   0xd   :  { %272 = vmatprep.subr.bf16.mxu1 %v290_v15 }
  0x10   :  { %273 = vmatpush3.bf16.msra.mxu1 %v285_v37 }
  0x90   :  { %v32_v4 = vpop.xlane.xlu0 %31 }
  0x91   :  { %v37_v5 = vmul.f32 0.03125, %v32_v4 }
  0x93   :  { %v39_v6 = vsub.f32 %v335_v0, %v37_v5 }
  0x94   :  { %v35_v7 = vpop.xlane.xlu0 %34 }
  0x95   :  { %v38_v8 = vmul.f32 0.03125, %v35_v7  ;;  %v41_v9 = vmul.f32 %v39_v6, %v39_v6 }
  0x97   :  { %v40_v10 = vsub.f32 %v340_v1, %v38_v8  ;;  %v43_v11 = vsel %vm29_vm0, %v41_v9, 0.0 }
  0x98   :  { %44 = vadd.xlane.f32.xlu1 %v43_v11 }
  0x99   :  { %v42_v12 = vmul.f32 %v40_v10, %v40_v10 }
  0x9b   :  { %v46_v13 = vsel %vm29_vm0, %v42_v12, 0.0 }
  0x9c   :  { %47 = vadd.xlane.f32.xlu1 %v46_v13 }
 0x125   :  { %v45_v19 = vpop.xlane.xlu1 %44 }
 0x126   :  { %v49_v20 = vmul.f32 0.03125, %v45_v19 }
 0x128   :  { %v51_v21 = vadd.f32 1e-05, %v49_v20 }
 0x129   :  { %v48_v22 = vpop.xlane.xlu1 %47 }
 0x12a   :  { %286 = vrsqrt.f32 %v51_v21  ;;  %v50_v23 = vmul.f32 0.03125, %v48_v22 }
 0x12c   :  { %v52_v24 = vadd.f32 1e-05, %v50_v23 }
 0x12e   :  { %288 = vrsqrt.f32 %v52_v24 }
 0x134   :  { %v287_v25 = vpop.eup %286 }
 0x135   :  { %v55_v26 = vmul.f32 %v287_v25, %v39_v6 }
 0x137   :  { %v64_v30 = vmul.f32 %v238_v27, %v55_v26 }
 0x138   :  { %v289_v28 = vpop.eup %288 }
 0x139   :  { %v56_v29 = vmul.f32 %v289_v28, %v40_v10  ;;  %v73_v33 = vadd.f32 %v239_v31, %v64_v30 }
 0x13b   :  { %v65_v32 = vmul.f32 %v238_v27, %v56_v29 }
 0x13d   :  { %v74_v34 = vadd.f32 %v239_v31, %v65_v32 }
 0x13f   :  { %v75_v35 = vpack.c.bf16 %v74_v34, %v73_v33 }
 0x141   :  { %263 = vmatmul.mubr.msk.bf16.vlgmr.msra.gmra.mrb[0].mxu0 %vm29_vm0, %v75_v35 }
 0x214   :  { %v136_v39 = vpop.f32.mrb[0].mxu0 }
 0x215   :  { %v137_v40 = vadd.f32 %v240_v38, %v136_v39  ;;  %v264_v41 = vpop.f32.mrb[1].mxu0 }
 0x216   :  { %v139_v42 = vpop.f32.mrb[2].mxu0 }
 0x217   :  { %v140_v43 = vadd.f32 %v240_v38, %v139_v42  ;;  %v265_v44 = vpop.f32.mrb[3].mxu0  ;;  %v143_v45 = vmax.f32 %v137_v40, 0.0 }
 0x219   :  { %v144_v46 = vmax.f32 %v140_v43, 0.0 }
 0x21b   :  { %v145_v47 = vpack.c.bf16 %v144_v46, %v143_v45 }
 0x21d   :  { %275 = vmatmul.mubr.msk.bf16.vlgmr.msra.gmra.mrb[0].mxu1 %vm185_vm2, %v145_v47 }
 0x2f0   :  { %v223_v49 = vpop.f32.mrb[0].mxu1 }
 0x2f1   :  { %v224_v50 = vadd.f32 %v244_v48, %v223_v49  ;;  %v276_v51 = vpop.f32.mrb[1].mxu1 }
 0x2f2   :  { %v226_v52 = vpop.f32.mrb[2].mxu1 }
 0x2f3   :  { %v230_v53 = vadd.f32 %v224_v50, %v335_v0  ;;  %v227_v54 = vadd.f32 %v244_v48, %v226_v52  ;;  %v277_v55 = vpop.f32.mrb[3].mxu1 }
 0x2f5   :  { %232 = vst.msk [vmem:[%s398_s7] sm:$0xff] %vm29_vm0, %v230_v53  ;;  %v231_v56 = vadd.f32 %v227_v54, %v340_v1 }
 0x2f7   :  { %233 = vst.msk [vmem:[%s398_s7 + $0x8] sm:$0xff] %vm29_vm0, %v231_v56 }

// kernel: decoder_forward.22
= control target key start
LH: loop header
LB: loop body
LE: loop exit
PB: predicated region body
PF: predicated region fallthrough
CT: control target
= control target key end

     0   :  { %s2323_s15 = smov 0   ;;  %s2325_s16 = smov 0   ;;  %s2895_s0 = inlined_call_operand.vmem [shape: f32[2,8,1,4,8], index: 0, kind: input, shape index: {}]   ;;  %s2896_s1 = inlined_call_operand.vmem [shape: f32[2,16,2,4,8], index: 1, kind: input, shape index: {}, may-alias: {1,2}]   ;;  %s2897_s2 = inlined_call_operand.vmem [shape: f32[2,16,2,4,8], index: 2, kind: input, shape index: {}, may-alias: {1,2}]   ;;  %s2898_s3 = inlined_call_operand.vmem [shape: f32[2,1,16], index: 3, kind: input, shape index: {}]   ;;  %s2899_s4 = inlined_call_operand.vmem [shape: bf16[2,8,32], index: 4, kind: output, shape index: {}]  }
   0x1   :  { %s2327_s17 = smov 0   ;;  %s2329_s18 = smov 0  }
   0x2   :  { %s2331_s19 = smov 0  }
   0x3 LB: > { %s33_s20 = sadd.s32 1, %s2287_s18  ;;  %p77_p1 = scmp.ne.s32.totalorder %s2279_s16, %s2275_s15  ;;  %s2291_s19 = sphi %s2331_s19, %s14_s19   ;;  %s2287_s18 = sphi %s2329_s18, %s2904_s18   ;;  %s2283_s17 = sphi %s2327_s17, %s2903_s17   ;;  %s2279_s16 = sphi %s2325_s16, %s2902_s16   ;;  %s2275_s15 = sphi %s2323_s15, %s2901_s15  }
   0x4   : > { %p35_p0 = scmp.ge.s32.totalorder %s33_s20, 2  ;;  %p78_p2 = scmp.eq.s32.totalorder %s2291_s19, 0 }
   0x5   : > { %s70_s23 = sadd.s32 1, %s2279_s16  ;;  %p2080_p5 = scmp.ge.s32.totalorder %s2291_s19, 2 }
   0x6   : > { %s2906_s20 = smov (%p35_p0, %s33_s20), 0  ;;  %p2354_p3 = por %p78_p2, %p77_p1 }
   0x7   : > { %s65_s22 = ssub.s32 %s2287_s18, %s2906_s20  ;;  %187 = sbr.rel (%p2080_p5) target bundleno = 42 (0x2a), region = 16 }
   0x8   : > { %p68_p4 = scmp.eq.s32.totalorder %s65_s22, 0 }
   0xa   : > { %s2362_s24 = scalar_select %p68_p4, %s2279_s16, %s70_s23  }
   0xe   : > { %203 = sbr.rel (!%p2354_p3) target bundleno = 28 (0x1c), region = 24  ;;  %s205_s25 = sand.u32 (%p2354_p3), 1, %s2279_s16  }
   0xf   : > { %s2122_s26 = sshll.u32 (%p2354_p3), %s2287_s18, 7  ;;  %s2081_s27 = sshll.u32 (%p2354_p3), %s205_s25, 6 }
  0x10   : > { %s2372_s30 = scalar_lea.vmem (%p2354_p3), %s2896_s1, %s2122_s26  ;;  %s207_s5 = scalar_lea.vmem (%p2354_p3), [#allocation2], %s2081_s27 }
  0x11   : > { %v229_v0 = vld [vmem:[%s2372_s30] sm:$0xf] (%p2354_p3)  ;;  %v231_v1 = vld [vmem:[%s2372_s30 + $0x8] sm:$0xf] (%p2354_p3)  ;;  %v233_v2 = vld [vmem:[%s2372_s30 + $0x10] sm:$0xf] (%p2354_p3) }
  0x12   : > { %230 = vst [vmem:[%s207_s5] sm:$0xf] (%p2354_p3), %v229_v0  ;;  %232 = vst [vmem:[%s207_s5 + $0x4] sm:$0xf] (%p2354_p3), %v231_v1  ;;  %v235_v3 = vld [vmem:[%s2372_s30 + $0x18] sm:$0xf] (%p2354_p3) }
  0x13   : > { %v237_v4 = vld [vmem:[%s2372_s30 + $0x20] sm:$0xf] (%p2354_p3)  ;;  %234 = vst [vmem:[%s207_s5 + $0x8] sm:$0xf] (%p2354_p3), %v233_v2  ;;  %236 = vst [vmem:[%s207_s5 + $0xc] sm:$0xf] (%p2354_p3), %v235_v3 }
  0x14   : > { %238 = vst [vmem:[%s207_s5 + $0x10] sm:$0xf] (%p2354_p3), %v237_v4  ;;  %v239_v5 = vld [vmem:[%s2372_s30 + $0x28] sm:$0xf] (%p2354_p3)  ;;  %v241_v6 = vld [vmem:[%s2372_s30 + $0x30] sm:$0xf] (%p2354_p3) }
  0x15   : > { %v243_v7 = vld [vmem:[%s2372_s30 + $0x38] sm:$0xf]  ;;  %240 = vst [vmem:[%s207_s5 + $0x14] sm:$0xf] %v239_v5  ;;  %242 = vst [vmem:[%s207_s5 + $0x18] sm:$0xf] %v241_v6 }
  0x16   : > { %244 = vst [vmem:[%s207_s5 + $0x1c] sm:$0xf] %v243_v7  ;;  %v245_v8 = vld [vmem:[%s2372_s30 + $0x40] sm:$0xf]  ;;  %v247_v9 = vld [vmem:[%s2372_s30 + $0x48] sm:$0xf] }
  0x17   : > { %v249_v10 = vld [vmem:[%s2372_s30 + $0x50] sm:$0xf]  ;;  %246 = vst [vmem:[%s207_s5 + $0x20] sm:$0xf] %v245_v8  ;;  %248 = vst [vmem:[%s207_s5 + $0x24] sm:$0xf] %v247_v9 }
  0x18   : > { %250 = vst [vmem:[%s207_s5 + $0x28] sm:$0xf] %v249_v10  ;;  %v251_v11 = vld [vmem:[%s2372_s30 + $0x58] sm:$0xf]  ;;  %v253_v12 = vld [vmem:[%s2372_s30 + $0x60] sm:$0xf] }
  0x19   : > { %v255_v13 = vld [vmem:[%s2372_s30 + $0x68] sm:$0xf]  ;;  %252 = vst [vmem:[%s207_s5 + $0x2c] sm:$0xf] %v251_v11  ;;  %254 = vst [vmem:[%s207_s5 + $0x30] sm:$0xf] %v253_v12 }
  0x1a   : > { %256 = vst [vmem:[%s207_s5 + $0x34] sm:$0xf] %v255_v13  ;;  %v257_v14 = vld [vmem:[%s2372_s30 + $0x70] sm:$0xf]  ;;  %v259_v15 = vld [vmem:[%s2372_s30 + $0x78] sm:$0xf] }
  0x1b   : > { %258 = vst [vmem:[%s207_s5 + $0x38] sm:$0xf] %v257_v14  ;;  %260 = vst [vmem:[%s207_s5 + $0x3c] sm:$0xf] %v259_v15 }
  0x1c PF: > { %315 = sbr.rel (!%p2354_p3) target bundleno = 42 (0x2a), region = 65  ;;  %s317_s6 = sand.u32 (%p2354_p3), 1, %s2279_s16  }
  0x1d   : > { %s2123_s7 = sshll.u32 (%p2354_p3), %s2287_s18, 7  ;;  %s2084_s8 = sshll.u32 (%p2354_p3), %s317_s6, 6 }
  0x1e   : > { %s2397_s11 = scalar_lea.vmem (%p2354_p3), %s2897_s2, %s2123_s7  ;;  %s319_s12 = scalar_lea.vmem (%p2354_p3), [#allocation3], %s2084_s8 }
  0x1f   : > { %v2087_v16 = vld [vmem:[%s2397_s11 + $0x4] sm:$0xf] (%p2354_p3)  ;;  %v2088_v17 = vld [vmem:[%s2397_s11 + $0xc] sm:$0xf] (%p2354_p3)  ;;  %v2089_v18 = vld [vmem:[%s2397_s11 + $0x14] sm:$0xf] (%p2354_p3) }
  0x20   : > { %343 = vst [vmem:[%s319_s12] sm:$0xf] (%p2354_p3), %v2087_v16  ;;  %345 = vst [vmem:[%s319_s12 + $0x4] sm:$0xf] (%p2354_p3), %v2088_v17  ;;  %v2090_v19 = vld [vmem:[%s2397_s11 + $0x1c] sm:$0xf] (%p2354_p3) }
  0x21   : > { %v2091_v20 = vld [vmem:[%s2397_s11 + $0x24] sm:$0xf] (%p2354_p3)  ;;  %347 = vst [vmem:[%s319_s12 + $0x8] sm:$0xf] (%p2354_p3), %v2089_v18  ;;  %349 = vst [vmem:[%s319_s12 + $0xc] sm:$0xf] (%p2354_p3), %v2090_v19 }
  0x22   : > { %351 = vst [vmem:[%s319_s12 + $0x10] sm:$0xf] (%p2354_p3), %v2091_v20  ;;  %v2092_v21 = vld [vmem:[%s2397_s11 + $0x2c] sm:$0xf] (%p2354_p3)  ;;  %v2093_v22 = vld [vmem:[%s2397_s11 + $0x34] sm:$0xf] (%p2354_p3) }
  0x23   : > { %v2094_v23 = vld [vmem:[%s2397_s11 + $0x3c] sm:$0xf]  ;;  %353 = vst [vmem:[%s319_s12 + $0x14] sm:$0xf] %v2092_v21  ;;  %355 = vst [vmem:[%s319_s12 + $0x18] sm:$0xf] %v2093_v22 }
  0x24   : > { %357 = vst [vmem:[%s319_s12 + $0x1c] sm:$0xf] %v2094_v23  ;;  %v2095_v24 = vld [vmem:[%s2397_s11 + $0x44] sm:$0xf]  ;;  %v2096_v25 = vld [vmem:[%s2397_s11 + $0x4c] sm:$0xf] }
  0x25   : > { %v2097_v26 = vld [vmem:[%s2397_s11 + $0x54] sm:$0xf]  ;;  %359 = vst [vmem:[%s319_s12 + $0x20] sm:$0xf] %v2095_v24  ;;  %361 = vst [vmem:[%s319_s12 + $0x24] sm:$0xf] %v2096_v25 }
  0x26   : > { %363 = vst [vmem:[%s319_s12 + $0x28] sm:$0xf] %v2097_v26  ;;  %v2098_v27 = vld [vmem:[%s2397_s11 + $0x5c] sm:$0xf]  ;;  %v2099_v28 = vld [vmem:[%s2397_s11 + $0x64] sm:$0xf] }
  0x27   : > { %v2100_v29 = vld [vmem:[%s2397_s11 + $0x6c] sm:$0xf]  ;;  %365 = vst [vmem:[%s319_s12 + $0x2c] sm:$0xf] %v2098_v27  ;;  %367 = vst [vmem:[%s319_s12 + $0x30] sm:$0xf] %v2099_v28 }
  0x28   : > { %369 = vst [vmem:[%s319_s12 + $0x34] sm:$0xf] %v2100_v29  ;;  %v2101_v30 = vld [vmem:[%s2397_s11 + $0x74] sm:$0xf]  ;;  %v2102_v31 = vld [vmem:[%s2397_s11 + $0x7c] sm:$0xf] }
  0x29   : > { %371 = vst [vmem:[%s319_s12 + $0x38] sm:$0xf] %v2101_v30  ;;  %373 = vst [vmem:[%s319_s12 + $0x3c] sm:$0xf] %v2102_v31 }
  0x2a PF: > { %p2103_p6 = scmp.ge.s32.totalorder %s2291_s19, 1  ;;  %p436_p7 = scmp.lt.s32.totalorder %s2291_s19, 3 }
  0x2c   : > { %p437_p8 = pnand %p2103_p6, %p436_p7 }
  0x2d   : > { %s443_s13 = sand.u32 (!%p437_p8), 1, %s2275_s15   ;;  %v2293_v32 = vmov (!%p437_p8), 0.0   ;;  %p497_p9 = scmp.lt.s32.totalorder (!%p437_p8), %s2283_s17, 1  ;;  %vm604_vm0 = vcmask (!%p437_p8), 1041409   ;;  %vm2294_vm1 = vmmov (!%p437_p8), 0   ;;  %vm607_vm2 = vcmask (!%p437_p8), 1042434  }
  0x2e   : > { %440 = sbr.rel (%p437_p8) target bundleno = 1496 (0x5d8), region = 110  ;;  %2144 = vmatprep.subr.bf16.mxu0 (!%p437_p8), %v2293_v32  ;;  %s2419_s14 = sshll.u32 (!%p437_p8), %s443_s13, 6  ;;  %2150 = vmatprep.subr.bf16.mxu1 (!%p437_p8), %v2293_v32  ;;  %vm610_vm3 = vcmask (!%p437_p8), 1043459   ;;  %vm613_vm4 = vcmask (!%p437_p8), 1044484   ;;  %vm616_vm5 = vcmask (!%p437_p8), 1045509   ;;  %vm619_vm6 = vcmask (!%p437_p8), 1046534  }
  0x2f   : > { %s2424_s21 = scalar_lea.vmem (!%p437_p8), [#allocation2], %s2419_s14  ;;  %2146 = vmatprep.mubr.msk.bf16.mxu0 (!%p437_p8), %vm2294_vm1, %v2293_v32  ;;  %2152 = vmatprep.mubr.msk.bf16.mxu1 (!%p437_p8), %vm2294_vm1, %v2293_v32  ;;  %vm622_vm7 = vcmask (!%p437_p8), 1047559   ;;  %vm686_vm8 = vcmask (!%p437_p8), 64512   ;;  %vm733_vm10 = vcmask (!%p437_p8), 130048   ;;  %s2505_s29 = scalar_lea.vmem (!%p437_p8), [#allocation3], %s2419_s14  ;;  %vm884_vm11 = vcmask (!%p437_p8), 60416  }
  0x30   : > { %v549_v33 = vld [vmem:[%s2424_s21] sm:$0x1] (!%p437_p8)  ;;  %v550_v34 = vld [vmem:[%s2424_s21 + $0x4] sm:$0x1] (!%p437_p8)  ;;  %v551_v35 = vld [vmem:[%s2424_s21 + $0x8] sm:$0x1] (!%p437_p8) }
  0x31   : > { %v552_v36 = vld [vmem:[%s2424_s21 + $0xc] sm:$0x1] (!%p437_p8)  ;;  %v553_v37 = vld [vmem:[%s2424_s21 + $0x10] sm:$0x1] (!%p437_p8)  ;;  %v554_v38 = vld [vmem:[%s2424_s21 + $0x14] sm:$0x1] (!%p437_p8)  ;;  %v565_v39 = vpack.c.bf16 (!%p437_p8), %v549_v33, %v549_v33  ;;  %v566_v40 = vpack.c.bf16 (!%p437_p8), %v550_v34, %v550_v34  ;;  %v567_v41 = vpack.c.bf16 (!%p437_p8), %v551_v35, %v551_v35 }
  0x32   : > { %v555_v42 = vld [vmem:[%s2424_s21 + $0x18] sm:$0x1] (!%p437_p8)  ;;  %v556_v43 = vld [vmem:[%s2424_s21 + $0x1c] sm:$0x1] (!%p437_p8)  ;;  %v557_v44 = vld [vmem:[%s2424_s21 + $0x20] sm:$0x1] (!%p437_p8)  ;;  %v568_v45 = vpack.c.bf16 (!%p437_p8), %v552_v36, %v552_v36  ;;  %v569_v46 = vpack.c.bf16 (!%p437_p8), %v553_v37, %v553_v37  ;;  %v570_v47 = vpack.c.bf16 (!%p437_p8), %v554_v38, %v554_v38 }
  0x33   : > { %v558_v48 = vld [vmem:[%s2424_s21 + $0x24] sm:$0x1] (!%p437_p8)  ;;  %v559_v49 = vld [vmem:[%s2424_s21 + $0x28] sm:$0x1] (!%p437_p8)  ;;  %v560_v50 = vld [vmem:[%s2424_s21 + $0x2c] sm:$0x1] (!%p437_p8)  ;;  %v571_v51 = vpack.c.bf16 (!%p437_p8), %v555_v42, %v555_v42  ;;  %v572_v52 = vpack.c.bf16 (!%p437_p8), %v556_v43, %v556_v43  ;;  %v573_v53 = vpack.c.bf16 (!%p437_p8), %v557_v44, %v557_v44  ;;  %v641_v54 = vunpack.c.l.b16 (!%p437_p8), %v565_v39 }
  0x34   : > { %v561_v55 = vld [vmem:[%s2424_s21 + $0x30] sm:$0x1] (!%p437_p8)  ;;  %v562_v56 = vld [vmem:[%s2424_s21 + $0x34] sm:$0x1] (!%p437_p8)  ;;  %v563_v57 = vld [vmem:[%s2424_s21 + $0x38] sm:$0x1] (!%p437_p8)  ;;  %v574_v58 = vpack.c.bf16 (!%p437_p8), %v558_v48, %v558_v48  ;;  %v575_v59 = vpack.c.bf16 (!%p437_p8), %v559_v49, %v559_v49  ;;  %v576_v60 = vpack.c.bf16 (!%p437_p8), %v560_v50, %v560_v50  ;;  %v642_v61 = vunpack.c.l.b16 (!%p437_p8), %v566_v40 }
  0x35   : > { %v564_v62 = vld [vmem:[%s2424_s21 + $0x3c] sm:$0x1]  ;;  %v577_v63 = vpack.c.bf16 %v561_v55, %v561_v55  ;;  %v578_v0 = vpack.c.bf16 %v562_v56, %v562_v56  ;;  %v579_v1 = vpack.c.bf16 %v563_v57, %v563_v57  ;;  %v643_v2 = vunpack.c.l.b16 %v567_v41  ;;  %s2908_s17 = smov (!%p497_p9, %s2283_s17), 1  ;;  %s2296_s8 = smov 16  }
  0x36   : > { %v580_v3 = vpack.c.bf16 %v564_v62, %v564_v62  ;;  %v644_v4 = vunpack.c.l.b16 %v568_v45  ;;  %v645_v5 = vunpack.c.l.b16 %v569_v46  ;;  %v646_v6 = vunpack.c.l.b16 %v570_v47  ;;  %s2124_s15 = sshll.u32 %s2908_s17, 5  ;;  %s513_s28 = scalar_lea.vmem %s2898_s3, %s2908_s17 }
  0x37   : > { %v647_v7 = vunpack.c.l.b16 %v571_v51  ;;  %v648_v8 = vunpack.c.l.b16 %v572_v52  ;;  %v649_v9 = vunpack.c.l.b16 %v573_v53  ;;  %v650_v10 = vunpack.c.l.b16 %v574_v58  ;;  %s2455_s25 = scalar_lea.vmem %s2895_s0, %s2124_s15  ;;  %s2108_s30 = sshll.u32 %s2908_s17, 2 }
  0x38   : > { %v651_v11 = vunpack.c.l.b16 %v575_v59  ;;  %v652_v12 = vunpack.c.l.b16 %v576_v60  ;;  %v653_v13 = vunpack.c.l.b16 %v577_v63  ;;  %v654_v14 = vunpack.c.l.b16 %v578_v0  ;;  %v525_v19 = vld [vmem:[%s2455_s25] sm:$0x1]  ;;  %v526_v20 = vld [vmem:[%s2455_s25 + $0x4] sm:$0x1]  ;;  %v527_v25 = vld [vmem:[%s2455_s25 + $0x8] sm:$0x1]  ;;  %s2742_s7 = scalar_lea.vmem %s2899_s4, %s2108_s30 }
  0x39   : > { %v655_v15 = vunpack.c.l.b16 %v579_v1  ;;  %v656_v16 = vunpack.c.l.b16 %v580_v3  ;;  %v657_v17 = vrot.slane %v642_v61, 7  ;;  %v659_v18 = vrot.slane %v643_v2, 6  ;;  %v528_v30 = vld [vmem:[%s2455_s25 + $0xc] sm:$0x1]  ;;  %v529_v36 = vld [vmem:[%s2455_s25 + $0x10] sm:$0x1] }
  0x3a   : > { %v661_v21 = vrot.slane %v644_v4, 5  ;;  %v663_v22 = vrot.slane %v645_v5, 4  ;;  %v665_v23 = vrot.slane %v646_v6, 3  ;;  %v667_v24 = vrot.slane %v647_v7, 2  ;;  %v530_v41 = vld [vmem:[%s2455_s25 + $0x14] sm:$0x1] }
  0x3b   : > { %v658_v26 = vsel %vm604_vm0, %v657_v17, %v641_v54  ;;  %v669_v27 = vrot.slane %v648_v8, 1  ;;  %v671_v28 = vrot.slane %v650_v10, 7  ;;  %v673_v29 = vrot.slane %v651_v11, 6  ;;  %v531_v42 = vld [vmem:[%s2455_s25 + $0x18] sm:$0x1]  ;;  %s2295_s17 = smov 8  }
  0x3c   : > { %v660_v31 = vsel %vm607_vm2, %v659_v18, %v658_v26  ;;  %v675_v33 = vrot.slane %v652_v12, 5  ;;  %v677_v34 = vrot.slane %v653_v13, 4  ;;  %v679_v35 = vrot.slane %v654_v14, 3  ;;  %v532_v45 = vld [vmem:[%s2455_s25 + $0x1c] sm:$0x1]  ;;  %s2297_s9 = smov 24  }
  0x3d   : > { %v662_v37 = vsel %vm610_vm3, %v661_v21, %v660_v31  ;;  %v672_v38 = vsel %vm604_vm0, %v671_v28, %v649_v9  ;;  %v681_v39 = vrot.slane %v655_v15, 2  ;;  %v683_v40 = vrot.slane %v656_v16, 1 }
  0x3e   : > { %v664_v43 = vsel %vm613_vm4, %v663_v22, %v662_v37  ;;  %v674_v44 = vsel %vm607_vm2, %v673_v29, %v672_v38  ;;  %v533_v46 = vmul.f32 0.35355338, %v525_v19  ;;  %v534_v47 = vmul.f32 0.35355338, %v526_v20 }
  0x3f   : > { %v666_v48 = vsel %vm616_vm5, %v665_v23, %v664_v43  ;;  %v676_v49 = vsel %vm610_vm3, %v675_v33, %v674_v44  ;;  %v535_v50 = vmul.f32 0.35355338, %v527_v25  ;;  %v536_v51 = vmul.f32 0.35355338, %v528_v30  ;;  %v522_v33 = vld [vmem:[%s513_s28] sm:$0x1] }
  0x40   : > { %v668_v52 = vsel %vm619_vm6, %v667_v24, %v666_v48  ;;  %v678_v53 = vsel %vm613_vm4, %v677_v34, %v676_v49  ;;  %v537_v54 = vmul.f32 0.35355338, %v529_v36  ;;  %v538_v55 = vmul.f32 0.35355338, %v530_v41  ;;  %v747_v49 = vld [vmem:[%s2505_s29 + $0x4] sm:$0x1] }
  0x41   : > { %v670_v56 = vsel %vm622_vm7, %v669_v27, %v668_v52  ;;  %v680_v57 = vsel %vm616_vm5, %v679_v35, %v678_v53  ;;  %v539_v58 = vmul.f32 0.35355338, %v531_v42  ;;  %v540_v59 = vmul.f32 0.35355338, %v532_v45  ;;  %v756_v52 = vld [vmem:[%s2505_s29 + $0x28] sm:$0x1] }
  0x42   : > { %v682_v60 = vsel %vm619_vm6, %v681_v39, %v680_v57  ;;  %v541_v61 = vpack.c.bf16 %v533_v46, %v533_v46  ;;  %v542_v62 = vpack.c.bf16 %v534_v47, %v534_v47  ;;  %v543_v63 = vpack.c.bf16 %v535_v50, %v535_v50  ;;  %v755_v50 = vld [vmem:[%s2505_s29 + $0x24] sm:$0x1] }
  0x43   : > { %v684_v0 = vsel %vm622_vm7, %v683_v40, %v682_v60  ;;  %v544_v1 = vpack.c.bf16 %v536_v51, %v536_v51  ;;  %v545_v2 = vpack.c.bf16 %v537_v54, %v537_v54  ;;  %v546_v3 = vpack.c.bf16 %v538_v55, %v538_v55  ;;  %v748_v51 = vld [vmem:[%s2505_s29 + $0x8] sm:$0x1]  ;;  %v746_v54 = vld [vmem:[%s2505_s29] sm:$0x1]  ;;  %v749_v55 = vld [vmem:[%s2505_s29 + $0xc] sm:$0x1] }
  0x44   : > { %v685_v4 = vpack.c.b16 %v684_v0, %v670_v56  ;;  %v547_v5 = vpack.c.bf16 %v539_v58, %v539_v58  ;;  %v548_v6 = vpack.c.bf16 %v540_v59, %v540_v59  ;;  %v595_v7 = vunpack.c.l.b16 %v541_v61  ;;  %v754_v56 = vld [vmem:[%s2505_s29 + $0x20] sm:$0x1]  ;;  %v750_v58 = vld [vmem:[%s2505_s29 + $0x10] sm:$0x1]  ;;  %v757_v59 = vld [vmem:[%s2505_s29 + $0x2c] sm:$0x1] }
  0x45   : > { %v596_v8 = vunpack.c.l.b16 %v542_v62  ;;  %v597_v9 = vunpack.c.l.b16 %v543_v63  ;;  %v598_v10 = vunpack.c.l.b16 %v544_v1  ;;  %v599_v11 = vunpack.c.l.b16 %v545_v2  ;;  %v758_v60 = vld [vmem:[%s2505_s29 + $0x30] sm:$0x1]  ;;  %v751_v1 = vld [vmem:[%s2505_s29 + $0x14] sm:$0x1] }
  0x46   : > { %v691_v12 = vsel %vm686_vm8, %v685_v4, 0  ;;  %v600_v13 = vunpack.c.l.b16 %v546_v3  ;;  %v601_v14 = vunpack.c.l.b16 %v547_v5  ;;  %v602_v15 = vunpack.c.l.b16 %v548_v6  ;;  %v759_v2 = vld [vmem:[%s2505_s29 + $0x34] sm:$0x1] }
  0x47   : > { %2145 = vmatpush3.bf16.xpose.msra.mxu0 %v691_v12  ;;  %v603_v16 = vrot.slane %v596_v8, 7  ;;  %v606_v17 = vrot.slane %v597_v9, 6  ;;  %v609_v18 = vrot.slane %v598_v10, 5  ;;  %v612_v19 = vrot.slane %v599_v11, 4  ;;  %v760_v8 = vld [vmem:[%s2505_s29 + $0x38] sm:$0x1] }
  0x48   : > { %2162 = vmatprep.subr.bf16.mxu0 %v2293_v32  ;;  %v615_v21 = vrot.slane %v600_v13, 3  ;;  %v618_v23 = vrot.slane %v601_v14, 2  ;;  %v621_v25 = vrot.slane %v602_v15, 1  ;;  %v582_v31 = vlaneseq  ;;  %v753_v13 = vld [vmem:[%s2505_s29 + $0x1c] sm:$0x1] }
  0x49   : > { %v605_v20 = vsel %vm604_vm0, %v603_v16, %v595_v7  ;;  %vm523_vm9 = vcmp.lt.f32.partialorder %v522_v33, -1.0  ;;  %v763_v53 = vpack.c.bf16 %v747_v49, %v747_v49  ;;  %v764_v57 = vpack.c.bf16 %v748_v51, %v748_v51  ;;  %v752_v7 = vld [vmem:[%s2505_s29 + $0x18] sm:$0x1]  ;;  %v761_v14 = vld [vmem:[%s2505_s29 + $0x3c] sm:$0x1] }
  0x4a   : > { %v608_v22 = vsel %vm607_vm2, %v606_v17, %v605_v20  ;;  %v583_v34 = vshrl.u32 %v582_v31, 7  ;;  %v524_v36 = vsel %vm523_vm9, -1e+30, %v2293_v32  ;;  %v762_v61 = vpack.c.bf16 %v746_v54, %v746_v54 }
  0x4b   : > { %v611_v24 = vsel %vm610_vm3, %v609_v18, %v608_v22  ;;  %v765_v62 = vpack.c.bf16 %v749_v55, %v749_v55  ;;  %v771_v63 = vpack.c.bf16 %v755_v50, %v755_v50  ;;  %v772_v0 = vpack.c.bf16 %v756_v52, %v756_v52 }
  0x4c   : > { %v614_v26 = vsel %vm613_vm4, %v612_v19, %v611_v24  ;;  %v584_v35 = vsub.s32 0, %v583_v34  ;;  %v766_v3 = vpack.c.bf16 %v750_v58, %v750_v58  ;;  %v770_v4 = vpack.c.bf16 %v754_v56, %v754_v56 }
  0x4d   : > { %v617_v27 = vsel %vm616_vm5, %v615_v21, %v614_v26  ;;  %v773_v5 = vpack.c.bf16 %v757_v59, %v757_v59  ;;  %v774_v6 = vpack.c.bf16 %v758_v60, %v758_v60  ;;  %v767_v9 = vpack.c.bf16 %v751_v1, %v751_v1  ;;  %v911_v1 = vld [vmem:[%s2424_s21 + $0x5] sm:$0x1] }
  0x4e   : > { %v620_v28 = vsel %vm619_vm6, %v618_v23, %v617_v27  ;;  %v2496_v37 = vrot.slane %v524_v36, %v584_v35  ;;  %v775_v10 = vpack.c.bf16 %v759_v2, %v759_v2  ;;  %v795_v11 = vunpack.c.l.b16 %v763_v53  ;;  %v912_v2 = vld [vmem:[%s2424_s21 + $0x9] sm:$0x1] }
  0x4f   : > { %v623_v29 = vsel %vm622_vm7, %v621_v25, %v620_v28  ;;  %v796_v12 = vunpack.c.l.b16 %v764_v57  ;;  %v768_v15 = vpack.c.bf16 %v752_v7, %v752_v7  ;;  %v776_v16 = vpack.c.bf16 %v760_v8, %v760_v8 }
  0x50   : > { %v624_v30 = vpack.c.b16 %v623_v29, %v623_v29  ;;  %v797_v17 = vunpack.c.l.b16 %v765_v62  ;;  %v798_v18 = vunpack.c.l.b16 %v766_v3  ;;  %v769_v19 = vpack.c.bf16 %v753_v13, %v753_v13 }
  0x51   : > { %v777_v20 = vpack.c.bf16 %v761_v14, %v761_v14  ;;  %v799_v21 = vunpack.c.l.b16 %v767_v9  ;;  %v803_v22 = vunpack.c.l.b16 %v771_v63  ;;  %v794_v23 = vunpack.c.l.b16 %v762_v61  ;;  %v918_v14 = vld [vmem:[%s2424_s21 + $0x21] sm:$0x1] }
  0x52   : > { %2147 = vmatmul.mubr.msk.bf16.vlgmr.msra.gmra.mrb[0].mxu0 %vm686_vm8, %v624_v30  ;;  %v804_v24 = vunpack.c.l.b16 %v772_v0  ;;  %v805_v25 = vunpack.c.l.b16 %v773_v5  ;;  %v806_v26 = vunpack.c.l.b16 %v774_v6  ;;  %v800_v27 = vunpack.c.l.b16 %v768_v15  ;;  %v913_v5 = vld [vmem:[%s2424_s21 + $0xd] sm:$0x1]  ;;  %v919_v6 = vld [vmem:[%s2424_s21 + $0x25] sm:$0x1] }
  0x53   : > { %2164 = vmatprep.mubr.msk.bf16.mxu0 %vm2294_vm1, %v2293_v32  ;;  %v801_v28 = vunpack.c.l.b16 %v769_v19  ;;  %v802_v29 = vunpack.c.l.b16 %v770_v4  ;;  %v807_v30 = vunpack.c.l.b16 %v775_v10  ;;  %v808_v31 = vunpack.c.l.b16 %v776_v16  ;;  %v910_v4 = vld [vmem:[%s2424_s21 + $0x1] sm:$0x1]  ;;  %v914_v10 = vld [vmem:[%s2424_s21 + $0x11] sm:$0x1]  ;;  %v921_v19 = vld [vmem:[%s2424_s21 + $0x2d] sm:$0x1] }
  0x54   : > { %v810_v33 = vrot.slane %v795_v11, 7  ;;  %v812_v34 = vrot.slane %v796_v12, 6  ;;  %v814_v35 = vrot.slane %v797_v17, 5  ;;  %v809_v36 = vunpack.c.l.b16 %v777_v20  ;;  %v920_v11 = vld [vmem:[%s2424_s21 + $0x29] sm:$0x1] }
  0x55   : > { %v832_v49 = vrot.slane %v807_v30, 3  ;;  %v822_v51 = vrot.slane %v801_v28, 1  ;;  %v834_v53 = vrot.slane %v808_v31, 2  ;;  %v927_v3 = vpack.c.bf16 %v911_v1, %v911_v1  ;;  %v886_v1 = vld [vmem:[%s2455_s25 + $0x1] sm:$0x1] }
  0x56   : > { %v836_v56 = vrot.slane %v809_v36, 1  ;;  %v928_v7 = vpack.c.bf16 %v912_v2, %v912_v2  ;;  %v926_v8 = vpack.c.bf16 %v910_v4, %v910_v4  ;;  %v929_v12 = vpack.c.bf16 %v913_v5, %v913_v5 }
  0x57   : > { %v990_v9 = vunpack.c.l.b16 %v927_v3  ;;  %v935_v13 = vpack.c.bf16 %v919_v6, %v919_v6  ;;  %v930_v20 = vpack.c.bf16 %v914_v10, %v914_v10  ;;  %vm1236_vm12 = vcmask 126016  }
  0x58   : > { %v991_v15 = vunpack.c.l.b16 %v928_v7  ;;  %v989_v16 = vunpack.c.l.b16 %v926_v8  ;;  %v889_v8 = vld [vmem:[%s2455_s25 + $0xd] sm:$0x1]  ;;  %vm1588_vm13 = vcmask 191616   ;;  %vm1940_vm14 = vcmask 257216  }
  0x59   : > { %v1005_v17 = vrot.slane %v990_v9, 7  ;;  %v993_v31 = vunpack.c.l.b16 %v930_v20 }
  0x5b   : > { %v1006_v30 = vsel %vm604_vm0, %v1005_v17, %v989_v16  ;;  %v891_v16 = vld [vmem:[%s2455_s25 + $0x15] sm:$0x1]  ;;  %v892_v17 = vld [vmem:[%s2455_s25 + $0x19] sm:$0x1] }
 0x125   : > { %v727_v38 = vpop.f32.mrb[0].mxu0 }
 0x126   : > { %v728_v39 = vadd.f32 %v727_v38, %v2496_v37  ;;  %v2148_v40 = vpop.f32.mrb[1].mxu0  ;;  %v816_v38 = vrot.slane %v798_v18, 4  ;;  %v915_v18 = vld [vmem:[%s2424_s21 + $0x15] sm:$0x1] }
 0x127   : > { %v730_v41 = vpop.f32.mrb[2].mxu0  ;;  %v824_v40 = vrot.slane %v803_v22, 7  ;;  %v934_v22 = vpack.c.bf16 %v918_v14, %v918_v14  ;;  %v931_v28 = vpack.c.bf16 %v915_v18, %v915_v18  ;;  %v1271_v18 = vld [vmem:[%s2424_s21 + $0x26] sm:$0x1] }
 0x128   : > { %v2149_v42 = vpop.f32.mrb[3].mxu0  ;;  %v734_v43 = vsel %vm733_vm10, %v728_v39, -inf  ;;  %v811_v41 = vsel %vm604_vm0, %v810_v33, %v794_v23  ;;  %v992_v23 = vunpack.c.l.b16 %v929_v12  ;;  %v890_v12 = vld [vmem:[%s2455_s25 + $0x11] sm:$0x1] }
 0x129   : > { %735 = vmax.xlane.f32.xlu0 %v734_v43  ;;  %v826_v42 = vrot.slane %v804_v24, 6  ;;  %v828_v43 = vrot.slane %v805_v25, 5  ;;  %v998_v24 = vunpack.c.l.b16 %v935_v13  ;;  %v1007_v25 = vrot.slane %v991_v15, 6  ;;  %v1263_v15 = vld [vmem:[%s2424_s21 + $0x6] sm:$0x1] }
 0x12a   : > { %v1009_v36 = vrot.slane %v992_v23, 5  ;;  %v894_v13 = vmul.f32 0.35355338, %v886_v1 }
 0x1b6   : > { %v736_v44 = vpop.xlane.xlu0 %735 }
 0x1b7   : > { %v737_v45 = vsub.f32 %v728_v39, %v736_v44  ;;  %v818_v39 = vrot.slane %v799_v21, 3  ;;  %v830_v44 = vrot.slane %v806_v26, 4  ;;  %v936_v21 = vpack.c.bf16 %v920_v11, %v920_v11  ;;  %v916_v26 = vld [vmem:[%s2424_s21 + $0x19] sm:$0x1] }
 0x1b9   : > { %v738_v46 = vmul.f32 1.442695, %v737_v45  ;;  %v813_v45 = vsel %vm607_vm2, %v812_v34, %v811_v41  ;;  %v999_v33 = vunpack.c.l.b16 %v936_v21  ;;  %v917_v34 = vld [vmem:[%s2424_s21 + $0x1d] sm:$0x1]  ;;  %v932_v41 = vpack.c.bf16 %v916_v26, %v916_v26  ;;  %v1262_v26 = vld [vmem:[%s2424_s21 + $0x2] sm:$0x1] }
 0x1ba   : > { %v815_v50 = vsel %vm610_vm3, %v814_v35, %v813_v45  ;;  %v997_v35 = vunpack.c.l.b16 %v934_v22  ;;  %v994_v45 = vunpack.c.l.b16 %v931_v28  ;;  %v897_v22 = vmul.f32 0.35355338, %v889_v8 }
 0x1bb   : > { %2237 = vpow2.f32 %v738_v46  ;;  %v820_v46 = vrot.slane %v800_v27, 2  ;;  %v817_v54 = vsel %vm613_vm4, %v816_v38, %v815_v50  ;;  %v922_v27 = vld [vmem:[%s2424_s21 + $0x31] sm:$0x1]  ;;  %v1019_v38 = vrot.slane %v998_v24, 7 }
 0x1bc   : > { %v819_v57 = vsel %vm616_vm5, %v818_v39, %v817_v54  ;;  %v923_v39 = vld [vmem:[%s2424_s21 + $0x35] sm:$0x1]  ;;  %v1021_v50 = vrot.slane %v999_v33, 6  ;;  %v1279_v28 = vpack.c.bf16 %v1263_v15, %v1263_v15  ;;  %v1270_v33 = vld [vmem:[%s2424_s21 + $0x22] sm:$0x1] }
 0x1bd   : > { %v821_v59 = vsel %vm619_vm6, %v820_v46, %v819_v57  ;;  %v995_v57 = vunpack.c.l.b16 %v932_v41 }
 0x1be   : > { %v823_v61 = vsel %vm622_vm7, %v822_v51, %v821_v59  ;;  %v887_v51 = vld [vmem:[%s2455_s25 + $0x5] sm:$0x1]  ;;  %v1013_v59 = vrot.slane %v994_v45, 3 }
 0x1bf   : > { %v1015_v6 = vrot.slane %v995_v57, 2 }
 0x1c5   : > { %v2500_v47 = vpop.eup %2237 }
 0x1c6   : > { %v740_v48 = vsel %vm733_vm10, %v2500_v47, 0.0 }
 0x1c7   : > { %741 = vadd.xlane.f32.xlu0 %v740_v48  ;;  %v825_v48 = vsel %vm604_vm0, %v824_v40, %v802_v29  ;;  %v937_v29 = vpack.c.bf16 %v921_v19, %v921_v19  ;;  %v924_v40 = vld [vmem:[%s2424_s21 + $0x39] sm:$0x1] }
 0x1c8   : > { %v827_v52 = vsel %vm607_vm2, %v826_v42, %v825_v48  ;;  %v938_v42 = vpack.c.bf16 %v922_v27, %v922_v27  ;;  %v933_v48 = vpack.c.bf16 %v917_v34, %v917_v34  ;;  %v1264_v27 = vld [vmem:[%s2424_s21 + $0xa] sm:$0x1] }
 0x1c9   : > { %v829_v55 = vsel %vm610_vm3, %v828_v43, %v827_v52  ;;  %v1008_v43 = vsel %vm607_vm2, %v1007_v25, %v1006_v30  ;;  %v1000_v46 = vunpack.c.l.b16 %v937_v29  ;;  %v939_v52 = vpack.c.bf16 %v923_v39, %v923_v39  ;;  %v1272_v34 = vld [vmem:[%s2424_s21 + $0x2a] sm:$0x1] }
 0x1ca   : > { %v831_v58 = vsel %vm613_vm4, %v830_v44, %v829_v55  ;;  %v925_v44 = vld [vmem:[%s2424_s21 + $0x3d] sm:$0x1]  ;;  %v1010_v54 = vsel %vm610_vm3, %v1009_v36, %v1008_v43  ;;  %v1020_v55 = vsel %vm604_vm0, %v1019_v38, %v997_v35  ;;  %v996_v2 = vunpack.c.l.b16 %v933_v48  ;;  %v1273_v48 = vld [vmem:[%s2424_s21 + $0x2e] sm:$0x1] }
 0x1cb   : > { %v833_v60 = vsel %vm616_vm5, %v832_v49, %v831_v58  ;;  %v1011_v49 = vrot.slane %v993_v31, 4  ;;  %v1001_v58 = vunpack.c.l.b16 %v938_v42  ;;  %v1002_v3 = vunpack.c.l.b16 %v939_v52  ;;  %v893_v42 = vld [vmem:[%s2455_s25 + $0x1d] sm:$0x1] }
 0x1cc   : > { %v835_v62 = vsel %vm619_vm6, %v834_v53, %v833_v60  ;;  %v940_v53 = vpack.c.bf16 %v924_v40, %v924_v40  ;;  %v1023_v60 = vrot.slane %v1000_v46, 5  ;;  %v1017_v19 = vrot.slane %v996_v2, 1 }
 0x1cd   : > { %v837_v63 = vsel %vm622_vm7, %v836_v56, %v835_v62  ;;  %v941_v56 = vpack.c.bf16 %v925_v44, %v925_v44  ;;  %v895_v62 = vmul.f32 0.35355338, %v887_v51  ;;  %v1025_v7 = vrot.slane %v1001_v58, 4  ;;  %v1265_v44 = vld [vmem:[%s2424_s21 + $0xe] sm:$0x1] }
 0x1ce   : > { %v838_v0 = vpack.c.b16 %v837_v63, %v823_v61  ;;  %v888_v61 = vld [vmem:[%s2455_s25 + $0x9] sm:$0x1]  ;;  %v1012_v63 = vsel %vm613_vm4, %v1011_v49, %v1010_v54  ;;  %v1003_v4 = vunpack.c.l.b16 %v940_v53  ;;  %v1027_v20 = vrot.slane %v1002_v3, 3 }
 0x1cf   : > { %v2563_v5 = vunpack.c.l.b16 %v941_v56  ;;  %v896_v9 = vmul.f32 0.35355338, %v888_v61  ;;  %v1014_v10 = vsel %vm616_vm5, %v1013_v59, %v1012_v63  ;;  %v903_v14 = vpack.c.bf16 %v895_v62, %v895_v62  ;;  %v1266_v59 = vld [vmem:[%s2424_s21 + $0x12] sm:$0x1] }
 0x1d0   : > { %2151 = vmatpush3.bf16.msra.mxu1 %v838_v0  ;;  %v1022_v0 = vsel %vm607_vm2, %v1021_v50, %v1020_v55  ;;  %v1029_v21 = vrot.slane %v1003_v4, 2  ;;  %v1016_v23 = vsel %vm619_vm6, %v1015_v6, %v1014_v10  ;;  %v902_v30 = vpack.c.bf16 %v894_v13, %v894_v13  ;;  %v1274_v63 = vld [vmem:[%s2424_s21 + $0x32] sm:$0x1]  ;;  %v1275_v13 = vld [vmem:[%s2424_s21 + $0x36] sm:$0x1] }
 0x1d1   : > { %2156 = vmatprep.subr.bf16.mxu1 %v2293_v32  ;;  %v1024_v11 = vsel %vm610_vm3, %v1023_v60, %v1022_v0  ;;  %v904_v25 = vpack.c.bf16 %v896_v9, %v896_v9  ;;  %v1031_v29 = vrot.slane %v2563_v5, 1  ;;  %v951_v31 = vunpack.c.l.b16 %v903_v14 }
 0x1d2   : > { %v1026_v24 = vsel %vm613_vm4, %v1025_v7, %v1024_v11  ;;  %v1287_v35 = vpack.c.bf16 %v1271_v18, %v1271_v18  ;;  %v898_v36 = vmul.f32 0.35355338, %v890_v12  ;;  %v899_v38 = vmul.f32 0.35355338, %v891_v16  ;;  %v1267_v7 = vld [vmem:[%s2424_s21 + $0x16] sm:$0x1] }
 0x1d3   : > { %v2580_v39 = vmul.f32 0.35355338, %v892_v17  ;;  %v2583_v40 = vsel %vm622_vm7, %v1017_v19, %v1016_v23  ;;  %v1028_v41 = vsel %vm616_vm5, %v1027_v20, %v1026_v24  ;;  %v905_v43 = vpack.c.bf16 %v897_v22, %v897_v22 }
 0x1d4   : > { %v1280_v45 = vpack.c.bf16 %v1264_v27, %v1264_v27  ;;  %v952_v46 = vunpack.c.l.b16 %v904_v25  ;;  %v1278_v49 = vpack.c.bf16 %v1262_v26, %v1262_v26  ;;  %v1288_v50 = vpack.c.bf16 %v1272_v34, %v1272_v34  ;;  %v1276_v26 = vld [vmem:[%s2424_s21 + $0x3a] sm:$0x1] }
 0x1d5   : > { %v1342_v51 = vunpack.c.l.b16 %v1279_v28  ;;  %v950_v52 = vunpack.c.l.b16 %v902_v30  ;;  %v958_v53 = vrot.slane %v951_v31, 7  ;;  %v1286_v54 = vpack.c.bf16 %v1270_v33, %v1270_v33  ;;  %v1269_v33 = vld [vmem:[%s2424_s21 + $0x1e] sm:$0x1] }
 0x1d6   : > { %v1350_v55 = vunpack.c.l.b16 %v1287_v35  ;;  %v1030_v56 = vsel %vm619_vm6, %v1029_v21, %v1028_v41  ;;  %v2590_v57 = vmul.f32 0.35355338, %v893_v42  ;;  %v906_v58 = vpack.c.bf16 %v898_v36, %v898_v36  ;;  %v1268_v21 = vld [vmem:[%s2424_s21 + $0x1a] sm:$0x1] }
 0x1d7   : > { %v1281_v60 = vpack.c.bf16 %v1265_v44, %v1265_v44  ;;  %v907_v61 = vpack.c.bf16 %v899_v38, %v899_v38  ;;  %v953_v62 = vunpack.c.l.b16 %v905_v43  ;;  %v1289_v0 = vpack.c.bf16 %v1273_v48, %v1273_v48  ;;  %v1277_v43 = vld [vmem:[%s2424_s21 + $0x3e] sm:$0x1]  ;;  %v1239_v48 = vld [vmem:[%s2455_s25 + $0x6] sm:$0x1] }
 0x1d8   : > { %v1343_v1 = vunpack.c.l.b16 %v1280_v45  ;;  %v960_v2 = vrot.slane %v952_v46, 6  ;;  %v1341_v3 = vunpack.c.l.b16 %v1278_v49  ;;  %v1351_v4 = vunpack.c.l.b16 %v1288_v50 }
 0x1d9   : > { %v1357_v5 = vrot.slane %v1342_v51, 7  ;;  %v959_v6 = vsel %vm604_vm0, %v958_v53, %v950_v52  ;;  %v1282_v8 = vpack.c.bf16 %v1266_v59, %v1266_v59  ;;  %v1349_v9 = vunpack.c.l.b16 %v1286_v54 }
 0x1da   : > { %v1371_v10 = vrot.slane %v1350_v55, 7  ;;  %v2597_v11 = vsel %vm622_vm7, %v1031_v29, %v1030_v56  ;;  %v954_v12 = vunpack.c.l.b16 %v906_v58  ;;  %v1290_v14 = vpack.c.bf16 %v1274_v63, %v1274_v63 }
 0x1db   : > { %v1344_v15 = vunpack.c.l.b16 %v1281_v60  ;;  %v908_v16 = vpack.c.bf16 %v2580_v39, %v2580_v39  ;;  %v962_v17 = vrot.slane %v953_v62, 5  ;;  %v1352_v18 = vunpack.c.l.b16 %v1289_v0  ;;  %v1242_v62 = vld [vmem:[%s2455_s25 + $0x12] sm:$0x1] }
 0x1dc   : > { %v1359_v19 = vrot.slane %v1343_v1, 6  ;;  %v961_v20 = vsel %vm607_vm2, %v960_v2, %v959_v6  ;;  %v1283_v22 = vpack.c.bf16 %v1267_v7, %v1267_v7  ;;  %v1358_v23 = vsel %vm604_vm0, %v1357_v5, %v1341_v3  ;;  %v1238_v3 = vld [vmem:[%s2455_s25 + $0x2] sm:$0x1] }
 0x1dd   : > { %v1373_v24 = vrot.slane %v1351_v4, 6  ;;  %v955_v25 = vunpack.c.l.b16 %v907_v61  ;;  %v1291_v27 = vpack.c.bf16 %v1275_v13, %v1275_v13  ;;  %v1345_v28 = vunpack.c.l.b16 %v1282_v8  ;;  %v1241_v61 = vld [vmem:[%s2455_s25 + $0xe] sm:$0x1]  ;;  %v1243_v4 = vld [vmem:[%s2455_s25 + $0x16] sm:$0x1] }
 0x1de   : > { %v1372_v29 = vsel %vm604_vm0, %v1371_v10, %v1349_v9  ;;  %v909_v30 = vpack.c.bf16 %v2590_v57, %v2590_v57  ;;  %v964_v31 = vrot.slane %v954_v12, 4  ;;  %v1353_v34 = vunpack.c.l.b16 %v1290_v14  ;;  %v1240_v57 = vld [vmem:[%s2455_s25 + $0xa] sm:$0x1]  ;;  %v1244_v9 = vld [vmem:[%s2455_s25 + $0x1a] sm:$0x1] }
 0x1df   : > { %v1361_v35 = vrot.slane %v1344_v15, 5  ;;  %v963_v36 = vsel %vm610_vm3, %v962_v17, %v961_v20  ;;  %v1284_v38 = vpack.c.bf16 %v1268_v21, %v1268_v21  ;;  %v1360_v39 = vsel %vm607_vm2, %v1359_v19, %v1358_v23  ;;  %v1245_v10 = vld [vmem:[%s2455_s25 + $0x1e] sm:$0x1] }
 0x1e0   : > { %v1375_v41 = vrot.slane %v1352_v18, 5  ;;  %v956_v42 = vunpack.c.l.b16 %v908_v16  ;;  %v1292_v44 = vpack.c.bf16 %v1276_v26, %v1276_v26  ;;  %v1346_v45 = vunpack.c.l.b16 %v1283_v22 }
 0x1e1   : > { %v1374_v46 = vsel %vm607_vm2, %v1373_v24, %v1372_v29  ;;  %v966_v49 = vrot.slane %v955_v25, 3  ;;  %v1285_v50 = vpack.c.bf16 %v1269_v33, %v1269_v33  ;;  %v1354_v51 = vunpack.c.l.b16 %v1291_v27  ;;  %v1615_v27 = vld [vmem:[%s2424_s21 + $0x7] sm:$0x1] }
 0x1e2   : > { %v1363_v52 = vrot.slane %v1345_v28, 4  ;;  %v1033_v53 = vpack.c.b16 %v2597_v11, %v2583_v40  ;;  %v965_v54 = vsel %vm613_vm4, %v964_v31, %v963_v36  ;;  %v1362_v55 = vsel %vm610_vm3, %v1361_v35, %v1360_v39  ;;  %v1623_v33 = vld [vmem:[%s2424_s21 + $0x27] sm:$0x1] }
 0x1e3   : > { %v1377_v56 = vrot.slane %v1353_v34, 4  ;;  %v1293_v58 = vpack.c.bf16 %v1277_v43, %v1277_v43  ;;  %v1347_v59 = vunpack.c.l.b16 %v1284_v38  ;;  %v1376_v60 = vsel %vm610_vm3, %v1375_v41, %v1374_v46  ;;  %v1616_v43 = vld [vmem:[%s2424_s21 + $0xb] sm:$0x1] }
 0x1e4   : > { %v1247_v63 = vmul.f32 0.35355338, %v1239_v48  ;;  %v957_v0 = vunpack.c.l.b16 %v909_v30  ;;  %v968_v1 = vrot.slane %v956_v42, 2  ;;  %v1355_v2 = vunpack.c.l.b16 %v1292_v44 }
 0x1e5   : > { %v1365_v40 = vrot.slane %v1346_v45, 3  ;;  %v967_v5 = vsel %vm616_vm5, %v966_v49, %v965_v54  ;;  %v1348_v6 = vunpack.c.l.b16 %v1285_v50  ;;  %v1364_v7 = vsel %vm613_vm4, %v1363_v52, %v1362_v55  ;;  %v1614_v49 = vld [vmem:[%s2424_s21 + $0x3] sm:$0x1]  ;;  %v1624_v50 = vld [vmem:[%s2424_s21 + $0x2b] sm:$0x1] }
 0x1e6   : > { %v1379_v8 = vrot.slane %v1354_v51, 3  ;;  %v1378_v11 = vsel %vm613_vm4, %v1377_v56, %v1376_v60  ;;  %v1248_v12 = vmul.f32 0.35355338, %v1240_v57  ;;  %v1249_v13 = vmul.f32 0.35355338, %v1241_v61 }
 0x1e7   : > { %v1250_v14 = vmul.f32 0.35355338, %v1242_v62  ;;  %v1356_v15 = vunpack.c.l.b16 %v1293_v58  ;;  %v1367_v16 = vrot.slane %v1347_v59, 2  ;;  %v1246_v17 = vmul.f32 0.35355338, %v1238_v3 }
 0x1e8   : > { %v1255_v18 = vpack.c.bf16 %v1247_v63, %v1247_v63  ;;  %v970_v19 = vrot.slane %v957_v0, 1  ;;  %v1366_v20 = vsel %vm616_vm5, %v1365_v40, %v1364_v7  ;;  %v1381_v21 = vrot.slane %v1355_v2, 2  ;;  %v1622_v56 = vld [vmem:[%s2424_s21 + $0x23] sm:$0x1]  ;;  %v1617_v60 = vld [vmem:[%s2424_s21 + $0xf] sm:$0x1] }
 0x1e9   : > { %v1251_v22 = vmul.f32 0.35355338, %v1243_v4  ;;  %v969_v23 = vsel %vm619_vm6, %v968_v1, %v967_v5  ;;  %v1380_v24 = vsel %vm616_vm5, %v1379_v8, %v1378_v11  ;;  %v1252_v25 = vmul.f32 0.35355338, %v1244_v9  ;;  %v1625_v63 = vld [vmem:[%s2424_s21 + $0x2f] sm:$0x1] }
 0x1ea   : > { %v1253_v26 = vmul.f32 0.35355338, %v1245_v10  ;;  %v1369_v28 = vrot.slane %v1348_v6, 1  ;;  %v1256_v29 = vpack.c.bf16 %v1248_v12, %v1248_v12  ;;  %v1257_v30 = vpack.c.bf16 %v1249_v13, %v1249_v13  ;;  %v1591_v40 = vld [vmem:[%s2455_s25 + $0x7] sm:$0x1] }
 0x1eb   : > { %v1258_v31 = vpack.c.bf16 %v1250_v14, %v1250_v14  ;;  %v1368_v34 = vsel %vm619_vm6, %v1367_v16, %v1366_v20  ;;  %v1383_v35 = vrot.slane %v1356_v15, 1  ;;  %v1254_v36 = vpack.c.bf16 %v1246_v17, %v1246_v17  ;;  %v1618_v10 = vld [vmem:[%s2424_s21 + $0x13] sm:$0x1]  ;;  %v1592_v16 = vld [vmem:[%s2455_s25 + $0xb] sm:$0x1] }
 0x1ec   : > { %v1303_v38 = vunpack.c.l.b16 %v1255_v18  ;;  %v2637_v39 = vsel %vm686_vm8, %v1033_v53, 0  ;;  %v1382_v41 = vsel %vm619_vm6, %v1381_v21, %v1380_v24  ;;  %v1259_v42 = vpack.c.bf16 %v1251_v22, %v1251_v22  ;;  %v1626_v13 = vld [vmem:[%s2424_s21 + $0x33] sm:$0x1]  ;;  %v1619_v24 = vld [vmem:[%s2424_s21 + $0x17] sm:$0x1] }
 0x1ed   : > { %v1631_v44 = vpack.c.bf16 %v1615_v27, %v1615_v27  ;;  %v2642_v45 = vsel %vm622_vm7, %v970_v19, %v969_v23  ;;  %v1260_v46 = vpack.c.bf16 %v1252_v25, %v1252_v25  ;;  %v1261_v48 = vpack.c.bf16 %v1253_v26, %v1253_v26  ;;  %v1590_v23 = vld [vmem:[%s2455_s25 + $0x3] sm:$0x1]  ;;  %v1620_v25 = vld [vmem:[%s2424_s21 + $0x1b] sm:$0x1] }
 0x1ee   : > { %v1639_v51 = vpack.c.bf16 %v1623_v33, %v1623_v33  ;;  %v2647_v52 = vsel %vm622_vm7, %v1369_v28, %v1368_v34  ;;  %v1304_v53 = vunpack.c.l.b16 %v1256_v29  ;;  %v2649_v54 = vunpack.c.l.b16 %v1257_v30  ;;  %v1627_v30 = vld [vmem:[%s2424_s21 + $0x37] sm:$0x1]  ;;  %v1593_v34 = vld [vmem:[%s2455_s25 + $0xf] sm:$0x1] }
 0x1ef   : > { %v2651_v55 = vunpack.c.l.b16 %v1258_v31  ;;  %v2655_v57 = vsel %vm622_vm7, %v1383_v35, %v1382_v41  ;;  %v1302_v58 = vunpack.c.l.b16 %v1254_v36  ;;  %v1310_v59 = vrot.slane %v1303_v38, 7 }
 0x1f0   : > { %v1632_v61 = vpack.c.bf16 %v1616_v43, %v1616_v43  ;;  %v2658_v62 = vunpack.c.l.b16 %v1259_v42  ;;  %v1630_v0 = vpack.c.bf16 %v1614_v49, %v1614_v49  ;;  %v1640_v1 = vpack.c.bf16 %v1624_v50, %v1624_v50  ;;  %v1621_v43 = vld [vmem:[%s2424_s21 + $0x1f] sm:$0x1]  ;;  %v1628_v50 = vld [vmem:[%s2424_s21 + $0x3b] sm:$0x1] }
 0x1f1   : > { %v1694_v2 = vunpack.c.l.b16 %v1631_v44  ;;  %v2662_v3 = vunpack.c.l.b16 %v1260_v46  ;;  %v2664_v4 = vunpack.c.l.b16 %v1261_v48  ;;  %v1638_v5 = vpack.c.bf16 %v1622_v56, %v1622_v56  ;;  %v1594_v56 = vld [vmem:[%s2455_s25 + $0x13] sm:$0x1] }
 0x1f2   : > { %v1702_v6 = vunpack.c.l.b16 %v1639_v51  ;;  %v1312_v7 = vrot.slane %v1304_v53, 6  ;;  %v1314_v8 = vrot.slane %v2649_v54, 5  ;;  %v1316_v9 = vrot.slane %v2651_v55, 4 }
 0x1f3   : > { %v1633_v11 = vpack.c.bf16 %v1617_v60, %v1617_v60  ;;  %v1311_v12 = vsel %vm604_vm0, %v1310_v59, %v1302_v58  ;;  %v1641_v14 = vpack.c.bf16 %v1625_v63, %v1625_v63  ;;  %v1695_v15 = vunpack.c.l.b16 %v1632_v61 }
 0x1f4   : > { %v1599_v17 = vmul.f32 0.35355338, %v1591_v40  ;;  %v1318_v19 = vrot.slane %v2658_v62, 3  ;;  %v1693_v20 = vunpack.c.l.b16 %v1630_v0  ;;  %v1703_v21 = vunpack.c.l.b16 %v1640_v1  ;;  %v1629_v0 = vld [vmem:[%s2424_s21 + $0x3f] sm:$0x1] }
 0x1f5   : > { %v1709_v22 = vrot.slane %v1694_v2, 7  ;;  %v1634_v26 = vpack.c.bf16 %v1618_v10, %v1618_v10  ;;  %v1701_v27 = vunpack.c.l.b16 %v1638_v5  ;;  %v1723_v28 = vrot.slane %v1702_v6, 7 }
 0x1f6   : > { %v1313_v29 = vsel %vm607_vm2, %v1312_v7, %v1311_v12  ;;  %v1642_v31 = vpack.c.bf16 %v1626_v13, %v1626_v13  ;;  %v1696_v33 = vunpack.c.l.b16 %v1633_v11  ;;  %v1600_v35 = vmul.f32 0.35355338, %v1592_v16  ;;  %v1595_v11 = vld [vmem:[%s2455_s25 + $0x17] sm:$0x1] }
 0x1f7   : > { %v1704_v36 = vunpack.c.l.b16 %v1641_v14  ;;  %v1711_v38 = vrot.slane %v1695_v15, 6  ;;  %v1598_v41 = vmul.f32 0.35355338, %v1590_v23  ;;  %v1607_v42 = vpack.c.bf16 %v1599_v17, %v1599_v17  ;;  %v1596_v23 = vld [vmem:[%s2455_s25 + $0x1b] sm:$0x1] }
 0x1f8   : > { %v1635_v44 = vpack.c.bf16 %v1619_v24, %v1619_v24  ;;  %v1636_v46 = vpack.c.bf16 %v1620_v25, %v1620_v25  ;;  %v1710_v48 = vsel %vm604_vm0, %v1709_v22, %v1693_v20  ;;  %v1725_v49 = vrot.slane %v1703_v21, 6 }
 0x1f9   : > { %v1643_v51 = vpack.c.bf16 %v1627_v30, %v1627_v30  ;;  %v1697_v53 = vunpack.c.l.b16 %v1634_v26  ;;  %v1724_v54 = vsel %vm604_vm0, %v1723_v28, %v1701_v27  ;;  %v1601_v58 = vmul.f32 0.35355338, %v1593_v34 }
 0x1fa   : > { %v1315_v59 = vsel %vm610_vm3, %v1314_v8, %v1313_v29  ;;  %v1705_v60 = vunpack.c.l.b16 %v1642_v31  ;;  %v1713_v61 = vrot.slane %v1696_v33, 5  ;;  %v1608_v63 = vpack.c.bf16 %v1600_v35, %v1600_v35 }
 0x1fb   : > { %v1712_v1 = vsel %vm607_vm2, %v1711_v38, %v1710_v48  ;;  %v1727_v2 = vrot.slane %v1704_v36, 5  ;;  %v1606_v40 = vpack.c.bf16 %v1598_v41, %v1598_v41  ;;  %v1655_v5 = vunpack.c.l.b16 %v1607_v42  ;;  %v1597_v41 = vld [vmem:[%s2455_s25 + $0x1f] sm:$0x1] }
 0x1fc   : > { %v1637_v6 = vpack.c.bf16 %v1621_v43, %v1621_v43  ;;  %v1644_v7 = vpack.c.bf16 %v1628_v50, %v1628_v50  ;;  %v1726_v10 = vsel %vm607_vm2, %v1725_v49, %v1724_v54  ;;  %v1602_v12 = vmul.f32 0.35355338, %v1594_v56 }
 0x1fd   : > { %v1698_v13 = vunpack.c.l.b16 %v1635_v44  ;;  %v1706_v14 = vunpack.c.l.b16 %v1643_v51  ;;  %v1715_v15 = vrot.slane %v1697_v53, 4  ;;  %v1609_v8 = vpack.c.bf16 %v1601_v58, %v1601_v58 }
 0x1fe   : > { %v1645_v16 = vpack.c.bf16 %v1629_v0, %v1629_v0  ;;  %v1714_v17 = vsel %vm610_vm3, %v1713_v61, %v1712_v1  ;;  %v1656_v20 = vunpack.c.l.b16 %v1608_v63  ;;  %v1728_v22 = vsel %vm610_vm3, %v1727_v2, %v1726_v10 }
 0x1ff   : > { %v1603_v24 = vmul.f32 0.35355338, %v1595_v11  ;;  %v1654_v25 = vunpack.c.l.b16 %v1606_v40  ;;  %v1662_v26 = vrot.slane %v1655_v5, 7  ;;  %v1699_v28 = vunpack.c.l.b16 %v1636_v46 }
 0x200   : > { %v1707_v29 = vunpack.c.l.b16 %v1644_v7  ;;  %v1610_v30 = vpack.c.bf16 %v1602_v12, %v1602_v12  ;;  %v1716_v31 = vsel %vm613_vm4, %v1715_v15, %v1714_v17  ;;  %v1717_v33 = vrot.slane %v1698_v13, 3 }
 0x201   : > { %v1731_v34 = vrot.slane %v1706_v14, 3  ;;  %v1657_v35 = vunpack.c.l.b16 %v1609_v8  ;;  %v1604_v42 = vmul.f32 0.35355338, %v1596_v23  ;;  %v1664_v43 = vrot.slane %v1656_v20, 6 }
 0x202   : > { %v1700_v44 = vunpack.c.l.b16 %v1637_v6  ;;  %v1708_v48 = vunpack.c.l.b16 %v1645_v16  ;;  %v1611_v49 = vpack.c.bf16 %v1603_v24, %v1603_v24  ;;  %v1663_v50 = vsel %vm604_vm0, %v1662_v26, %v1654_v25 }
 0x203   : > { %v1719_v46 = vrot.slane %v1699_v28, 2  ;;  %v1733_v51 = vrot.slane %v1707_v29, 2  ;;  %v1658_v53 = vunpack.c.l.b16 %v1610_v30  ;;  %v1718_v54 = vsel %vm616_vm5, %v1717_v33, %v1716_v31 }
 0x204   : > { %v1605_v58 = vmul.f32 0.35355338, %v1597_v41  ;;  %v1385_v55 = vpack.c.b16 %v2655_v57, %v2647_v52  ;;  %v1665_v61 = vsel %vm607_vm2, %v1664_v43, %v1663_v50  ;;  %v1721_v63 = vrot.slane %v1700_v44, 1 }
 0x205   : > { %v1735_v0 = vrot.slane %v1708_v48, 1  ;;  %v1659_v1 = vunpack.c.l.b16 %v1611_v49  ;;  %v972_v2 = vpack.c.b16 %v2642_v45, %v2642_v45  ;;  %v1720_v40 = vsel %vm619_vm6, %v1719_v46, %v1718_v54 }
 0x206   : > { %v1668_v52 = vrot.slane %v1658_v53, 4  ;;  %v1322_v57 = vrot.slane %v2664_v4, 1  ;;  %v1390_v62 = vsel %vm686_vm8, %v1385_v55, 0  ;;  %v1722_v10 = vsel %vm622_vm7, %v1721_v63, %v1720_v40  ;;  %v1102_v40 = vld [vmem:[%s2505_s29 + $0x29] sm:$0x1] }
 0x207   : > { %v1670_v45 = vrot.slane %v1659_v1, 3  ;;  %v1101_v1 = vld [vmem:[%s2505_s29 + $0x25] sm:$0x1] }
 0x254   : > { %v742_v18 = vpop.xlane.xlu0 %741 }
 0x255   : > { %2239 = vrcp.f32 %v742_v18  ;;  %v1729_v18 = vrot.slane %v1705_v60, 4  ;;  %v1666_v60 = vrot.slane %v1657_v35, 5 }
 0x257   : > { %v1730_v38 = vsel %vm613_vm4, %v1729_v18, %v1728_v22  ;;  %v1667_v6 = vsel %vm610_vm3, %v1666_v60, %v1665_v61 }
 0x258   : > { %v1732_v56 = vsel %vm616_vm5, %v1731_v34, %v1730_v38  ;;  %v1669_v12 = vsel %vm613_vm4, %v1668_v52, %v1667_v6  ;;  %v1092_v52 = vld [vmem:[%s2505_s29 + $0x1] sm:$0x1] }
 0x259   : > { %v1734_v5 = vsel %vm619_vm6, %v1733_v51, %v1732_v56  ;;  %v1671_v8 = vsel %vm616_vm5, %v1670_v45, %v1669_v12  ;;  %v1117_v45 = vpack.c.bf16 %v1101_v1, %v1101_v1  ;;  %v1118_v12 = vpack.c.bf16 %v1102_v40, %v1102_v40 }
 0x25a   : > { %v1736_v11 = vsel %vm622_vm7, %v1735_v0, %v1734_v5  ;;  %v1093_v0 = vld [vmem:[%s2505_s29 + $0x5] sm:$0x1] }
 0x25b   : > { %v1737_v14 = vpack.c.b16 %v1736_v11, %v1722_v10  ;;  %v1109_v5 = vpack.c.bf16 %v1093_v0, %v1093_v0  ;;  %v1108_v10 = vpack.c.bf16 %v1092_v52, %v1092_v52 }
 0x25d   : > { %v1742_v18 = vsel %vm686_vm8, %v1737_v14, 0  ;;  %v1105_v14 = vld [vmem:[%s2505_s29 + $0x35] sm:$0x1] }
 0x25f   : > { %v2240_v21 = vpop.eup %2239 }
 0x260   : > { %v744_v27 = vmul.f32 %v2240_v21, %v2500_v47  ;;  %v1317_v47 = vsel %vm613_vm4, %v1316_v9, %v1315_v59  ;;  %v1320_v9 = vrot.slane %v2662_v3, 2  ;;  %v1612_v59 = vpack.c.bf16 %v1604_v42, %v1604_v42 }
 0x261   : > { %v1613_v3 = vpack.c.bf16 %v1605_v58, %v1605_v58 }
 0x262   : > { %v745_v36 = vpack.c.bf16 %v744_v27, %v744_v27  ;;  %v1660_v7 = vunpack.c.l.b16 %v1612_v59 }
 0x263   : > { %v1661_v13 = vunpack.c.l.b16 %v1613_v3  ;;  %v1100_v3 = vld [vmem:[%s2505_s29 + $0x21] sm:$0x1] }
 0x264   : > { %2153 = vmatmul.mubr.msk.bf16.vlgmr.msra.gmra.mrb[0].mxu1 %vm733_vm10, %v745_v36  ;;  %v1672_v15 = vrot.slane %v1660_v7, 2  ;;  %v1104_v7 = vld [vmem:[%s2505_s29 + $0x31] sm:$0x1] }
 0x265   : > { %2157 = vmatpush3.bf16.xpose.msra.mxu1 %v2637_v39  ;;  %2158 = vmatprep.mubr.msk.bf16.mxu1 %vm2294_vm1, %v2293_v32  ;;  %v1319_v39 = vsel %vm616_vm5, %v1318_v19, %v1317_v47  ;;  %v1674_v17 = vrot.slane %v1661_v13, 1  ;;  %v1097_v13 = vld [vmem:[%s2505_s29 + $0x15] sm:$0x1] }
 0x266   : > { %2168 = vmatprep.subr.bf16.mxu1 %v2293_v32  ;;  %v1321_v19 = vsel %vm619_vm6, %v1320_v9, %v1319_v39  ;;  %v1673_v20 = vsel %vm619_vm6, %v1672_v15, %v1671_v8  ;;  %v1116_v8 = vpack.c.bf16 %v1100_v3, %v1100_v3 }
 0x267   : > { %v1323_v4 = vsel %vm622_vm7, %v1322_v57, %v1321_v19  ;;  %v1675_v21 = vsel %vm622_vm7, %v1674_v17, %v1673_v20  ;;  %v1095_v57 = vld [vmem:[%s2505_s29 + $0xd] sm:$0x1]  ;;  %v1141_v17 = vunpack.c.l.b16 %v1109_v5  ;;  %v1098_v20 = vld [vmem:[%s2505_s29 + $0x19] sm:$0x1] }
 0x268   : > { %v1324_v16 = vpack.c.b16 %v1323_v4, %v1323_v4  ;;  %v1676_v22 = vpack.c.b16 %v1675_v21, %v1675_v21  ;;  %v1103_v19 = vld [vmem:[%s2505_s29 + $0x2d] sm:$0x1]  ;;  %v1111_v11 = vpack.c.bf16 %v1095_v57, %v1095_v57  ;;  %v1106_v21 = vld [vmem:[%s2505_s29 + $0x39] sm:$0x1] }
 0x26c   : > { %2159 = vmatmul.mubr.msk.bf16.vlgmr.msra.gmra.mrb[4].mxu1 %vm686_vm8, %v972_v2  ;;  %v1094_v2 = vld [vmem:[%s2505_s29 + $0x9] sm:$0x1] }
 0x26d   : > { %2169 = vmatpush3.bf16.xpose.msra.mxu1 %v1390_v62  ;;  %2170 = vmatprep.mubr.msk.bf16.mxu1 %vm2294_vm1, %v2293_v32  ;;  %v1110_v6 = vpack.c.bf16 %v1094_v2, %v1094_v2  ;;  %v1096_v62 = vld [vmem:[%s2505_s29 + $0x11] sm:$0x1] }
 0x26e   : > { %2180 = vmatprep.subr.bf16.mxu1 %v2293_v32  ;;  %v1112_v15 = vpack.c.bf16 %v1096_v62, %v1096_v62 }
 0x274   : > { %2171 = vmatmul.mubr.msk.bf16.vlgmr.msra.gmra.mrb[8].mxu1 %vm686_vm8, %v1324_v16  ;;  %v1119_v16 = vpack.c.bf16 %v1103_v19, %v1103_v19 }
 0x275   : > { %2181 = vmatpush3.bf16.xpose.msra.mxu1 %v1742_v18  ;;  %2182 = vmatprep.mubr.msk.bf16.mxu1 %vm2294_vm1, %v2293_v32 }
 0x27c   : > { %2183 = vmatmul.mubr.msk.bf16.vlgmr.msra.gmra.mrb[12].mxu1 %vm686_vm8, %v1676_v22  ;;  %v1113_v22 = vpack.c.bf16 %v1097_v13, %v1097_v13 }
 0x337   : > { %v877_v23 = vpop.f32.mrb[0].mxu1 }
 0x338   : > { %v883_v24 = vpack.c.bf16 %v877_v23, %v877_v23  ;;  %v2154_v25 = vpop.f32.mrb[1].mxu1  ;;  %v1120_v23 = vpack.c.bf16 %v1104_v7, %v1104_v7 }
 0x339   : > { %v880_v26 = vpop.f32.mrb[2].mxu1  ;;  %v1099_v25 = vld [vmem:[%s2505_s29 + $0x1d] sm:$0x1] }
 0x33a   : > { %885 = vst.msk [vmem:[%s2742_s7] sm:$0xf] %vm884_vm11, %v883_v24  ;;  %v2155_v27 = vpop.f32.mrb[3].mxu1  ;;  %v1142_v24 = vunpack.c.l.b16 %v1110_v6  ;;  %v1107_v26 = vld [vmem:[%s2505_s29 + $0x3d] sm:$0x1] }
 0x33b   : > { %v1114_v27 = vpack.c.bf16 %v1098_v20, %v1098_v20  ;;  %v1447_v20 = vld [vmem:[%s2505_s29 + $0xe] sm:$0x1] }
 0x33f   : > { %v1074_v28 = vpop.f32.mrb[4].mxu1 }
 0x340   : > { %v1075_v29 = vadd.f32 %v1074_v28, %v2496_v37  ;;  %v2160_v30 = vpop.f32.mrb[5].mxu1  ;;  %v1121_v28 = vpack.c.bf16 %v1105_v14, %v1105_v14 }
 0x341   : > { %v1077_v31 = vpop.f32.mrb[6].mxu1  ;;  %v1143_v30 = vunpack.c.l.b16 %v1111_v11 }
 0x342   : > { %v2161_v33 = vpop.f32.mrb[7].mxu1  ;;  %v1080_v34 = vsel %vm733_vm10, %v1075_v29, -inf  ;;  %v1115_v31 = vpack.c.bf16 %v1099_v25, %v1099_v25 }
 0x343   : > { %1081 = vmax.xlane.f32.xlu1 %v1080_v34  ;;  %v1123_v33 = vpack.c.bf16 %v1107_v26, %v1107_v26  ;;  %v1144_v34 = vunpack.c.l.b16 %v1112_v15  ;;  %v1445_v15 = vld [vmem:[%s2505_s29 + $0x6] sm:$0x1] }
 0x347   : > { %v1426_v35 = vpop.f32.mrb[8].mxu1 }
 0x348   : > { %v1427_v36 = vadd.f32 %v1426_v35, %v2496_v37  ;;  %v2172_v38 = vpop.f32.mrb[9].mxu1  ;;  %v1145_v35 = vunpack.c.l.b16 %v1113_v22 }
 0x349   : > { %v1429_v41 = vpop.f32.mrb[10].mxu1  ;;  %v1149_v38 = vunpack.c.l.b16 %v1117_v45 }
 0x34a   : > { %v2173_v42 = vpop.f32.mrb[11].mxu1  ;;  %v1432_v43 = vsel %vm733_vm10, %v1427_v36, -inf  ;;  %v1150_v41 = vunpack.c.l.b16 %v1118_v12 }
 0x34b   : > { %1433 = vmax.xlane.f32.xlu1 %v1432_v43  ;;  %v1151_v42 = vunpack.c.l.b16 %v1119_v16  ;;  %v1146_v43 = vunpack.c.l.b16 %v1114_v27  ;;  %v1453_v16 = vld [vmem:[%s2505_s29 + $0x26] sm:$0x1]  ;;  %v1448_v27 = vld [vmem:[%s2505_s29 + $0x12] sm:$0x1] }
 0x34f   : > { %v1778_v44 = vpop.f32.mrb[12].mxu1 }
 0x350   : > { %v1779_v48 = vadd.f32 %v1778_v44, %v2496_v37  ;;  %v2184_v49 = vpop.f32.mrb[13].mxu1  ;;  %v1147_v44 = vunpack.c.l.b16 %v1115_v31 }
 0x351   : > { %v1781_v50 = vpop.f32.mrb[14].mxu1  ;;  %v1152_v49 = vunpack.c.l.b16 %v1120_v23  ;;  %v1469_v23 = vpack.c.bf16 %v1453_v16, %v1453_v16 }
 0x352   : > { %v2185_v47 = vpop.f32.mrb[15].mxu1  ;;  %v1784_v46 = vsel %vm733_vm10, %v1779_v48, -inf  ;;  %v1153_v50 = vunpack.c.l.b16 %v1121_v28  ;;  %v1168_v2 = vrot.slane %v1147_v44, 1  ;;  %v1449_v28 = vld [vmem:[%s2505_s29 + $0x16] sm:$0x1] }
 0x353   : > { %1785 = vmax.xlane.f32.xlu0 %v1784_v46  ;;  %v1156_v47 = vrot.slane %v1141_v17, 7  ;;  %v1158_v46 = vrot.slane %v1142_v24, 6  ;;  %v1176_v0 = vrot.slane %v1152_v49, 4  ;;  %v1461_v17 = vpack.c.bf16 %v1445_v15, %v1445_v15  ;;  %v1452_v24 = vld [vmem:[%s2505_s29 + $0x22] sm:$0x1] }
 0x354   : > { %v1178_v5 = vrot.slane %v1153_v50, 3  ;;  %v1457_v44 = vld [vmem:[%s2505_s29 + $0x36] sm:$0x1]  ;;  %v1465_v49 = vpack.c.bf16 %v1449_v28, %v1449_v28  ;;  %v1807_v15 = vld [vmem:[%s2505_s29 + $0x2f] sm:$0x1] }
 0x355   : > { %v1493_v26 = vunpack.c.l.b16 %v1461_v17  ;;  %v1800_v28 = vld [vmem:[%s2505_s29 + $0x13] sm:$0x1] }
 0x3d0   : > { %v1082_v51 = vpop.xlane.xlu1 %1081 }
 0x3d1   : > { %v1083_v53 = vsub.f32 %v1075_v29, %v1082_v51  ;;  %v1122_v29 = vpack.c.bf16 %v1106_v21, %v1106_v21  ;;  %v1160_v51 = vrot.slane %v1143_v30, 5  ;;  %v1454_v21 = vld [vmem:[%s2505_s29 + $0x2a] sm:$0x1]  ;;  %v1463_v30 = vpack.c.bf16 %v1447_v20, %v1447_v20 }
 0x3d2   : > { %v1470_v31 = vpack.c.bf16 %v1454_v21, %v1454_v21 }
 0x3d3   : > { %v1084_v54 = vmul.f32 1.442695, %v1083_v53  ;;  %v1154_v53 = vunpack.c.l.b16 %v1122_v29  ;;  %v1450_v29 = vld [vmem:[%s2505_s29 + $0x1a] sm:$0x1] }
 0x3d4   : > { %v1466_v50 = vpack.c.bf16 %v1450_v29, %v1450_v29  ;;  %v1808_v29 = vld [vmem:[%s2505_s29 + $0x33] sm:$0x1] }
 0x3d5   : > { %2241 = vpow2.f32 %v1084_v54  ;;  %v1155_v54 = vunpack.c.l.b16 %v1123_v33  ;;  %v1180_v3 = vrot.slane %v1154_v53, 2  ;;  %v1451_v33 = vld [vmem:[%s2505_s29 + $0x1e] sm:$0x1] }
 0x3d6   : > { %v1459_v53 = vld [vmem:[%s2505_s29 + $0x3e] sm:$0x1] }
 0x3d7   : > { %v1182_v19 = vrot.slane %v1155_v54, 1  ;;  %v1467_v54 = vpack.c.bf16 %v1451_v33, %v1451_v33 }
 0x3d8   : > { %v1434_v56 = vpop.xlane.xlu1 %1433 }
 0x3d9   : > { %v1435_v58 = vsub.f32 %v1427_v36, %v1434_v56  ;;  %v1140_v36 = vunpack.c.l.b16 %v1108_v10  ;;  %v1162_v56 = vrot.slane %v1144_v34, 4  ;;  %v1455_v34 = vld [vmem:[%s2505_s29 + $0x2e] sm:$0x1] }
 0x3db   : > { %v1436_v60 = vmul.f32 1.442695, %v1435_v58  ;;  %v1164_v58 = vrot.slane %v1145_v35, 3  ;;  %v1468_v35 = vpack.c.bf16 %v1452_v24, %v1452_v24 }
 0x3dd   : > { %2243 = vpow2.f32 %v1436_v60  ;;  %v1157_v60 = vsel %vm604_vm0, %v1156_v47, %v1140_v36  ;;  %v1797_v47 = vld [vmem:[%s2505_s29 + $0x7] sm:$0x1] }
 0x3df   : > { %v2751_v37 = vpop.eup %2241 }
 0x3e0   : > { %v1786_v55 = vpop.xlane.xlu0 %1785  ;;  %v1086_v9 = vsel %vm733_vm10, %v2751_v37, 0.0 }
 0x3e1   : > { %v1787_v59 = vsub.f32 %v1779_v48, %v1786_v55  ;;  %1087 = vadd.xlane.f32.xlu1 %v1086_v9  ;;  %v1148_v48 = vunpack.c.l.b16 %v1116_v8  ;;  %v1170_v55 = vrot.slane %v1149_v38, 7  ;;  %v1172_v9 = vrot.slane %v1150_v41, 6  ;;  %v1446_v8 = vld [vmem:[%s2505_s29 + $0xa] sm:$0x1]  ;;  %v1456_v41 = vld [vmem:[%s2505_s29 + $0x32] sm:$0x1] }
 0x3e2   : > { %v1462_v22 = vpack.c.bf16 %v1446_v8, %v1446_v8  ;;  %v1501_v38 = vunpack.c.l.b16 %v1469_v23 }
 0x3e3   : > { %v1788_v61 = vmul.f32 1.442695, %v1787_v59  ;;  %v1174_v59 = vrot.slane %v1151_v42, 5  ;;  %v1171_v40 = vsel %vm604_vm0, %v1170_v55, %v1148_v48  ;;  %v1464_v48 = vpack.c.bf16 %v1448_v27, %v1448_v27 }
 0x3e4   : > { %v1173_v57 = vsel %vm607_vm2, %v1172_v9, %v1171_v40  ;;  %v1494_v36 = vunpack.c.l.b16 %v1462_v22  ;;  %v1472_v55 = vpack.c.bf16 %v1456_v41, %v1456_v41  ;;  %v1500_v9 = vunpack.c.l.b16 %v1468_v35 }
 0x3e5   : > { %2245 = vpow2.f32 %v1788_v61  ;;  %v1159_v61 = vsel %vm607_vm2, %v1158_v46, %v1157_v60  ;;  %v1175_v62 = vsel %vm610_vm3, %v1174_v59, %v1173_v57  ;;  %v1805_v46 = vld [vmem:[%s2505_s29 + $0x27] sm:$0x1]  ;;  %v1502_v60 = vunpack.c.l.b16 %v1470_v31 }
 0x3e6   : > { %v1161_v1 = vsel %vm610_vm3, %v1160_v51, %v1159_v61  ;;  %v1177_v10 = vsel %vm613_vm4, %v1176_v0, %v1175_v62  ;;  %v1458_v51 = vld [vmem:[%s2505_s29 + $0x3a] sm:$0x1]  ;;  %v1510_v59 = vrot.slane %v1494_v36, 6  ;;  %v1522_v61 = vrot.slane %v1501_v38, 7  ;;  %v1796_v62 = vld [vmem:[%s2505_s29 + $0x3] sm:$0x1] }
 0x3e7   : > { %v2755_v39 = vpop.eup %2243  ;;  %v1163_v52 = vsel %vm613_vm4, %v1162_v56, %v1161_v1  ;;  %v1179_v45 = vsel %vm616_vm5, %v1178_v5, %v1177_v10  ;;  %v1471_v56 = vpack.c.bf16 %v1455_v34, %v1455_v34  ;;  %v1798_v1 = vld [vmem:[%s2505_s29 + $0xb] sm:$0x1]  ;;  %v1813_v40 = vpack.c.bf16 %v1797_v47, %v1797_v47 }
 0x3e8   : > { %v1438_v63 = vsel %vm733_vm10, %v2755_v39, 0.0  ;;  %v1165_v6 = vsel %vm616_vm5, %v1164_v58, %v1163_v52  ;;  %v1181_v12 = vsel %vm619_vm6, %v1180_v3, %v1179_v45  ;;  %v1495_v58 = vunpack.c.l.b16 %v1463_v30 }
 0x3e9   : > { %1439 = vadd.xlane.f32.xlu0 %v1438_v63  ;;  %v1166_v63 = vrot.slane %v1146_v43, 2  ;;  %v1183_v13 = vsel %vm622_vm7, %v1182_v19, %v1181_v12  ;;  %v1508_v43 = vrot.slane %v1493_v26, 7  ;;  %v1821_v5 = vpack.c.bf16 %v1805_v46, %v1805_v46  ;;  %v1804_v19 = vld [vmem:[%s2505_s29 + $0x23] sm:$0x1] }
 0x3ea   : > { %v1474_v52 = vpack.c.bf16 %v1458_v51, %v1458_v51  ;;  %v1475_v57 = vpack.c.bf16 %v1459_v53, %v1459_v53  ;;  %v1496_v3 = vunpack.c.l.b16 %v1464_v48  ;;  %v1503_v10 = vunpack.c.l.b16 %v1471_v56 }
 0x3eb   : > { %v1167_v7 = vsel %vm619_vm6, %v1166_v63, %v1165_v6  ;;  %v1473_v63 = vpack.c.bf16 %v1457_v44, %v1457_v44  ;;  %v2815_v6 = vunpack.c.l.b16 %v1465_v49  ;;  %v1524_v45 = vrot.slane %v1502_v60, 6  ;;  %v1801_v49 = vld [vmem:[%s2505_s29 + $0x17] sm:$0x1] }
 0x3ec   : > { %v1169_v11 = vsel %vm622_vm7, %v1168_v2, %v1167_v7  ;;  %v1806_v2 = vld [vmem:[%s2505_s29 + $0x2b] sm:$0x1]  ;;  %v2819_v7 = vunpack.c.l.b16 %v1466_v50  ;;  %v1814_v8 = vpack.c.bf16 %v1798_v1, %v1798_v1  ;;  %v1812_v17 = vpack.c.bf16 %v1796_v62, %v1796_v62  ;;  %v1809_v50 = vld [vmem:[%s2505_s29 + $0x37] sm:$0x1] }
 0x3ed   : > { %v1184_v14 = vpack.c.b16 %v1183_v13, %v1169_v11  ;;  %v1512_v11 = vrot.slane %v1495_v58, 5  ;;  %v1523_v13 = vsel %vm604_vm0, %v1522_v61, %v1500_v9  ;;  %v1822_v16 = vpack.c.bf16 %v1806_v2, %v1806_v2  ;;  %v1802_v61 = vld [vmem:[%s2505_s29 + $0x1b] sm:$0x1] }
 0x3ee   : > { %v1845_v20 = vunpack.c.l.b16 %v1813_v40  ;;  %v1853_v21 = vunpack.c.l.b16 %v1821_v5  ;;  %v2825_v22 = vunpack.c.l.b16 %v1467_v54  ;;  %v1504_v23 = vunpack.c.l.b16 %v1472_v55 }
 0x3ef   : > { %v2769_v4 = vpop.eup %2245  ;;  %2163 = vmatpush3.bf16.msra.mxu0 %v1184_v14  ;;  %v1799_v14 = vld [vmem:[%s2505_s29 + $0xf] sm:$0x1]  ;;  %v1505_v24 = vunpack.c.l.b16 %v1473_v63  ;;  %v1514_v26 = vrot.slane %v1496_v3, 4  ;;  %v1526_v27 = vrot.slane %v1503_v10, 5  ;;  %v1823_v31 = vpack.c.bf16 %v1807_v15, %v1807_v15  ;;  %v1810_v63 = vld [vmem:[%s2505_s29 + $0x3b] sm:$0x1] }
 0x3f0   : > { %v1790_v18 = vsel %vm733_vm10, %v2769_v4, 0.0  ;;  %2174 = vmatprep.subr.bf16.mxu0 %v2293_v32  ;;  %v1815_v30 = vpack.c.bf16 %v1799_v14, %v1799_v14  ;;  %v1525_v34 = vsel %vm607_vm2, %v1524_v45, %v1523_v13  ;;  %v1846_v35 = vunpack.c.l.b16 %v1814_v8  ;;  %v1803_v10 = vld [vmem:[%s2505_s29 + $0x1f] sm:$0x1] }
 0x3f1   : > { %1791 = vadd.xlane.f32.xlu1 %v1790_v18  ;;  %v1444_v18 = vld [vmem:[%s2505_s29 + $0x2] sm:$0x1]  ;;  %v1854_v36 = vunpack.c.l.b16 %v1822_v16  ;;  %v1844_v38 = vunpack.c.l.b16 %v1812_v17  ;;  %v1507_v44 = vunpack.c.l.b16 %v1475_v57  ;;  %v1528_v48 = vrot.slane %v1504_v23, 4 }
 0x3f2   : > { %v1460_v25 = vpack.c.bf16 %v1444_v18, %v1444_v18  ;;  %v1820_v18 = vpack.c.bf16 %v1804_v19, %v1804_v19  ;;  %v1816_v47 = vpack.c.bf16 %v1800_v28, %v1800_v28  ;;  %v1824_v46 = vpack.c.bf16 %v1808_v29, %v1808_v29 }
 0x3f3   : > { %v1516_v51 = vrot.slane %v2815_v6, 3  ;;  %v1527_v53 = vsel %vm610_vm3, %v1526_v27, %v1525_v34  ;;  %v1847_v54 = vunpack.c.l.b16 %v1815_v30  ;;  %v1855_v56 = vunpack.c.l.b16 %v1823_v31 }
 0x3f4   : > { %v1492_v42 = vunpack.c.l.b16 %v1460_v25  ;;  %v2827_v25 = vunpack.c.l.b16 %v1474_v52  ;;  %v1852_v41 = vunpack.c.l.b16 %v1820_v18  ;;  %v1530_v60 = vrot.slane %v1505_v24, 3 }
 0x3f5   : > { %v1862_v55 = vrot.slane %v1846_v35, 6  ;;  %v1876_v9 = vrot.slane %v1854_v36, 6  ;;  %v1825_v1 = vpack.c.bf16 %v1809_v50, %v1809_v50  ;;  %v1529_v5 = vsel %vm613_vm4, %v1528_v48, %v1527_v53 }
 0x3f6   : > { %v1509_v0 = vsel %vm604_vm0, %v1508_v43, %v1492_v42  ;;  %v1860_v42 = vrot.slane %v1845_v20, 7  ;;  %v1874_v43 = vrot.slane %v1853_v21, 7  ;;  %v1848_v52 = vunpack.c.l.b16 %v1816_v47 }
 0x3f7   : > { %v1511_v12 = vsel %vm607_vm2, %v1510_v59, %v1509_v0  ;;  %v1817_v0 = vpack.c.bf16 %v1801_v49, %v1801_v49  ;;  %v1856_v57 = vunpack.c.l.b16 %v1824_v46  ;;  %v1518_v3 = vrot.slane %v2819_v7, 2 }
 0x3f8   : > { %v1513_v33 = vsel %vm610_vm3, %v1512_v11, %v1511_v12  ;;  %v1861_v2 = vsel %vm604_vm0, %v1860_v42, %v1844_v38  ;;  %v1875_v40 = vsel %vm604_vm0, %v1874_v43, %v1852_v41  ;;  %v1532_v6 = vrot.slane %v2827_v25, 2  ;;  %v1811_v11 = vld [vmem:[%s2505_s29 + $0x3f] sm:$0x1] }
 0x3f9   : > { %v1515_v58 = vsel %vm613_vm4, %v1514_v26, %v1513_v33  ;;  %v1864_v62 = vrot.slane %v1847_v54, 5  ;;  %v1878_v19 = vrot.slane %v1855_v56, 5  ;;  %v1818_v45 = vpack.c.bf16 %v1802_v61, %v1802_v61 }
 0x3fa   : > { %v1826_v12 = vpack.c.bf16 %v1810_v63, %v1810_v63  ;;  %v1863_v13 = vsel %vm607_vm2, %v1862_v55, %v1861_v2  ;;  %v1877_v14 = vsel %vm607_vm2, %v1876_v9, %v1875_v40  ;;  %v1517_v15 = vsel %vm616_vm5, %v1516_v51, %v1515_v58 }
 0x3fb   : > { %v1531_v8 = vsel %vm616_vm5, %v1530_v60, %v1529_v5  ;;  %v1849_v16 = vunpack.c.l.b16 %v1817_v0  ;;  %v1857_v17 = vunpack.c.l.b16 %v1825_v1  ;;  %v1520_v7 = vrot.slane %v2825_v22, 1 }
 0x3fc   : > { %v1534_v18 = vrot.slane %v1507_v44, 1  ;;  %v1866_v20 = vrot.slane %v1848_v52, 4  ;;  %v1880_v21 = vrot.slane %v1856_v57, 4  ;;  %v1819_v23 = vpack.c.bf16 %v1803_v10, %v1803_v10 }
 0x3fd   : > { %v1827_v24 = vpack.c.bf16 %v1811_v11, %v1811_v11  ;;  %v1865_v25 = vsel %vm610_vm3, %v1864_v62, %v1863_v13  ;;  %v1879_v26 = vsel %vm610_vm3, %v1878_v19, %v1877_v14  ;;  %v1519_v27 = vsel %vm619_vm6, %v1518_v3, %v1517_v15 }
 0x3fe   : > { %v1533_v28 = vsel %vm619_vm6, %v1532_v6, %v1531_v8  ;;  %v1850_v29 = vunpack.c.l.b16 %v1818_v45  ;;  %v1858_v30 = vunpack.c.l.b16 %v1826_v12  ;;  %v1868_v33 = vrot.slane %v1849_v16, 3 }
 0x3ff   : > { %v1882_v34 = vrot.slane %v1857_v17, 3  ;;  %v1867_v22 = vsel %vm613_vm4, %v1866_v20, %v1865_v25  ;;  %v1881_v35 = vsel %vm613_vm4, %v1880_v21, %v1879_v26  ;;  %v1521_v36 = vsel %vm622_vm7, %v1520_v7, %v1519_v27 }
 0x400   : > { %v1535_v38 = vsel %vm622_vm7, %v1534_v18, %v1533_v28  ;;  %v1851_v41 = vunpack.c.l.b16 %v1819_v23  ;;  %v1859_v42 = vunpack.c.l.b16 %v1827_v24  ;;  %v1870_v44 = vrot.slane %v1850_v29, 2 }
 0x401   : > { %v1884_v48 = vrot.slane %v1858_v30, 2  ;;  %v1869_v50 = vsel %vm616_vm5, %v1868_v33, %v1867_v22  ;;  %v1883_v47 = vsel %vm616_vm5, %v1882_v34, %v1881_v35  ;;  %v1536_v46 = vpack.c.b16 %v1535_v38, %v1521_v36 }
 0x402   : > { %v1872_v53 = vrot.slane %v1851_v41, 1  ;;  %v1886_v54 = vrot.slane %v1859_v42, 1  ;;  %v1871_v56 = vsel %vm619_vm6, %v1870_v44, %v1869_v50 }
 0x403   : > { %v1885_v58 = vsel %vm619_vm6, %v1884_v48, %v1883_v47 }
 0x404   : > { %v1887_v55 = vsel %vm622_vm7, %v1886_v54, %v1885_v58 }
 0x46e   : > { %v1088_v59 = vpop.xlane.xlu1 %1087 }
 0x46f   : > { %2247 = vrcp.f32 %v1088_v59 }
 0x476   : > { %v1440_v31 = vpop.xlane.xlu0 %1439 }
 0x477   : > { %2249 = vrcp.f32 %v1440_v31 }
 0x479   : > { %v2248_v43 = vpop.eup %2247 }
 0x47a   : > { %v1090_v49 = vmul.f32 %v2248_v43, %v2751_v37  ;;  %v1873_v37 = vsel %vm622_vm7, %v1872_v53, %v1871_v56 }
 0x47b   : > { %v1888_v61 = vpack.c.b16 %v1887_v55, %v1873_v37 }
 0x47c   : > { %v1091_v51 = vpack.c.bf16 %v1090_v49, %v1090_v49 }
 0x47e   : > { %2165 = vmatmul.mubr.msk.bf16.vlgmr.msra.gmra.mrb[4].mxu0 %vm733_vm10, %v1091_v51  ;;  %v1792_v60 = vpop.xlane.xlu1 %1791 }
 0x47f   : > { %2175 = vmatpush3.bf16.msra.mxu0 %v1536_v46  ;;  %2251 = vrcp.f32 %v1792_v60  ;;  %2176 = vmatprep.mubr.msk.bf16.mxu0 %vm2294_vm1, %v2293_v32 }
 0x480   : > { %2186 = vmatprep.subr.bf16.mxu0 %v2293_v32 }
 0x481   : > { %v2250_v9 = vpop.eup %2249 }
 0x482   : > { %v1442_v59 = vmul.f32 %v2250_v9, %v2755_v39 }
 0x484   : > { %v1443_v63 = vpack.c.bf16 %v1442_v59, %v1442_v59 }
 0x486   : > { %2177 = vmatmul.mubr.msk.bf16.vlgmr.msra.gmra.mrb[8].mxu0 %vm733_vm10, %v1443_v63 }
 0x487   : > { %2187 = vmatpush3.bf16.msra.mxu0 %v1888_v61  ;;  %2188 = vmatprep.mubr.msk.bf16.mxu0 %vm2294_vm1, %v2293_v32 }
 0x489   : > { %v2252_v0 = vpop.eup %2251 }
 0x48a   : > { %v1794_v1 = vmul.f32 %v2252_v0, %v2769_v4 }
 0x48c   : > { %v1795_v2 = vpack.c.bf16 %v1794_v1, %v1794_v1 }
 0x48e   : > { %2189 = vmatmul.mubr.msk.bf16.vlgmr.msra.gmra.mrb[12].mxu0 %vm733_vm10, %v1795_v2 }
 0x551   : > { %v1223_v40 = vpop.f32.mrb[4].mxu0 }
 0x552   : > { %v2125_v5 = vpack.c.bf16 %v1223_v40, %v1223_v40  ;;  %v2166_v52 = vpop.f32.mrb[5].mxu0 }
 0x553   : > { %v1226_v57 = vpop.f32.mrb[6].mxu0 }
 0x554   : > { %1233 = vrot.lane.b32.xlu0 %v2125_v5, %s2295_s17  ;;  %v2167_v39 = vpop.f32.mrb[7].mxu0 }
 0x559   : > { %v1575_v3 = vpop.f32.mrb[8].mxu0 }
 0x55a   : > { %v2126_v6 = vpack.c.bf16 %v1575_v3, %v1575_v3  ;;  %v2178_v62 = vpop.f32.mrb[9].mxu0 }
 0x55b   : > { %v1578_v19 = vpop.f32.mrb[10].mxu0 }
 0x55c   : > { %1585 = vrot.lane.b32.xlu1 %v2126_v6, %s2296_s8  ;;  %v2179_v32 = vpop.f32.mrb[11].mxu0 }
 0x561   : > { %v1927_v4 = vpop.f32.mrb[12].mxu0 }
 0x562   : > { %v2127_v10 = vpack.c.bf16 %v1927_v4, %v1927_v4  ;;  %v2190_v11 = vpop.f32.mrb[13].mxu0 }
 0x563   : > { %v1930_v45 = vpop.f32.mrb[14].mxu0 }
 0x564   : > { %1937 = vrot.lane.b32.xlu1 %v2127_v10, %s2297_s9  ;;  %v2191_v12 = vpop.f32.mrb[15].mxu0 }
 0x5c6   : > { %v1234_v13 = vpop.permute.xlu0 %1233 }
 0x5c7   : > { %1237 = vst.msk [vmem:[%s2742_s7] sm:$0xf] %vm1236_vm12, %v1234_v13 }
 0x5ce   : > { %v1586_v14 = vpop.permute.xlu1 %1585 }
 0x5cf   : > { %1589 = vst.msk [vmem:[%s2742_s7] sm:$0xf] %vm1588_vm13, %v1586_v14 }
 0x5d6   : > { %v1938_v15 = vpop.permute.xlu1 %1937 }
 0x5d7   : > { %1941 = vst.msk [vmem:[%s2742_s7] sm:$0xf] %vm1940_vm14, %v1938_v15 }
 0x5d8 PF: > { %s14_s19 = sadd.s32 1, %s2291_s19   ;;  %s2901_s15 = smov %s2279_s16 }
 0x5d9   : > { %p11_p10 = scmp.ge.s32.totalorder %s14_s19, 4   ;;  %s2902_s16 = smov %s2362_s24 }
 0x5da   : > { %s2903_s17 = smov %s2287_s18  ;;  %s2904_s18 = smov %s2906_s20 }
 0x5db   :  { %13 = sbr.rel (!%p11_p10) target bundleno = 3 (0x3), region = 167 }

// kernel: decoder_forward.33
= control target key start
LH: loop header
LB: loop body
LE: loop exit
PB: predicated region body
PF: predicated region fallthrough
CT: control target
= control target key end

     0   :  { %v157_v1 = vmov 0.0   ;;  %vm158_vm0 = vmmov 0   ;;  %s206_s0 = inlined_call_operand.vmem [shape: bf16[16,32], index: 0, kind: input, shape index: {}]   ;;  %s207_s1 = inlined_call_operand.vmem [shape: bf16[32,32], index: 1, kind: input, shape index: {}]   ;;  %s208_s2 = inlined_call_operand.vmem [shape: f32[1,32], index: 2, kind: input, shape index: {}]   ;;  %s209_s3 = inlined_call_operand.hbm [shape: f32[16,32], index: 3, kind: output, shape index: {}]  }
   0x1   :  { %v130_v0 = vld [vmem:[%s207_s1] sm:$0xff]   ;;  %117 = vmatprep.subr.bf16.mxu0 %v157_v1  ;;  %v131_v2 = vld [vmem:[%s207_s1 + $0x8] sm:$0xff]   ;;  %121 = vmatprep.mubr.msk.bf16.mxu0 %vm158_vm0, %v157_v1 }
   0x2   :  { %118 = vmatpush3.bf16.msra.mxu0 %v130_v0 }
   0x3   :  { %119 = vmatprep.subr.bf16.mxu0 %v157_v1 }
   0x4   :  { %8 = vsyncpa [#allocation3], 0  ;;  %v132_v3 = vld [vmem:[%s206_s0] sm:$0xff]   ;;  %vm46_vm1 = vcmask 261120   ;;  %s159_s20 = smov [#allocation2]  }
   0x5   :  { %v109_v4 = vld [vmem:[%s208_s2] ss:$0 sm:$0xff]  ;;  %s98_s21 = sshll.u32 %s159_s20, 4  ;;  %s99_s21 = int_to_ptr.vmem [resolvable:$true] %s98_s21 }
   0x6   :  { %120 = vmatpush3.bf16.msra.mxu0 %v131_v2  ;;  %s133_s1 = scalar_lea.vmem %s99_s21, 256  ;;  %p138_p1 = scmp.lt.s32.totalorder %s99_s21, %s99_s21 }
   0x7   :  { %p134_p0 = scmp.ne.s32.totalorder %s99_s21, %s133_s1  ;;  %p139_p2 = scmp.lt.s32.totalorder %s133_s1, %s133_s1 }
   0x9   :  { %122 = vmatmul.mubr.msk.bf16.vlgmr.msra.gmra.mrb[0].mxu0 %vm46_vm1, %v132_v3  ;;  %p140_p3 = por %p139_p2, %p138_p1 }
   0xb   :  { %p141_p4 = pnand %p140_p3, %p134_p0 }
  0xdc   :  { %v84_v5 = vpop.f32.mrb[0].mxu0 }
  0xdd   :  { %v85_v6 = vadd.f32 %v109_v4, %v84_v5  ;;  %v123_v7 = vpop.f32.mrb[1].mxu0 }
  0xde   :  { %v87_v8 = vpop.f32.mrb[2].mxu0 }
  0xdf   :  { %91 = vst.msk [vmem:[#allocation2] sm:$0xff] %vm46_vm1, %v85_v6  ;;  %v88_v9 = vadd.f32 %v109_v4, %v87_v8  ;;  %v124_v10 = vpop.f32.mrb[3].mxu0 }
  0xe1   :  { %92 = vst.msk [vmem:[#allocation2 + $0x8] sm:$0xff] %vm46_vm1, %v88_v9 }
  0xe2   :  { %144 = shalt.err (!%p141_p4)
}
  0xe3   :  { %s145_s22 = scalar_lea.hbm %s209_s3, 256 }
  0xe4   :  { %p146_p5 = scmp.ne.s32.totalorder %s209_s3, %s145_s22  ;;  %p149_p6 = scmp.lt.u32.totalorder %s145_s22, %s209_s3 }
  0xe6   :  { %p151_p7 = pnand %p149_p6, %p146_p5 }
  0xe8   :  { %154 = shalt.err (!%p151_p7)
}
  0xe9   :  { %s160_s27 = smov 128   ;;  %s161_s28 = smov 8  }
  0xea   :  { %104 = dma.vmem_to_hbm [thread:$0]  %s99_s21, 256, %s209_s3, [#allocation3], %s160_s27, %s160_s27, %s161_s28  }
  0xeb   :  { %155 = dma.done.wait [#allocation3], 256  }
  0xec   :  { %156 = vsyncadd [#allocation3], 4294967040 }
  0xed   :  { %108 = vsyncpa [#allocation3], 1 }

// kernel: decoder_forward.32
= control target key start
LH: loop header
LB: loop body
LE: loop exit
PB: predicated region body
PF: predicated region fallthrough
CT: control target
= control target key end

     0   :  { %vm35_vm0 = vcmask 261120   ;;  %v359_v15 = vmov 0.0   ;;  %vm360_vm1 = vmmov 0   ;;  %vm191_vm2 = vcmask 523264   ;;  %s478_s0 = inlined_call_operand.vmem [shape: f32[16,32], index: 0, kind: input, shape index: {}]   ;;  %s479_s3 = inlined_call_operand.vmem [shape: bf16[32,64], index: 3, kind: input, shape index: {}]   ;;  %s480_s5 = inlined_call_operand.vmem [shape: bf16[64,32], index: 5, kind: input, shape index: {}]   ;;  %s481_s1 = inlined_call_operand.vmem [shape: f32[1,32], index: 1, kind: input, shape index: {}]   ;;  %s482_s2 = inlined_call_operand.vmem [shape: f32[1,32], index: 2, kind: input, shape index: {}]   ;;  %s483_s4 = inlined_call_operand.vmem [shape: f32[1,64], index: 4, kind: input, shape index: {}]   ;;  %s484_s6 = inlined_call_operand.vmem [shape: f32[1,32], index: 6, kind: input, shape index: {}]   ;;  %s485_s7 = inlined_call_operand.vmem [shape: f32[1,32], index: 7, kind: input, shape index: {}]   ;;  %s486_s8 = inlined_call_operand.vmem [shape: f32[1,32], index: 8, kind: input, shape index: {}]   ;;  %s487_s9 = inlined_call_operand.vmem [shape: bf16[16,32], index: 9, kind: output, shape index: {}]  }
   0x1   :  { %v414_v0 = vld [vmem:[%s478_s0] sm:$0xff]  ;;  %v419_v1 = vld [vmem:[%s478_s0 + $0x8] sm:$0xff]  ;;  %323 = vmatprep.subr.bf16.mxu0 %v359_v15  ;;  %331 = vmatprep.subr.bf16.mxu1 %v359_v15  ;;  %v349_v36 = vld [vmem:[%s480_s5 + $0x10] sm:$0xff]   ;;  %vm290_vm3 = vcmask 257024  }
   0x2   :  { %v36_v2 = vsel %vm35_vm0, %v414_v0, 0.0  ;;  %v39_v3 = vsel %vm35_vm0, %v419_v1, 0.0  ;;  %v345_v14 = vld [vmem:[%s479_s3] sm:$0xff]   ;;  %v346_v16 = vld [vmem:[%s479_s3 + $0x8] sm:$0xff]   ;;  %327 = vmatprep.mubr.msk.bf16.mxu0 %vm360_vm1, %v359_v15  ;;  %339 = vmatprep.mubr.msk.bf16.mxu1 %vm360_vm1, %v359_v15  ;;  %v350_v37 = vld [vmem:[%s480_s5 + $0x18] sm:$0xff]  }
   0x3   :  { %37 = vadd.xlane.f32.xlu0 %v36_v2  ;;  %324 = vmatpush3.bf16.msra.mxu0 %v345_v14  ;;  %v347_v17 = vld [vmem:[%s480_s5] sm:$0xff]   ;;  %v348_v18 = vld [vmem:[%s480_s5 + $0x8] sm:$0xff]  }
   0x4   :  { %325 = vmatprep.subr.bf16.mxu0 %v359_v15  ;;  %332 = vmatpush3.bf16.msra.mxu1 %v347_v17  ;;  %v297_v27 = vld [vmem:[%s481_s1] ss:$0 sm:$0xff] }
   0x5   :  { %333 = vmatprep.subr.bf16.mxu1 %v359_v15  ;;  %v298_v31 = vld [vmem:[%s482_s2] ss:$0 sm:$0xff] }
   0x6   :  { %v299_v38 = vld [vmem:[%s483_s4] ss:$0 sm:$0xff] }
   0x7   :  { %40 = vadd.xlane.f32.xlu0 %v39_v3  ;;  %326 = vmatpush3.bf16.msra.mxu0 %v346_v16  ;;  %v303_v48 = vld [vmem:[%s484_s6] ss:$0 sm:$0xff] }
   0x8   :  { %334 = vmatpush3.bf16.msra.mxu1 %v348_v18 }
   0x9   :  { %335 = vmatprep.subr.bf16.mxu1 %v359_v15 }
   0xc   :  { %336 = vmatpush3.bf16.msra.mxu1 %v349_v36 }
   0xd   :  { %337 = vmatprep.subr.bf16.mxu1 %v359_v15  ;;  %v310_v15 = vld [vmem:[%s486_s8] ss:$0 sm:$0xff] }
  0x10   :  { %338 = vmatpush3.bf16.msra.mxu1 %v350_v37 }
  0x90   :  { %v38_v4 = vpop.xlane.xlu0 %37 }
  0x91   :  { %v43_v5 = vmul.f32 0.03125, %v38_v4 }
  0x93   :  { %v45_v6 = vsub.f32 %v414_v0, %v43_v5 }
  0x94   :  { %v41_v7 = vpop.xlane.xlu0 %40 }
  0x95   :  { %v44_v8 = vmul.f32 0.03125, %v41_v7  ;;  %v47_v9 = vmul.f32 %v45_v6, %v45_v6 }
  0x97   :  { %v46_v10 = vsub.f32 %v419_v1, %v44_v8  ;;  %v49_v11 = vsel %vm35_vm0, %v47_v9, 0.0 }
  0x98   :  { %50 = vadd.xlane.f32.xlu1 %v49_v11 }
  0x99   :  { %v48_v12 = vmul.f32 %v46_v10, %v46_v10 }
  0x9b   :  { %v52_v13 = vsel %vm35_vm0, %v48_v12, 0.0  ;;  %v309_v12 = vld [vmem:[%s485_s7] ss:$0 sm:$0xff] }
  0x9c   :  { %53 = vadd.xlane.f32.xlu1 %v52_v13 }
 0x125   :  { %v51_v19 = vpop.xlane.xlu1 %50 }
 0x126   :  { %v55_v20 = vmul.f32 0.03125, %v51_v19 }
 0x128   :  { %v57_v21 = vadd.f32 1e-05, %v55_v20 }
 0x129   :  { %v54_v22 = vpop.xlane.xlu1 %53 }
 0x12a   :  { %351 = vrsqrt.f32 %v57_v21  ;;  %v56_v23 = vmul.f32 0.03125, %v54_v22 }
 0x12c   :  { %v58_v24 = vadd.f32 1e-05, %v56_v23 }
 0x12e   :  { %353 = vrsqrt.f32 %v58_v24 }
 0x134   :  { %v352_v25 = vpop.eup %351 }
 0x135   :  { %v61_v26 = vmul.f32 %v352_v25, %v45_v6 }
 0x137   :  { %v70_v30 = vmul.f32 %v297_v27, %v61_v26 }
 0x138   :  { %v354_v28 = vpop.eup %353 }
 0x139   :  { %v62_v29 = vmul.f32 %v354_v28, %v46_v10  ;;  %v79_v33 = vadd.f32 %v298_v31, %v70_v30 }
 0x13b   :  { %v71_v32 = vmul.f32 %v297_v27, %v62_v29 }
 0x13d   :  { %v80_v34 = vadd.f32 %v298_v31, %v71_v32 }
 0x13f   :  { %v81_v35 = vpack.c.bf16 %v80_v34, %v79_v33 }
 0x141   :  { %328 = vmatmul.mubr.msk.bf16.vlgmr.msra.gmra.mrb[0].mxu0 %vm35_vm0, %v81_v35 }
 0x214   :  { %v142_v39 = vpop.f32.mrb[0].mxu0 }
 0x215   :  { %v143_v40 = vadd.f32 %v299_v38, %v142_v39  ;;  %v329_v41 = vpop.f32.mrb[1].mxu0 }
 0x216   :  { %v145_v42 = vpop.f32.mrb[2].mxu0 }
 0x217   :  { %v146_v43 = vadd.f32 %v299_v38, %v145_v42  ;;  %v330_v44 = vpop.f32.mrb[3].mxu0  ;;  %v149_v45 = vmax.f32 %v143_v40, 0.0 }
 0x219   :  { %v150_v46 = vmax.f32 %v146_v43, 0.0 }
 0x21b   :  { %v151_v47 = vpack.c.bf16 %v150_v46, %v149_v45 }
 0x21d   :  { %340 = vmatmul.mubr.msk.bf16.vlgmr.msra.gmra.mrb[0].mxu1 %vm191_vm2, %v151_v47 }
 0x2f0   :  { %v229_v49 = vpop.f32.mrb[0].mxu1 }
 0x2f1   :  { %v230_v50 = vadd.f32 %v303_v48, %v229_v49  ;;  %v341_v51 = vpop.f32.mrb[1].mxu1 }
 0x2f2   :  { %v232_v52 = vpop.f32.mrb[2].mxu1 }
 0x2f3   :  { %v233_v53 = vadd.f32 %v303_v48, %v232_v52  ;;  %v342_v54 = vpop.f32.mrb[3].mxu1  ;;  %v236_v55 = vadd.f32 %v230_v50, %v414_v0 }
 0x2f5   :  { %v238_v56 = vsel %vm35_vm0, %v236_v55, 0.0  ;;  %v237_v57 = vadd.f32 %v233_v53, %v419_v1 }
 0x2f6   :  { %239 = vadd.xlane.f32.xlu0 %v238_v56 }
 0x2f7   :  { %v241_v58 = vsel %vm35_vm0, %v237_v57, 0.0 }
 0x2f8   :  { %242 = vadd.xlane.f32.xlu1 %v241_v58 }
 0x383   :  { %v240_v59 = vpop.xlane.xlu0 %239 }
 0x384   :  { %v244_v60 = vmul.f32 0.03125, %v240_v59 }
 0x385   :  { %v243_v61 = vpop.xlane.xlu1 %242 }
 0x386   :  { %v246_v62 = vsub.f32 %v236_v55, %v244_v60  ;;  %v245_v63 = vmul.f32 0.03125, %v243_v61 }
 0x388   :  { %v247_v2 = vsub.f32 %v237_v57, %v245_v63  ;;  %v248_v3 = vmul.f32 %v246_v62, %v246_v62 }
 0x38a   :  { %v250_v4 = vsel %vm35_vm0, %v248_v3, 0.0  ;;  %v249_v5 = vmul.f32 %v247_v2, %v247_v2 }
 0x38b   :  { %251 = vadd.xlane.f32.xlu0 %v250_v4 }
 0x38c   :  { %v253_v0 = vsel %vm35_vm0, %v249_v5, 0.0 }
 0x38d   :  { %254 = vadd.xlane.f32.xlu1 %v253_v0 }
 0x418   :  { %v252_v6 = vpop.xlane.xlu0 %251 }
 0x419   :  { %v256_v1 = vmul.f32 0.03125, %v252_v6 }
 0x41a   :  { %v255_v7 = vpop.xlane.xlu1 %254 }
 0x41b   :  { %v258_v8 = vadd.f32 1e-05, %v256_v1  ;;  %v257_v9 = vmul.f32 0.03125, %v255_v7 }
 0x41d   :  { %355 = vrsqrt.f32 %v258_v8  ;;  %v259_v10 = vadd.f32 1e-05, %v257_v9 }
 0x41f   :  { %357 = vrsqrt.f32 %v259_v10 }
 0x427   :  { %v356_v11 = vpop.eup %355 }
 0x428   :  { %v262_v13 = vmul.f32 %v356_v11, %v246_v62 }
 0x429   :  { %v358_v14 = vpop.eup %357 }
 0x42a   :  { %v271_v16 = vmul.f32 %v309_v12, %v262_v13  ;;  %v263_v17 = vmul.f32 %v358_v14, %v247_v2 }
 0x42c   :  { %v280_v18 = vadd.f32 %v310_v15, %v271_v16  ;;  %v272_v19 = vmul.f32 %v309_v12, %v263_v17 }
 0x42e   :  { %v313_v20 = vpack.c.bf16 %v280_v18, %v280_v18  ;;  %v281_v21 = vadd.f32 %v310_v15, %v272_v19 }
 0x430   :  { %291 = vst.msk [vmem:[%s487_s9] sm:$0xf] %vm290_vm3, %v313_v20  ;;  %v314_v22 = vpack.c.bf16 %v281_v21, %v281_v21 }
 0x432   :  { %292 = vst.msk [vmem:[%s487_s9 + $0x4] sm:$0xf] %vm290_vm3, %v314_v22 }

// kernel: decoder_forward.30
= control target key start
LH: loop header
LB: loop body
LE: loop exit
PB: predicated region body
PF: predicated region fallthrough
CT: control target
= control target key end

     0   :  { %11 = vsyncpa [#allocation5], 0  ;;  %s3146_s0 = inlined_call_operand.vmem [shape: f32[2,8,1,4,8], index: 0, kind: input, shape index: {}]   ;;  %s3147_s1 = inlined_call_operand.vmem [shape: f32[2,16,2,4,8], index: 1, kind: input, shape index: {}, may-alias: {1,2}]   ;;  %s3148_s2 = inlined_call_operand.vmem [shape: f32[2,16,2,4,8], index: 2, kind: input, shape index: {}, may-alias: {1,2}]   ;;  %s3149_s3 = inlined_call_operand.vmem [shape: f32[2,1,16], index: 3, kind: input, shape index: {}]   ;;  %s3150_s4 = inlined_call_operand.vmem [shape: bf16[2,8,32], index: 4, kind: output, shape index: {0}]   ;;  %s3151_s5 = inlined_call_operand.hbm [shape: f32[2,4,8,16], index: 5, kind: output, shape index: {1}]  }
   0x1   :  { %13 = vsyncpa [#allocation5 + $0x1], 0  ;;  %s2498_s18 = smov 0   ;;  %s2500_s19 = smov 0  }
   0x2   :  { %s2502_s20 = smov 0   ;;  %s2504_s21 = smov 0  }
   0x3   :  { %s2506_s22 = smov 0   ;;  %s2508_s23 = smov 0  }
   0x4 LB: > { %s2181_s24 = sadd.s32 4294967295, %s2459_s23   ;;  %s2182_s25 = sadd.s32 4294967294, %s2459_s23   ;;  %s2459_s23 = sphi %s2508_s23, %s19_s23   ;;  %s2455_s22 = sphi %s2506_s22, %s3159_s22   ;;  %s2451_s21 = sphi %s2504_s21, %s3158_s21   ;;  %s2447_s20 = sphi %s2502_s20, %s3157_s20   ;;  %s2443_s19 = sphi %s2500_s19, %s3156_s19   ;;  %s2439_s18 = sphi %s2498_s18, %s3155_s18  }
   0x5   : > { %s38_s26 = sadd.s32 1, %s2455_s22  ;;  %s75_s27 = sadd.s32 1, %s2447_s20 }
   0x6   : > { %p40_p0 = scmp.ge.s32.totalorder %s38_s26, 2  ;;  %p82_p1 = scmp.ne.s32.totalorder %s2447_s20, %s2443_s19 }
   0x7   : > { %p83_p2 = scmp.eq.s32.totalorder %s2459_s23, 0  ;;  %p198_p3 = scmp.eq.s32.totalorder %s2181_s24, 1 }
   0x8   : > { %s3161_s26 = smov (%p40_p0, %s38_s26), 0  ;;  %p203_p6 = scmp.ne.s32.totalorder %s2443_s19, %s2439_s18 }
   0x9   : > { %p2537_p4 = por %p83_p2, %p82_p1  ;;  %p2541_p5 = por %p198_p3, %p82_p1 }
   0xa   : > { %s70_s30 = ssub.s32 %s2455_s22, %s3161_s26  ;;  %p204_p8 = scmp.eq.s32.totalorder %s2182_s25, 1 }
   0xb   : > { %p73_p7 = scmp.eq.s32.totalorder %s70_s30, 0  ;;  %p2184_p10 = scmp.ge.s32.totalorder %s2459_s23, 2 }
   0xc   : > { %p2552_p9 = por %p204_p8, %p203_p6 }
   0xd   : > { %s2550_s6 = scalar_select %p73_p7, %s2447_s20, %s75_s27  }
   0xe   : > { %220 = sbr.rel (%p2184_p10) target bundleno = 49 (0x31), region = 16 }
  0x15   : > { %236 = sbr.rel (!%p2537_p4) target bundleno = 35 (0x23), region = 24  ;;  %s238_s8 = sand.u32 (%p2537_p4), 1, %s2447_s20  }
  0x16   : > { %s2233_s9 = sshll.u32 (%p2537_p4), %s2455_s22, 7  ;;  %s2185_s10 = sshll.u32 (%p2537_p4), %s238_s8, 6 }
  0x17   : > { %s2566_s13 = scalar_lea.vmem (%p2537_p4), %s3147_s1, %s2233_s9  ;;  %s240_s14 = scalar_lea.vmem (%p2537_p4), [#allocation2], %s2185_s10 }
  0x18   : > { %v262_v0 = vld [vmem:[%s2566_s13] sm:$0xf] (%p2537_p4)  ;;  %v264_v1 = vld [vmem:[%s2566_s13 + $0x8] sm:$0xf] (%p2537_p4)  ;;  %v266_v2 = vld [vmem:[%s2566_s13 + $0x10] sm:$0xf] (%p2537_p4) }
  0x19   : > { %263 = vst [vmem:[%s240_s14] sm:$0xf] (%p2537_p4), %v262_v0  ;;  %265 = vst [vmem:[%s240_s14 + $0x4] sm:$0xf] (%p2537_p4), %v264_v1  ;;  %v268_v3 = vld [vmem:[%s2566_s13 + $0x18] sm:$0xf] (%p2537_p4) }
  0x1a   : > { %v270_v4 = vld [vmem:[%s2566_s13 + $0x20] sm:$0xf] (%p2537_p4)  ;;  %267 = vst [vmem:[%s240_s14 + $0x8] sm:$0xf] (%p2537_p4), %v266_v2  ;;  %269 = vst [vmem:[%s240_s14 + $0xc] sm:$0xf] (%p2537_p4), %v268_v3 }
  0x1b   : > { %271 = vst [vmem:[%s240_s14 + $0x10] sm:$0xf] (%p2537_p4), %v270_v4  ;;  %v272_v5 = vld [vmem:[%s2566_s13 + $0x28] sm:$0xf] (%p2537_p4)  ;;  %v274_v6 = vld [vmem:[%s2566_s13 + $0x30] sm:$0xf] (%p2537_p4) }
  0x1c   : > { %v276_v7 = vld [vmem:[%s2566_s13 + $0x38] sm:$0xf]  ;;  %273 = vst [vmem:[%s240_s14 + $0x14] sm:$0xf] %v272_v5  ;;  %275 = vst [vmem:[%s240_s14 + $0x18] sm:$0xf] %v274_v6 }
  0x1d   : > { %277 = vst [vmem:[%s240_s14 + $0x1c] sm:$0xf] %v276_v7  ;;  %v278_v8 = vld [vmem:[%s2566_s13 + $0x40] sm:$0xf]  ;;  %v280_v9 = vld [vmem:[%s2566_s13 + $0x48] sm:$0xf] }
  0x1e   : > { %v282_v10 = vld [vmem:[%s2566_s13 + $0x50] sm:$0xf]  ;;  %279 = vst [vmem:[%s240_s14 + $0x20] sm:$0xf] %v278_v8  ;;  %281 = vst [vmem:[%s240_s14 + $0x24] sm:$0xf] %v280_v9 }
  0x1f   : > { %283 = vst [vmem:[%s240_s14 + $0x28] sm:$0xf] %v282_v10  ;;  %v284_v11 = vld [vmem:[%s2566_s13 + $0x58] sm:$0xf]  ;;  %v286_v12 = vld [vmem:[%s2566_s13 + $0x60] sm:$0xf] }
  0x20   : > { %v288_v13 = vld [vmem:[%s2566_s13 + $0x68] sm:$0xf]  ;;  %285 = vst [vmem:[%s240_s14 + $0x2c] sm:$0xf] %v284_v11  ;;  %287 = vst [vmem:[%s240_s14 + $0x30] sm:$0xf] %v286_v12 }
  0x21   : > { %289 = vst [vmem:[%s240_s14 + $0x34] sm:$0xf] %v288_v13  ;;  %v290_v14 = vld [vmem:[%s2566_s13 + $0x70] sm:$0xf]  ;;  %v292_v15 = vld [vmem:[%s2566_s13 + $0x78] sm:$0xf] }
  0x22   : > { %291 = vst [vmem:[%s240_s14 + $0x38] sm:$0xf] %v290_v14  ;;  %293 = vst [vmem:[%s240_s14 + $0x3c] sm:$0xf] %v292_v15 }
  0x23 PF: > { %348 = sbr.rel (!%p2537_p4) target bundleno = 49 (0x31), region = 65  ;;  %s350_s15 = sand.u32 (%p2537_p4), 1, %s2447_s20  }
  0x24   : > { %s2234_s16 = sshll.u32 (%p2537_p4), %s2455_s22, 7  ;;  %s2188_s17 = sshll.u32 (%p2537_p4), %s350_s15, 6 }
  0x25   : > { %s2591_s27 = scalar_lea.vmem (%p2537_p4), %s3148_s2, %s2234_s16  ;;  %s352_s28 = scalar_lea.vmem (%p2537_p4), [#allocation3], %s2188_s17 }
  0x26   : > { %v2191_v16 = vld [vmem:[%s2591_s27 + $0x4] sm:$0xf] (%p2537_p4)  ;;  %v2192_v17 = vld [vmem:[%s2591_s27 + $0xc] sm:$0xf] (%p2537_p4)  ;;  %v2193_v18 = vld [vmem:[%s2591_s27 + $0x14] sm:$0xf] (%p2537_p4) }
  0x27   : > { %376 = vst [vmem:[%s352_s28] sm:$0xf] (%p2537_p4), %v2191_v16  ;;  %378 = vst [vmem:[%s352_s28 + $0x4] sm:$0xf] (%p2537_p4), %v2192_v17  ;;  %v2194_v19 = vld [vmem:[%s2591_s27 + $0x1c] sm:$0xf] (%p2537_p4) }
  0x28   : > { %v2195_v20 = vld [vmem:[%s2591_s27 + $0x24] sm:$0xf] (%p2537_p4)  ;;  %380 = vst [vmem:[%s352_s28 + $0x8] sm:$0xf] (%p2537_p4), %v2193_v18  ;;  %382 = vst [vmem:[%s352_s28 + $0xc] sm:$0xf] (%p2537_p4), %v2194_v19 }
  0x29   : > { %384 = vst [vmem:[%s352_s28 + $0x10] sm:$0xf] (%p2537_p4), %v2195_v20  ;;  %v2196_v21 = vld [vmem:[%s2591_s27 + $0x2c] sm:$0xf] (%p2537_p4)  ;;  %v2197_v22 = vld [vmem:[%s2591_s27 + $0x34] sm:$0xf] (%p2537_p4) }
  0x2a   : > { %v2198_v23 = vld [vmem:[%s2591_s27 + $0x3c] sm:$0xf]  ;;  %386 = vst [vmem:[%s352_s28 + $0x14] sm:$0xf] %v2196_v21  ;;  %388 = vst [vmem:[%s352_s28 + $0x18] sm:$0xf] %v2197_v22 }
  0x2b   : > { %390 = vst [vmem:[%s352_s28 + $0x1c] sm:$0xf] %v2198_v23  ;;  %v2199_v24 = vld [vmem:[%s2591_s27 + $0x44] sm:$0xf]  ;;  %v2200_v25 = vld [vmem:[%s2591_s27 + $0x4c] sm:$0xf] }
  0x2c   : > { %v2201_v26 = vld [vmem:[%s2591_s27 + $0x54] sm:$0xf]  ;;  %392 = vst [vmem:[%s352_s28 + $0x20] sm:$0xf] %v2199_v24  ;;  %394 = vst [vmem:[%s352_s28 + $0x24] sm:$0xf] %v2200_v25 }
  0x2d   : > { %396 = vst [vmem:[%s352_s28 + $0x28] sm:$0xf] %v2201_v26  ;;  %v2202_v27 = vld [vmem:[%s2591_s27 + $0x5c] sm:$0xf]  ;;  %v2203_v28 = vld [vmem:[%s2591_s27 + $0x64] sm:$0xf] }
  0x2e   : > { %v2204_v29 = vld [vmem:[%s2591_s27 + $0x6c] sm:$0xf]  ;;  %398 = vst [vmem:[%s352_s28 + $0x2c] sm:$0xf] %v2202_v27  ;;  %400 = vst [vmem:[%s352_s28 + $0x30] sm:$0xf] %v2203_v28 }
  0x2f   : > { %402 = vst [vmem:[%s352_s28 + $0x34] sm:$0xf] %v2204_v29  ;;  %v2205_v30 = vld [vmem:[%s2591_s27 + $0x74] sm:$0xf]  ;;  %v2206_v31 = vld [vmem:[%s2591_s27 + $0x7c] sm:$0xf] }
  0x30   : > { %404 = vst [vmem:[%s352_s28 + $0x38] sm:$0xf] %v2205_v30  ;;  %406 = vst [vmem:[%s352_s28 + $0x3c] sm:$0xf] %v2206_v31 }
  0x31 PF: > { %p2207_p11 = scmp.ge.s32.totalorder %s2459_s23, 1  ;;  %p469_p12 = scmp.lt.s32.totalorder %s2459_s23, 3 }
  0x33   : > { %p470_p13 = pnand %p2207_p11, %p469_p12 }
  0x34   : > { %s2612_s30 = sand.u32 (!%p470_p13), 1, %s2443_s19   ;;  %v2461_v32 = vmov (!%p470_p13), 0.0   ;;  %p537_p0 = scmp.lt.s32.totalorder (!%p470_p13), %s2451_s21, 1  ;;  %vm644_vm0 = vcmask (!%p470_p13), 1041409   ;;  %vm2462_vm1 = vmmov (!%p470_p13), 0   ;;  %vm647_vm2 = vcmask (!%p470_p13), 1042434  }
  0x35   : > { %473 = sbr.rel (%p470_p13) target bundleno = 1507 (0x5e3), region = 110  ;;  %2256 = vmatprep.subr.bf16.mxu0 (!%p470_p13), %v2461_v32  ;;  %s2208_s8 = sshll.u32 (!%p470_p13), %s2612_s30, 6  ;;  %2262 = vmatprep.subr.bf16.mxu1 (!%p470_p13), %v2461_v32  ;;  %vm650_vm3 = vcmask (!%p470_p13), 1043459   ;;  %vm653_vm4 = vcmask (!%p470_p13), 1044484   ;;  %vm656_vm5 = vcmask (!%p470_p13), 1045509   ;;  %vm659_vm6 = vcmask (!%p470_p13), 1046534  }
  0x36   : > { %s2620_s9 = scalar_lea.vmem (!%p470_p13), [#allocation2], %s2208_s8  ;;  %2258 = vmatprep.mubr.msk.bf16.mxu0 (!%p470_p13), %vm2462_vm1, %v2461_v32  ;;  %2264 = vmatprep.mubr.msk.bf16.mxu1 (!%p470_p13), %vm2462_vm1, %v2461_v32  ;;  %vm662_vm7 = vcmask (!%p470_p13), 1047559   ;;  %vm726_vm8 = vcmask (!%p470_p13), 64512   ;;  %vm773_vm10 = vcmask (!%p470_p13), 130048   ;;  %s2702_s24 = scalar_lea.vmem (!%p470_p13), [#allocation3], %s2208_s8  ;;  %vm924_vm11 = vcmask (!%p470_p13), 60416  }
  0x37   : > { %v589_v33 = vld [vmem:[%s2620_s9] sm:$0x1] (!%p470_p13)  ;;  %v590_v34 = vld [vmem:[%s2620_s9 + $0x4] sm:$0x1] (!%p470_p13)  ;;  %v591_v35 = vld [vmem:[%s2620_s9 + $0x8] sm:$0x1] (!%p470_p13) }
  0x38   : > { %v592_v36 = vld [vmem:[%s2620_s9 + $0xc] sm:$0x1] (!%p470_p13)  ;;  %v593_v37 = vld [vmem:[%s2620_s9 + $0x10] sm:$0x1] (!%p470_p13)  ;;  %v594_v38 = vld [vmem:[%s2620_s9 + $0x14] sm:$0x1] (!%p470_p13)  ;;  %v605_v39 = vpack.c.bf16 (!%p470_p13), %v589_v33, %v589_v33  ;;  %v606_v40 = vpack.c.bf16 (!%p470_p13), %v590_v34, %v590_v34  ;;  %v607_v41 = vpack.c.bf16 (!%p470_p13), %v591_v35, %v591_v35 }
  0x39   : > { %v595_v42 = vld [vmem:[%s2620_s9 + $0x18] sm:$0x1] (!%p470_p13)  ;;  %v596_v43 = vld [vmem:[%s2620_s9 + $0x1c] sm:$0x1] (!%p470_p13)  ;;  %v597_v44 = vld [vmem:[%s2620_s9 + $0x20] sm:$0x1] (!%p470_p13)  ;;  %v608_v45 = vpack.c.bf16 (!%p470_p13), %v592_v36, %v592_v36  ;;  %v609_v46 = vpack.c.bf16 (!%p470_p13), %v593_v37, %v593_v37  ;;  %v610_v47 = vpack.c.bf16 (!%p470_p13), %v594_v38, %v594_v38 }
  0x3a   : > { %v598_v48 = vld [vmem:[%s2620_s9 + $0x24] sm:$0x1] (!%p470_p13)  ;;  %v599_v49 = vld [vmem:[%s2620_s9 + $0x28] sm:$0x1] (!%p470_p13)  ;;  %v600_v50 = vld [vmem:[%s2620_s9 + $0x2c] sm:$0x1] (!%p470_p13)  ;;  %v611_v51 = vpack.c.bf16 (!%p470_p13), %v595_v42, %v595_v42  ;;  %v612_v52 = vpack.c.bf16 (!%p470_p13), %v596_v43, %v596_v43  ;;  %v613_v53 = vpack.c.bf16 (!%p470_p13), %v597_v44, %v597_v44  ;;  %v681_v54 = vunpack.c.l.b16 (!%p470_p13), %v605_v39 }
  0x3b   : > { %v601_v55 = vld [vmem:[%s2620_s9 + $0x30] sm:$0x1] (!%p470_p13)  ;;  %v602_v56 = vld [vmem:[%s2620_s9 + $0x34] sm:$0x1] (!%p470_p13)  ;;  %v603_v57 = vld [vmem:[%s2620_s9 + $0x38] sm:$0x1] (!%p470_p13)  ;;  %v614_v58 = vpack.c.bf16 (!%p470_p13), %v598_v48, %v598_v48  ;;  %v615_v59 = vpack.c.bf16 (!%p470_p13), %v599_v49, %v599_v49  ;;  %v616_v60 = vpack.c.bf16 (!%p470_p13), %v600_v50, %v600_v50  ;;  %v682_v61 = vunpack.c.l.b16 (!%p470_p13), %v606_v40 }
  0x3c   : > { %v604_v62 = vld [vmem:[%s2620_s9 + $0x3c] sm:$0x1]  ;;  %v617_v63 = vpack.c.bf16 %v601_v55, %v601_v55  ;;  %v618_v0 = vpack.c.bf16 %v602_v56, %v602_v56  ;;  %v619_v1 = vpack.c.bf16 %v603_v57, %v603_v57  ;;  %v683_v2 = vunpack.c.l.b16 %v607_v41  ;;  %s2645_s10 = scalar_select %p537_p0, %s2451_s21, 1 }
  0x3d   : > { %v620_v3 = vpack.c.bf16 %v604_v62, %v604_v62  ;;  %v684_v4 = vunpack.c.l.b16 %v608_v45  ;;  %v685_v5 = vunpack.c.l.b16 %v609_v46  ;;  %v686_v6 = vunpack.c.l.b16 %v610_v47  ;;  %s2210_s25 = sshll.u32 %s2612_s30, 5  ;;  %s2239_s12 = sshll.u32 %s2451_s21, 9 }
  0x3e   : > { %v687_v7 = vunpack.c.l.b16 %v611_v51  ;;  %v688_v8 = vunpack.c.l.b16 %v612_v52  ;;  %v689_v9 = vunpack.c.l.b16 %v613_v53  ;;  %v690_v10 = vunpack.c.l.b16 %v614_v58  ;;  %s2235_s11 = sshll.u32 %s2645_s10, 5  ;;  %s553_s17 = scalar_lea.vmem %s3149_s3, %s2645_s10 }
  0x3f   : > { %v691_v11 = vunpack.c.l.b16 %v615_v59  ;;  %v692_v12 = vunpack.c.l.b16 %v616_v60  ;;  %v693_v13 = vunpack.c.l.b16 %v617_v63  ;;  %v694_v14 = vunpack.c.l.b16 %v618_v0  ;;  %s2651_s14 = scalar_lea.vmem %s3146_s0, %s2235_s11  ;;  %s2892_s27 = scalar_lea.vmem [#allocation4], %s2210_s25 }
  0x40   : > { %v695_v15 = vunpack.c.l.b16 %v619_v1  ;;  %v696_v16 = vunpack.c.l.b16 %v620_v3  ;;  %v697_v17 = vrot.slane %v682_v61, 7  ;;  %v699_v18 = vrot.slane %v683_v2, 6  ;;  %v565_v19 = vld [vmem:[%s2651_s14] sm:$0x1]  ;;  %v566_v20 = vld [vmem:[%s2651_s14 + $0x4] sm:$0x1]  ;;  %s3091_s16 = scalar_lea.hbm %s3151_s5, %s2239_s12 }
  0x41   : > { %v701_v21 = vrot.slane %v684_v4, 5  ;;  %v703_v22 = vrot.slane %v685_v5, 4  ;;  %v705_v23 = vrot.slane %v686_v6, 3  ;;  %v707_v24 = vrot.slane %v687_v7, 2  ;;  %v567_v25 = vld [vmem:[%s2651_s14 + $0x8] sm:$0x1] }
  0x42   : > { %v698_v26 = vsel %vm644_vm0, %v697_v17, %v681_v54  ;;  %v709_v27 = vrot.slane %v688_v8, 1  ;;  %v711_v28 = vrot.slane %v690_v10, 7  ;;  %v713_v29 = vrot.slane %v691_v11, 6  ;;  %v568_v30 = vld [vmem:[%s2651_s14 + $0xc] sm:$0x1]  ;;  %s2213_s28 = sshll.u32 %s2645_s10, 2 }
  0x43   : > { %v700_v31 = vsel %vm647_vm2, %v699_v18, %v698_v26  ;;  %v715_v33 = vrot.slane %v692_v12, 5  ;;  %v717_v34 = vrot.slane %v693_v13, 4  ;;  %v719_v35 = vrot.slane %v694_v14, 3  ;;  %v569_v36 = vld [vmem:[%s2651_s14 + $0x10] sm:$0x1]  ;;  %s2944_s11 = scalar_lea.vmem %s3150_s4, %s2213_s28  ;;  %s2463_s10 = smov 8  }
  0x44   : > { %v702_v37 = vsel %vm650_vm3, %v701_v21, %v700_v31  ;;  %v712_v38 = vsel %vm644_vm0, %v711_v28, %v689_v9  ;;  %v721_v39 = vrot.slane %v695_v15, 2  ;;  %v723_v40 = vrot.slane %v696_v16, 1  ;;  %v570_v41 = vld [vmem:[%s2651_s14 + $0x14] sm:$0x1]  ;;  %v571_v42 = vld [vmem:[%s2651_s14 + $0x18] sm:$0x1] }
  0x45   : > { %v704_v43 = vsel %vm653_vm4, %v703_v22, %v702_v37  ;;  %v714_v44 = vsel %vm647_vm2, %v713_v29, %v712_v38  ;;  %v572_v45 = vld [vmem:[%s2651_s14 + $0x1c] sm:$0x1]  ;;  %v573_v46 = vmul.f32 0.35355338, %v565_v19  ;;  %v574_v47 = vmul.f32 0.35355338, %v566_v20 }
  0x46   : > { %v706_v48 = vsel %vm656_vm5, %v705_v23, %v704_v43  ;;  %v716_v49 = vsel %vm650_vm3, %v715_v33, %v714_v44  ;;  %v575_v50 = vmul.f32 0.35355338, %v567_v25  ;;  %v576_v51 = vmul.f32 0.35355338, %v568_v30  ;;  %v562_v33 = vld [vmem:[%s553_s17] sm:$0x1] }
  0x47   : > { %v708_v52 = vsel %vm659_vm6, %v707_v24, %v706_v48  ;;  %v718_v53 = vsel %vm653_vm4, %v717_v34, %v716_v49  ;;  %v577_v54 = vmul.f32 0.35355338, %v569_v36  ;;  %v578_v55 = vmul.f32 0.35355338, %v570_v41  ;;  %v787_v49 = vld [vmem:[%s2702_s24 + $0x4] sm:$0x1] }
  0x48   : > { %v710_v56 = vsel %vm662_vm7, %v709_v27, %v708_v52  ;;  %v720_v57 = vsel %vm656_vm5, %v719_v35, %v718_v53  ;;  %v579_v58 = vmul.f32 0.35355338, %v571_v42  ;;  %v580_v59 = vmul.f32 0.35355338, %v572_v45  ;;  %v796_v52 = vld [vmem:[%s2702_s24 + $0x28] sm:$0x1] }
  0x49   : > { %v722_v60 = vsel %vm659_vm6, %v721_v39, %v720_v57  ;;  %v581_v61 = vpack.c.bf16 %v573_v46, %v573_v46  ;;  %v582_v62 = vpack.c.bf16 %v574_v47, %v574_v47  ;;  %v583_v63 = vpack.c.bf16 %v575_v50, %v575_v50  ;;  %v795_v50 = vld [vmem:[%s2702_s24 + $0x24] sm:$0x1]  ;;  %s2014_s13 = sshll.u32 %s2892_s27, 4  ;;  %s1997_s17 = scalar_lea.sflag [#allocation5], %s2612_s30  ;;  %s3093_s13 = int_to_ptr.vmem [resolvable:$true] %s2014_s13 }
  0x4a   : > { %v724_v0 = vsel %vm662_vm7, %v723_v40, %v722_v60  ;;  %v584_v1 = vpack.c.bf16 %v576_v51, %v576_v51  ;;  %v585_v2 = vpack.c.bf16 %v577_v54, %v577_v54  ;;  %v586_v3 = vpack.c.bf16 %v578_v55, %v578_v55  ;;  %v788_v51 = vld [vmem:[%s2702_s24 + $0x8] sm:$0x1]  ;;  %v786_v54 = vld [vmem:[%s2702_s24] sm:$0x1]  ;;  %v789_v55 = vld [vmem:[%s2702_s24 + $0xc] sm:$0x1] }
  0x4b   : > { %v725_v4 = vpack.c.b16 %v724_v0, %v710_v56  ;;  %v587_v5 = vpack.c.bf16 %v579_v58, %v579_v58  ;;  %v588_v6 = vpack.c.bf16 %v580_v59, %v580_v59  ;;  %v635_v7 = vunpack.c.l.b16 %v581_v61  ;;  %v794_v56 = vld [vmem:[%s2702_s24 + $0x20] sm:$0x1]  ;;  %v790_v58 = vld [vmem:[%s2702_s24 + $0x10] sm:$0x1]  ;;  %v797_v59 = vld [vmem:[%s2702_s24 + $0x2c] sm:$0x1] }
  0x4c   : > { %v636_v8 = vunpack.c.l.b16 %v582_v62  ;;  %v637_v9 = vunpack.c.l.b16 %v583_v63  ;;  %v638_v10 = vunpack.c.l.b16 %v584_v1  ;;  %v639_v11 = vunpack.c.l.b16 %v585_v2  ;;  %v798_v60 = vld [vmem:[%s2702_s24 + $0x30] sm:$0x1]  ;;  %v791_v1 = vld [vmem:[%s2702_s24 + $0x14] sm:$0x1]  ;;  %s2464_s25 = smov [#allocation4]  }
  0x4d   : > { %v731_v12 = vsel %vm726_vm8, %v725_v4, 0  ;;  %v640_v13 = vunpack.c.l.b16 %v586_v3  ;;  %v641_v14 = vunpack.c.l.b16 %v587_v5  ;;  %v642_v15 = vunpack.c.l.b16 %v588_v6  ;;  %v799_v2 = vld [vmem:[%s2702_s24 + $0x34] sm:$0x1]  ;;  %s2385_s28 = sshll.u32 %s2464_s25, 4  ;;  %s2386_s28 = int_to_ptr.vmem [resolvable:$false] %s2385_s28 }
  0x4e   : > { %2257 = vmatpush3.bf16.xpose.msra.mxu0 %v731_v12  ;;  %v643_v16 = vrot.slane %v636_v8, 7  ;;  %v646_v17 = vrot.slane %v637_v9, 6  ;;  %v649_v18 = vrot.slane %v638_v10, 5  ;;  %v652_v19 = vrot.slane %v639_v11, 4  ;;  %v800_v8 = vld [vmem:[%s2702_s24 + $0x38] sm:$0x1]  ;;  %p2388_p4 = scmp.lt.s32.totalorder %s3093_s13, %s2386_s28 }
  0x4f   : > { %2274 = vmatprep.subr.bf16.mxu0 %v2461_v32  ;;  %v655_v21 = vrot.slane %v640_v13, 3  ;;  %v658_v23 = vrot.slane %v641_v14, 2  ;;  %v661_v25 = vrot.slane %v642_v15, 1  ;;  %v622_v31 = vlaneseq  ;;  %v793_v13 = vld [vmem:[%s2702_s24 + $0x1c] sm:$0x1]  ;;  %s2387_s21 = scalar_lea.vmem %s2386_s28, 1024 }
  0x50   : > { %v645_v20 = vsel %vm644_vm0, %v643_v16, %v635_v7  ;;  %vm563_vm9 = vcmp.lt.f32.partialorder %v562_v33, -1.0  ;;  %v803_v53 = vpack.c.bf16 %v787_v49, %v787_v49  ;;  %v804_v57 = vpack.c.bf16 %v788_v51, %v788_v51  ;;  %v792_v7 = vld [vmem:[%s2702_s24 + $0x18] sm:$0x1]  ;;  %v801_v14 = vld [vmem:[%s2702_s24 + $0x3c] sm:$0x1] }
  0x51   : > { %v648_v22 = vsel %vm647_vm2, %v646_v17, %v645_v20  ;;  %v623_v34 = vshrl.u32 %v622_v31, 7  ;;  %v564_v36 = vsel %vm563_vm9, -1e+30, %v2461_v32  ;;  %v802_v61 = vpack.c.bf16 %v786_v54, %v786_v54 }
  0x52   : > { %v651_v24 = vsel %vm650_vm3, %v649_v18, %v648_v22  ;;  %v805_v62 = vpack.c.bf16 %v789_v55, %v789_v55  ;;  %v811_v63 = vpack.c.bf16 %v795_v50, %v795_v50  ;;  %v812_v0 = vpack.c.bf16 %v796_v52, %v796_v52 }
  0x53   : > { %v654_v26 = vsel %vm653_vm4, %v652_v19, %v651_v24  ;;  %v624_v35 = vsub.s32 0, %v623_v34  ;;  %v806_v3 = vpack.c.bf16 %v790_v58, %v790_v58  ;;  %v810_v4 = vpack.c.bf16 %v794_v56, %v794_v56 }
  0x54   : > { %v657_v27 = vsel %vm656_vm5, %v655_v21, %v654_v26  ;;  %v813_v5 = vpack.c.bf16 %v797_v59, %v797_v59  ;;  %v814_v6 = vpack.c.bf16 %v798_v60, %v798_v60  ;;  %v807_v9 = vpack.c.bf16 %v791_v1, %v791_v1  ;;  %v952_v1 = vld [vmem:[%s2620_s9 + $0x5] sm:$0x1] }
  0x55   : > { %v660_v28 = vsel %vm659_vm6, %v658_v23, %v657_v27  ;;  %v2692_v37 = vrot.slane %v564_v36, %v624_v35  ;;  %v815_v10 = vpack.c.bf16 %v799_v2, %v799_v2  ;;  %v835_v11 = vunpack.c.l.b16 %v803_v53  ;;  %v953_v2 = vld [vmem:[%s2620_s9 + $0x9] sm:$0x1] }
  0x56   : > { %v663_v29 = vsel %vm662_vm7, %v661_v25, %v660_v28  ;;  %v836_v12 = vunpack.c.l.b16 %v804_v57  ;;  %v808_v15 = vpack.c.bf16 %v792_v7, %v792_v7  ;;  %v816_v16 = vpack.c.bf16 %v800_v8, %v800_v8 }
  0x57   : > { %v664_v30 = vpack.c.b16 %v663_v29, %v663_v29  ;;  %v837_v17 = vunpack.c.l.b16 %v805_v62  ;;  %v838_v18 = vunpack.c.l.b16 %v806_v3  ;;  %v809_v19 = vpack.c.bf16 %v793_v13, %v793_v13 }
  0x58   : > { %v817_v20 = vpack.c.bf16 %v801_v14, %v801_v14  ;;  %v839_v21 = vunpack.c.l.b16 %v807_v9  ;;  %v843_v22 = vunpack.c.l.b16 %v811_v63  ;;  %v834_v23 = vunpack.c.l.b16 %v802_v61  ;;  %v959_v14 = vld [vmem:[%s2620_s9 + $0x21] sm:$0x1] }
  0x59   : > { %2259 = vmatmul.mubr.msk.bf16.vlgmr.msra.gmra.mrb[0].mxu0 %vm726_vm8, %v664_v30  ;;  %v844_v24 = vunpack.c.l.b16 %v812_v0  ;;  %v845_v25 = vunpack.c.l.b16 %v813_v5  ;;  %v846_v26 = vunpack.c.l.b16 %v814_v6  ;;  %v840_v27 = vunpack.c.l.b16 %v808_v15  ;;  %v954_v5 = vld [vmem:[%s2620_s9 + $0xd] sm:$0x1]  ;;  %v960_v6 = vld [vmem:[%s2620_s9 + $0x25] sm:$0x1] }
  0x5a   : > { %2276 = vmatprep.mubr.msk.bf16.mxu0 %vm2462_vm1, %v2461_v32  ;;  %v841_v28 = vunpack.c.l.b16 %v809_v19  ;;  %v842_v29 = vunpack.c.l.b16 %v810_v4  ;;  %v847_v30 = vunpack.c.l.b16 %v815_v10  ;;  %v848_v31 = vunpack.c.l.b16 %v816_v16  ;;  %v951_v4 = vld [vmem:[%s2620_s9 + $0x1] sm:$0x1]  ;;  %v955_v10 = vld [vmem:[%s2620_s9 + $0x11] sm:$0x1]  ;;  %v962_v19 = vld [vmem:[%s2620_s9 + $0x2d] sm:$0x1] }
  0x5b   : > { %v850_v33 = vrot.slane %v835_v11, 7  ;;  %v852_v34 = vrot.slane %v836_v12, 6  ;;  %v854_v35 = vrot.slane %v837_v17, 5  ;;  %v849_v36 = vunpack.c.l.b16 %v817_v20  ;;  %v961_v11 = vld [vmem:[%s2620_s9 + $0x29] sm:$0x1] }
  0x5c   : > { %v872_v49 = vrot.slane %v847_v30, 3  ;;  %v862_v51 = vrot.slane %v841_v28, 1  ;;  %v874_v53 = vrot.slane %v848_v31, 2  ;;  %v968_v3 = vpack.c.bf16 %v952_v1, %v952_v1  ;;  %v927_v1 = vld [vmem:[%s2651_s14 + $0x1] sm:$0x1] }
  0x5d   : > { %v876_v56 = vrot.slane %v849_v36, 1  ;;  %v969_v7 = vpack.c.bf16 %v953_v2, %v953_v2  ;;  %v967_v8 = vpack.c.bf16 %v951_v4, %v951_v4  ;;  %v970_v12 = vpack.c.bf16 %v954_v5, %v954_v5 }
  0x5e   : > { %v1031_v9 = vunpack.c.l.b16 %v968_v3  ;;  %v976_v13 = vpack.c.bf16 %v960_v6, %v960_v6  ;;  %v971_v20 = vpack.c.bf16 %v955_v10, %v955_v10 }
  0x5f   : > { %v1032_v15 = vunpack.c.l.b16 %v969_v7  ;;  %v1030_v16 = vunpack.c.l.b16 %v967_v8  ;;  %v930_v8 = vld [vmem:[%s2651_s14 + $0xd] sm:$0x1] }
  0x60   : > { %v1046_v17 = vrot.slane %v1031_v9, 7  ;;  %v1034_v31 = vunpack.c.l.b16 %v971_v20 }
  0x62   : > { %v1047_v30 = vsel %vm644_vm0, %v1046_v17, %v1030_v16  ;;  %v932_v16 = vld [vmem:[%s2651_s14 + $0x15] sm:$0x1]  ;;  %v933_v17 = vld [vmem:[%s2651_s14 + $0x19] sm:$0x1] }
 0x12c   : > { %v767_v38 = vpop.f32.mrb[0].mxu0 }
 0x12d   : > { %v768_v39 = vadd.f32 %v767_v38, %v2692_v37  ;;  %v2260_v40 = vpop.f32.mrb[1].mxu0  ;;  %v856_v38 = vrot.slane %v838_v18, 4  ;;  %v956_v18 = vld [vmem:[%s2620_s9 + $0x15] sm:$0x1] }
 0x12e   : > { %v770_v41 = vpop.f32.mrb[2].mxu0  ;;  %v864_v40 = vrot.slane %v843_v22, 7  ;;  %v975_v22 = vpack.c.bf16 %v959_v14, %v959_v14  ;;  %v972_v28 = vpack.c.bf16 %v956_v18, %v956_v18  ;;  %v1314_v18 = vld [vmem:[%s2620_s9 + $0x26] sm:$0x1] }
 0x12f   : > { %v2261_v42 = vpop.f32.mrb[3].mxu0  ;;  %v774_v43 = vsel %vm773_vm10, %v768_v39, -inf  ;;  %v851_v41 = vsel %vm644_vm0, %v850_v33, %v834_v23  ;;  %v1033_v23 = vunpack.c.l.b16 %v970_v12  ;;  %v931_v12 = vld [vmem:[%s2651_s14 + $0x11] sm:$0x1] }
 0x130   : > { %775 = vmax.xlane.f32.xlu0 %v774_v43  ;;  %v866_v42 = vrot.slane %v844_v24, 6  ;;  %v868_v43 = vrot.slane %v845_v25, 5  ;;  %v1039_v24 = vunpack.c.l.b16 %v976_v13  ;;  %v1048_v25 = vrot.slane %v1032_v15, 6  ;;  %v1306_v15 = vld [vmem:[%s2620_s9 + $0x6] sm:$0x1] }
 0x131   : > { %v1050_v36 = vrot.slane %v1033_v23, 5  ;;  %v935_v13 = vmul.f32 0.35355338, %v927_v1 }
 0x1bd   : > { %v776_v44 = vpop.xlane.xlu0 %775 }
 0x1be   : > { %v777_v45 = vsub.f32 %v768_v39, %v776_v44  ;;  %v858_v39 = vrot.slane %v839_v21, 3  ;;  %v870_v44 = vrot.slane %v846_v26, 4  ;;  %v977_v21 = vpack.c.bf16 %v961_v11, %v961_v11  ;;  %v957_v26 = vld [vmem:[%s2620_s9 + $0x19] sm:$0x1] }
 0x1c0   : > { %v778_v46 = vmul.f32 1.442695, %v777_v45  ;;  %v853_v45 = vsel %vm647_vm2, %v852_v34, %v851_v41  ;;  %v1040_v33 = vunpack.c.l.b16 %v977_v21  ;;  %v958_v34 = vld [vmem:[%s2620_s9 + $0x1d] sm:$0x1]  ;;  %v973_v41 = vpack.c.bf16 %v957_v26, %v957_v26  ;;  %v1305_v26 = vld [vmem:[%s2620_s9 + $0x2] sm:$0x1] }
 0x1c1   : > { %v855_v50 = vsel %vm650_vm3, %v854_v35, %v853_v45  ;;  %v1038_v35 = vunpack.c.l.b16 %v975_v22  ;;  %v1035_v45 = vunpack.c.l.b16 %v972_v28  ;;  %v938_v22 = vmul.f32 0.35355338, %v930_v8 }
 0x1c2   : > { %2365 = vpow2.f32 %v778_v46  ;;  %v860_v46 = vrot.slane %v840_v27, 2  ;;  %v857_v54 = vsel %vm653_vm4, %v856_v38, %v855_v50  ;;  %v963_v27 = vld [vmem:[%s2620_s9 + $0x31] sm:$0x1]  ;;  %v1060_v38 = vrot.slane %v1039_v24, 7 }
 0x1c3   : > { %v859_v57 = vsel %vm656_vm5, %v858_v39, %v857_v54  ;;  %v964_v39 = vld [vmem:[%s2620_s9 + $0x35] sm:$0x1]  ;;  %v1062_v50 = vrot.slane %v1040_v33, 6  ;;  %v1322_v28 = vpack.c.bf16 %v1306_v15, %v1306_v15  ;;  %v1313_v33 = vld [vmem:[%s2620_s9 + $0x22] sm:$0x1] }
 0x1c4   : > { %v861_v59 = vsel %vm659_vm6, %v860_v46, %v859_v57  ;;  %v1036_v57 = vunpack.c.l.b16 %v973_v41 }
 0x1c5   : > { %v863_v61 = vsel %vm662_vm7, %v862_v51, %v861_v59  ;;  %v928_v51 = vld [vmem:[%s2651_s14 + $0x5] sm:$0x1]  ;;  %v1054_v59 = vrot.slane %v1035_v45, 3 }
 0x1c6   : > { %v1056_v6 = vrot.slane %v1036_v57, 2 }
 0x1cc   : > { %v2696_v47 = vpop.eup %2365 }
 0x1cd   : > { %v780_v48 = vsel %vm773_vm10, %v2696_v47, 0.0 }
 0x1ce   : > { %781 = vadd.xlane.f32.xlu0 %v780_v48  ;;  %v865_v48 = vsel %vm644_vm0, %v864_v40, %v842_v29  ;;  %v978_v29 = vpack.c.bf16 %v962_v19, %v962_v19  ;;  %v965_v40 = vld [vmem:[%s2620_s9 + $0x39] sm:$0x1] }
 0x1cf   : > { %v867_v52 = vsel %vm647_vm2, %v866_v42, %v865_v48  ;;  %v979_v42 = vpack.c.bf16 %v963_v27, %v963_v27  ;;  %v974_v48 = vpack.c.bf16 %v958_v34, %v958_v34  ;;  %v1307_v27 = vld [vmem:[%s2620_s9 + $0xa] sm:$0x1] }
 0x1d0   : > { %v869_v55 = vsel %vm650_vm3, %v868_v43, %v867_v52  ;;  %v1049_v43 = vsel %vm647_vm2, %v1048_v25, %v1047_v30  ;;  %v1041_v46 = vunpack.c.l.b16 %v978_v29  ;;  %v980_v52 = vpack.c.bf16 %v964_v39, %v964_v39  ;;  %v1315_v34 = vld [vmem:[%s2620_s9 + $0x2a] sm:$0x1] }
 0x1d1   : > { %v871_v58 = vsel %vm653_vm4, %v870_v44, %v869_v55  ;;  %v966_v44 = vld [vmem:[%s2620_s9 + $0x3d] sm:$0x1]  ;;  %v1051_v54 = vsel %vm650_vm3, %v1050_v36, %v1049_v43  ;;  %v1061_v55 = vsel %vm644_vm0, %v1060_v38, %v1038_v35  ;;  %v1037_v2 = vunpack.c.l.b16 %v974_v48  ;;  %v1316_v48 = vld [vmem:[%s2620_s9 + $0x2e] sm:$0x1] }
 0x1d2   : > { %v873_v60 = vsel %vm656_vm5, %v872_v49, %v871_v58  ;;  %v1052_v49 = vrot.slane %v1034_v31, 4  ;;  %v1042_v58 = vunpack.c.l.b16 %v979_v42  ;;  %v1043_v3 = vunpack.c.l.b16 %v980_v52  ;;  %v934_v42 = vld [vmem:[%s2651_s14 + $0x1d] sm:$0x1] }
 0x1d3   : > { %v875_v62 = vsel %vm659_vm6, %v874_v53, %v873_v60  ;;  %v981_v53 = vpack.c.bf16 %v965_v40, %v965_v40  ;;  %v1064_v60 = vrot.slane %v1041_v46, 5  ;;  %v1058_v19 = vrot.slane %v1037_v2, 1 }
 0x1d4   : > { %v877_v63 = vsel %vm662_vm7, %v876_v56, %v875_v62  ;;  %v982_v56 = vpack.c.bf16 %v966_v44, %v966_v44  ;;  %v936_v62 = vmul.f32 0.35355338, %v928_v51  ;;  %v1066_v7 = vrot.slane %v1042_v58, 4  ;;  %v1308_v44 = vld [vmem:[%s2620_s9 + $0xe] sm:$0x1] }
 0x1d5   : > { %v878_v0 = vpack.c.b16 %v877_v63, %v863_v61  ;;  %v929_v61 = vld [vmem:[%s2651_s14 + $0x9] sm:$0x1]  ;;  %v1053_v63 = vsel %vm653_vm4, %v1052_v49, %v1051_v54  ;;  %v1044_v4 = vunpack.c.l.b16 %v981_v53  ;;  %v1068_v20 = vrot.slane %v1043_v3, 3 }
 0x1d6   : > { %v2760_v5 = vunpack.c.l.b16 %v982_v56  ;;  %v937_v9 = vmul.f32 0.35355338, %v929_v61  ;;  %v1055_v10 = vsel %vm656_vm5, %v1054_v59, %v1053_v63  ;;  %v944_v14 = vpack.c.bf16 %v936_v62, %v936_v62  ;;  %v1309_v59 = vld [vmem:[%s2620_s9 + $0x12] sm:$0x1] }
 0x1d7   : > { %2263 = vmatpush3.bf16.msra.mxu1 %v878_v0  ;;  %v1063_v0 = vsel %vm647_vm2, %v1062_v50, %v1061_v55  ;;  %v1070_v21 = vrot.slane %v1044_v4, 2  ;;  %v1057_v23 = vsel %vm659_vm6, %v1056_v6, %v1055_v10  ;;  %v943_v30 = vpack.c.bf16 %v935_v13, %v935_v13  ;;  %v1317_v63 = vld [vmem:[%s2620_s9 + $0x32] sm:$0x1]  ;;  %v1318_v13 = vld [vmem:[%s2620_s9 + $0x36] sm:$0x1] }
 0x1d8   : > { %2268 = vmatprep.subr.bf16.mxu1 %v2461_v32  ;;  %v1065_v11 = vsel %vm650_vm3, %v1064_v60, %v1063_v0  ;;  %v945_v25 = vpack.c.bf16 %v937_v9, %v937_v9  ;;  %v1072_v29 = vrot.slane %v2760_v5, 1  ;;  %v992_v31 = vunpack.c.l.b16 %v944_v14 }
 0x1d9   : > { %v1067_v24 = vsel %vm653_vm4, %v1066_v7, %v1065_v11  ;;  %v1330_v35 = vpack.c.bf16 %v1314_v18, %v1314_v18  ;;  %v939_v36 = vmul.f32 0.35355338, %v931_v12  ;;  %v940_v38 = vmul.f32 0.35355338, %v932_v16  ;;  %v1310_v7 = vld [vmem:[%s2620_s9 + $0x16] sm:$0x1] }
 0x1da   : > { %v2777_v39 = vmul.f32 0.35355338, %v933_v17  ;;  %v2780_v40 = vsel %vm662_vm7, %v1058_v19, %v1057_v23  ;;  %v1069_v41 = vsel %vm656_vm5, %v1068_v20, %v1067_v24  ;;  %v946_v43 = vpack.c.bf16 %v938_v22, %v938_v22 }
 0x1db   : > { %v1323_v45 = vpack.c.bf16 %v1307_v27, %v1307_v27  ;;  %v993_v46 = vunpack.c.l.b16 %v945_v25  ;;  %v1321_v49 = vpack.c.bf16 %v1305_v26, %v1305_v26  ;;  %v1331_v50 = vpack.c.bf16 %v1315_v34, %v1315_v34  ;;  %v1319_v26 = vld [vmem:[%s2620_s9 + $0x3a] sm:$0x1] }
 0x1dc   : > { %v1385_v51 = vunpack.c.l.b16 %v1322_v28  ;;  %v991_v52 = vunpack.c.l.b16 %v943_v30  ;;  %v999_v53 = vrot.slane %v992_v31, 7  ;;  %v1329_v54 = vpack.c.bf16 %v1313_v33, %v1313_v33  ;;  %v1312_v33 = vld [vmem:[%s2620_s9 + $0x1e] sm:$0x1] }
 0x1dd   : > { %v1393_v55 = vunpack.c.l.b16 %v1330_v35  ;;  %v1071_v56 = vsel %vm659_vm6, %v1070_v21, %v1069_v41  ;;  %v2787_v57 = vmul.f32 0.35355338, %v934_v42  ;;  %v947_v58 = vpack.c.bf16 %v939_v36, %v939_v36  ;;  %v1311_v21 = vld [vmem:[%s2620_s9 + $0x1a] sm:$0x1] }
 0x1de   : > { %v1324_v60 = vpack.c.bf16 %v1308_v44, %v1308_v44  ;;  %v948_v61 = vpack.c.bf16 %v940_v38, %v940_v38  ;;  %v994_v62 = vunpack.c.l.b16 %v946_v43  ;;  %v1332_v0 = vpack.c.bf16 %v1316_v48, %v1316_v48  ;;  %v1320_v43 = vld [vmem:[%s2620_s9 + $0x3e] sm:$0x1]  ;;  %v1282_v48 = vld [vmem:[%s2651_s14 + $0x6] sm:$0x1] }
 0x1df   : > { %v1386_v1 = vunpack.c.l.b16 %v1323_v45  ;;  %v1001_v2 = vrot.slane %v993_v46, 6  ;;  %v1384_v3 = vunpack.c.l.b16 %v1321_v49  ;;  %v1394_v4 = vunpack.c.l.b16 %v1331_v50 }
 0x1e0   : > { %v1400_v5 = vrot.slane %v1385_v51, 7  ;;  %v1000_v6 = vsel %vm644_vm0, %v999_v53, %v991_v52  ;;  %v1325_v8 = vpack.c.bf16 %v1309_v59, %v1309_v59  ;;  %v1392_v9 = vunpack.c.l.b16 %v1329_v54 }
 0x1e1   : > { %v1414_v10 = vrot.slane %v1393_v55, 7  ;;  %v2794_v11 = vsel %vm662_vm7, %v1072_v29, %v1071_v56  ;;  %v995_v12 = vunpack.c.l.b16 %v947_v58  ;;  %v1333_v14 = vpack.c.bf16 %v1317_v63, %v1317_v63 }
 0x1e2   : > { %v1387_v15 = vunpack.c.l.b16 %v1324_v60  ;;  %v949_v16 = vpack.c.bf16 %v2777_v39, %v2777_v39  ;;  %v1003_v17 = vrot.slane %v994_v62, 5  ;;  %v1395_v18 = vunpack.c.l.b16 %v1332_v0  ;;  %v1285_v62 = vld [vmem:[%s2651_s14 + $0x12] sm:$0x1] }
 0x1e3   : > { %v1402_v19 = vrot.slane %v1386_v1, 6  ;;  %v1002_v20 = vsel %vm647_vm2, %v1001_v2, %v1000_v6  ;;  %v1326_v22 = vpack.c.bf16 %v1310_v7, %v1310_v7  ;;  %v1401_v23 = vsel %vm644_vm0, %v1400_v5, %v1384_v3  ;;  %v1281_v3 = vld [vmem:[%s2651_s14 + $0x2] sm:$0x1] }
 0x1e4   : > { %v1416_v24 = vrot.slane %v1394_v4, 6  ;;  %v996_v25 = vunpack.c.l.b16 %v948_v61  ;;  %v1334_v27 = vpack.c.bf16 %v1318_v13, %v1318_v13  ;;  %v1388_v28 = vunpack.c.l.b16 %v1325_v8  ;;  %v1284_v61 = vld [vmem:[%s2651_s14 + $0xe] sm:$0x1]  ;;  %v1286_v4 = vld [vmem:[%s2651_s14 + $0x16] sm:$0x1] }
 0x1e5   : > { %v1415_v29 = vsel %vm644_vm0, %v1414_v10, %v1392_v9  ;;  %v950_v30 = vpack.c.bf16 %v2787_v57, %v2787_v57  ;;  %v1005_v31 = vrot.slane %v995_v12, 4  ;;  %v1396_v34 = vunpack.c.l.b16 %v1333_v14  ;;  %v1283_v57 = vld [vmem:[%s2651_s14 + $0xa] sm:$0x1]  ;;  %v1287_v9 = vld [vmem:[%s2651_s14 + $0x1a] sm:$0x1] }
 0x1e6   : > { %v1404_v35 = vrot.slane %v1387_v15, 5  ;;  %v1004_v36 = vsel %vm650_vm3, %v1003_v17, %v1002_v20  ;;  %v1327_v38 = vpack.c.bf16 %v1311_v21, %v1311_v21  ;;  %v1403_v39 = vsel %vm647_vm2, %v1402_v19, %v1401_v23  ;;  %v1288_v10 = vld [vmem:[%s2651_s14 + $0x1e] sm:$0x1] }
 0x1e7   : > { %v1418_v41 = vrot.slane %v1395_v18, 5  ;;  %v997_v42 = vunpack.c.l.b16 %v949_v16  ;;  %v1335_v44 = vpack.c.bf16 %v1319_v26, %v1319_v26  ;;  %v1389_v45 = vunpack.c.l.b16 %v1326_v22 }
 0x1e8   : > { %v1417_v46 = vsel %vm647_vm2, %v1416_v24, %v1415_v29  ;;  %v1007_v49 = vrot.slane %v996_v25, 3  ;;  %v1328_v50 = vpack.c.bf16 %v1312_v33, %v1312_v33  ;;  %v1397_v51 = vunpack.c.l.b16 %v1334_v27  ;;  %v1660_v27 = vld [vmem:[%s2620_s9 + $0x7] sm:$0x1] }
 0x1e9   : > { %v1406_v52 = vrot.slane %v1388_v28, 4  ;;  %v1074_v53 = vpack.c.b16 %v2794_v11, %v2780_v40  ;;  %v1006_v54 = vsel %vm653_vm4, %v1005_v31, %v1004_v36  ;;  %v1405_v55 = vsel %vm650_vm3, %v1404_v35, %v1403_v39  ;;  %v1668_v33 = vld [vmem:[%s2620_s9 + $0x27] sm:$0x1] }
 0x1ea   : > { %v1420_v56 = vrot.slane %v1396_v34, 4  ;;  %v1336_v58 = vpack.c.bf16 %v1320_v43, %v1320_v43  ;;  %v1390_v59 = vunpack.c.l.b16 %v1327_v38  ;;  %v1419_v60 = vsel %vm650_vm3, %v1418_v41, %v1417_v46  ;;  %v1661_v43 = vld [vmem:[%s2620_s9 + $0xb] sm:$0x1] }
 0x1eb   : > { %v1290_v63 = vmul.f32 0.35355338, %v1282_v48  ;;  %v998_v0 = vunpack.c.l.b16 %v950_v30  ;;  %v1009_v1 = vrot.slane %v997_v42, 2  ;;  %v1398_v2 = vunpack.c.l.b16 %v1335_v44 }
 0x1ec   : > { %v1408_v40 = vrot.slane %v1389_v45, 3  ;;  %v1008_v5 = vsel %vm656_vm5, %v1007_v49, %v1006_v54  ;;  %v1391_v6 = vunpack.c.l.b16 %v1328_v50  ;;  %v1407_v7 = vsel %vm653_vm4, %v1406_v52, %v1405_v55  ;;  %v1659_v49 = vld [vmem:[%s2620_s9 + $0x3] sm:$0x1]  ;;  %v1669_v50 = vld [vmem:[%s2620_s9 + $0x2b] sm:$0x1] }
 0x1ed   : > { %v1422_v8 = vrot.slane %v1397_v51, 3  ;;  %v1421_v11 = vsel %vm653_vm4, %v1420_v56, %v1419_v60  ;;  %v1291_v12 = vmul.f32 0.35355338, %v1283_v57  ;;  %v1292_v13 = vmul.f32 0.35355338, %v1284_v61 }
 0x1ee   : > { %v1293_v14 = vmul.f32 0.35355338, %v1285_v62  ;;  %v1399_v15 = vunpack.c.l.b16 %v1336_v58  ;;  %v1410_v16 = vrot.slane %v1390_v59, 2  ;;  %v1289_v17 = vmul.f32 0.35355338, %v1281_v3 }
 0x1ef   : > { %v1298_v18 = vpack.c.bf16 %v1290_v63, %v1290_v63  ;;  %v1011_v19 = vrot.slane %v998_v0, 1  ;;  %v1409_v20 = vsel %vm656_vm5, %v1408_v40, %v1407_v7  ;;  %v1424_v21 = vrot.slane %v1398_v2, 2  ;;  %v1667_v56 = vld [vmem:[%s2620_s9 + $0x23] sm:$0x1]  ;;  %v1662_v60 = vld [vmem:[%s2620_s9 + $0xf] sm:$0x1] }
 0x1f0   : > { %v1294_v22 = vmul.f32 0.35355338, %v1286_v4  ;;  %v1010_v23 = vsel %vm659_vm6, %v1009_v1, %v1008_v5  ;;  %v1423_v24 = vsel %vm656_vm5, %v1422_v8, %v1421_v11  ;;  %v1295_v25 = vmul.f32 0.35355338, %v1287_v9  ;;  %v1670_v63 = vld [vmem:[%s2620_s9 + $0x2f] sm:$0x1] }
 0x1f1   : > { %v1296_v26 = vmul.f32 0.35355338, %v1288_v10  ;;  %v1412_v28 = vrot.slane %v1391_v6, 1  ;;  %v1299_v29 = vpack.c.bf16 %v1291_v12, %v1291_v12  ;;  %v1300_v30 = vpack.c.bf16 %v1292_v13, %v1292_v13  ;;  %v1636_v40 = vld [vmem:[%s2651_s14 + $0x7] sm:$0x1] }
 0x1f2   : > { %v1301_v31 = vpack.c.bf16 %v1293_v14, %v1293_v14  ;;  %v1411_v34 = vsel %vm659_vm6, %v1410_v16, %v1409_v20  ;;  %v1426_v35 = vrot.slane %v1399_v15, 1  ;;  %v1297_v36 = vpack.c.bf16 %v1289_v17, %v1289_v17  ;;  %v1663_v10 = vld [vmem:[%s2620_s9 + $0x13] sm:$0x1]  ;;  %v1637_v16 = vld [vmem:[%s2651_s14 + $0xb] sm:$0x1] }
 0x1f3   : > { %v1346_v38 = vunpack.c.l.b16 %v1298_v18  ;;  %v2834_v39 = vsel %vm726_vm8, %v1074_v53, 0  ;;  %v1425_v41 = vsel %vm659_vm6, %v1424_v21, %v1423_v24  ;;  %v1302_v42 = vpack.c.bf16 %v1294_v22, %v1294_v22  ;;  %v1671_v13 = vld [vmem:[%s2620_s9 + $0x33] sm:$0x1]  ;;  %v1664_v24 = vld [vmem:[%s2620_s9 + $0x17] sm:$0x1] }
 0x1f4   : > { %v1676_v44 = vpack.c.bf16 %v1660_v27, %v1660_v27  ;;  %v2839_v45 = vsel %vm662_vm7, %v1011_v19, %v1010_v23  ;;  %v1303_v46 = vpack.c.bf16 %v1295_v25, %v1295_v25  ;;  %v1304_v48 = vpack.c.bf16 %v1296_v26, %v1296_v26  ;;  %v1635_v23 = vld [vmem:[%s2651_s14 + $0x3] sm:$0x1]  ;;  %v1665_v25 = vld [vmem:[%s2620_s9 + $0x1b] sm:$0x1] }
 0x1f5   : > { %v1684_v51 = vpack.c.bf16 %v1668_v33, %v1668_v33  ;;  %v2844_v52 = vsel %vm662_vm7, %v1412_v28, %v1411_v34  ;;  %v1347_v53 = vunpack.c.l.b16 %v1299_v29  ;;  %v2846_v54 = vunpack.c.l.b16 %v1300_v30  ;;  %v1672_v30 = vld [vmem:[%s2620_s9 + $0x37] sm:$0x1]  ;;  %v1638_v34 = vld [vmem:[%s2651_s14 + $0xf] sm:$0x1] }
 0x1f6   : > { %v2848_v55 = vunpack.c.l.b16 %v1301_v31  ;;  %v2852_v57 = vsel %vm662_vm7, %v1426_v35, %v1425_v41  ;;  %v1345_v58 = vunpack.c.l.b16 %v1297_v36  ;;  %v1353_v59 = vrot.slane %v1346_v38, 7 }
 0x1f7   : > { %v1677_v61 = vpack.c.bf16 %v1661_v43, %v1661_v43  ;;  %v2855_v62 = vunpack.c.l.b16 %v1302_v42  ;;  %v1675_v0 = vpack.c.bf16 %v1659_v49, %v1659_v49  ;;  %v1685_v1 = vpack.c.bf16 %v1669_v50, %v1669_v50  ;;  %v1666_v43 = vld [vmem:[%s2620_s9 + $0x1f] sm:$0x1]  ;;  %v1673_v50 = vld [vmem:[%s2620_s9 + $0x3b] sm:$0x1] }
 0x1f8   : > { %v1739_v2 = vunpack.c.l.b16 %v1676_v44  ;;  %v2859_v3 = vunpack.c.l.b16 %v1303_v46  ;;  %v2861_v4 = vunpack.c.l.b16 %v1304_v48  ;;  %v1683_v5 = vpack.c.bf16 %v1667_v56, %v1667_v56  ;;  %v1639_v56 = vld [vmem:[%s2651_s14 + $0x13] sm:$0x1] }
 0x1f9   : > { %v1747_v6 = vunpack.c.l.b16 %v1684_v51  ;;  %v1355_v7 = vrot.slane %v1347_v53, 6  ;;  %v1357_v8 = vrot.slane %v2846_v54, 5  ;;  %v1359_v9 = vrot.slane %v2848_v55, 4 }
 0x1fa   : > { %v1678_v11 = vpack.c.bf16 %v1662_v60, %v1662_v60  ;;  %v1354_v12 = vsel %vm644_vm0, %v1353_v59, %v1345_v58  ;;  %v1686_v14 = vpack.c.bf16 %v1670_v63, %v1670_v63  ;;  %v1740_v15 = vunpack.c.l.b16 %v1677_v61 }
 0x1fb   : > { %v1644_v17 = vmul.f32 0.35355338, %v1636_v40  ;;  %v1361_v19 = vrot.slane %v2855_v62, 3  ;;  %v1738_v20 = vunpack.c.l.b16 %v1675_v0  ;;  %v1748_v21 = vunpack.c.l.b16 %v1685_v1  ;;  %v1674_v0 = vld [vmem:[%s2620_s9 + $0x3f] sm:$0x1] }
 0x1fc   : > { %v1754_v22 = vrot.slane %v1739_v2, 7  ;;  %v1679_v26 = vpack.c.bf16 %v1663_v10, %v1663_v10  ;;  %v1746_v27 = vunpack.c.l.b16 %v1683_v5  ;;  %v1768_v28 = vrot.slane %v1747_v6, 7 }
 0x1fd   : > { %v1356_v29 = vsel %vm647_vm2, %v1355_v7, %v1354_v12  ;;  %v1687_v31 = vpack.c.bf16 %v1671_v13, %v1671_v13  ;;  %v1741_v33 = vunpack.c.l.b16 %v1678_v11  ;;  %v1645_v35 = vmul.f32 0.35355338, %v1637_v16  ;;  %v1640_v11 = vld [vmem:[%s2651_s14 + $0x17] sm:$0x1] }
 0x1fe   : > { %v1749_v36 = vunpack.c.l.b16 %v1686_v14  ;;  %v1756_v38 = vrot.slane %v1740_v15, 6  ;;  %v1643_v41 = vmul.f32 0.35355338, %v1635_v23  ;;  %v1652_v42 = vpack.c.bf16 %v1644_v17, %v1644_v17  ;;  %v1641_v23 = vld [vmem:[%s2651_s14 + $0x1b] sm:$0x1] }
 0x1ff   : > { %v1680_v44 = vpack.c.bf16 %v1664_v24, %v1664_v24  ;;  %v1681_v46 = vpack.c.bf16 %v1665_v25, %v1665_v25  ;;  %v1755_v48 = vsel %vm644_vm0, %v1754_v22, %v1738_v20  ;;  %v1770_v49 = vrot.slane %v1748_v21, 6 }
 0x200   : > { %v1688_v51 = vpack.c.bf16 %v1672_v30, %v1672_v30  ;;  %v1742_v53 = vunpack.c.l.b16 %v1679_v26  ;;  %v1769_v54 = vsel %vm644_vm0, %v1768_v28, %v1746_v27  ;;  %v1646_v58 = vmul.f32 0.35355338, %v1638_v34 }
 0x201   : > { %v1358_v59 = vsel %vm650_vm3, %v1357_v8, %v1356_v29  ;;  %v1750_v60 = vunpack.c.l.b16 %v1687_v31  ;;  %v1758_v61 = vrot.slane %v1741_v33, 5  ;;  %v1653_v63 = vpack.c.bf16 %v1645_v35, %v1645_v35 }
 0x202   : > { %v1757_v1 = vsel %vm647_vm2, %v1756_v38, %v1755_v48  ;;  %v1772_v2 = vrot.slane %v1749_v36, 5  ;;  %v1651_v40 = vpack.c.bf16 %v1643_v41, %v1643_v41  ;;  %v1700_v5 = vunpack.c.l.b16 %v1652_v42  ;;  %v1642_v41 = vld [vmem:[%s2651_s14 + $0x1f] sm:$0x1] }
 0x203   : > { %v1682_v6 = vpack.c.bf16 %v1666_v43, %v1666_v43  ;;  %v1689_v7 = vpack.c.bf16 %v1673_v50, %v1673_v50  ;;  %v1771_v10 = vsel %vm647_vm2, %v1770_v49, %v1769_v54  ;;  %v1647_v12 = vmul.f32 0.35355338, %v1639_v56 }
 0x204   : > { %v1743_v13 = vunpack.c.l.b16 %v1680_v44  ;;  %v1751_v14 = vunpack.c.l.b16 %v1688_v51  ;;  %v1760_v8 = vrot.slane %v1742_v53, 4  ;;  %v1654_v15 = vpack.c.bf16 %v1646_v58, %v1646_v58 }
 0x205   : > { %v1690_v16 = vpack.c.bf16 %v1674_v0, %v1674_v0  ;;  %v1759_v17 = vsel %vm650_vm3, %v1758_v61, %v1757_v1  ;;  %v1701_v20 = vunpack.c.l.b16 %v1653_v63  ;;  %v1773_v22 = vsel %vm650_vm3, %v1772_v2, %v1771_v10 }
 0x206   : > { %v1648_v24 = vmul.f32 0.35355338, %v1640_v11  ;;  %v1699_v25 = vunpack.c.l.b16 %v1651_v40  ;;  %v1707_v26 = vrot.slane %v1700_v5, 7  ;;  %v1744_v28 = vunpack.c.l.b16 %v1681_v46 }
 0x207   : > { %v1752_v29 = vunpack.c.l.b16 %v1689_v7  ;;  %v1655_v30 = vpack.c.bf16 %v1647_v12, %v1647_v12  ;;  %v1761_v31 = vsel %vm653_vm4, %v1760_v8, %v1759_v17  ;;  %v1762_v33 = vrot.slane %v1743_v13, 3 }
 0x208   : > { %v1776_v34 = vrot.slane %v1751_v14, 3  ;;  %v1702_v35 = vunpack.c.l.b16 %v1654_v15  ;;  %v1649_v42 = vmul.f32 0.35355338, %v1641_v23  ;;  %v1709_v43 = vrot.slane %v1701_v20, 6 }
 0x209   : > { %v1753_v44 = vunpack.c.l.b16 %v1690_v16  ;;  %v1656_v46 = vpack.c.bf16 %v1648_v24, %v1648_v24  ;;  %v1708_v48 = vsel %vm644_vm0, %v1707_v26, %v1699_v25  ;;  %v1360_v49 = vsel %vm653_vm4, %v1359_v9, %v1358_v59 }
 0x20a   : > { %v1764_v50 = vrot.slane %v1744_v28, 2  ;;  %v1778_v51 = vrot.slane %v1752_v29, 2  ;;  %v1703_v53 = vunpack.c.l.b16 %v1655_v30  ;;  %v1763_v54 = vsel %vm656_vm5, %v1762_v33, %v1761_v31 }
 0x20b   : > { %v1650_v58 = vmul.f32 0.35355338, %v1642_v41  ;;  %v1428_v55 = vpack.c.b16 %v2852_v57, %v2844_v52  ;;  %v1363_v9 = vrot.slane %v2859_v3, 2  ;;  %v1657_v59 = vpack.c.bf16 %v1649_v42, %v1649_v42 }
 0x20c   : > { %v1710_v61 = vsel %vm647_vm2, %v1709_v43, %v1708_v48  ;;  %v1780_v0 = vrot.slane %v1753_v44, 1  ;;  %v1704_v1 = vunpack.c.l.b16 %v1656_v46  ;;  %v1013_v2 = vpack.c.b16 %v2839_v45, %v2839_v45 }
 0x20d   : > { %v1765_v40 = vsel %vm659_vm6, %v1764_v50, %v1763_v54  ;;  %v1713_v52 = vrot.slane %v1703_v53, 4  ;;  %v1365_v57 = vrot.slane %v2861_v4, 1  ;;  %v1658_v3 = vpack.c.bf16 %v1650_v58, %v1650_v58 }
 0x20e   : > { %v1433_v62 = vsel %vm726_vm8, %v1428_v55, 0  ;;  %v1705_v7 = vunpack.c.l.b16 %v1657_v59  ;;  %v1715_v45 = vrot.slane %v1704_v1, 3  ;;  %v1142_v1 = vld [vmem:[%s2702_s24 + $0x25] sm:$0x1] }
 0x20f   : > { %v1706_v13 = vunpack.c.l.b16 %v1658_v3  ;;  %v1141_v3 = vld [vmem:[%s2702_s24 + $0x21] sm:$0x1] }
 0x210   : > { %v1717_v8 = vrot.slane %v1705_v7, 2  ;;  %v1145_v7 = vld [vmem:[%s2702_s24 + $0x31] sm:$0x1] }
 0x211   : > { %v1719_v17 = vrot.slane %v1706_v13, 1  ;;  %v1138_v13 = vld [vmem:[%s2702_s24 + $0x15] sm:$0x1] }
 0x25b   : > { %v782_v18 = vpop.xlane.xlu0 %781 }
 0x25c   : > { %2367 = vrcp.f32 %v782_v18  ;;  %v1774_v18 = vrot.slane %v1750_v60, 4  ;;  %v1711_v60 = vrot.slane %v1702_v35, 5 }
 0x25e   : > { %v1775_v38 = vsel %vm653_vm4, %v1774_v18, %v1773_v22 }
 0x25f   : > { %v1777_v56 = vsel %vm656_vm5, %v1776_v34, %v1775_v38 }
 0x260   : > { %v1779_v5 = vsel %vm659_vm6, %v1778_v51, %v1777_v56 }
 0x261   : > { %v1781_v11 = vsel %vm662_vm7, %v1780_v0, %v1779_v5  ;;  %v1134_v0 = vld [vmem:[%s2702_s24 + $0x5] sm:$0x1] }
 0x262   : > { %v1150_v5 = vpack.c.bf16 %v1134_v0, %v1134_v0 }
 0x266   : > { %v2368_v21 = vpop.eup %2367 }
 0x267   : > { %v784_v27 = vmul.f32 %v2368_v21, %v2696_v47  ;;  %v1745_v47 = vunpack.c.l.b16 %v1682_v6  ;;  %v1712_v6 = vsel %vm650_vm3, %v1711_v60, %v1710_v61 }
 0x268   : > { %v1714_v12 = vsel %vm653_vm4, %v1713_v52, %v1712_v6  ;;  %v1133_v52 = vld [vmem:[%s2702_s24 + $0x1] sm:$0x1] }
 0x269   : > { %v785_v36 = vpack.c.bf16 %v784_v27, %v784_v27  ;;  %926 = vst.msk [vmem:[%s2892_s27] sm:$0xff] %vm773_vm10, %v784_v27  ;;  %v1766_v63 = vrot.slane %v1745_v47, 1  ;;  %v1716_v15 = vsel %vm656_vm5, %v1715_v45, %v1714_v12  ;;  %v1158_v45 = vpack.c.bf16 %v1142_v1, %v1142_v1 }
 0x26a   : > { %v1718_v20 = vsel %vm659_vm6, %v1717_v8, %v1716_v15  ;;  %v1157_v15 = vpack.c.bf16 %v1141_v3, %v1141_v3 }
 0x26b   : > { %2265 = vmatmul.mubr.msk.bf16.vlgmr.msra.gmra.mrb[0].mxu1 %vm773_vm10, %v785_v36  ;;  %v1767_v10 = vsel %vm662_vm7, %v1766_v63, %v1765_v40  ;;  %v1720_v21 = vsel %vm662_vm7, %v1719_v17, %v1718_v20  ;;  %v1143_v40 = vld [vmem:[%s2702_s24 + $0x29] sm:$0x1]  ;;  %v1182_v17 = vunpack.c.l.b16 %v1150_v5  ;;  %v1139_v20 = vld [vmem:[%s2702_s24 + $0x19] sm:$0x1] }
 0x26c   : > { %2269 = vmatpush3.bf16.xpose.msra.mxu1 %v2834_v39  ;;  %2270 = vmatprep.mubr.msk.bf16.mxu1 %vm2462_vm1, %v2461_v32  ;;  %v1362_v39 = vsel %vm656_vm5, %v1361_v19, %v1360_v49  ;;  %v1782_v14 = vpack.c.b16 %v1781_v11, %v1767_v10  ;;  %v1721_v22 = vpack.c.b16 %v1720_v21, %v1720_v21  ;;  %v1147_v21 = vld [vmem:[%s2702_s24 + $0x39] sm:$0x1] }
 0x26d   : > { %2280 = vmatprep.subr.bf16.mxu1 %v2461_v32  ;;  %v1364_v19 = vsel %vm659_vm6, %v1363_v9, %v1362_v39  ;;  %v1149_v10 = vpack.c.bf16 %v1133_v52, %v1133_v52  ;;  %v1159_v12 = vpack.c.bf16 %v1143_v40, %v1143_v40 }
 0x26e   : > { %v1366_v4 = vsel %vm662_vm7, %v1365_v57, %v1364_v19  ;;  %v1787_v18 = vsel %vm726_vm8, %v1782_v14, 0  ;;  %v1136_v57 = vld [vmem:[%s2702_s24 + $0xd] sm:$0x1]  ;;  %v1146_v14 = vld [vmem:[%s2702_s24 + $0x35] sm:$0x1] }
 0x26f   : > { %v1367_v16 = vpack.c.b16 %v1366_v4, %v1366_v4  ;;  %v1144_v19 = vld [vmem:[%s2702_s24 + $0x2d] sm:$0x1]  ;;  %v1152_v11 = vpack.c.bf16 %v1136_v57, %v1136_v57 }
 0x273   : > { %2271 = vmatmul.mubr.msk.bf16.vlgmr.msra.gmra.mrb[4].mxu1 %vm726_vm8, %v1013_v2  ;;  %v1135_v2 = vld [vmem:[%s2702_s24 + $0x9] sm:$0x1] }
 0x274   : > { %2281 = vmatpush3.bf16.xpose.msra.mxu1 %v1433_v62  ;;  %2282 = vmatprep.mubr.msk.bf16.mxu1 %vm2462_vm1, %v2461_v32  ;;  %v1151_v6 = vpack.c.bf16 %v1135_v2, %v1135_v2  ;;  %v1137_v62 = vld [vmem:[%s2702_s24 + $0x11] sm:$0x1] }
 0x275   : > { %2292 = vmatprep.subr.bf16.mxu1 %v2461_v32  ;;  %v1153_v8 = vpack.c.bf16 %v1137_v62, %v1137_v62 }
 0x27b   : > { %2283 = vmatmul.mubr.msk.bf16.vlgmr.msra.gmra.mrb[8].mxu1 %vm726_vm8, %v1367_v16  ;;  %v1160_v16 = vpack.c.bf16 %v1144_v19, %v1144_v19 }
 0x27c   : > { %2293 = vmatpush3.bf16.xpose.msra.mxu1 %v1787_v18  ;;  %2294 = vmatprep.mubr.msk.bf16.mxu1 %vm2462_vm1, %v2461_v32 }
 0x283   : > { %2295 = vmatmul.mubr.msk.bf16.vlgmr.msra.gmra.mrb[12].mxu1 %vm726_vm8, %v1721_v22  ;;  %v1154_v22 = vpack.c.bf16 %v1138_v13, %v1138_v13 }
 0x33e   : > { %v917_v23 = vpop.f32.mrb[0].mxu1 }
 0x33f   : > { %v923_v24 = vpack.c.bf16 %v917_v23, %v917_v23  ;;  %v2266_v25 = vpop.f32.mrb[1].mxu1  ;;  %v1161_v23 = vpack.c.bf16 %v1145_v7, %v1145_v7 }
 0x340   : > { %v920_v26 = vpop.f32.mrb[2].mxu1  ;;  %v1140_v25 = vld [vmem:[%s2702_s24 + $0x1d] sm:$0x1] }
 0x341   : > { %925 = vst.msk [vmem:[%s2944_s11] sm:$0xf] %vm924_vm11, %v923_v24  ;;  %v2267_v27 = vpop.f32.mrb[3].mxu1  ;;  %v1183_v24 = vunpack.c.l.b16 %v1151_v6  ;;  %v1148_v26 = vld [vmem:[%s2702_s24 + $0x3d] sm:$0x1] }
 0x342   : > { %v1155_v27 = vpack.c.bf16 %v1139_v20, %v1139_v20  ;;  %v1490_v20 = vld [vmem:[%s2702_s24 + $0xe] sm:$0x1] }
 0x346   : > { %v1115_v28 = vpop.f32.mrb[4].mxu1 }
 0x347   : > { %v1116_v29 = vadd.f32 %v1115_v28, %v2692_v37  ;;  %v2272_v30 = vpop.f32.mrb[5].mxu1  ;;  %v1162_v28 = vpack.c.bf16 %v1146_v14, %v1146_v14 }
 0x348   : > { %v1118_v31 = vpop.f32.mrb[6].mxu1  ;;  %v1184_v30 = vunpack.c.l.b16 %v1152_v11 }
 0x349   : > { %v2273_v33 = vpop.f32.mrb[7].mxu1  ;;  %v1121_v34 = vsel %vm773_vm10, %v1116_v29, -inf  ;;  %v1156_v31 = vpack.c.bf16 %v1140_v25, %v1140_v25 }
 0x34a   : > { %1122 = vmax.xlane.f32.xlu1 %v1121_v34  ;;  %v1164_v33 = vpack.c.bf16 %v1148_v26, %v1148_v26  ;;  %v1185_v34 = vunpack.c.l.b16 %v1153_v8  ;;  %v1488_v8 = vld [vmem:[%s2702_s24 + $0x6] sm:$0x1] }
 0x34e   : > { %v1469_v35 = vpop.f32.mrb[8].mxu1 }
 0x34f   : > { %v1470_v36 = vadd.f32 %v1469_v35, %v2692_v37  ;;  %v2284_v38 = vpop.f32.mrb[9].mxu1  ;;  %v1186_v35 = vunpack.c.l.b16 %v1154_v22 }
 0x350   : > { %v1472_v41 = vpop.f32.mrb[10].mxu1  ;;  %v1190_v38 = vunpack.c.l.b16 %v1158_v45 }
 0x351   : > { %v2285_v42 = vpop.f32.mrb[11].mxu1  ;;  %v1475_v43 = vsel %vm773_vm10, %v1470_v36, -inf  ;;  %v1191_v41 = vunpack.c.l.b16 %v1159_v12 }
 0x352   : > { %1476 = vmax.xlane.f32.xlu1 %v1475_v43  ;;  %v1192_v42 = vunpack.c.l.b16 %v1160_v16  ;;  %v1187_v43 = vunpack.c.l.b16 %v1155_v27  ;;  %v1496_v16 = vld [vmem:[%s2702_s24 + $0x26] sm:$0x1]  ;;  %v1491_v27 = vld [vmem:[%s2702_s24 + $0x12] sm:$0x1] }
 0x356   : > { %v1823_v47 = vpop.f32.mrb[12].mxu1 }
 0x357   : > { %v1824_v44 = vadd.f32 %v1823_v47, %v2692_v37  ;;  %v2296_v46 = vpop.f32.mrb[13].mxu1  ;;  %v1188_v47 = vunpack.c.l.b16 %v1156_v31 }
 0x358   : > { %v1826_v48 = vpop.f32.mrb[14].mxu1  ;;  %v1193_v46 = vunpack.c.l.b16 %v1161_v23  ;;  %v1512_v23 = vpack.c.bf16 %v1496_v16, %v1496_v16 }
 0x359   : > { %v2297_v49 = vpop.f32.mrb[15].mxu1  ;;  %v1829_v50 = vsel %vm773_vm10, %v1824_v44, -inf  ;;  %v1194_v48 = vunpack.c.l.b16 %v1162_v28  ;;  %v1209_v2 = vrot.slane %v1188_v47, 1  ;;  %v1492_v28 = vld [vmem:[%s2702_s24 + $0x16] sm:$0x1] }
 0x35a   : > { %1830 = vmax.xlane.f32.xlu0 %v1829_v50  ;;  %v1197_v49 = vrot.slane %v1182_v17, 7  ;;  %v1199_v50 = vrot.slane %v1183_v24, 6  ;;  %v1217_v0 = vrot.slane %v1193_v46, 4  ;;  %v1504_v17 = vpack.c.bf16 %v1488_v8, %v1488_v8  ;;  %v1495_v24 = vld [vmem:[%s2702_s24 + $0x22] sm:$0x1] }
 0x35b   : > { %v1219_v5 = vrot.slane %v1194_v48, 3  ;;  %v1500_v47 = vld [vmem:[%s2702_s24 + $0x36] sm:$0x1]  ;;  %v1508_v46 = vpack.c.bf16 %v1492_v28, %v1492_v28  ;;  %v1852_v8 = vld [vmem:[%s2702_s24 + $0x2f] sm:$0x1] }
 0x35c   : > { %v1536_v26 = vunpack.c.l.b16 %v1504_v17  ;;  %v1845_v28 = vld [vmem:[%s2702_s24 + $0x13] sm:$0x1] }
 0x3d7   : > { %v1123_v51 = vpop.xlane.xlu1 %1122 }
 0x3d8   : > { %v1124_v53 = vsub.f32 %v1116_v29, %v1123_v51  ;;  %v1163_v29 = vpack.c.bf16 %v1147_v21, %v1147_v21  ;;  %v1201_v51 = vrot.slane %v1184_v30, 5  ;;  %v1497_v21 = vld [vmem:[%s2702_s24 + $0x2a] sm:$0x1]  ;;  %v1506_v30 = vpack.c.bf16 %v1490_v20, %v1490_v20 }
 0x3d9   : > { %v1513_v31 = vpack.c.bf16 %v1497_v21, %v1497_v21 }
 0x3da   : > { %v1125_v54 = vmul.f32 1.442695, %v1124_v53  ;;  %v1195_v53 = vunpack.c.l.b16 %v1163_v29  ;;  %v1493_v29 = vld [vmem:[%s2702_s24 + $0x1a] sm:$0x1] }
 0x3db   : > { %v1509_v48 = vpack.c.bf16 %v1493_v29, %v1493_v29  ;;  %v1853_v29 = vld [vmem:[%s2702_s24 + $0x33] sm:$0x1] }
 0x3dc   : > { %2369 = vpow2.f32 %v1125_v54  ;;  %v1196_v54 = vunpack.c.l.b16 %v1164_v33  ;;  %v1221_v3 = vrot.slane %v1195_v53, 2  ;;  %v1494_v33 = vld [vmem:[%s2702_s24 + $0x1e] sm:$0x1] }
 0x3dd   : > { %v1502_v53 = vld [vmem:[%s2702_s24 + $0x3e] sm:$0x1] }
 0x3de   : > { %v1223_v19 = vrot.slane %v1196_v54, 1  ;;  %v1510_v54 = vpack.c.bf16 %v1494_v33, %v1494_v33 }
 0x3df   : > { %v1477_v56 = vpop.xlane.xlu1 %1476 }
 0x3e0   : > { %v1478_v58 = vsub.f32 %v1470_v36, %v1477_v56  ;;  %v1181_v36 = vunpack.c.l.b16 %v1149_v10  ;;  %v1203_v56 = vrot.slane %v1185_v34, 4  ;;  %v1498_v34 = vld [vmem:[%s2702_s24 + $0x2e] sm:$0x1] }
 0x3e2   : > { %v1479_v60 = vmul.f32 1.442695, %v1478_v58  ;;  %v1205_v58 = vrot.slane %v1186_v35, 3  ;;  %v1511_v35 = vpack.c.bf16 %v1495_v24, %v1495_v24 }
 0x3e4   : > { %2371 = vpow2.f32 %v1479_v60  ;;  %v1198_v60 = vsel %vm644_vm0, %v1197_v49, %v1181_v36  ;;  %v1842_v49 = vld [vmem:[%s2702_s24 + $0x7] sm:$0x1] }
 0x3e6   : > { %v2953_v37 = vpop.eup %2369 }
 0x3e7   : > { %v1831_v55 = vpop.xlane.xlu0 %1830  ;;  %v1127_v9 = vsel %vm773_vm10, %v2953_v37, 0.0 }
 0x3e8   : > { %v1832_v59 = vsub.f32 %v1824_v44, %v1831_v55  ;;  %1128 = vadd.xlane.f32.xlu1 %v1127_v9  ;;  %v1189_v44 = vunpack.c.l.b16 %v1157_v15  ;;  %v1211_v55 = vrot.slane %v1190_v38, 7  ;;  %v1213_v9 = vrot.slane %v1191_v41, 6  ;;  %v1489_v15 = vld [vmem:[%s2702_s24 + $0xa] sm:$0x1]  ;;  %v1499_v41 = vld [vmem:[%s2702_s24 + $0x32] sm:$0x1] }
 0x3e9   : > { %v1505_v22 = vpack.c.bf16 %v1489_v15, %v1489_v15  ;;  %v1544_v38 = vunpack.c.l.b16 %v1512_v23 }
 0x3ea   : > { %v1833_v61 = vmul.f32 1.442695, %v1832_v59  ;;  %v1215_v59 = vrot.slane %v1192_v42, 5  ;;  %v1212_v40 = vsel %vm644_vm0, %v1211_v55, %v1189_v44  ;;  %v1507_v44 = vpack.c.bf16 %v1491_v27, %v1491_v27 }
 0x3eb   : > { %v1214_v57 = vsel %vm647_vm2, %v1213_v9, %v1212_v40  ;;  %v1537_v36 = vunpack.c.l.b16 %v1505_v22  ;;  %v1515_v55 = vpack.c.bf16 %v1499_v41, %v1499_v41  ;;  %v1543_v9 = vunpack.c.l.b16 %v1511_v35 }
 0x3ec   : > { %2373 = vpow2.f32 %v1833_v61  ;;  %v1200_v61 = vsel %vm647_vm2, %v1199_v50, %v1198_v60  ;;  %v1216_v62 = vsel %vm650_vm3, %v1215_v59, %v1214_v57  ;;  %v1850_v50 = vld [vmem:[%s2702_s24 + $0x27] sm:$0x1]  ;;  %v1545_v60 = vunpack.c.l.b16 %v1513_v31 }
 0x3ed   : > { %v1202_v1 = vsel %vm650_vm3, %v1201_v51, %v1200_v61  ;;  %v1218_v10 = vsel %vm653_vm4, %v1217_v0, %v1216_v62  ;;  %v1501_v51 = vld [vmem:[%s2702_s24 + $0x3a] sm:$0x1]  ;;  %v1553_v59 = vrot.slane %v1537_v36, 6  ;;  %v1565_v61 = vrot.slane %v1544_v38, 7  ;;  %v1841_v62 = vld [vmem:[%s2702_s24 + $0x3] sm:$0x1] }
 0x3ee   : > { %v2957_v39 = vpop.eup %2371  ;;  %v1204_v52 = vsel %vm653_vm4, %v1203_v56, %v1202_v1  ;;  %v1220_v45 = vsel %vm656_vm5, %v1219_v5, %v1218_v10  ;;  %v1514_v56 = vpack.c.bf16 %v1498_v34, %v1498_v34  ;;  %v1843_v1 = vld [vmem:[%s2702_s24 + $0xb] sm:$0x1]  ;;  %v1858_v40 = vpack.c.bf16 %v1842_v49, %v1842_v49 }
 0x3ef   : > { %v1481_v63 = vsel %vm773_vm10, %v2957_v39, 0.0  ;;  %v1206_v6 = vsel %vm656_vm5, %v1205_v58, %v1204_v52  ;;  %v1222_v12 = vsel %vm659_vm6, %v1221_v3, %v1220_v45  ;;  %v1538_v58 = vunpack.c.l.b16 %v1506_v30 }
 0x3f0   : > { %1482 = vadd.xlane.f32.xlu0 %v1481_v63  ;;  %v1207_v63 = vrot.slane %v1187_v43, 2  ;;  %v1224_v13 = vsel %vm662_vm7, %v1223_v19, %v1222_v12  ;;  %v1551_v43 = vrot.slane %v1536_v26, 7  ;;  %v1866_v5 = vpack.c.bf16 %v1850_v50, %v1850_v50  ;;  %v1849_v19 = vld [vmem:[%s2702_s24 + $0x23] sm:$0x1] }
 0x3f1   : > { %v1517_v52 = vpack.c.bf16 %v1501_v51, %v1501_v51  ;;  %v1518_v57 = vpack.c.bf16 %v1502_v53, %v1502_v53  ;;  %v1539_v3 = vunpack.c.l.b16 %v1507_v44  ;;  %v1546_v10 = vunpack.c.l.b16 %v1514_v56 }
 0x3f2   : > { %v1208_v7 = vsel %vm659_vm6, %v1207_v63, %v1206_v6  ;;  %v1516_v63 = vpack.c.bf16 %v1500_v47, %v1500_v47  ;;  %v3017_v6 = vunpack.c.l.b16 %v1508_v46  ;;  %v1567_v45 = vrot.slane %v1545_v60, 6  ;;  %v1846_v46 = vld [vmem:[%s2702_s24 + $0x17] sm:$0x1] }
 0x3f3   : > { %v1210_v11 = vsel %vm662_vm7, %v1209_v2, %v1208_v7  ;;  %v1851_v2 = vld [vmem:[%s2702_s24 + $0x2b] sm:$0x1]  ;;  %v3021_v7 = vunpack.c.l.b16 %v1509_v48  ;;  %v1859_v15 = vpack.c.bf16 %v1843_v1, %v1843_v1  ;;  %v1857_v17 = vpack.c.bf16 %v1841_v62, %v1841_v62  ;;  %v1854_v48 = vld [vmem:[%s2702_s24 + $0x37] sm:$0x1] }
 0x3f4   : > { %v1225_v14 = vpack.c.b16 %v1224_v13, %v1210_v11  ;;  %v1555_v11 = vrot.slane %v1538_v58, 5  ;;  %v1566_v13 = vsel %vm644_vm0, %v1565_v61, %v1543_v9  ;;  %v1867_v16 = vpack.c.bf16 %v1851_v2, %v1851_v2  ;;  %v1847_v61 = vld [vmem:[%s2702_s24 + $0x1b] sm:$0x1] }
 0x3f5   : > { %v1890_v20 = vunpack.c.l.b16 %v1858_v40  ;;  %v1898_v21 = vunpack.c.l.b16 %v1866_v5  ;;  %v3027_v22 = vunpack.c.l.b16 %v1510_v54  ;;  %v1547_v23 = vunpack.c.l.b16 %v1515_v55 }
 0x3f6   : > { %v2971_v4 = vpop.eup %2373  ;;  %2275 = vmatpush3.bf16.msra.mxu0 %v1225_v14  ;;  %v1844_v14 = vld [vmem:[%s2702_s24 + $0xf] sm:$0x1]  ;;  %v1548_v24 = vunpack.c.l.b16 %v1516_v63  ;;  %v1557_v26 = vrot.slane %v1539_v3, 4  ;;  %v1569_v27 = vrot.slane %v1546_v10, 5  ;;  %v1868_v31 = vpack.c.bf16 %v1852_v8, %v1852_v8  ;;  %v1855_v63 = vld [vmem:[%s2702_s24 + $0x3b] sm:$0x1] }
 0x3f7   : > { %v1835_v18 = vsel %vm773_vm10, %v2971_v4, 0.0  ;;  %2286 = vmatprep.subr.bf16.mxu0 %v2461_v32  ;;  %v1860_v30 = vpack.c.bf16 %v1844_v14, %v1844_v14  ;;  %v1568_v34 = vsel %vm647_vm2, %v1567_v45, %v1566_v13  ;;  %v1891_v35 = vunpack.c.l.b16 %v1859_v15  ;;  %v1848_v10 = vld [vmem:[%s2702_s24 + $0x1f] sm:$0x1] }
 0x3f8   : > { %1836 = vadd.xlane.f32.xlu1 %v1835_v18  ;;  %v1487_v18 = vld [vmem:[%s2702_s24 + $0x2] sm:$0x1]  ;;  %v1899_v36 = vunpack.c.l.b16 %v1867_v16  ;;  %v1889_v38 = vunpack.c.l.b16 %v1857_v17  ;;  %v1550_v47 = vunpack.c.l.b16 %v1518_v57  ;;  %v1571_v44 = vrot.slane %v1547_v23, 4 }
 0x3f9   : > { %v1503_v25 = vpack.c.bf16 %v1487_v18, %v1487_v18  ;;  %v1865_v18 = vpack.c.bf16 %v1849_v19, %v1849_v19  ;;  %v1861_v49 = vpack.c.bf16 %v1845_v28, %v1845_v28  ;;  %v1869_v50 = vpack.c.bf16 %v1853_v29, %v1853_v29 }
 0x3fa   : > { %v1559_v51 = vrot.slane %v3017_v6, 3  ;;  %v1570_v53 = vsel %vm650_vm3, %v1569_v27, %v1568_v34  ;;  %v1892_v54 = vunpack.c.l.b16 %v1860_v30  ;;  %v1900_v56 = vunpack.c.l.b16 %v1868_v31 }
 0x3fb   : > { %v1535_v42 = vunpack.c.l.b16 %v1503_v25  ;;  %v3029_v25 = vunpack.c.l.b16 %v1517_v52  ;;  %v1897_v41 = vunpack.c.l.b16 %v1865_v18  ;;  %v1573_v60 = vrot.slane %v1548_v24, 3 }
 0x3fc   : > { %v1907_v55 = vrot.slane %v1891_v35, 6  ;;  %v1921_v9 = vrot.slane %v1899_v36, 6  ;;  %v1870_v1 = vpack.c.bf16 %v1854_v48, %v1854_v48  ;;  %v1572_v5 = vsel %vm653_vm4, %v1571_v44, %v1570_v53 }
 0x3fd   : > { %v1552_v0 = vsel %vm644_vm0, %v1551_v43, %v1535_v42  ;;  %v1905_v42 = vrot.slane %v1890_v20, 7  ;;  %v1919_v43 = vrot.slane %v1898_v21, 7  ;;  %v1893_v52 = vunpack.c.l.b16 %v1861_v49 }
 0x3fe   : > { %v1554_v12 = vsel %vm647_vm2, %v1553_v59, %v1552_v0  ;;  %v1862_v0 = vpack.c.bf16 %v1846_v46, %v1846_v46  ;;  %v1901_v57 = vunpack.c.l.b16 %v1869_v50  ;;  %v1561_v3 = vrot.slane %v3021_v7, 2 }
 0x3ff   : > { %v1556_v33 = vsel %vm650_vm3, %v1555_v11, %v1554_v12  ;;  %v1906_v2 = vsel %vm644_vm0, %v1905_v42, %v1889_v38  ;;  %v1920_v40 = vsel %vm644_vm0, %v1919_v43, %v1897_v41  ;;  %v1575_v6 = vrot.slane %v3029_v25, 2  ;;  %v1856_v11 = vld [vmem:[%s2702_s24 + $0x3f] sm:$0x1]  ;;  %s2381_s24 = scalar_lea.vmem %s3093_s13, 512 }
 0x400   : > { %v1558_v58 = vsel %vm653_vm4, %v1557_v26, %v1556_v33  ;;  %v1909_v62 = vrot.slane %v1892_v54, 5  ;;  %v1923_v19 = vrot.slane %v1900_v56, 5  ;;  %v1863_v45 = vpack.c.bf16 %v1847_v61, %v1847_v61  ;;  %p2382_p1 = scmp.ne.s32.totalorder %s3093_s13, %s2381_s24  ;;  %p2389_p6 = scmp.lt.s32.totalorder %s2387_s21, %s2381_s24 }
 0x401   : > { %v1871_v12 = vpack.c.bf16 %v1855_v63, %v1855_v63  ;;  %v1908_v13 = vsel %vm647_vm2, %v1907_v55, %v1906_v2  ;;  %v1922_v14 = vsel %vm647_vm2, %v1921_v9, %v1920_v40  ;;  %v1560_v8 = vsel %vm656_vm5, %v1559_v51, %v1558_v58 }
 0x402   : > { %v1574_v15 = vsel %vm656_vm5, %v1573_v60, %v1572_v5  ;;  %v1894_v16 = vunpack.c.l.b16 %v1862_v0  ;;  %v1902_v17 = vunpack.c.l.b16 %v1870_v1  ;;  %v1563_v7 = vrot.slane %v3027_v22, 1  ;;  %p2383_p2 = pnand %p2382_p1, %p2541_p5  ;;  %p2390_p7 = por %p2389_p6, %p2388_p4 }
 0x403   : > { %v1577_v18 = vrot.slane %v1550_v47, 1  ;;  %v1911_v20 = vrot.slane %v1893_v52, 4  ;;  %v1925_v21 = vrot.slane %v1901_v57, 4  ;;  %v1864_v23 = vpack.c.bf16 %v1848_v10, %v1848_v10 }
 0x404   : > { %v1872_v24 = vpack.c.bf16 %v1856_v11, %v1856_v11  ;;  %v1910_v25 = vsel %vm650_vm3, %v1909_v62, %v1908_v13  ;;  %v1924_v26 = vsel %vm650_vm3, %v1923_v19, %v1922_v14  ;;  %v1562_v27 = vsel %vm659_vm6, %v1561_v3, %v1560_v8  ;;  %p2384_p3 = pneg %p2383_p2 }
 0x405   : > { %v1576_v28 = vsel %vm659_vm6, %v1575_v6, %v1574_v15  ;;  %v1895_v29 = vunpack.c.l.b16 %v1863_v45  ;;  %v1903_v30 = vunpack.c.l.b16 %v1871_v12  ;;  %v1913_v33 = vrot.slane %v1894_v16, 3 }
 0x406   : > { %v1927_v34 = vrot.slane %v1902_v17, 3  ;;  %v1912_v22 = vsel %vm653_vm4, %v1911_v20, %v1910_v25  ;;  %v1926_v35 = vsel %vm653_vm4, %v1925_v21, %v1924_v26  ;;  %v1564_v36 = vsel %vm662_vm7, %v1563_v7, %v1562_v27  ;;  %p2391_p8 = pnand %p2390_p7, %p2384_p3 }
 0x407   : > { %v1578_v38 = vsel %vm662_vm7, %v1577_v18, %v1576_v28  ;;  %v1896_v41 = vunpack.c.l.b16 %v1864_v23  ;;  %v1904_v42 = vunpack.c.l.b16 %v1872_v24  ;;  %v1915_v47 = vrot.slane %v1895_v29, 2 }
 0x408   : > { %v1929_v44 = vrot.slane %v1903_v30, 2  ;;  %v1914_v48 = vsel %vm656_vm5, %v1913_v33, %v1912_v22  ;;  %v1928_v49 = vsel %vm656_vm5, %v1927_v34, %v1926_v35  ;;  %v1579_v50 = vpack.c.b16 %v1578_v38, %v1564_v36 }
 0x409   : > { %v1917_v53 = vrot.slane %v1896_v41, 1  ;;  %v1931_v54 = vrot.slane %v1904_v42, 1  ;;  %v1916_v56 = vsel %vm659_vm6, %v1915_v47, %v1914_v48 }
 0x40a   : > { %v1930_v58 = vsel %vm659_vm6, %v1929_v44, %v1928_v49 }
 0x40b   : > { %v1932_v55 = vsel %vm662_vm7, %v1931_v54, %v1930_v58 }
 0x475   : > { %v1129_v59 = vpop.xlane.xlu1 %1128 }
 0x476   : > { %2375 = vrcp.f32 %v1129_v59 }
 0x47d   : > { %v1483_v31 = vpop.xlane.xlu0 %1482 }
 0x47e   : > { %2377 = vrcp.f32 %v1483_v31 }
 0x480   : > { %v2376_v43 = vpop.eup %2375 }
 0x481   : > { %v1131_v46 = vmul.f32 %v2376_v43, %v2953_v37  ;;  %v1918_v37 = vsel %vm662_vm7, %v1917_v53, %v1916_v56 }
 0x482   : > { %v1933_v61 = vpack.c.b16 %v1932_v55, %v1918_v37 }
 0x483   : > { %2219 = vst.msk [vmem:[%s2892_s27 + $0x8] sm:$0xff] %vm773_vm10, %v1131_v46  ;;  %v1132_v51 = vpack.c.bf16 %v1131_v46, %v1131_v46 }
 0x485   : > { %2277 = vmatmul.mubr.msk.bf16.vlgmr.msra.gmra.mrb[4].mxu0 %vm773_vm10, %v1132_v51  ;;  %v1837_v60 = vpop.xlane.xlu1 %1836 }
 0x486   : > { %2287 = vmatpush3.bf16.msra.mxu0 %v1579_v50  ;;  %2379 = vrcp.f32 %v1837_v60  ;;  %2288 = vmatprep.mubr.msk.bf16.mxu0 %vm2462_vm1, %v2461_v32 }
 0x487   : > { %2298 = vmatprep.subr.bf16.mxu0 %v2461_v32 }
 0x488   : > { %v2378_v9 = vpop.eup %2377 }
 0x489   : > { %v1485_v59 = vmul.f32 %v2378_v9, %v2957_v39 }
 0x48b   : > { %2223 = vst.msk [vmem:[%s2892_s27 + $0x10] sm:$0xff] %vm773_vm10, %v1485_v59  ;;  %v1486_v63 = vpack.c.bf16 %v1485_v59, %v1485_v59 }
 0x48d   : > { %2289 = vmatmul.mubr.msk.bf16.vlgmr.msra.gmra.mrb[8].mxu0 %vm773_vm10, %v1486_v63 }
 0x48e   : > { %2299 = vmatpush3.bf16.msra.mxu0 %v1933_v61  ;;  %2300 = vmatprep.mubr.msk.bf16.mxu0 %vm2462_vm1, %v2461_v32 }
 0x490   : > { %v2380_v0 = vpop.eup %2379 }
 0x491   : > { %v1839_v1 = vmul.f32 %v2380_v0, %v2971_v4 }
 0x493   : > { %2227 = vst.msk [vmem:[%s2892_s27 + $0x18] sm:$0xff] %vm773_vm10, %v1839_v1  ;;  %v1840_v2 = vpack.c.bf16 %v1839_v1, %v1839_v1 }
 0x495   : > { %2301 = vmatmul.mubr.msk.bf16.vlgmr.msra.gmra.mrb[12].mxu0 %vm773_vm10, %v1840_v2 }
 0x558   : > { %v1264_v39 = vpop.f32.mrb[4].mxu0 }
 0x559   : > { %v2236_v40 = vpack.c.bf16 %v1264_v39, %v1264_v39  ;;  %v2278_v5 = vpop.f32.mrb[5].mxu0 }
 0x55a   : > { %v1267_v52 = vpop.f32.mrb[6].mxu0 }
 0x55b   : > { %1274 = vrot.lane.b32.xlu0 %v2236_v40, %s2463_s10  ;;  %v2279_v57 = vpop.f32.mrb[7].mxu0 }
 0x55c   : > { %2394 = shalt.err (!%p2391_p8)
}
 0x55d   : > { %s2395_s27 = scalar_lea.hbm %s3091_s16, 512  ;;  %s2399_s12 = scalar_lea.hbm %s3151_s5, 1024 }
 0x55e   : > { %p2396_p11 = scmp.ne.s32.totalorder %s3091_s16, %s2395_s27  ;;  %p2400_p0 = scmp.lt.u32.totalorder %s3091_s16, %s3151_s5 }
 0x55f   : > { %p2401_p1 = scmp.lt.u32.totalorder %s2399_s12, %s2395_s27  ;;  %p2403_p3 = scmp.lt.u32.totalorder %s2395_s27, %s3091_s16 }
 0x560   : > { %p2397_p12 = pnand %p2396_p11, %p2541_p5 }
 0x561   : > { %p2402_p2 = por %p2401_p1, %p2400_p0 }
 0x562   : > { %p2398_p13 = pneg %p2397_p12 }
 0x563   : > { %p2404_p4 = por %p2403_p3, %p2402_p2 }
 0x565   : > { %p2405_p6 = pnand %p2404_p4, %p2398_p13 }
 0x567   : > { %2408 = shalt.err (!%p2405_p6)
}
 0x568   : > { %s2465_s24 = smov 128   ;;  %v1618_v32 = vpop.f32.mrb[8].mxu0  ;;  %s2466_s25 = smov 16   ;;  %vm1277_vm12 = vcmask 126016   ;;  %vm1631_vm13 = vcmask 191616   ;;  %vm1985_vm14 = vcmask 257216  }
 0x569   : > { %2304 = dma.vmem_to_hbm [thread:$0]  (%p2541_p5), %s3093_s13, 512, %s3091_s16, %s1997_s17, %s2465_s24, %s2465_s24, %s2463_s10   ;;  %v2237_v4 = vpack.c.bf16 %v1618_v32, %v1618_v32  ;;  %v2290_v3 = vpop.f32.mrb[9].mxu0 }
 0x56a   : > { %v1621_v6 = vpop.f32.mrb[10].mxu0  ;;  %s2467_s29 = smov 24  }
 0x56b   : > { %1628 = vrot.lane.b32.xlu1 %v2237_v4, %s2466_s25  ;;  %v2291_v62 = vpop.f32.mrb[11].mxu0 }
 0x56c   : > { %v1972_v19 = vpop.f32.mrb[12].mxu0 }
 0x56d   : > { %v2238_v10 = vpack.c.bf16 %v1972_v19, %v1972_v19  ;;  %v2302_v11 = vpop.f32.mrb[13].mxu0 }
 0x56e   : > { %v1975_v45 = vpop.f32.mrb[14].mxu0 }
 0x56f   : > { %1982 = vrot.lane.b32.xlu1 %v2238_v10, %s2467_s29  ;;  %v2303_v12 = vpop.f32.mrb[15].mxu0 }
 0x5cd   : > { %v1275_v13 = vpop.permute.xlu0 %1274 }
 0x5ce   : > { %1278 = vst.msk [vmem:[%s2944_s11] sm:$0xf] %vm1277_vm12, %v1275_v13 }
 0x5dd   : > { %v1629_v14 = vpop.permute.xlu1 %1628 }
 0x5de   : > { %1632 = vst.msk [vmem:[%s2944_s11] sm:$0xf] %vm1631_vm13, %v1629_v14 }
 0x5e1   : > { %v1983_v8 = vpop.permute.xlu1 %1982 }
 0x5e2   : > { %1986 = vst.msk [vmem:[%s2944_s11] sm:$0xf] %vm1985_vm14, %v1983_v8 }
 0x5e3 PF: > { %s2039_s30 = sand.u32 1, %s2439_s18   ;;  %p2307_p5 = pnand %p2184_p10, %p2552_p9 }
 0x5e4   : > { %s2040_s10 = scalar_lea.sflag [#allocation5], %s2039_s30 }
 0x5e5   : > { %2434 = dma.done.wait (!%p2307_p5), %s2040_s10, 512  }
 0x5e6   : > { %2436 = vsyncadd (!%p2307_p5), %s2040_s10, 4294966784  ;;  %s19_s23 = sadd.s32 1, %s2459_s23   ;;  %s3155_s18 = smov %s2443_s19 }
 0x5e7   : > { %p16_p7 = scmp.ge.s32.totalorder %s19_s23, 4   ;;  %s3156_s19 = smov %s2447_s20 }
 0x5e8   : > { %s3157_s20 = smov %s2550_s6  ;;  %s3158_s21 = smov %s2455_s22 }
 0x5e9   : > { %s3159_s22 = smov %s3161_s26  ;;  %18 = sbr.rel (!%p16_p7) target bundleno = 4 (0x4), region = 187 }
 0x5f0   :  { %2045 = vsyncpa [#allocation5], 1 }
 0x5f1   :  { %2047 = vsyncpa [#allocation5 + $0x1], 1 }

</bundles_post_ra>
